<compile_context>
chip_gen: v5e
topology: v5e:2x2
jax: 0.10.0
libtpu: 0.0.40
codegen_flags: <defaults>
</compile_context>

<pallas_src>
import math
import functools

import jax
import jax.numpy as jnp
from jax.experimental import pallas as pl
from jax.experimental.pallas import tpu as pltpu

D_ORIG = 768            # orig_d_l / orig_d_a / orig_d_v
D_MODEL = 256           # d_l / d_a / d_v
D_FFN = 4 * D_MODEL     # 1024
NUM_HEADS = 4
HEAD_DIM = D_MODEL // NUM_HEADS
NUM_LAYERS = 5
LN_EPS = 1e-5


# ----------------------------- Pallas kernel -----------------------------

def _mult_encoder_kernel(xq_raw_ref, xkv_raw_ref, pw_q_ref, pw_kv_ref, pos_ref,
                         mask_ref, wqkv_ref, wo_ref, fc1w_ref, fc2w_ref, pk_ref,
                         out_ref, x_state, kv_state, *, B, L, scale):
    """One grid step = one (stack, layer) pair.  Rows are batch-major (row = b*L + l)."""
    layer = pl.program_id(1)
    BL = B * L

    @pl.when(layer == 0)
    def _project():
        # Conv1d(k=1, bias=False) == per-timestep linear; then embed_scale * x + pos.
        xq = jnp.dot(xq_raw_ref[...].astype(jnp.bfloat16), pw_q_ref[...],
                     preferred_element_type=jnp.float32)
        xkv = jnp.dot(xkv_raw_ref[...].astype(jnp.bfloat16), pw_kv_ref[...],
                      preferred_element_type=jnp.float32)
        x_state[...] = xq * scale + pos_ref[...]      # query stream (evolves)
        kv_state[...] = xkv * scale + pos_ref[...]    # key == value stream (fixed)

    def layer_norm(x, g, b):
        mu = jnp.mean(x, axis=-1, keepdims=True)
        var = jnp.mean((x - mu) ** 2, axis=-1, keepdims=True)
        return (x - mu) * jax.lax.rsqrt(var + LN_EPS) * g + b

    # Unpack the lane-dense packed per-layer params: [4, 1024]
    pk = pk_ref[...]
    fc1_b = pk[0:1, :]                                          # [1, 1024]
    b_qkv = pk[1:2, 0:3 * D_MODEL]                              # [1, 768]
    b_o = pk[1:2, 3 * D_MODEL:4 * D_MODEL]                      # [1, 256]
    ln0_g, ln0_b = pk[2:3, 0:D_MODEL], pk[2:3, D_MODEL:2 * D_MODEL]
    ln1_g, ln1_b = pk[2:3, 2 * D_MODEL:3 * D_MODEL], pk[2:3, 3 * D_MODEL:4 * D_MODEL]
    fc2_b = pk[3:4, 0:D_MODEL]
    lnf_g, lnf_b = pk[3:4, D_MODEL:2 * D_MODEL], pk[3:4, 2 * D_MODEL:3 * D_MODEL]

    x = x_state[...]                  # [BL, 256] f32
    kv = kv_state[...]                # [BL, 256] f32

    # ---------------- cross-modal multi-head attention (pre-LN) ----------------
    xn = layer_norm(x, ln0_g, ln0_b)
    kvn = layer_norm(kv, ln0_g, ln0_b)         # same LN applied to key and value stream

    # Single fused MXU pass: [2*BL, 256] x [256, 768]; take the useful quadrants.
    lhs = jnp.concatenate([xn, kvn], axis=0).astype(jnp.bfloat16)
    qkv = jnp.dot(lhs, wqkv_ref[...], preferred_element_type=jnp.float32)  # [2BL, 768]
    q = (qkv[:BL, 0:D_MODEL] + b_qkv[:, 0:D_MODEL]) * (HEAD_DIM ** -0.5)
    k = qkv[BL:, D_MODEL:2 * D_MODEL] + b_qkv[:, D_MODEL:2 * D_MODEL]
    v = qkv[BL:, 2 * D_MODEL:3 * D_MODEL] + b_qkv[:, 2 * D_MODEL:3 * D_MODEL]

    q3 = q.reshape(B, L, D_MODEL)
    k3 = k.reshape(B, L, D_MODEL)
    v3 = v.reshape(B, L, D_MODEL)
    add_mask = mask_ref[...][None, :, :]                   # [1, L, L] additive mask

    heads = []
    for h in range(NUM_HEADS):                             # 4 iters, batched over B
        sl = slice(h * HEAD_DIM, (h + 1) * HEAD_DIM)
        s = jnp.einsum('bqd,bkd->bqk', q3[:, :, sl], k3[:, :, sl],
                       preferred_element_type=jnp.float32)             # [B, L, L]
        s = s + add_mask
        m = jnp.max(s, axis=-1, keepdims=True)
        p = jnp.exp(s - m)
        p = p * pl.reciprocal(jnp.sum(p, axis=-1, keepdims=True), approx=True)
        heads.append(jnp.einsum('bqk,bkd->bqd', p, v3[:, :, sl],
                                preferred_element_type=jnp.float32))    # [B, L, 64]
    att = jnp.concatenate(heads, axis=-1).reshape(BL, D_MODEL)          # lane-dense

    x = x + (jnp.dot(att.astype(jnp.bfloat16), wo_ref[...],
                     preferred_element_type=jnp.float32) + b_o)

    # --------------------------- FFN (pre-LN) ---------------------------
    xn1 = layer_norm(x, ln1_g, ln1_b)
    hdn = jnp.dot(xn1.astype(jnp.bfloat16), fc1w_ref[...],
                  preferred_element_type=jnp.float32) + fc1_b
    hdn = jnp.maximum(hdn, 0.0)
    hdn = jnp.dot(hdn.astype(jnp.bfloat16), fc2w_ref[...],
                  preferred_element_type=jnp.float32) + fc2_b
    x = x + hdn
    x_state[...] = x

    @pl.when(layer == pl.num_programs(1) - 1)
    def _finalize():
        # final encoder LayerNorm + mean over the sequence -> [B, 256] lane-dense
        xf = layer_norm(x, lnf_g, lnf_b)
        out_ref[...] = jnp.mean(xf.reshape(B, L, D_MODEL), axis=1)


# --------------------------- model glue (plain JAX) ---------------------------

def sinusoidal_positions(seq_len, dim):
    # fairseq SinusoidalPositionalEmbedding; positions start at padding_idx + 1 = 1.
    half = dim // 2
    inv = math.log(10000.0) / (half - 1)
    freqs = jnp.exp(jnp.arange(half, dtype=jnp.float32) * -inv)
    pos = jnp.arange(1, seq_len + 1, dtype=jnp.float32)
    ang = pos[:, None] * freqs[None, :]
    return jnp.concatenate([jnp.sin(ang), jnp.cos(ang)], axis=1)   # [L, dim]


def mult_forward(params, x_l, x_a, x_v):
    # x_*: [B, L, 768]  ->  returns h_vs: [B, 2 * d_v] = [B, 512]
    B, L, _ = x_l.shape
    BL = B * L

    xq_raw = x_v.reshape(BL, D_ORIG)                                   # query modality
    xkv_raw = jnp.stack([x_l.reshape(BL, D_ORIG),
                         x_a.reshape(BL, D_ORIG)], axis=0)             # kv per stack
    pos = jnp.tile(sinusoidal_positions(L, D_MODEL), (B, 1))           # [B*L, 256]
    row = jnp.arange(L)[:, None]
    col = jnp.arange(L)[None, :]
    # MulT buffered_future_mask with Lq == Lk: triu(+1) masked (additive).
    add_mask = jnp.where(col > row, -1e30, 0.0).astype(jnp.float32)    # [L, L]

    in_specs = [
        pl.BlockSpec((BL, D_ORIG), lambda s, k: (0, 0)),               # raw v (query)
        pl.BlockSpec((None, BL, D_ORIG), lambda s, k: (s, 0, 0)),      # raw l / a (kv)
        pl.BlockSpec((D_ORIG, D_MODEL), lambda s, k: (0, 0)),          # proj_w (v)
        pl.BlockSpec((None, D_ORIG, D_MODEL), lambda s, k: (s, 0, 0)), # proj_w (l / a)
        pl.BlockSpec((BL, D_MODEL), lambda s, k: (0, 0)),              # positions
        pl.BlockSpec((L, L), lambda s, k: (0, 0)),                     # additive mask
        pl.BlockSpec((None, None, D_MODEL, 3 * D_MODEL), lambda s, k: (s, k, 0, 0)),  # wqkv
        pl.BlockSpec((None, None, D_MODEL, D_MODEL), lambda s, k: (s, k, 0, 0)),      # wo
        pl.BlockSpec((None, None, D_MODEL, D_FFN), lambda s, k: (s, k, 0, 0)),        # fc1w
        pl.BlockSpec((None, None, D_FFN, D_MODEL), lambda s, k: (s, k, 0, 0)),        # fc2w
        pl.BlockSpec((None, None, 4, 4 * D_MODEL), lambda s, k: (s, k, 0, 0)),        # packed
    ]
    out = pl.pallas_call(
        functools.partial(_mult_encoder_kernel, B=B, L=L, scale=math.sqrt(D_MODEL)),
        out_shape=jax.ShapeDtypeStruct((B, 2 * D_MODEL), jnp.float32),
        grid=(2, NUM_LAYERS),
        in_specs=in_specs,
        out_specs=pl.BlockSpec((B, D_MODEL), lambda s, k: (0, s)),
        scratch_shapes=[pltpu.VMEM((BL, D_MODEL), jnp.float32),   # query stream state
                        pltpu.VMEM((BL, D_MODEL), jnp.float32)],  # kv stream state
        compiler_params=pltpu.CompilerParams(
            dimension_semantics=(pltpu.PARALLEL, pltpu.ARBITRARY),
            vmem_limit_bytes=32 * 1024 * 1024),
    )(xq_raw, xkv_raw, params['proj_w_v'], params['proj_w_la'], pos, add_mask,
      params['wqkv'], params['wo'], params['fc1w'], params['fc2w'], params['packed'])
    return out                                                          # [B, 512]


# ------------------------- deterministic parameter init -------------------------

def xavier_uniform(key, shape):
    fan_out, fan_in = shape
    limit = math.sqrt(6.0 / (fan_in + fan_out))
    return jax.random.uniform(key, shape, jnp.float32, -limit, limit)


def init_stack(key):
    """One 5-layer stack; matmul weights stored pre-transposed [in, out]."""
    ks = jax.random.split(key, NUM_LAYERS)
    wqkv, wo, fc1w, fc2w = [], [], [], []
    for kk in ks:
        k0, k1, k2, k3, k4, k5 = jax.random.split(kk, 6)
        wq = xavier_uniform(k0, (D_MODEL, D_MODEL)).T
        wk = xavier_uniform(k1, (D_MODEL, D_MODEL)).T
        wv = xavier_uniform(k2, (D_MODEL, D_MODEL)).T
        wqkv.append(jnp.concatenate([wq, wk, wv], axis=1))           # [256, 768]
        wo.append(xavier_uniform(k3, (D_MODEL, D_MODEL)).T)          # [256, 256]
        fc1w.append(xavier_uniform(k4, (D_FFN, D_MODEL)).T)          # [256, 1024]
        fc2w.append(xavier_uniform(k5, (D_MODEL, D_FFN)).T)          # [1024, 256]
    return {'wqkv': jnp.stack(wqkv), 'wo': jnp.stack(wo),
            'fc1w': jnp.stack(fc1w), 'fc2w': jnp.stack(fc2w)}


def pack_small_params(bqkv, bo, fc1b, fc2b, ln0_g, ln0_b, ln1_g, ln1_b, lnf_g, lnf_b):
    """Pack all small per-(stack,layer) params into a lane-dense [2, 5, 4, 1024] array.
       row0: fc1_b | row1: b_qkv ++ b_o | row2: ln0_g ++ ln0_b ++ ln1_g ++ ln1_b
       row3: fc2_b ++ lnf_g ++ lnf_b ++ pad."""
    S, Ly = bqkv.shape[:2]
    row0 = fc1b
    row1 = jnp.concatenate([bqkv, bo], axis=-1)
    row2 = jnp.concatenate([ln0_g, ln0_b, ln1_g, ln1_b], axis=-1)
    lnf_g = jnp.broadcast_to(lnf_g[:, None, :], (S, Ly, D_MODEL))
    lnf_b = jnp.broadcast_to(lnf_b[:, None, :], (S, Ly, D_MODEL))
    pad = jnp.zeros((S, Ly, D_MODEL), jnp.float32)
    row3 = jnp.concatenate([fc2b, lnf_g, lnf_b, pad], axis=-1)
    return jnp.stack([row0, row1, row2, row3], axis=2).astype(jnp.float32)


def init_params(key):
    kp, k_vl, k_va = jax.random.split(key, 3)
    kpl, kpa, kpv = jax.random.split(kp, 3)
    proj_l = xavier_uniform(kpl, (D_MODEL, D_ORIG)).T                 # [768, 256]
    proj_a = xavier_uniform(kpa, (D_MODEL, D_ORIG)).T
    proj_v = xavier_uniform(kpv, (D_MODEL, D_ORIG)).T
    s_vl = init_stack(k_vl)      # trans_v_with_l
    s_va = init_stack(k_va)      # trans_v_with_a

    def stack2(name):
        return jnp.stack([s_vl[name], s_va[name]], axis=0)

    zeros = lambda n: jnp.zeros((2, NUM_LAYERS, n), jnp.float32)
    ones = lambda n: jnp.ones((2, NUM_LAYERS, n), jnp.float32)
    packed = pack_small_params(
        bqkv=zeros(3 * D_MODEL), bo=zeros(D_MODEL),
        fc1b=zeros(D_FFN), fc2b=zeros(D_MODEL),
        ln0_g=ones(D_MODEL), ln0_b=zeros(D_MODEL),
        ln1_g=ones(D_MODEL), ln1_b=zeros(D_MODEL),
        lnf_g=jnp.ones((2, D_MODEL), jnp.float32),
        lnf_b=jnp.zeros((2, D_MODEL), jnp.float32))

    return {
        'proj_w_v': proj_v.astype(jnp.bfloat16),                               # [768, 256]
        'proj_w_la': jnp.stack([proj_l, proj_a], axis=0).astype(jnp.bfloat16), # [2, 768, 256]
        'wqkv': stack2('wqkv').astype(jnp.bfloat16),                           # [2, 5, 256, 768]
        'wo':   stack2('wo').astype(jnp.bfloat16),                             # [2, 5, 256, 256]
        'fc1w': stack2('fc1w').astype(jnp.bfloat16),                           # [2, 5, 256, 1024]
        'fc2w': stack2('fc2w').astype(jnp.bfloat16),                           # [2, 5, 1024, 256]
        'packed': packed,                                                      # [2, 5, 4, 1024]
    }


if __name__ == "__main__":
    B, L = 2, 8
    key = jax.random.PRNGKey(0)
    kx1, kx2, kx3, kp = jax.random.split(key, 4)
    x_l = jax.random.normal(kx1, (B, L, D_ORIG), jnp.float32)
    x_a = jax.random.normal(kx2, (B, L, D_ORIG), jnp.float32)
    x_v = jax.random.normal(kx3, (B, L, D_ORIG), jnp.float32)
    params = init_params(kp)

    fwd = jax.jit(mult_forward)
    out = jax.block_until_ready(fwd(params, x_l, x_a, x_v))
    assert out.shape == (B, 2 * D_MODEL), out.shape
    assert bool(jnp.all(jnp.isfinite(out)))
    print("KERNEL_OK")
</pallas_src>

<mosaic_0001>
module attributes {stable_mosaic.version = 11 : i64} {
  func.func @_mult_encoder_kernel(%arg0: i32, %arg1: i32, %arg2: memref<16x768xf32, #tpu.memory_space<vmem>>, %arg3: memref<1x16x768xf32, #tpu.memory_space<vmem>>, %arg4: memref<768x256xbf16, #tpu.memory_space<vmem>>, %arg5: memref<1x768x256xbf16, #tpu.memory_space<vmem>>, %arg6: memref<16x256xf32, #tpu.memory_space<vmem>>, %arg7: memref<8x8xf32, #tpu.memory_space<vmem>>, %arg8: memref<1x1x256x768xbf16, #tpu.memory_space<vmem>>, %arg9: memref<1x1x256x256xbf16, #tpu.memory_space<vmem>>, %arg10: memref<1x1x256x1024xbf16, #tpu.memory_space<vmem>>, %arg11: memref<1x1x1024x256xbf16, #tpu.memory_space<vmem>>, %arg12: memref<1x1x4x1024xf32, #tpu.memory_space<vmem>>, %arg13: memref<2x256xf32, #tpu.memory_space<vmem>>, %arg14: memref<16x256xf32, #tpu.memory_space<vmem>>, %arg15: memref<16x256xf32, #tpu.memory_space<vmem>>) attributes {dimension_semantics = [#tpu.dimension_semantics<parallel>, #tpu.dimension_semantics<arbitrary>], iteration_bounds = array<i64: 2, 5>, scalar_prefetch = 0 : i64, scratch_operands = 2 : i64, tpu.core_type = #tpu.core_type<tc>, window_params = [{pipeline_mode = #tpu.pipeline_mode<synchronous>, transform_indices = @transform_0, window_bounds = array<i64: 16, 768>}, {transform_indices = @transform_1, window_bounds = array<i64: 1, 16, 768>}, {pipeline_mode = #tpu.pipeline_mode<synchronous>, transform_indices = @transform_2, window_bounds = array<i64: 768, 256>}, {transform_indices = @transform_3, window_bounds = array<i64: 1, 768, 256>}, {pipeline_mode = #tpu.pipeline_mode<synchronous>, transform_indices = @transform_4, window_bounds = array<i64: 16, 256>}, {pipeline_mode = #tpu.pipeline_mode<synchronous>, transform_indices = @transform_5, window_bounds = array<i64: 8, 8>}, {transform_indices = @transform_6, window_bounds = array<i64: 1, 1, 256, 768>}, {transform_indices = @transform_7, window_bounds = array<i64: 1, 1, 256, 256>}, {transform_indices = @transform_8, window_bounds = array<i64: 1, 1, 256, 1024>}, {transform_indices = @transform_9, window_bounds = array<i64: 1, 1, 1024, 256>}, {transform_indices = @transform_10, window_bounds = array<i64: 1, 1, 4, 1024>}, {transform_indices = @transform_11, window_bounds = array<i64: 2, 256>}]} {
    %c0_i32 = arith.constant 0 : i32
    %0 = arith.cmpi eq, %arg1, %c0_i32 : i32
    %1 = arith.extui %0 : i1 to i32
    %c0_i32_0 = arith.constant 0 : i32
    %2 = arith.cmpi ne, %1, %c0_i32_0 : i32
    scf.if %2 {
      %c0_65 = arith.constant 0 : index
      %c0_66 = arith.constant 0 : index
      %203 = vector.load %arg2[%c0_65, %c0_66] : memref<16x768xf32, #tpu.memory_space<vmem>>, vector<16x768xf32>
      %204 = arith.truncf %203 : vector<16x768xf32> to vector<16x768xbf16>
      %c0_67 = arith.constant 0 : index
      %c0_68 = arith.constant 0 : index
      %205 = vector.load %arg4[%c0_67, %c0_68] : memref<768x256xbf16, #tpu.memory_space<vmem>>, vector<768x256xbf16>
      %cst_69 = arith.constant dense<0.000000e+00> : vector<16x256xf32>
      %206 = tpu.matmul %204, %205, %cst_69 {dimension_numbers = #tpu.dot_dimension_numbers<[1], [0], [0], [1], [0, 0, 1, 1], [], []>} : vector<16x768xbf16>, vector<768x256xbf16>, vector<16x256xf32> -> vector<16x256xf32>
      %c0_70 = arith.constant 0 : index
      %c0_71 = arith.constant 0 : index
      %c0_72 = arith.constant 0 : index
      %207 = vector.load %arg3[%c0_70, %c0_71, %c0_72] : memref<1x16x768xf32, #tpu.memory_space<vmem>>, vector<1x16x768xf32>
      %208 = vector.shape_cast %207 : vector<1x16x768xf32> to vector<16x768xf32>
      %209 = arith.truncf %208 : vector<16x768xf32> to vector<16x768xbf16>
      %c0_73 = arith.constant 0 : index
      %c0_74 = arith.constant 0 : index
      %c0_75 = arith.constant 0 : index
      %210 = vector.load %arg5[%c0_73, %c0_74, %c0_75] : memref<1x768x256xbf16, #tpu.memory_space<vmem>>, vector<1x768x256xbf16>
      %211 = vector.shape_cast %210 : vector<1x768x256xbf16> to vector<768x256xbf16>
      %cst_76 = arith.constant dense<0.000000e+00> : vector<16x256xf32>
      %212 = tpu.matmul %209, %211, %cst_76 {dimension_numbers = #tpu.dot_dimension_numbers<[1], [0], [0], [1], [0, 0, 1, 1], [], []>} : vector<16x768xbf16>, vector<768x256xbf16>, vector<16x256xf32> -> vector<16x256xf32>
      %cst_77 = arith.constant 1.600000e+01 : f32
      %213 = vector.broadcast %cst_77 : f32 to vector<16x256xf32>
      %214 = arith.mulf %206, %213 : vector<16x256xf32>
      %c0_78 = arith.constant 0 : index
      %c0_79 = arith.constant 0 : index
      %215 = vector.load %arg6[%c0_78, %c0_79] : memref<16x256xf32, #tpu.memory_space<vmem>>, vector<16x256xf32>
      %216 = arith.addf %214, %215 : vector<16x256xf32>
      %c0_80 = arith.constant 0 : index
      %c0_81 = arith.constant 0 : index
      %217 = vector.load %arg14[%c0_80, %c0_81] : memref<16x256xf32, #tpu.memory_space<vmem>>, vector<16x256xf32>
      tpu.vector_store %arg14[%c0_80, %c0_81], %216 {strides = array<i32>} : memref<16x256xf32, #tpu.memory_space<vmem>>, vector<16x256xf32>,
      %cst_82 = arith.constant 1.600000e+01 : f32
      %218 = vector.broadcast %cst_82 : f32 to vector<16x256xf32>
      %219 = arith.mulf %212, %218 : vector<16x256xf32>
      %c0_83 = arith.constant 0 : index
      %c0_84 = arith.constant 0 : index
      %220 = vector.load %arg6[%c0_83, %c0_84] : memref<16x256xf32, #tpu.memory_space<vmem>>, vector<16x256xf32>
      %221 = arith.addf %219, %220 : vector<16x256xf32>
      %c0_85 = arith.constant 0 : index
      %c0_86 = arith.constant 0 : index
      %222 = vector.load %arg15[%c0_85, %c0_86] : memref<16x256xf32, #tpu.memory_space<vmem>>, vector<16x256xf32>
      tpu.vector_store %arg15[%c0_85, %c0_86], %221 {strides = array<i32>} : memref<16x256xf32, #tpu.memory_space<vmem>>, vector<16x256xf32>,
    } else {
    }
    %c0 = arith.constant 0 : index
    %c0_1 = arith.constant 0 : index
    %c0_2 = arith.constant 0 : index
    %c0_3 = arith.constant 0 : index
    %3 = vector.load %arg12[%c0, %c0_1, %c0_2, %c0_3] : memref<1x1x4x1024xf32, #tpu.memory_space<vmem>>, vector<1x1x4x1024xf32>
    %4 = vector.shape_cast %3 : vector<1x1x4x1024xf32> to vector<4x1024xf32>
    %5 = vector.extract_strided_slice %4 {offsets = [0, 0], sizes = [1, 1024], strides = [1, 1]} : vector<4x1024xf32> to vector<1x1024xf32>
    %6 = vector.extract_strided_slice %4 {offsets = [1, 0], sizes = [1, 768], strides = [1, 1]} : vector<4x1024xf32> to vector<1x768xf32>
    %7 = vector.extract_strided_slice %4 {offsets = [1, 768], sizes = [1, 256], strides = [1, 1]} : vector<4x1024xf32> to vector<1x256xf32>
    %8 = vector.extract_strided_slice %4 {offsets = [2, 0], sizes = [1, 256], strides = [1, 1]} : vector<4x1024xf32> to vector<1x256xf32>
    %9 = vector.extract_strided_slice %4 {offsets = [2, 256], sizes = [1, 256], strides = [1, 1]} : vector<4x1024xf32> to vector<1x256xf32>
    %10 = vector.extract_strided_slice %4 {offsets = [2, 512], sizes = [1, 256], strides = [1, 1]} : vector<4x1024xf32> to vector<1x256xf32>
    %11 = vector.extract_strided_slice %4 {offsets = [2, 768], sizes = [1, 256], strides = [1, 1]} : vector<4x1024xf32> to vector<1x256xf32>
    %12 = vector.extract_strided_slice %4 {offsets = [3, 0], sizes = [1, 256], strides = [1, 1]} : vector<4x1024xf32> to vector<1x256xf32>
    %13 = vector.extract_strided_slice %4 {offsets = [3, 256], sizes = [1, 256], strides = [1, 1]} : vector<4x1024xf32> to vector<1x256xf32>
    %14 = vector.extract_strided_slice %4 {offsets = [3, 512], sizes = [1, 256], strides = [1, 1]} : vector<4x1024xf32> to vector<1x256xf32>
    %c0_4 = arith.constant 0 : index
    %c0_5 = arith.constant 0 : index
    %15 = vector.load %arg14[%c0_4, %c0_5] : memref<16x256xf32, #tpu.memory_space<vmem>>, vector<16x256xf32>
    %c0_6 = arith.constant 0 : index
    %c0_7 = arith.constant 0 : index
    %16 = vector.load %arg15[%c0_6, %c0_7] : memref<16x256xf32, #tpu.memory_space<vmem>>, vector<16x256xf32>
    %cst = arith.constant dense<0.000000e+00> : vector<16xf32>
    %17 = vector.multi_reduction <add>, %15, %cst [1] : vector<16x256xf32> to vector<16xf32>
    %18 = vector.shape_cast %17 : vector<16xf32> to vector<16x1xf32>
    %cst_8 = arith.constant 2.560000e+02 : f32
    %19 = vector.broadcast %cst_8 : f32 to vector<16x1xf32>
    %20 = arith.divf %18, %19 : vector<16x1xf32>
    %21 = vector.broadcast %20 : vector<16x1xf32> to vector<16x256xf32>
    %22 = arith.subf %15, %21 : vector<16x256xf32>
    %23 = arith.mulf %22, %22 : vector<16x256xf32>
    %cst_9 = arith.constant dense<0.000000e+00> : vector<16xf32>
    %24 = vector.multi_reduction <add>, %23, %cst_9 [1] : vector<16x256xf32> to vector<16xf32>
    %25 = vector.shape_cast %24 : vector<16xf32> to vector<16x1xf32>
    %cst_10 = arith.constant 2.560000e+02 : f32
    %26 = vector.broadcast %cst_10 : f32 to vector<16x1xf32>
    %27 = arith.divf %25, %26 : vector<16x1xf32>
    %28 = vector.broadcast %20 : vector<16x1xf32> to vector<16x256xf32>
    %29 = arith.subf %15, %28 : vector<16x256xf32>
    %cst_11 = arith.constant 9.99999974E-6 : f32
    %30 = vector.broadcast %cst_11 : f32 to vector<16x1xf32>
    %31 = arith.addf %27, %30 : vector<16x1xf32>
    %32 = math.rsqrt %31 : vector<16x1xf32>
    %33 = vector.broadcast %32 : vector<16x1xf32> to vector<16x256xf32>
    %34 = arith.mulf %29, %33 : vector<16x256xf32>
    %35 = vector.broadcast %8 : vector<1x256xf32> to vector<16x256xf32>
    %36 = arith.mulf %34, %35 : vector<16x256xf32>
    %37 = vector.broadcast %9 : vector<1x256xf32> to vector<16x256xf32>
    %38 = arith.addf %36, %37 : vector<16x256xf32>
    %cst_12 = arith.constant dense<0.000000e+00> : vector<16xf32>
    %39 = vector.multi_reduction <add>, %16, %cst_12 [1] : vector<16x256xf32> to vector<16xf32>
    %40 = vector.shape_cast %39 : vector<16xf32> to vector<16x1xf32>
    %cst_13 = arith.constant 2.560000e+02 : f32
    %41 = vector.broadcast %cst_13 : f32 to vector<16x1xf32>
    %42 = arith.divf %40, %41 : vector<16x1xf32>
    %43 = vector.broadcast %42 : vector<16x1xf32> to vector<16x256xf32>
    %44 = arith.subf %16, %43 : vector<16x256xf32>
    %45 = arith.mulf %44, %44 : vector<16x256xf32>
    %cst_14 = arith.constant dense<0.000000e+00> : vector<16xf32>
    %46 = vector.multi_reduction <add>, %45, %cst_14 [1] : vector<16x256xf32> to vector<16xf32>
    %47 = vector.shape_cast %46 : vector<16xf32> to vector<16x1xf32>
    %cst_15 = arith.constant 2.560000e+02 : f32
    %48 = vector.broadcast %cst_15 : f32 to vector<16x1xf32>
    %49 = arith.divf %47, %48 : vector<16x1xf32>
    %50 = vector.broadcast %42 : vector<16x1xf32> to vector<16x256xf32>
    %51 = arith.subf %16, %50 : vector<16x256xf32>
    %cst_16 = arith.constant 9.99999974E-6 : f32
    %52 = vector.broadcast %cst_16 : f32 to vector<16x1xf32>
    %53 = arith.addf %49, %52 : vector<16x1xf32>
    %54 = math.rsqrt %53 : vector<16x1xf32>
    %55 = vector.broadcast %54 : vector<16x1xf32> to vector<16x256xf32>
    %56 = arith.mulf %51, %55 : vector<16x256xf32>
    %57 = vector.broadcast %8 : vector<1x256xf32> to vector<16x256xf32>
    %58 = arith.mulf %56, %57 : vector<16x256xf32>
    %59 = vector.broadcast %9 : vector<1x256xf32> to vector<16x256xf32>
    %60 = arith.addf %58, %59 : vector<16x256xf32>
    %61 = tpu.concatenate %38, %60 in 0 : vector<16x256xf32>, vector<16x256xf32> -> vector<32x256xf32>
    %62 = arith.truncf %61 : vector<32x256xf32> to vector<32x256xbf16>
    %c0_17 = arith.constant 0 : index
    %c0_18 = arith.constant 0 : index
    %c0_19 = arith.constant 0 : index
    %c0_20 = arith.constant 0 : index
    %63 = vector.load %arg8[%c0_17, %c0_18, %c0_19, %c0_20] : memref<1x1x256x768xbf16, #tpu.memory_space<vmem>>, vector<1x1x256x768xbf16>
    %64 = vector.shape_cast %63 : vector<1x1x256x768xbf16> to vector<256x768xbf16>
    %cst_21 = arith.constant dense<0.000000e+00> : vector<32x768xf32>
    %65 = tpu.matmul %62, %64, %cst_21 {dimension_numbers = #tpu.dot_dimension_numbers<[1], [0], [0], [1], [0, 0, 1, 1], [], []>} : vector<32x256xbf16>, vector<256x768xbf16>, vector<32x768xf32> -> vector<32x768xf32>
    %66 = vector.extract_strided_slice %65 {offsets = [0, 0], sizes = [16, 256], strides = [1, 1]} : vector<32x768xf32> to vector<16x256xf32>
    %67 = vector.extract_strided_slice %6 {offsets = [0, 0], sizes = [1, 256], strides = [1, 1]} : vector<1x768xf32> to vector<1x256xf32>
    %68 = vector.broadcast %67 : vector<1x256xf32> to vector<16x256xf32>
    %69 = arith.addf %66, %68 : vector<16x256xf32>
    %cst_22 = arith.constant 1.250000e-01 : f32
    %70 = vector.broadcast %cst_22 : f32 to vector<16x256xf32>
    %71 = arith.mulf %69, %70 : vector<16x256xf32>
    %72 = vector.extract_strided_slice %65 {offsets = [16, 256], sizes = [16, 256], strides = [1, 1]} : vector<32x768xf32> to vector<16x256xf32>
    %73 = vector.extract_strided_slice %6 {offsets = [0, 256], sizes = [1, 256], strides = [1, 1]} : vector<1x768xf32> to vector<1x256xf32>
    %74 = vector.broadcast %73 : vector<1x256xf32> to vector<16x256xf32>
    %75 = arith.addf %72, %74 : vector<16x256xf32>
    %76 = vector.extract_strided_slice %65 {offsets = [16, 512], sizes = [16, 256], strides = [1, 1]} : vector<32x768xf32> to vector<16x256xf32>
    %77 = vector.extract_strided_slice %6 {offsets = [0, 512], sizes = [1, 256], strides = [1, 1]} : vector<1x768xf32> to vector<1x256xf32>
    %78 = vector.broadcast %77 : vector<1x256xf32> to vector<16x256xf32>
    %79 = arith.addf %76, %78 : vector<16x256xf32>
    %80 = vector.shape_cast %71 : vector<16x256xf32> to vector<2x8x256xf32>
    %81 = vector.shape_cast %75 : vector<16x256xf32> to vector<2x8x256xf32>
    %82 = vector.shape_cast %79 : vector<16x256xf32> to vector<2x8x256xf32>
    %c0_23 = arith.constant 0 : index
    %c0_24 = arith.constant 0 : index
    %83 = vector.load %arg7[%c0_23, %c0_24] : memref<8x8xf32, #tpu.memory_space<vmem>>, vector<8x8xf32>
    %84 = vector.shape_cast %83 : vector<8x8xf32> to vector<1x8x8xf32>
    %85 = vector.extract_strided_slice %80 {offsets = [0, 0, 0], sizes = [2, 8, 64], strides = [1, 1, 1]} : vector<2x8x256xf32> to vector<2x8x64xf32>
    %86 = vector.extract_strided_slice %81 {offsets = [0, 0, 0], sizes = [2, 8, 64], strides = [1, 1, 1]} : vector<2x8x256xf32> to vector<2x8x64xf32>
    "tpu.trace_start"() <{level = 10 : i32, message = "bqd,bkd->bqk"}> : () -> ()
    %cst_25 = arith.constant dense<0.000000e+00> : vector<2x8x8xf32>
    %87 = tpu.matmul %85, %86, %cst_25 {dimension_numbers = #tpu.dot_dimension_numbers<[2], [2], [1], [1], [0, 0, 0, 1, 1, 1], [0], [0]>} : vector<2x8x64xf32>, vector<2x8x64xf32>, vector<2x8x8xf32> -> vector<2x8x8xf32>
    "tpu.trace_stop"() : () -> ()
    %88 = vector.broadcast %84 : vector<1x8x8xf32> to vector<2x8x8xf32>
    %89 = arith.addf %87, %88 : vector<2x8x8xf32>
    %cst_26 = arith.constant dense<0xFF800000> : vector<2x8xf32>
    %90 = vector.multi_reduction <maximumf>, %89, %cst_26 [2] : vector<2x8x8xf32> to vector<2x8xf32>
    %91 = vector.shape_cast %90 : vector<2x8xf32> to vector<2x8x1xf32>
    %92 = vector.broadcast %91 : vector<2x8x1xf32> to vector<2x8x8xf32>
    %93 = arith.subf %89, %92 : vector<2x8x8xf32>
    %94 = math.exp %93 : vector<2x8x8xf32>
    %cst_27 = arith.constant dense<0.000000e+00> : vector<2x8xf32>
    %95 = vector.multi_reduction <add>, %94, %cst_27 [2] : vector<2x8x8xf32> to vector<2x8xf32>
    %96 = vector.shape_cast %95 : vector<2x8xf32> to vector<2x8x1xf32>
    %97 = tpu.reciprocal %96 {approx = true} : vector<2x8x1xf32> -> vector<2x8x1xf32>
    %98 = vector.broadcast %97 : vector<2x8x1xf32> to vector<2x8x8xf32>
    %99 = arith.mulf %94, %98 : vector<2x8x8xf32>
    %100 = vector.extract_strided_slice %82 {offsets = [0, 0, 0], sizes = [2, 8, 64], strides = [1, 1, 1]} : vector<2x8x256xf32> to vector<2x8x64xf32>
    "tpu.trace_start"() <{level = 10 : i32, message = "bqk,bkd->bqd"}> : () -> ()
    %cst_28 = arith.constant dense<0.000000e+00> : vector<2x8x64xf32>
    %101 = tpu.matmul %99, %100, %cst_28 {dimension_numbers = #tpu.dot_dimension_numbers<[2], [1], [1], [2], [0, 0, 0, 1, 1, 2], [0], [0]>} : vector<2x8x8xf32>, vector<2x8x64xf32>, vector<2x8x64xf32> -> vector<2x8x64xf32>
    "tpu.trace_stop"() : () -> ()
    %102 = vector.extract_strided_slice %80 {offsets = [0, 0, 64], sizes = [2, 8, 64], strides = [1, 1, 1]} : vector<2x8x256xf32> to vector<2x8x64xf32>
    %103 = vector.extract_strided_slice %81 {offsets = [0, 0, 64], sizes = [2, 8, 64], strides = [1, 1, 1]} : vector<2x8x256xf32> to vector<2x8x64xf32>
    "tpu.trace_start"() <{level = 10 : i32, message = "bqd,bkd->bqk"}> : () -> ()
    %cst_29 = arith.constant dense<0.000000e+00> : vector<2x8x8xf32>
    %104 = tpu.matmul %102, %103, %cst_29 {dimension_numbers = #tpu.dot_dimension_numbers<[2], [2], [1], [1], [0, 0, 0, 1, 1, 1], [0], [0]>} : vector<2x8x64xf32>, vector<2x8x64xf32>, vector<2x8x8xf32> -> vector<2x8x8xf32>
    "tpu.trace_stop"() : () -> ()
    %105 = vector.broadcast %84 : vector<1x8x8xf32> to vector<2x8x8xf32>
    %106 = arith.addf %104, %105 : vector<2x8x8xf32>
    %cst_30 = arith.constant dense<0xFF800000> : vector<2x8xf32>
    %107 = vector.multi_reduction <maximumf>, %106, %cst_30 [2] : vector<2x8x8xf32> to vector<2x8xf32>
    %108 = vector.shape_cast %107 : vector<2x8xf32> to vector<2x8x1xf32>
    %109 = vector.broadcast %108 : vector<2x8x1xf32> to vector<2x8x8xf32>
    %110 = arith.subf %106, %109 : vector<2x8x8xf32>
    %111 = math.exp %110 : vector<2x8x8xf32>
    %cst_31 = arith.constant dense<0.000000e+00> : vector<2x8xf32>
    %112 = vector.multi_reduction <add>, %111, %cst_31 [2] : vector<2x8x8xf32> to vector<2x8xf32>
    %113 = vector.shape_cast %112 : vector<2x8xf32> to vector<2x8x1xf32>
    %114 = tpu.reciprocal %113 {approx = true} : vector<2x8x1xf32> -> vector<2x8x1xf32>
    %115 = vector.broadcast %114 : vector<2x8x1xf32> to vector<2x8x8xf32>
    %116 = arith.mulf %111, %115 : vector<2x8x8xf32>
    %117 = vector.extract_strided_slice %82 {offsets = [0, 0, 64], sizes = [2, 8, 64], strides = [1, 1, 1]} : vector<2x8x256xf32> to vector<2x8x64xf32>
    "tpu.trace_start"() <{level = 10 : i32, message = "bqk,bkd->bqd"}> : () -> ()
    %cst_32 = arith.constant dense<0.000000e+00> : vector<2x8x64xf32>
    %118 = tpu.matmul %116, %117, %cst_32 {dimension_numbers = #tpu.dot_dimension_numbers<[2], [1], [1], [2], [0, 0, 0, 1, 1, 2], [0], [0]>} : vector<2x8x8xf32>, vector<2x8x64xf32>, vector<2x8x64xf32> -> vector<2x8x64xf32>
    "tpu.trace_stop"() : () -> ()
    %119 = vector.extract_strided_slice %80 {offsets = [0, 0, 128], sizes = [2, 8, 64], strides = [1, 1, 1]} : vector<2x8x256xf32> to vector<2x8x64xf32>
    %120 = vector.extract_strided_slice %81 {offsets = [0, 0, 128], sizes = [2, 8, 64], strides = [1, 1, 1]} : vector<2x8x256xf32> to vector<2x8x64xf32>
    "tpu.trace_start"() <{level = 10 : i32, message = "bqd,bkd->bqk"}> : () -> ()
    %cst_33 = arith.constant dense<0.000000e+00> : vector<2x8x8xf32>
    %121 = tpu.matmul %119, %120, %cst_33 {dimension_numbers = #tpu.dot_dimension_numbers<[2], [2], [1], [1], [0, 0, 0, 1, 1, 1], [0], [0]>} : vector<2x8x64xf32>, vector<2x8x64xf32>, vector<2x8x8xf32> -> vector<2x8x8xf32>
    "tpu.trace_stop"() : () -> ()
    %122 = vector.broadcast %84 : vector<1x8x8xf32> to vector<2x8x8xf32>
    %123 = arith.addf %121, %122 : vector<2x8x8xf32>
    %cst_34 = arith.constant dense<0xFF800000> : vector<2x8xf32>
    %124 = vector.multi_reduction <maximumf>, %123, %cst_34 [2] : vector<2x8x8xf32> to vector<2x8xf32>
    %125 = vector.shape_cast %124 : vector<2x8xf32> to vector<2x8x1xf32>
    %126 = vector.broadcast %125 : vector<2x8x1xf32> to vector<2x8x8xf32>
    %127 = arith.subf %123, %126 : vector<2x8x8xf32>
    %128 = math.exp %127 : vector<2x8x8xf32>
    %cst_35 = arith.constant dense<0.000000e+00> : vector<2x8xf32>
    %129 = vector.multi_reduction <add>, %128, %cst_35 [2] : vector<2x8x8xf32> to vector<2x8xf32>
    %130 = vector.shape_cast %129 : vector<2x8xf32> to vector<2x8x1xf32>
    %131 = tpu.reciprocal %130 {approx = true} : vector<2x8x1xf32> -> vector<2x8x1xf32>
    %132 = vector.broadcast %131 : vector<2x8x1xf32> to vector<2x8x8xf32>
    %133 = arith.mulf %128, %132 : vector<2x8x8xf32>
    %134 = vector.extract_strided_slice %82 {offsets = [0, 0, 128], sizes = [2, 8, 64], strides = [1, 1, 1]} : vector<2x8x256xf32> to vector<2x8x64xf32>
    "tpu.trace_start"() <{level = 10 : i32, message = "bqk,bkd->bqd"}> : () -> ()
    %cst_36 = arith.constant dense<0.000000e+00> : vector<2x8x64xf32>
    %135 = tpu.matmul %133, %134, %cst_36 {dimension_numbers = #tpu.dot_dimension_numbers<[2], [1], [1], [2], [0, 0, 0, 1, 1, 2], [0], [0]>} : vector<2x8x8xf32>, vector<2x8x64xf32>, vector<2x8x64xf32> -> vector<2x8x64xf32>
    "tpu.trace_stop"() : () -> ()
    %136 = vector.extract_strided_slice %80 {offsets = [0, 0, 192], sizes = [2, 8, 64], strides = [1, 1, 1]} : vector<2x8x256xf32> to vector<2x8x64xf32>
    %137 = vector.extract_strided_slice %81 {offsets = [0, 0, 192], sizes = [2, 8, 64], strides = [1, 1, 1]} : vector<2x8x256xf32> to vector<2x8x64xf32>
    "tpu.trace_start"() <{level = 10 : i32, message = "bqd,bkd->bqk"}> : () -> ()
    %cst_37 = arith.constant dense<0.000000e+00> : vector<2x8x8xf32>
    %138 = tpu.matmul %136, %137, %cst_37 {dimension_numbers = #tpu.dot_dimension_numbers<[2], [2], [1], [1], [0, 0, 0, 1, 1, 1], [0], [0]>} : vector<2x8x64xf32>, vector<2x8x64xf32>, vector<2x8x8xf32> -> vector<2x8x8xf32>
    "tpu.trace_stop"() : () -> ()
    %139 = vector.broadcast %84 : vector<1x8x8xf32> to vector<2x8x8xf32>
    %140 = arith.addf %138, %139 : vector<2x8x8xf32>
    %cst_38 = arith.constant dense<0xFF800000> : vector<2x8xf32>
    %141 = vector.multi_reduction <maximumf>, %140, %cst_38 [2] : vector<2x8x8xf32> to vector<2x8xf32>
    %142 = vector.shape_cast %141 : vector<2x8xf32> to vector<2x8x1xf32>
    %143 = vector.broadcast %142 : vector<2x8x1xf32> to vector<2x8x8xf32>
    %144 = arith.subf %140, %143 : vector<2x8x8xf32>
    %145 = math.exp %144 : vector<2x8x8xf32>
    %cst_39 = arith.constant dense<0.000000e+00> : vector<2x8xf32>
    %146 = vector.multi_reduction <add>, %145, %cst_39 [2] : vector<2x8x8xf32> to vector<2x8xf32>
    %147 = vector.shape_cast %146 : vector<2x8xf32> to vector<2x8x1xf32>
    %148 = tpu.reciprocal %147 {approx = true} : vector<2x8x1xf32> -> vector<2x8x1xf32>
    %149 = vector.broadcast %148 : vector<2x8x1xf32> to vector<2x8x8xf32>
    %150 = arith.mulf %145, %149 : vector<2x8x8xf32>
    %151 = vector.extract_strided_slice %82 {offsets = [0, 0, 192], sizes = [2, 8, 64], strides = [1, 1, 1]} : vector<2x8x256xf32> to vector<2x8x64xf32>
    "tpu.trace_start"() <{level = 10 : i32, message = "bqk,bkd->bqd"}> : () -> ()
    %cst_40 = arith.constant dense<0.000000e+00> : vector<2x8x64xf32>
    %152 = tpu.matmul %150, %151, %cst_40 {dimension_numbers = #tpu.dot_dimension_numbers<[2], [1], [1], [2], [0, 0, 0, 1, 1, 2], [0], [0]>} : vector<2x8x8xf32>, vector<2x8x64xf32>, vector<2x8x64xf32> -> vector<2x8x64xf32>
    "tpu.trace_stop"() : () -> ()
    %153 = tpu.concatenate %101, %118, %135, %152 in 2 : vector<2x8x64xf32>, vector<2x8x64xf32>, vector<2x8x64xf32>, vector<2x8x64xf32> -> vector<2x8x256xf32>
    %154 = vector.shape_cast %153 : vector<2x8x256xf32> to vector<16x256xf32>
    %155 = arith.truncf %154 : vector<16x256xf32> to vector<16x256xbf16>
    %c0_41 = arith.constant 0 : index
    %c0_42 = arith.constant 0 : index
    %c0_43 = arith.constant 0 : index
    %c0_44 = arith.constant 0 : index
    %156 = vector.load %arg9[%c0_41, %c0_42, %c0_43, %c0_44] : memref<1x1x256x256xbf16, #tpu.memory_space<vmem>>, vector<1x1x256x256xbf16>
    %157 = vector.shape_cast %156 : vector<1x1x256x256xbf16> to vector<256x256xbf16>
    %cst_45 = arith.constant dense<0.000000e+00> : vector<16x256xf32>
    %158 = tpu.matmul %155, %157, %cst_45 {dimension_numbers = #tpu.dot_dimension_numbers<[1], [0], [0], [1], [0, 0, 1, 1], [], []>} : vector<16x256xbf16>, vector<256x256xbf16>, vector<16x256xf32> -> vector<16x256xf32>
    %159 = vector.broadcast %7 : vector<1x256xf32> to vector<16x256xf32>
    %160 = arith.addf %158, %159 : vector<16x256xf32>
    %161 = arith.addf %15, %160 : vector<16x256xf32>
    %cst_46 = arith.constant dense<0.000000e+00> : vector<16xf32>
    %162 = vector.multi_reduction <add>, %161, %cst_46 [1] : vector<16x256xf32> to vector<16xf32>
    %163 = vector.shape_cast %162 : vector<16xf32> to vector<16x1xf32>
    %cst_47 = arith.constant 2.560000e+02 : f32
    %164 = vector.broadcast %cst_47 : f32 to vector<16x1xf32>
    %165 = arith.divf %163, %164 : vector<16x1xf32>
    %166 = vector.broadcast %165 : vector<16x1xf32> to vector<16x256xf32>
    %167 = arith.subf %161, %166 : vector<16x256xf32>
    %168 = arith.mulf %167, %167 : vector<16x256xf32>
    %cst_48 = arith.constant dense<0.000000e+00> : vector<16xf32>
    %169 = vector.multi_reduction <add>, %168, %cst_48 [1] : vector<16x256xf32> to vector<16xf32>
    %170 = vector.shape_cast %169 : vector<16xf32> to vector<16x1xf32>
    %cst_49 = arith.constant 2.560000e+02 : f32
    %171 = vector.broadcast %cst_49 : f32 to vector<16x1xf32>
    %172 = arith.divf %170, %171 : vector<16x1xf32>
    %173 = vector.broadcast %165 : vector<16x1xf32> to vector<16x256xf32>
    %174 = arith.subf %161, %173 : vector<16x256xf32>
    %cst_50 = arith.constant 9.99999974E-6 : f32
    %175 = vector.broadcast %cst_50 : f32 to vector<16x1xf32>
    %176 = arith.addf %172, %175 : vector<16x1xf32>
    %177 = math.rsqrt %176 : vector<16x1xf32>
    %178 = vector.broadcast %177 : vector<16x1xf32> to vector<16x256xf32>
    %179 = arith.mulf %174, %178 : vector<16x256xf32>
    %180 = vector.broadcast %10 : vector<1x256xf32> to vector<16x256xf32>
    %181 = arith.mulf %179, %180 : vector<16x256xf32>
    %182 = vector.broadcast %11 : vector<1x256xf32> to vector<16x256xf32>
    %183 = arith.addf %181, %182 : vector<16x256xf32>
    %184 = arith.truncf %183 : vector<16x256xf32> to vector<16x256xbf16>
    %c0_51 = arith.constant 0 : index
    %c0_52 = arith.constant 0 : index
    %c0_53 = arith.constant 0 : index
    %c0_54 = arith.constant 0 : index
    %185 = vector.load %arg10[%c0_51, %c0_52, %c0_53, %c0_54] : memref<1x1x256x1024xbf16, #tpu.memory_space<vmem>>, vector<1x1x256x1024xbf16>
    %186 = vector.shape_cast %185 : vector<1x1x256x1024xbf16> to vector<256x1024xbf16>
    %cst_55 = arith.constant dense<0.000000e+00> : vector<16x1024xf32>
    %187 = tpu.matmul %184, %186, %cst_55 {dimension_numbers = #tpu.dot_dimension_numbers<[1], [0], [0], [1], [0, 0, 1, 1], [], []>} : vector<16x256xbf16>, vector<256x1024xbf16>, vector<16x1024xf32> -> vector<16x1024xf32>
    %188 = vector.broadcast %5 : vector<1x1024xf32> to vector<16x1024xf32>
    %189 = arith.addf %187, %188 : vector<16x1024xf32>
    %cst_56 = arith.constant 0.000000e+00 : f32
    %190 = vector.broadcast %cst_56 : f32 to vector<16x1024xf32>
    %191 = arith.maximumf %189, %190 : vector<16x1024xf32>
    %192 = arith.truncf %191 : vector<16x1024xf32> to vector<16x1024xbf16>
    %c0_57 = arith.constant 0 : index
    %c0_58 = arith.constant 0 : index
    %c0_59 = arith.constant 0 : index
    %c0_60 = arith.constant 0 : index
    %193 = vector.load %arg11[%c0_57, %c0_58, %c0_59, %c0_60] : memref<1x1x1024x256xbf16, #tpu.memory_space<vmem>>, vector<1x1x1024x256xbf16>
    %194 = vector.shape_cast %193 : vector<1x1x1024x256xbf16> to vector<1024x256xbf16>
    %cst_61 = arith.constant dense<0.000000e+00> : vector<16x256xf32>
    %195 = tpu.matmul %192, %194, %cst_61 {dimension_numbers = #tpu.dot_dimension_numbers<[1], [0], [0], [1], [0, 0, 1, 1], [], []>} : vector<16x1024xbf16>, vector<1024x256xbf16>, vector<16x256xf32> -> vector<16x256xf32>
    %196 = vector.broadcast %12 : vector<1x256xf32> to vector<16x256xf32>
    %197 = arith.addf %195, %196 : vector<16x256xf32>
    %198 = arith.addf %161, %197 : vector<16x256xf32>
    %c0_62 = arith.constant 0 : index
    %c0_63 = arith.constant 0 : index
    %199 = vector.load %arg14[%c0_62, %c0_63] : memref<16x256xf32, #tpu.memory_space<vmem>>, vector<16x256xf32>
    tpu.vector_store %arg14[%c0_62, %c0_63], %198 {strides = array<i32>} : memref<16x256xf32, #tpu.memory_space<vmem>>, vector<16x256xf32>,
    %c4_i32 = arith.constant 4 : i32
    %200 = arith.cmpi eq, %arg1, %c4_i32 : i32
    %201 = arith.extui %200 : i1 to i32
    %c0_i32_64 = arith.constant 0 : i32
    %202 = arith.cmpi ne, %201, %c0_i32_64 : i32
    scf.if %202 {
      %cst_65 = arith.constant dense<0.000000e+00> : vector<16xf32>
      %203 = vector.multi_reduction <add>, %198, %cst_65 [1] : vector<16x256xf32> to vector<16xf32>
      %204 = vector.shape_cast %203 : vector<16xf32> to vector<16x1xf32>
      %cst_66 = arith.constant 2.560000e+02 : f32
      %205 = vector.broadcast %cst_66 : f32 to vector<16x1xf32>
      %206 = arith.divf %204, %205 : vector<16x1xf32>
      %207 = vector.broadcast %206 : vector<16x1xf32> to vector<16x256xf32>
      %208 = arith.subf %198, %207 : vector<16x256xf32>
      %209 = arith.mulf %208, %208 : vector<16x256xf32>
      %cst_67 = arith.constant dense<0.000000e+00> : vector<16xf32>
      %210 = vector.multi_reduction <add>, %209, %cst_67 [1] : vector<16x256xf32> to vector<16xf32>
      %211 = vector.shape_cast %210 : vector<16xf32> to vector<16x1xf32>
      %cst_68 = arith.constant 2.560000e+02 : f32
      %212 = vector.broadcast %cst_68 : f32 to vector<16x1xf32>
      %213 = arith.divf %211, %212 : vector<16x1xf32>
      %214 = vector.broadcast %206 : vector<16x1xf32> to vector<16x256xf32>
      %215 = arith.subf %198, %214 : vector<16x256xf32>
      %cst_69 = arith.constant 9.99999974E-6 : f32
      %216 = vector.broadcast %cst_69 : f32 to vector<16x1xf32>
      %217 = arith.addf %213, %216 : vector<16x1xf32>
      %218 = math.rsqrt %217 : vector<16x1xf32>
      %219 = vector.broadcast %218 : vector<16x1xf32> to vector<16x256xf32>
      %220 = arith.mulf %215, %219 : vector<16x256xf32>
      %221 = vector.broadcast %13 : vector<1x256xf32> to vector<16x256xf32>
      %222 = arith.mulf %220, %221 : vector<16x256xf32>
      %223 = vector.broadcast %14 : vector<1x256xf32> to vector<16x256xf32>
      %224 = arith.addf %222, %223 : vector<16x256xf32>
      %225 = vector.shape_cast %224 : vector<16x256xf32> to vector<2x8x256xf32>
      %cst_70 = arith.constant dense<0.000000e+00> : vector<2x256xf32>
      %226 = vector.multi_reduction <add>, %225, %cst_70 [1] : vector<2x8x256xf32> to vector<2x256xf32>
      %cst_71 = arith.constant 8.000000e+00 : f32
      %227 = vector.broadcast %cst_71 : f32 to vector<2x256xf32>
      %228 = arith.divf %226, %227 : vector<2x256xf32>
      %c0_72 = arith.constant 0 : index
      %c0_73 = arith.constant 0 : index
      %229 = vector.load %arg13[%c0_72, %c0_73] : memref<2x256xf32, #tpu.memory_space<vmem>>, vector<2x256xf32>
      tpu.vector_store %arg13[%c0_72, %c0_73], %228 {strides = array<i32>} : memref<2x256xf32, #tpu.memory_space<vmem>>, vector<2x256xf32>,
    } else {
    }
    return
  }
  func.func @transform_0(%arg0: i32, %arg1: i32) -> (i32, i32) {
    %c0_i32 = arith.constant 0 : i32
    %c0_i32_0 = arith.constant 0 : i32
    %c0_i32_1 = arith.constant 0 : i32
    return %c0_i32, %c0_i32_0 : i32, i32
  }
  func.func @transform_1(%arg0: i32, %arg1: i32) -> (i32, i32, i32) {
    %c0_i32 = arith.constant 0 : i32
    %c0_i32_0 = arith.constant 0 : i32
    %c0_i32_1 = arith.constant 0 : i32
    return %arg0, %c0_i32, %c0_i32_0 : i32, i32, i32
  }
  func.func @transform_2(%arg0: i32, %arg1: i32) -> (i32, i32) {
    %c0_i32 = arith.constant 0 : i32
    %c0_i32_0 = arith.constant 0 : i32
    %c0_i32_1 = arith.constant 0 : i32
    return %c0_i32, %c0_i32_0 : i32, i32
  }
  func.func @transform_3(%arg0: i32, %arg1: i32) -> (i32, i32, i32) {
    %c0_i32 = arith.constant 0 : i32
    %c0_i32_0 = arith.constant 0 : i32
    %c0_i32_1 = arith.constant 0 : i32
    return %arg0, %c0_i32, %c0_i32_0 : i32, i32, i32
  }
  func.func @transform_4(%arg0: i32, %arg1: i32) -> (i32, i32) {
    %c0_i32 = arith.constant 0 : i32
    %c0_i32_0 = arith.constant 0 : i32
    %c0_i32_1 = arith.constant 0 : i32
    return %c0_i32, %c0_i32_0 : i32, i32
  }
  func.func @transform_5(%arg0: i32, %arg1: i32) -> (i32, i32) {
    %c0_i32 = arith.constant 0 : i32
    %c0_i32_0 = arith.constant 0 : i32
    %c0_i32_1 = arith.constant 0 : i32
    return %c0_i32, %c0_i32_0 : i32, i32
  }
  func.func @transform_6(%arg0: i32, %arg1: i32) -> (i32, i32, i32, i32) {
    %c0_i32 = arith.constant 0 : i32
    %c0_i32_0 = arith.constant 0 : i32
    %c0_i32_1 = arith.constant 0 : i32
    return %arg0, %arg1, %c0_i32, %c0_i32_0 : i32, i32, i32, i32
  }
  func.func @transform_7(%arg0: i32, %arg1: i32) -> (i32, i32, i32, i32) {
    %c0_i32 = arith.constant 0 : i32
    %c0_i32_0 = arith.constant 0 : i32
    %c0_i32_1 = arith.constant 0 : i32
    return %arg0, %arg1, %c0_i32, %c0_i32_0 : i32, i32, i32, i32
  }
  func.func @transform_8(%arg0: i32, %arg1: i32) -> (i32, i32, i32, i32) {
    %c0_i32 = arith.constant 0 : i32
    %c0_i32_0 = arith.constant 0 : i32
    %c0_i32_1 = arith.constant 0 : i32
    return %arg0, %arg1, %c0_i32, %c0_i32_0 : i32, i32, i32, i32
  }
  func.func @transform_9(%arg0: i32, %arg1: i32) -> (i32, i32, i32, i32) {
    %c0_i32 = arith.constant 0 : i32
    %c0_i32_0 = arith.constant 0 : i32
    %c0_i32_1 = arith.constant 0 : i32
    return %arg0, %arg1, %c0_i32, %c0_i32_0 : i32, i32, i32, i32
  }
  func.func @transform_10(%arg0: i32, %arg1: i32) -> (i32, i32, i32, i32) {
    %c0_i32 = arith.constant 0 : i32
    %c0_i32_0 = arith.constant 0 : i32
    %c0_i32_1 = arith.constant 0 : i32
    return %arg0, %arg1, %c0_i32, %c0_i32_0 : i32, i32, i32, i32
  }
  func.func @transform_11(%arg0: i32, %arg1: i32) -> (i32, i32) {
    %c0_i32 = arith.constant 0 : i32
    %c0_i32_0 = arith.constant 0 : i32
    return %c0_i32, %arg0 : i32, i32
  }
}

</mosaic_0001>

<bundles_post_ra>
// kernel: mult_forward.1
= control target key start
LH: loop header
LB: loop body
LE: loop exit
PB: predicated region body
PF: predicated region fallthrough
CT: control target
= control target key end

     0   :  { %s11904_s0 = inlined_call_operand.hbm [shape: f32[16,768], index: 0, kind: input, shape index: {}]   ;;  %s11905_s1 = inlined_call_operand.vmem [shape: f32[2,16,768], index: 1, kind: input, shape index: {}]   ;;  %s11906_s2 = inlined_call_operand.hbm [shape: bf16[768,256], index: 2, kind: input, shape index: {}]   ;;  %s11907_s3 = inlined_call_operand.hbm [shape: bf16[2,768,256], index: 3, kind: input, shape index: {}]   ;;  %s11908_s4 = inlined_call_operand.vmem [shape: f32[16,256], index: 4, kind: input, shape index: {}]   ;;  %s11909_s5 = inlined_call_operand.vmem [shape: f32[8,8], index: 5, kind: input, shape index: {}]   ;;  %s11910_s6 = inlined_call_operand.hbm [shape: bf16[2,5,256,768], index: 6, kind: input, shape index: {}]   ;;  %s11911_s7 = inlined_call_operand.hbm [shape: bf16[2,5,256,256], index: 7, kind: input, shape index: {}]   ;;  %s11912_s8 = inlined_call_operand.hbm [shape: bf16[2,5,256,1024], index: 8, kind: input, shape index: {}]   ;;  %s11913_s9 = inlined_call_operand.hbm [shape: bf16[2,5,1024,256], index: 9, kind: input, shape index: {}]   ;;  %s11914_s10 = inlined_call_operand.hbm [shape: f32[2,5,4,1024], index: 10, kind: input, shape index: {}]   ;;  %s11915_s11 = inlined_call_operand.hbm [shape: f32[2,512], index: 11, kind: output, shape index: {}]  }
   0x1   :  { %11940 = sst [smem:[#allocation37_spill]] %s11904_s0 }
   0x2   :  { %11941 = sst [smem:[#allocation38_spill]] %s11905_s1 }
   0x3   :  { %11942 = sst [smem:[#allocation39_spill]] %s11907_s3 }
   0x4   :  { %11943 = sst [smem:[#allocation40_spill]] %s11908_s4 }
   0x5   :  { %11944 = sst [smem:[#allocation41_spill]] %s11909_s5 }
   0x6   :  { %11945 = sst [smem:[#allocation42_spill]] %s11910_s6 }
   0x7   :  { %11946 = sst [smem:[#allocation43_spill]] %s11915_s11 }
   0x8   :  { %16 = vsyncpa [#allocation5], 0 }
   0x9   :  { %17 = vsyncpa [#allocation8], 0 }
   0xa   :  { %18 = vsyncpa [#allocation6], 0 }
   0xb   :  { %20 = vsyncpa [#allocation6 + $0x1], 0  ;;  %s10137_s17 = smov 0   ;;  %s10139_s18 = smov 0  }
   0xc   :  { %s10141_s19 = smov 0   ;;  %s10143_s20 = smov 0  }
   0xd   :  { %s10145_s21 = smov 0   ;;  %s10147_s22 = smov 0  }
   0xe   :  { %s10149_s23 = smov 0   ;;  %s10151_s24 = smov 0  }
   0xf   :  { %s10153_s25 = smov 0   ;;  %s10155_s26 = smov 0  }
  0x10   :  { %s10157_s27 = smov 0  }
  0x11 LB: > { %11947 = sst [smem:[#allocation21_spill]] %s10026_s18  ;;  %s10191_s28 = sadd.s32 4294967295, %s10062_s27   ;;  %s10062_s27 = sphi %s10157_s27, %s26_s27   ;;  %s10058_s26 = sphi %s10155_s26, %s12010_s26   ;;  %s10054_s25 = sphi %s10153_s25, %s12009_s25   ;;  %s10050_s24 = sphi %s10151_s24, %s12008_s24   ;;  %s10046_s23 = sphi %s10149_s23, %s12007_s23   ;;  %s10042_s22 = sphi %s10147_s22, %s12004_s22   ;;  %s10038_s21 = sphi %s10145_s21, %s12003_s21   ;;  %s10034_s20 = sphi %s10143_s20, %s12002_s20   ;;  %s10030_s19 = sphi %s10141_s19, %s12001_s19   ;;  %s10026_s18 = sphi %s10139_s18, %s12000_s18   ;;  %s10022_s17 = sphi %s10137_s17, %s11999_s17  }
  0x12   : > { %11948 = sst [smem:[#allocation22_spill]] %s10030_s19  ;;  %s6496_s29 = sadd.s32 4294967294, %s10062_s27  }
  0x13   : > { %11949 = sst [smem:[#allocation23_spill]] %s10034_s20  ;;  %p126_p0 = scmp.ne.s32.totalorder %s10038_s21, %s10034_s20 }
  0x14   : > { %11950 = sst [smem:[#allocation24_spill]] %s10038_s21  ;;  %p11919_p1 = scmp.eq.s32.totalorder %s10191_s28, 0 }
  0x15   : > { %11951 = sst [smem:[#allocation25_spill]] %s10042_s22  ;;  %p196_p2 = scmp.ne.s32.totalorder %s10026_s18, %s10022_s17 }
  0x16   : > { %11952 = sst [smem:[#allocation26_spill]] %s10046_s23  ;;  %p332_p3 = scmp.eq.s32.totalorder %s10191_s28, 9 }
  0x17   : > { %11953 = sst [smem:[#allocation27_spill]] %s10050_s24  ;;  %p10201_p4 = por %p11919_p1, %p126_p0 }
  0x18   : > { %11954 = sst [smem:[#allocation28_spill]] %s10062_s27  ;;  %p338_p5 = scmp.eq.s32.totalorder %s6496_s29, 9 }
  0x19   : > { %s11955_s30 = scalar_select %p10201_p4, 1, 0 }
  0x1a   : > { %p10207_p6 = por %p196_p2, %p11919_p1  ;;  %p6497_p7 = scmp.ge.s32.totalorder %s10062_s27, 1 }
  0x1b   : > { %11956 = sst [smem:[#allocation29_spill]] %s11955_s30  ;;  %p10212_p8 = por %p338_p5, %p126_p0 }
  0x1c   : > { %s11957_s12 = scalar_select %p10207_p6, 1, 0 }
  0x1d   : > { %s11959_s13 = scalar_select %p10212_p8, 1, 0 }
  0x1e   : > { %11958 = sst [smem:[#allocation30_spill]] %s11957_s12  ;;  %p345_p9 = scmp.lt.s32.totalorder %s10062_s27, 11 }
  0x1f   : > { %11960 = sst [smem:[#allocation31_spill]] %s11959_s13  ;;  %s10064_s29 = smov [#allocation4]  }
  0x20   : > { %s11961_s0 = sld [smem:[#allocation37_spill]]  ;;  %p10220_p10 = pnand %p6497_p7, %p345_p9 }
  0x21   : > { %s358_s13 = sshll.u32 %s10064_s29, 4  ;;  %s10065_s15 = smov 768   ;;  %s359_s13 = int_to_ptr.vmem [resolvable:$true] %s358_s13 }
  0x22   : > { %p9470_p11 = pneg %p10220_p10  ;;  %s35_s20 = sadd.s32 1, %s10054_s25 }
  0x23   : > { %p36_p13 = scmp.ge.s32.totalorder %s35_s20, 5  ;;  %s38_s11 = sadd.s32 1, %s10058_s26 }
  0x24   : > { %p10228_p12 = pnand %p9470_p11, %p11919_p1  ;;  %s113_s29 = sadd.s32 1, %s10042_s22 }
  0x25   : > { %p120_p0 = scmp.ne.s32.totalorder %s10042_s22, %s10038_s21  ;;  %s12012_s20 = smov (%p36_p13, %s35_s20), 0 }
  0x26   : > { %s356_s16 = sshll.u32 %s11961_s0, 4  ;;  %s10066_s0 = smov 48   ;;  %s357_s16 = int_to_ptr.hbm [resolvable:$true] %s356_s16 }
  0x27   : > { %9473 = dma.hbm_to_vmem [thread:$0]  (!%p10228_p12), %s357_s16, 1536, %s359_s13, [#allocation5], %s10065_s15, %s10065_s15, %s10066_s0  }
  0x28   : > { %11964 = sst [smem:[#allocation32_spill]] %s12012_s20  ;;  %s12014_s11 = smov (!%p36_p13, %s38_s11), %s10058_s26 }
  0x29   : > { %p121_p2 = scmp.eq.s32.totalorder %s10062_s27, 0  ;;  %s179_s5 = ssub.s32 %s10054_s25, %s12012_s20 }
  0x2a   : > { %p40_p5 = scmp.ge.s32.totalorder %s12014_s11, 2  ;;  %p10247_p7 = por %p332_p3, %p120_p0 }
  0x2b   : > { %p122_p9 = por %p121_p2, %p120_p0  ;;  %p9502_p11 = scmp.lt.s32.totalorder %s10062_s27, 10 }
  0x2c   : > { %s11965_s0 = scalar_select %p10247_p7, 1, 0 }
  0x2d   : > { %s12016_s11 = smov (%p40_p5, %s12014_s11), 0  ;;  %s400_s16 = sand.u32 1, %s10062_s27  }
  0x2e   : > { %11966 = sst [smem:[#allocation33_spill]] %s11965_s0  ;;  %s110_s13 = ssub.s32 %s10058_s26, %s12016_s11 }
  0x2f   : > { %11967 = sst [smem:[#allocation34_spill]] %s12016_s11  ;;  %p111_p1 = scmp.eq.s32.totalorder %s110_s13, 0 }
  0x30   : > { %s180_s15 = sor.u32 %s179_s5, %s110_s13  ;;  %s402_s20 = sand.u32 1, %s10042_s22  }
  0x31   : > { %p181_p13 = scmp.eq.s32.totalorder %s180_s15, 0  ;;  %s9437_s23 = smul.u32 768, %s10058_s26 }
  0x32   : > { %s10260_s4 = scalar_select %p111_p1, %s10042_s22, %s113_s29  }
  0x33   : > { %s9436_s0 = smul.u32 768, %s402_s20  ;;  %p9478_p3 = pnand %p9502_p11, %p122_p9 }
  0x34   : > { %11968 = sst [smem:[#allocation35_spill]] %s10260_s4  ;;  %s10269_s4 = scalar_lea.sflag [#allocation5], %s400_s16 }
  0x35   : > { %s11969_s3 = sld [smem:[#allocation39_spill]]  ;;  %s404_s29 = scalar_lea.vmem [#allocation9], %s9436_s0 }
  0x36   : > { %s412_s13 = sshll.u32 %s404_s29, 4  ;;  %s11929_s22 = smov 128   ;;  %s413_s13 = int_to_ptr.vmem [resolvable:$true] %s412_s13 }
  0x37   : > { %s11931_s20 = smov 8   ;;  %s9439_s12 = smul.u32 192, %s10054_s25 }
  0x38   : > { %s183_s1 = sadd.s32 1, %s10030_s19  ;;  %p190_p1 = scmp.ne.s32.totalorder %s10030_s19, %s10026_s18 }
  0x39   : > { %s9440_s0 = smul.u32 960, %s10058_s26  ;;  %s11972_s6 = sld [smem:[#allocation42_spill]] }
  0x3a   : > { %p192_p0 = por %p190_p1, %p121_p2  ;;  %s10070_s27 = smov 24  }
  0x3b   : > { %s409_s11 = scalar_lea.hbm %s11969_s3, %s9437_s23  ;;  %s10286_s23 = sand.u32 1, %s10030_s19  }
  0x3c   : > { %s410_s5 = sshll.u32 %s409_s11, 4  ;;  %s9438_s24 = smul.u32 768, %s10286_s23  ;;  %s411_s5 = int_to_ptr.hbm [resolvable:$true] %s410_s5 }
  0x3d   : > { %9480 = dma.hbm_to_vmem [thread:$0]  (!%p9478_p3), %s411_s5, 12288, %s413_s13, %s10269_s4, %s11929_s22, %s11929_s22, %s11931_s20  }
  0x3e   : > { %s10281_s11 = scalar_select %p181_p13, %s10030_s19, %s183_s1  }
  0x3f   : > { %p10292_p5 = pnand %p9502_p11, %p192_p0  ;;  %s431_s15 = sadd.s32 %s9440_s0, %s9439_s12 }
  0x40   : > { %11970 = sst [smem:[#allocation36_spill]] %s10281_s11  ;;  %s426_s5 = scalar_lea.vmem [#allocation10], %s9438_s24 }
  0x41   : > { %s436_s29 = sshll.u32 %s426_s5, 4  ;;  %s6502_s13 = sshll.u32 %s431_s15, 2  ;;  %s437_s29 = int_to_ptr.vmem [resolvable:$true] %s436_s29 }
  0x42   : > { %s433_s20 = scalar_lea.hbm %s11972_s6, %s6502_s13  ;;  %s6503_s11 = sshll.u32 %s10286_s23, 8 }
  0x43   : > { %s434_s3 = sshll.u32 %s433_s20, 4  ;;  %s10069_s19 = smov 384   ;;  %s435_s3 = int_to_ptr.hbm [resolvable:$true] %s434_s3 }
  0x44   : > { %9483 = dma.hbm_to_vmem [thread:$0]  (!%p10292_p5), %s435_s3, 12288, %s437_s29, %s10269_s4, %s10069_s19, %s10069_s19, %s10070_s27  }
  0x45   : > { %s6504_s12 = sshll.u32 %s10054_s25, 6  ;;  %s9441_s24 = smul.u32 320, %s10058_s26 }
  0x46   : > { %s450_s0 = scalar_lea.vmem [#allocation11], %s6503_s11  ;;  %s6506_s5 = sshll.u32 %s10286_s23, 10 }
  0x47   : > { %s460_s15 = sshll.u32 %s450_s0, 4  ;;  %s455_s18 = sadd.s32 %s9441_s24, %s6504_s12  ;;  %s461_s15 = int_to_ptr.vmem [resolvable:$true] %s460_s15 }
  0x48   : > { %s6505_s22 = sshll.u32 %s455_s18, 2  ;;  %s6507_s6 = sshll.u32 %s10054_s25, 8 }
  0x49   : > { %s457_s20 = scalar_lea.hbm %s11911_s7, %s6505_s22  ;;  %s9442_s21 = smul.u32 1280, %s10058_s26 }
  0x4a   : > { %s458_s30 = sshll.u32 %s457_s20, 4  ;;  %s474_s3 = scalar_lea.vmem [#allocation12], %s6506_s5  ;;  %s459_s30 = int_to_ptr.hbm [resolvable:$true] %s458_s30 }
  0x4b   : > { %s484_s19 = sshll.u32 %s474_s3, 4  ;;  %s11973_s27 = smov 8   ;;  %s485_s19 = int_to_ptr.vmem [resolvable:$true] %s484_s19 }
  0x4c   : > { %s11974_s11 = smov 128   ;;  %s479_s18 = sadd.s32 %s9442_s21, %s6507_s6 }
  0x4d   : > { %9486 = dma.hbm_to_vmem [thread:$0]  (!%p10292_p5), %s459_s30, 4096, %s461_s15, %s10269_s4, %s11974_s11, %s11974_s11, %s11973_s27  }
  0x4e   : > { %s6508_s29 = sshll.u32 %s479_s18, 2  ;;  %s10071_s3 = smov 512  }
  0x4f   : > { %s481_s0 = scalar_lea.hbm %s11912_s8, %s6508_s29  ;;  %s505_s20 = scalar_lea.hbm %s11913_s9, %s6508_s29 }
  0x50   : > { %s482_s22 = sshll.u32 %s481_s0, 4  ;;  %s10072_s30 = smov 32   ;;  %s483_s22 = int_to_ptr.hbm [resolvable:$true] %s482_s22 }
  0x51   : > { %9489 = dma.hbm_to_vmem [thread:$0]  (!%p10292_p5), %s483_s22, 16384, %s485_s19, %s10269_s4, %s10071_s3, %s10071_s3, %s10072_s30  }
  0x52   : > { %s506_s6 = sshll.u32 %s505_s20, 4  ;;  %s498_s21 = scalar_lea.vmem [#allocation13], %s6506_s5  ;;  %s507_s6 = int_to_ptr.hbm [resolvable:$true] %s506_s6 }
  0x53   : > { %s508_s15 = sshll.u32 %s498_s21, 4  ;;  %s370_s29 = sshll.u32 %s11906_s2, 4  ;;  %s509_s15 = int_to_ptr.vmem [resolvable:$true] %s508_s15  ;;  %s371_s29 = int_to_ptr.hbm [resolvable:$true] %s370_s29 }
  0x54   : > { %9492 = dma.hbm_to_vmem [thread:$0]  (!%p10292_p5), %s507_s6, 16384, %s509_s15, %s10269_s4, %s11974_s11, %s11974_s11, %s11973_s27  }
  0x55   : > { %s10073_s24 = smov [#allocation7]   ;;  %s6512_s19 = sshll.u32 %s10286_s23, 5 }
  0x56   : > { %s372_s0 = sshll.u32 %s10073_s24, 4  ;;  %s6513_s5 = sshll.u32 %s10054_s25, 3  ;;  %s373_s0 = int_to_ptr.vmem [resolvable:$true] %s372_s0 }
  0x57   : > { %9476 = dma.hbm_to_vmem [thread:$0]  (!%p10228_p12), %s371_s29, 12288, %s373_s0, [#allocation8], %s11974_s11, %s11974_s11, %s11973_s27  }
  0x58   : > { %s9444_s22 = smul.u32 40, %s10058_s26  ;;  %s522_s13 = scalar_lea.vmem [#allocation14], %s6512_s19 }
  0x59   : > { %s533_s1 = sshll.u32 %s522_s13, 4  ;;  %p11975_p12 = scmp.eq.s32.totalorder (!%p10220_p10), %s10191_s28, 0  ;;  %s534_s1 = int_to_ptr.vmem [resolvable:$true] %s533_s1 }
  0x5a   : > { %s527_s20 = sadd.s32 %s9444_s22, %s6513_s5  ;;  %542 = sbr.rel (%p10220_p10) target bundleno = 2865 (0xb31), region = 64 }
  0x5b   : > { %s6514_s3 = sshll.u32 %s527_s20, 2 }
  0x5c   : > { %s529_s21 = scalar_lea.hbm %s11914_s10, %s6514_s3 }
  0x5d   : > { %s531_s15 = sshll.u32 %s529_s21, 4  ;;  %s532_s15 = int_to_ptr.hbm [resolvable:$true] %s531_s15 }
  0x5e   : > { %9495 = dma.hbm_to_vmem [thread:$0]  (!%p10292_p5), %s532_s15, 512, %s534_s1, %s10269_s4  }
  0x5f   : > { %10001 = dma.done.wait (%p11975_p12), [#allocation5], 1536   ;;  %p11976_p2 = pmov %p11975_p12 }
  0x61   : > { %10003 = vsyncadd (%p11976_p2), [#allocation5], 4294965760  ;;  %p11977_p9 = pmov %p11976_p2 }
  0x62   : > { %p11978_p11 = pmov %p11976_p2 }
  0x63   : > { %10005 = dma.done.wait (%p11977_p9), [#allocation8], 12288  }
  0x64   : > { %10007 = vsyncadd (%p11978_p11), [#allocation8], 4294955008  ;;  %s11979_s14 = sld [smem:[#allocation24_spill]]  ;;  %s554_s16 = sand.u32 1, %s10191_s28  }
  0x65   : > { %s555_s27 = scalar_lea.sflag [#allocation5], %s554_s16 }
  0x6a   : > { %s10361_s4 = sand.u32 1, %s11979_s14  }
  0x6b   : > { %s9445_s17 = smul.u32 768, %s10361_s4 }
  0x6d   : > { %s10364_s11 = scalar_lea.vmem [#allocation9], %s9445_s17 }
  0x6e   : > { %10009 = dma.done.wait (%p10201_p4), %s555_s27, 12288  }
  0x6f   : > { %10011 = vsyncadd (%p10201_p4), %s555_s27, 4294955008  ;;  %s11981_s18 = sld [smem:[#allocation21_spill]] }
  0x75   : > { %s566_s29 = sand.u32 1, %s11981_s18  }
  0x76   : > { %s9446_s24 = smul.u32 768, %s566_s29 }
  0x78   : > { %s10371_s0 = scalar_lea.vmem [#allocation10], %s9446_s24 }
  0x79   : > { %10013 = dma.done.wait (%p10207_p6), %s555_s27, 49664  }
  0x7a   : > { %10015 = vsyncadd (%p10207_p6), %s555_s27, 4294917632  ;;  %s11983_s28 = sld [smem:[#allocation27_spill]]  ;;  %s6518_s19 = sshll.u32 %s566_s29, 8 }
  0x7b   : > { %s6519_s5 = sshll.u32 %s566_s29, 10  ;;  %s6521_s22 = sshll.u32 %s566_s29, 5 }
  0x7c   : > { %s6522_s13 = sshll.u32 %s10361_s4, 2  ;;  %s11984_s30 = sld [smem:[#allocation38_spill]] }
  0x7d   : > { %s10385_s21 = scalar_lea.vmem [#allocation11], %s6518_s19  ;;  %s10387_s15 = scalar_lea.vmem [#allocation12], %s6519_s5 }
  0x7e   : > { %s10389_s14 = scalar_lea.vmem [#allocation13], %s6519_s5  ;;  %s10391_s23 = scalar_lea.vmem [#allocation14], %s6521_s22 }
  0x7f   : > { %s10393_s16 = scalar_lea.vmem [#allocation15], %s6522_s13  ;;  %s11985_s17 = sld [smem:[#allocation26_spill]] }
  0x80   : > { %p678_p10 = scmp.lt.s32.totalorder %s11983_s28, 1 }
  0x82   : > { %s12018_s28 = smov (!%p678_p10, %s11983_s28), 1 }
  0x83   : > { %s9447_s1 = smul.u32 96, %s12018_s28 }
  0x85   : > { %s10383_s6 = scalar_lea.vmem %s11984_s30, %s9447_s1  ;;  %p6524_p4 = scmp.ne.s32.totalorder %s11985_s17, 0 }
  0x86   : > { %s11986_s18 = sld [smem:[#allocation40_spill]] (!%p6524_p4) }
  0x87   : > { %687 = sbr.rel (%p6524_p4) target bundleno = 485 (0x1e5), region = 100 }
  0x8c   : > { %v6583_v0 = vld [vmem:[#allocation7 + $0x70] sm:$0xf]  ;;  %v8874_v1 = vld [vmem:[#allocation7 + $0x74] sm:$0xf0]  ;;  %v6575_v11 = vld [vmem:[#allocation7 + $0x60] sm:$0xf]  ;;  %s11987_s12 = smov %s11986_s18 }
  0x8d   : > { %v6647_v2 = vld [vmem:[#allocation7 + $0xf0] sm:$0xf]  ;;  %v6584_v3 = vor.u32 %v8874_v1, %v6583_v0  ;;  %v8890_v4 = vld [vmem:[#allocation7 + $0xf4] sm:$0xf0]  ;;  %v8872_v13 = vld [vmem:[#allocation7 + $0x64] sm:$0xf0] }
  0x8e   : > { %v6711_v5 = vld [vmem:[#allocation7 + $0x170] sm:$0xf]  ;;  %v8906_v6 = vld [vmem:[#allocation7 + $0x174] sm:$0xf0]  ;;  %v6648_v7 = vor.u32 %v8890_v4, %v6647_v2  ;;  %v6639_v14 = vld [vmem:[#allocation7 + $0xe0] sm:$0xf]  ;;  %v6576_v16 = vor.u32 %v8872_v13, %v6575_v11 }
  0x8f   : > { %v6712_v8 = vor.u32 %v8906_v6, %v6711_v5  ;;  %v6775_v9 = vld [vmem:[#allocation7 + $0x1f0] sm:$0xf]  ;;  %v8922_v10 = vld [vmem:[#allocation7 + $0x1f4] sm:$0xf0]  ;;  %1282 = vmatpush.bf16.msra.mxu0 %v6584_v3  ;;  %v8888_v15 = vld [vmem:[#allocation7 + $0xe4] sm:$0xf0] }
  0x90   : > { %v6776_v12 = vor.u32 %v8922_v10, %v6775_v9  ;;  %1296 = vmatpush.bf16.msra.mxu1 %v6648_v7  ;;  %v6640_v17 = vor.u32 %v8888_v15, %v6639_v14  ;;  %v6703_v18 = vld [vmem:[#allocation7 + $0x160] sm:$0xf]  ;;  %v8904_v19 = vld [vmem:[#allocation7 + $0x164] sm:$0xf0]  ;;  %v6567_v23 = vld [vmem:[#allocation7 + $0x50] sm:$0xf] }
  0x91   : > { %1310 = vmatpush.bf16.msra.mxu2 %v6712_v8  ;;  %v6767_v20 = vld [vmem:[#allocation7 + $0x1e0] sm:$0xf]  ;;  %v6704_v21 = vor.u32 %v8904_v19, %v6703_v18  ;;  %v8920_v22 = vld [vmem:[#allocation7 + $0x1e4] sm:$0xf0]  ;;  %v8870_v24 = vld [vmem:[#allocation7 + $0x54] sm:$0xf0] }
  0x92   : > { %1324 = vmatpush.bf16.msra.mxu3 %v6776_v12  ;;  %v6768_v25 = vor.u32 %v8920_v22, %v6767_v20  ;;  %v6631_v26 = vld [vmem:[#allocation7 + $0xd0] sm:$0xf]  ;;  %v8886_v27 = vld [vmem:[#allocation7 + $0xd4] sm:$0xf0]  ;;  %v6568_v29 = vor.u32 %v8870_v24, %v6567_v23  ;;  %v6559_v35 = vld [vmem:[#allocation7 + $0x40] sm:$0xf] }
  0x93   : > { %v6695_v28 = vld [vmem:[#allocation7 + $0x150] sm:$0xf]  ;;  %1283 = vmatpush.bf16.msra.mxu0 %v6576_v16  ;;  %v8902_v30 = vld [vmem:[#allocation7 + $0x154] sm:$0xf0]  ;;  %v6632_v33 = vor.u32 %v8886_v27, %v6631_v26  ;;  %v8868_v36 = vld [vmem:[#allocation7 + $0x44] sm:$0xf0] }
  0x94   : > { %v6759_v31 = vld [vmem:[#allocation7 + $0x1d0] sm:$0xf]  ;;  %v8918_v32 = vld [vmem:[#allocation7 + $0x1d4] sm:$0xf0]  ;;  %1297 = vmatpush.bf16.msra.mxu1 %v6640_v17  ;;  %v6696_v34 = vor.u32 %v8902_v30, %v6695_v28  ;;  %v6623_v37 = vld [vmem:[#allocation7 + $0xc0] sm:$0xf]  ;;  %v6560_v44 = vor.u32 %v8868_v36, %v6559_v35 }
  0x95   : > { %1311 = vmatpush.bf16.msra.mxu2 %v6704_v21  ;;  %v6760_v38 = vor.u32 %v8918_v32, %v6759_v31  ;;  %v8884_v39 = vld [vmem:[#allocation7 + $0xc4] sm:$0xf0]  ;;  %v6687_v40 = vld [vmem:[#allocation7 + $0x140] sm:$0xf]  ;;  %v6551_v47 = vld [vmem:[#allocation7 + $0x30] sm:$0xf] }
  0x96   : > { %1325 = vmatpush.bf16.msra.mxu3 %v6768_v25  ;;  %v8900_v41 = vld [vmem:[#allocation7 + $0x144] sm:$0xf0]  ;;  %v6751_v42 = vld [vmem:[#allocation7 + $0x1c0] sm:$0xf]  ;;  %v6624_v45 = vor.u32 %v8884_v39, %v6623_v37  ;;  %v8866_v48 = vld [vmem:[#allocation7 + $0x34] sm:$0xf0] }
  0x97   : > { %v8916_v43 = vld [vmem:[#allocation7 + $0x1c4] sm:$0xf0]  ;;  %1284 = vmatpush.bf16.msra.mxu0 %v6568_v29  ;;  %v6688_v46 = vor.u32 %v8900_v41, %v6687_v40  ;;  %v6615_v49 = vld [vmem:[#allocation7 + $0xb0] sm:$0xf]  ;;  %v8882_v51 = vld [vmem:[#allocation7 + $0xb4] sm:$0xf0]  ;;  %v6552_v56 = vor.u32 %v8866_v48, %v6551_v47 }
  0x98   : > { %1298 = vmatpush.bf16.msra.mxu1 %v6632_v33  ;;  %v6752_v50 = vor.u32 %v8916_v43, %v6751_v42  ;;  %v6679_v52 = vld [vmem:[#allocation7 + $0x130] sm:$0xf]  ;;  %v8898_v53 = vld [vmem:[#allocation7 + $0x134] sm:$0xf0]  ;;  %v6616_v57 = vor.u32 %v8882_v51, %v6615_v49  ;;  %v6543_v59 = vld [vmem:[#allocation7 + $0x20] sm:$0xf] }
  0x99   : > { %1312 = vmatpush.bf16.msra.mxu2 %v6696_v34  ;;  %v6743_v54 = vld [vmem:[#allocation7 + $0x1b0] sm:$0xf]  ;;  %v8914_v55 = vld [vmem:[#allocation7 + $0x1b4] sm:$0xf0]  ;;  %v6680_v58 = vor.u32 %v8898_v53, %v6679_v52  ;;  %v8864_v60 = vld [vmem:[#allocation7 + $0x24] sm:$0xf0] }
  0x9a   : > { %1326 = vmatpush.bf16.msra.mxu3 %v6760_v38  ;;  %v6607_v61 = vld [vmem:[#allocation7 + $0xa0] sm:$0xf]  ;;  %v6744_v62 = vor.u32 %v8914_v55, %v6743_v54  ;;  %v8880_v63 = vld [vmem:[#allocation7 + $0xa4] sm:$0xf0]  ;;  %v6544_v4 = vor.u32 %v8864_v60, %v6543_v59  ;;  %v6535_v7 = vld [vmem:[#allocation7 + $0x10] sm:$0xf] }
  0x9b   : > { %1285 = vmatpush.bf16.msra.mxu0 %v6560_v44  ;;  %v6671_v0 = vld [vmem:[#allocation7 + $0x120] sm:$0xf]  ;;  %v8896_v1 = vld [vmem:[#allocation7 + $0x124] sm:$0xf0]  ;;  %v6608_v5 = vor.u32 %v8880_v63, %v6607_v61  ;;  %v8862_v8 = vld [vmem:[#allocation7 + $0x14] sm:$0xf0] }
  0x9c   : > { %1299 = vmatpush.bf16.msra.mxu1 %v6624_v45  ;;  %v6735_v2 = vld [vmem:[#allocation7 + $0x1a0] sm:$0xf]  ;;  %v8912_v3 = vld [vmem:[#allocation7 + $0x1a4] sm:$0xf0]  ;;  %v6672_v6 = vor.u32 %v8896_v1, %v6671_v0  ;;  %v6599_v9 = vld [vmem:[#allocation7 + $0x90] sm:$0xf]  ;;  %v6536_v16 = vor.u32 %v8862_v8, %v6535_v7 }
  0x9d   : > { %1313 = vmatpush.bf16.msra.mxu2 %v6688_v46  ;;  %v6736_v10 = vor.u32 %v8912_v3, %v6735_v2  ;;  %v8878_v11 = vld [vmem:[#allocation7 + $0x94] sm:$0xf0]  ;;  %v6663_v12 = vld [vmem:[#allocation7 + $0x110] sm:$0xf]  ;;  %v6527_v17 = vld [vmem:[#allocation7] sm:$0xf] }
  0x9e   : > { %1327 = vmatpush.bf16.msra.mxu3 %v6752_v50  ;;  %v8894_v13 = vld [vmem:[#allocation7 + $0x114] sm:$0xf0]  ;;  %v6727_v14 = vld [vmem:[#allocation7 + $0x190] sm:$0xf]  ;;  %v8860_v18 = vld [vmem:[#allocation7 + $0x4] sm:$0xf0]  ;;  %v6600_v19 = vor.u32 %v8878_v11, %v6599_v9 }
  0x9f   : > { %1286 = vmatpush.bf16.msra.mxu0 %v6552_v56  ;;  %v8910_v15 = vld [vmem:[#allocation7 + $0x194] sm:$0xf0]  ;;  %v6664_v20 = vor.u32 %v8894_v13, %v6663_v12  ;;  %v6591_v21 = vld [vmem:[#allocation7 + $0x80] sm:$0xf]  ;;  %v8876_v22 = vld [vmem:[#allocation7 + $0x84] sm:$0xf0]  ;;  %v6528_v31 = vor.u32 %v8860_v18, %v6527_v17 }
  0xa0   : > { %1300 = vmatpush.bf16.msra.mxu1 %v6616_v57  ;;  %v6655_v23 = vld [vmem:[#allocation7 + $0x100] sm:$0xf]  ;;  %v6728_v24 = vor.u32 %v8910_v15, %v6727_v14  ;;  %v8892_v25 = vld [vmem:[#allocation7 + $0x104] sm:$0xf0]  ;;  %v6839_v28 = vld [vmem:[#allocation7 + $0x270] sm:$0xf]  ;;  %v6592_v35 = vor.u32 %v8876_v22, %v6591_v21 }
  0xa1   : > { %1314 = vmatpush.bf16.msra.mxu2 %v6680_v58  ;;  %v6719_v26 = vld [vmem:[#allocation7 + $0x180] sm:$0xf]  ;;  %v8908_v27 = vld [vmem:[#allocation7 + $0x184] sm:$0xf0]  ;;  %v8938_v29 = vld [vmem:[#allocation7 + $0x274] sm:$0xf0]  ;;  %v6656_v36 = vor.u32 %v8892_v25, %v6655_v23 }
  0xa2   : > { %1328 = vmatpush.bf16.msra.mxu3 %v6744_v62  ;;  %v6903_v30 = vld [vmem:[#allocation7 + $0x2f0] sm:$0xf]  ;;  %v8954_v32 = vld [vmem:[#allocation7 + $0x2f4] sm:$0xf0]  ;;  %v8873_v33 = vld [vmem:[#allocation7 + $0x74] sm:$0xf]  ;;  %v6720_v39 = vor.u32 %v8908_v27, %v6719_v26  ;;  %v6840_v40 = vor.u32 %v8938_v29, %v6839_v28 }
  0xa3   : > { %1287 = vmatpush.bf16.msra.mxu0 %v6544_v4  ;;  %v6585_v34 = vld [vmem:[#allocation7 + $0x78] sm:$0xf0]  ;;  %v8889_v37 = vld [vmem:[#allocation7 + $0xf4] sm:$0xf]  ;;  %v6831_v41 = vld [vmem:[#allocation7 + $0x260] sm:$0xf]  ;;  %v6904_v42 = vor.u32 %v8954_v32, %v6903_v30 }
  0xa4   : > { %1301 = vmatpush.bf16.msra.mxu1 %v6608_v5  ;;  %v6649_v38 = vld [vmem:[#allocation7 + $0xf8] sm:$0xf0]  ;;  %v6588_v43 = vor.u32 %v8873_v33, %v6585_v34  ;;  %v8936_v44 = vld [vmem:[#allocation7 + $0x264] sm:$0xf0]  ;;  %v6895_v45 = vld [vmem:[#allocation7 + $0x2e0] sm:$0xf] }
  0xa5   : > { %1315 = vmatpush.bf16.msra.mxu2 %v6672_v6  ;;  %v8952_v46 = vld [vmem:[#allocation7 + $0x2e4] sm:$0xf0]  ;;  %v6652_v47 = vor.u32 %v8889_v37, %v6649_v38  ;;  %v8871_v48 = vld [vmem:[#allocation7 + $0x64] sm:$0xf]  ;;  %v6577_v49 = vld [vmem:[#allocation7 + $0x68] sm:$0xf0]  ;;  %v6832_v54 = vor.u32 %v8936_v44, %v6831_v41 }
  0xa6   : > { %1329 = vmatpush.bf16.msra.mxu3 %v6736_v10  ;;  %v8887_v50 = vld [vmem:[#allocation7 + $0xe4] sm:$0xf]  ;;  %v6641_v51 = vld [vmem:[#allocation7 + $0xe8] sm:$0xf0]  ;;  %v694_v53 = vld [vmem:[#allocation4 + $0x30] sm:$0xff]  ;;  %v6896_v59 = vor.u32 %v8952_v46, %v6895_v45  ;;  %v6580_v60 = vor.u32 %v8871_v48, %v6577_v49 }
  0xa7   : > { %1288 = vmatpush.bf16.msra.mxu0 %v6536_v16  ;;  %v688_v52 = vld [vmem:[#allocation4] sm:$0xff]  ;;  %v6823_v55 = vld [vmem:[#allocation7 + $0x250] sm:$0xf]  ;;  %v8934_v56 = vld [vmem:[#allocation7 + $0x254] sm:$0xf0]  ;;  %v6644_v0 = vor.u32 %v8887_v50, %v6641_v51 }
  0xa8   : > { %1302 = vmatpush.bf16.msra.mxu1 %v6600_v19  ;;  %v6887_v57 = vld [vmem:[#allocation7 + $0x2d0] sm:$0xf]  ;;  %v10396_v58 = vpack.c.bf16 %v694_v53, %v688_v52  ;;  %v8950_v61 = vld [vmem:[#allocation7 + $0x2d4] sm:$0xf0]  ;;  %v8869_v62 = vld [vmem:[#allocation7 + $0x54] sm:$0xf]  ;;  %v6824_v8 = vor.u32 %v8934_v56, %v6823_v55 }
  0xa9   : > { %1316 = vmatpush.bf16.msra.mxu2 %v6664_v20  ;;  %v6569_v63 = vld [vmem:[#allocation7 + $0x58] sm:$0xf0]  ;;  %v8885_v1 = vld [vmem:[#allocation7 + $0xd4] sm:$0xf]  ;;  %v689_v2 = vld [vmem:[#allocation4 + $0x8] sm:$0xff]  ;;  %v6888_v12 = vor.u32 %v8950_v61, %v6887_v57 }
  0xaa   : > { %1330 = vmatpush.bf16.msra.mxu3 %v6728_v24  ;;  %v695_v3 = vld [vmem:[#allocation4 + $0x38] sm:$0xff]  ;;  %v690_v6 = vld [vmem:[#allocation4 + $0x10] sm:$0xff]  ;;  %v696_v7 = vld [vmem:[#allocation4 + $0x40] sm:$0xff]  ;;  %v6572_v13 = vor.u32 %v8869_v62, %v6569_v63 }
  0xab   : > { %1289 = vmatpush.bf16.msra.mxu0 %v6528_v31  ;;  %v6633_v4 = vld [vmem:[#allocation7 + $0xd8] sm:$0xf0]  ;;  %v10399_v5 = vpack.c.bf16 %v695_v3, %v689_v2  ;;  %v6815_v9 = vld [vmem:[#allocation7 + $0x240] sm:$0xf]  ;;  %v8932_v10 = vld [vmem:[#allocation7 + $0x244] sm:$0xf0]  ;;  %v10401_v11 = vpack.c.bf16 %v696_v7, %v690_v6 }
  0xac   : > { %1303 = vmatpush.bf16.msra.mxu1 %v6592_v35  ;;  %v6879_v14 = vld [vmem:[#allocation7 + $0x2c0] sm:$0xf]  ;;  %v8948_v15 = vld [vmem:[#allocation7 + $0x2c4] sm:$0xf0]  ;;  %v8867_v16 = vld [vmem:[#allocation7 + $0x44] sm:$0xf]  ;;  %v6636_v17 = vor.u32 %v8885_v1, %v6633_v4  ;;  %v6816_v24 = vor.u32 %v8932_v10, %v6815_v9 }
  0xad   : > { %1317 = vmatpush.bf16.msra.mxu2 %v6656_v36  ;;  %v6561_v18 = vld [vmem:[#allocation7 + $0x48] sm:$0xf0]  ;;  %v691_v19 = vld [vmem:[#allocation4 + $0x18] sm:$0xff]  ;;  %v8883_v21 = vld [vmem:[#allocation7 + $0xc4] sm:$0xf]  ;;  %v6880_v25 = vor.u32 %v8948_v15, %v6879_v14 }
  0xae   : > { %1331 = vmatpush.bf16.msra.mxu3 %v6720_v39  ;;  %1290 = vmatmul.bf16.vlgmr.msra.gmra.mxu0 %v10396_v58  ;;  %v697_v20 = vld [vmem:[#allocation4 + $0x48] sm:$0xff]  ;;  %v6564_v26 = vor.u32 %v8867_v16, %v6561_v18  ;;  %v6807_v27 = vld [vmem:[#allocation7 + $0x230] sm:$0xf]  ;;  %v8930_v28 = vld [vmem:[#allocation7 + $0x234] sm:$0xf0] }
  0xaf   : > { %1338 = vmatpush.bf16.msrb.mxu0 %v6840_v40  ;;  %1304 = vmatmul.bf16.vlgmr.msra.gmra.mxu1 %v10399_v5  ;;  %v6625_v22 = vld [vmem:[#allocation7 + $0xc8] sm:$0xf0]  ;;  %v10405_v23 = vpack.c.bf16 %v697_v20, %v691_v19  ;;  %v6871_v29 = vld [vmem:[#allocation7 + $0x2b0] sm:$0xf]  ;;  %v8946_v31 = vld [vmem:[#allocation7 + $0x2b4] sm:$0xf0]  ;;  %v6808_v36 = vor.u32 %v8930_v28, %v6807_v27 }
  0xb0   : > { %1352 = vmatpush.bf16.msrb.mxu1 %v6904_v42  ;;  %1318 = vmatmul.bf16.vlgmr.msra.gmra.mxu2 %v10401_v11  ;;  %v6628_v30 = vor.u32 %v8883_v21, %v6625_v22  ;;  %v8865_v32 = vld [vmem:[#allocation7 + $0x34] sm:$0xf]  ;;  %v6553_v33 = vld [vmem:[#allocation7 + $0x38] sm:$0xf0]  ;;  %v6872_v37 = vor.u32 %v8946_v31, %v6871_v29  ;;  %v6799_v39 = vld [vmem:[#allocation7 + $0x220] sm:$0xf] }
  0xb1   : > { %1366 = vmatpush.bf16.msrb.mxu2 %v6588_v43  ;;  %v8881_v34 = vld [vmem:[#allocation7 + $0xb4] sm:$0xf]  ;;  %v6617_v35 = vld [vmem:[#allocation7 + $0xb8] sm:$0xf0]  ;;  %1332 = vmatmul.bf16.vlgmr.msra.gmra.mxu3 %v10405_v23  ;;  %v6556_v38 = vor.u32 %v8865_v32, %v6553_v33  ;;  %v8928_v40 = vld [vmem:[#allocation7 + $0x224] sm:$0xf0] }
  0xb2   : > { %1380 = vmatpush.bf16.msrb.mxu3 %v6652_v47  ;;  %v6863_v41 = vld [vmem:[#allocation7 + $0x2a0] sm:$0xf]  ;;  %v6620_v42 = vor.u32 %v8881_v34, %v6617_v35  ;;  %v8944_v43 = vld [vmem:[#allocation7 + $0x2a4] sm:$0xf0]  ;;  %v8863_v44 = vld [vmem:[#allocation7 + $0x24] sm:$0xf]  ;;  %v6800_v48 = vor.u32 %v8928_v40, %v6799_v39 }
  0xb3   : > { %1339 = vmatpush.bf16.msrb.mxu0 %v6832_v54  ;;  %v6545_v45 = vld [vmem:[#allocation7 + $0x28] sm:$0xf0]  ;;  %v8879_v46 = vld [vmem:[#allocation7 + $0xa4] sm:$0xf]  ;;  %v6864_v49 = vor.u32 %v8944_v43, %v6863_v41  ;;  %v6791_v51 = vld [vmem:[#allocation7 + $0x210] sm:$0xf] }
  0xb4   : > { %1353 = vmatpush.bf16.msrb.mxu1 %v6896_v59  ;;  %v6609_v47 = vld [vmem:[#allocation7 + $0xa8] sm:$0xf0]  ;;  %v6548_v50 = vor.u32 %v8863_v44, %v6545_v45  ;;  %v8926_v52 = vld [vmem:[#allocation7 + $0x214] sm:$0xf0]  ;;  %v6855_v53 = vld [vmem:[#allocation7 + $0x290] sm:$0xf] }
  0xb5   : > { %1367 = vmatpush.bf16.msrb.mxu2 %v6580_v60  ;;  %v6612_v54 = vor.u32 %v8879_v46, %v6609_v47  ;;  %v8942_v55 = vld [vmem:[#allocation7 + $0x294] sm:$0xf0]  ;;  %v8861_v56 = vld [vmem:[#allocation7 + $0x14] sm:$0xf]  ;;  %v6537_v57 = vld [vmem:[#allocation7 + $0x18] sm:$0xf0]  ;;  %v6792_v61 = vor.u32 %v8926_v52, %v6791_v51 }
  0xb6   : > { %1381 = vmatpush.bf16.msrb.mxu3 %v6644_v0  ;;  %v8877_v59 = vld [vmem:[#allocation7 + $0x94] sm:$0xf]  ;;  %v6601_v60 = vld [vmem:[#allocation7 + $0x98] sm:$0xf0]  ;;  %v6783_v62 = vld [vmem:[#allocation7 + $0x200] sm:$0xf]  ;;  %v6856_v1 = vor.u32 %v8942_v55, %v6855_v53  ;;  %v6540_v2 = vor.u32 %v8861_v56, %v6537_v57 }
  0xb7   : > { %1340 = vmatpush.bf16.msrb.mxu0 %v6824_v8  ;;  %v8924_v63 = vld [vmem:[#allocation7 + $0x204] sm:$0xf0]  ;;  %v6847_v0 = vld [vmem:[#allocation7 + $0x280] sm:$0xf]  ;;  %v8859_v4 = vld [vmem:[#allocation7 + $0x4] sm:$0xf]  ;;  %v6604_v7 = vor.u32 %v8877_v59, %v6601_v60 }
  0xb8   : > { %1354 = vmatpush.bf16.msrb.mxu1 %v6888_v12  ;;  %v8940_v3 = vld [vmem:[#allocation7 + $0x284] sm:$0xf0]  ;;  %v6529_v6 = vld [vmem:[#allocation7 + $0x8] sm:$0xf0]  ;;  %v8875_v8 = vld [vmem:[#allocation7 + $0x84] sm:$0xf]  ;;  %v6784_v15 = vor.u32 %v8924_v63, %v6783_v62 }
  0xb9   : > { %1368 = vmatpush.bf16.msrb.mxu2 %v6572_v13  ;;  %v6593_v9 = vld [vmem:[#allocation7 + $0x88] sm:$0xf0]  ;;  %v8905_v10 = vld [vmem:[#allocation7 + $0x174] sm:$0xf]  ;;  %v6713_v12 = vld [vmem:[#allocation7 + $0x178] sm:$0xf0]  ;;  %v6848_v19 = vor.u32 %v8940_v3, %v6847_v0  ;;  %v6532_v20 = vor.u32 %v8859_v4, %v6529_v6 }
  0xba   : > { %1382 = vmatpush.bf16.msrb.mxu3 %v6636_v17  ;;  %v8921_v13 = vld [vmem:[#allocation7 + $0x1f4] sm:$0xf]  ;;  %v6777_v14 = vld [vmem:[#allocation7 + $0x1f8] sm:$0xf0]  ;;  %v692_v22 = vld [vmem:[#allocation4 + $0x20] sm:$0xff] }
  0xbb   : > { %1341 = vmatpush.bf16.msrb.mxu0 %v6816_v24  ;;  %v8937_v16 = vld [vmem:[#allocation7 + $0x274] sm:$0xf]  ;;  %v6841_v17 = vld [vmem:[#allocation7 + $0x278] sm:$0xf0]  ;;  %v693_v27 = vld [vmem:[#allocation4 + $0x28] sm:$0xff]  ;;  %v6780_v29 = vor.u32 %v8921_v13, %v6777_v14 }
  0xbc   : > { %1355 = vmatpush.bf16.msrb.mxu1 %v6880_v25  ;;  %v8953_v18 = vld [vmem:[#allocation7 + $0x2f4] sm:$0xf]  ;;  %v6905_v21 = vld [vmem:[#allocation7 + $0x2f8] sm:$0xf0]  ;;  %v6596_v25 = vor.u32 %v8875_v8, %v6593_v9  ;;  %v8903_v31 = vld [vmem:[#allocation7 + $0x164] sm:$0xf] }
  0xbd   : > { %1369 = vmatpush.bf16.msrb.mxu2 %v6564_v26  ;;  %v698_v24 = vld [vmem:[#allocation4 + $0x50] sm:$0xff]  ;;  %v6716_v26 = vor.u32 %v8905_v10, %v6713_v12  ;;  %v699_v28 = vld [vmem:[#allocation4 + $0x58] sm:$0xff]  ;;  %v6705_v32 = vld [vmem:[#allocation7 + $0x168] sm:$0xf0]  ;;  %v6908_v34 = vor.u32 %v8953_v18, %v6905_v21 }
  0xbe   : > { %1383 = vmatpush.bf16.msrb.mxu3 %v6628_v30  ;;  %v6844_v30 = vor.u32 %v8937_v16, %v6841_v17  ;;  %v8919_v33 = vld [vmem:[#allocation7 + $0x1e4] sm:$0xf]  ;;  %v10408_v35 = vpack.c.bf16 %v698_v24, %v692_v22  ;;  %v10410_v39 = vpack.c.bf16 %v699_v28, %v693_v27  ;;  %v6897_v41 = vld [vmem:[#allocation7 + $0x2e8] sm:$0xf0]  ;;  %v8901_v45 = vld [vmem:[#allocation7 + $0x154] sm:$0xf] }
  0xbf   : > { %1342 = vmatpush.bf16.msrb.mxu0 %v6808_v36  ;;  %v6769_v36 = vld [vmem:[#allocation7 + $0x1e8] sm:$0xf0]  ;;  %v8951_v40 = vld [vmem:[#allocation7 + $0x2e4] sm:$0xf]  ;;  %v6697_v46 = vld [vmem:[#allocation7 + $0x158] sm:$0xf0] }
  0xc0   : > { %1356 = vmatpush.bf16.msrb.mxu1 %v6872_v37  ;;  %v8935_v37 = vld [vmem:[#allocation7 + $0x264] sm:$0xf]  ;;  %v6772_v43 = vor.u32 %v8919_v33, %v6769_v36  ;;  %v8917_v47 = vld [vmem:[#allocation7 + $0x1d4] sm:$0xf]  ;;  %v6825_v51 = vld [vmem:[#allocation7 + $0x258] sm:$0xf0] }
  0xc1   : > { %1370 = vmatpush.bf16.msrb.mxu2 %v6556_v38  ;;  %v6833_v38 = vld [vmem:[#allocation7 + $0x268] sm:$0xf0]  ;;  %v8949_v52 = vld [vmem:[#allocation7 + $0x2d4] sm:$0xf]  ;;  %v6889_v53 = vld [vmem:[#allocation7 + $0x2d8] sm:$0xf0] }
  0xc2   : > { %1384 = vmatpush.bf16.msrb.mxu3 %v6620_v42  ;;  %v6708_v42 = vor.u32 %v8903_v31, %v6705_v32  ;;  %v6836_v44 = vor.u32 %v8935_v37, %v6833_v38  ;;  %v8899_v57 = vld [vmem:[#allocation7 + $0x144] sm:$0xf]  ;;  %v6689_v59 = vld [vmem:[#allocation7 + $0x148] sm:$0xf0]  ;;  %v8897_v4 = vld [vmem:[#allocation7 + $0x134] sm:$0xf] }
  0xc3   : > { %1343 = vmatpush.bf16.msrb.mxu0 %v6800_v48  ;;  %v6900_v48 = vor.u32 %v8951_v40, %v6897_v41  ;;  %v8915_v60 = vld [vmem:[#allocation7 + $0x1c4] sm:$0xf]  ;;  %v6753_v62 = vld [vmem:[#allocation7 + $0x1c8] sm:$0xf0]  ;;  %v6681_v6 = vld [vmem:[#allocation7 + $0x138] sm:$0xf0] }
  0xc4   : > { %1357 = vmatpush.bf16.msrb.mxu1 %v6864_v49  ;;  %v6761_v49 = vld [vmem:[#allocation7 + $0x1d8] sm:$0xf0]  ;;  %v8931_v63 = vld [vmem:[#allocation7 + $0x244] sm:$0xf]  ;;  %v6817_v0 = vld [vmem:[#allocation7 + $0x248] sm:$0xf0]  ;;  %v6756_v3 = vor.u32 %v8915_v60, %v6753_v62 }
  0xc5   : > { %1371 = vmatpush.bf16.msrb.mxu2 %v6548_v50  ;;  %v8933_v50 = vld [vmem:[#allocation7 + $0x254] sm:$0xf]  ;;  %v6764_v55 = vor.u32 %v8917_v47, %v6761_v49  ;;  %v6745_v9 = vld [vmem:[#allocation7 + $0x1b8] sm:$0xf0]  ;;  %v8895_v18 = vld [vmem:[#allocation7 + $0x124] sm:$0xf] }
  0xc6   : > { %1385 = vmatpush.bf16.msrb.mxu3 %v6612_v54  ;;  %v6700_v54 = vor.u32 %v8901_v45, %v6697_v46  ;;  %v6828_v56 = vor.u32 %v8933_v50, %v6825_v51  ;;  %v8929_v10 = vld [vmem:[#allocation7 + $0x234] sm:$0xf]  ;;  %v6809_v12 = vld [vmem:[#allocation7 + $0x238] sm:$0xf0]  ;;  %v6737_v22 = vld [vmem:[#allocation7 + $0x1a8] sm:$0xf0] }
  0xc7   : > { %1344 = vmatpush.bf16.msrb.mxu0 %v6792_v61  ;;  %v6892_v61 = vor.u32 %v8949_v52, %v6889_v53  ;;  %v8945_v13 = vld [vmem:[#allocation7 + $0x2b4] sm:$0xf]  ;;  %v6873_v14 = vld [vmem:[#allocation7 + $0x2b8] sm:$0xf0]  ;;  %v6812_v17 = vor.u32 %v8929_v10, %v6809_v12  ;;  %v8927_v24 = vld [vmem:[#allocation7 + $0x224] sm:$0xf] }
  0xc8   : > { %1358 = vmatpush.bf16.msrb.mxu1 %v6856_v1  ;;  %v8947_v1 = vld [vmem:[#allocation7 + $0x2c4] sm:$0xf]  ;;  %v6876_v21 = vor.u32 %v8945_v13, %v6873_v14  ;;  %v6865_v27 = vld [vmem:[#allocation7 + $0x2a8] sm:$0xf0]  ;;  %v8893_v31 = vld [vmem:[#allocation7 + $0x114] sm:$0xf] }
  0xc9   : > { %1372 = vmatpush.bf16.msrb.mxu2 %v6540_v2  ;;  %v6881_v2 = vld [vmem:[#allocation7 + $0x2c8] sm:$0xf0]  ;;  %v6665_v32 = vld [vmem:[#allocation7 + $0x118] sm:$0xf0]  ;;  %v8909_v33 = vld [vmem:[#allocation7 + $0x194] sm:$0xf] }
  0xca   : > { %1386 = vmatpush.bf16.msrb.mxu3 %v6604_v7  ;;  %v8913_v7 = vld [vmem:[#allocation7 + $0x1b4] sm:$0xf]  ;;  %v6884_v8 = vor.u32 %v8947_v1, %v6881_v2  ;;  %v6729_v36 = vld [vmem:[#allocation7 + $0x198] sm:$0xf0]  ;;  %v8907_v47 = vld [vmem:[#allocation7 + $0x184] sm:$0xf] }
  0xcb   : > { %1345 = vmatpush.bf16.msrb.mxu0 %v6784_v15  ;;  %v6684_v15 = vor.u32 %v8897_v4, %v6681_v6  ;;  %v6748_v16 = vor.u32 %v8913_v7, %v6745_v9  ;;  %v8925_v37 = vld [vmem:[#allocation7 + $0x214] sm:$0xf]  ;;  %v6793_v38 = vld [vmem:[#allocation7 + $0x218] sm:$0xf0]  ;;  %v6732_v45 = vor.u32 %v8909_v33, %v6729_v36  ;;  %v8923_v49 = vld [vmem:[#allocation7 + $0x204] sm:$0xf] }
  0xcc   : > { %1359 = vmatpush.bf16.msrb.mxu1 %v6848_v19  ;;  %v6673_v19 = vld [vmem:[#allocation7 + $0x128] sm:$0xf0]  ;;  %v8941_v40 = vld [vmem:[#allocation7 + $0x294] sm:$0xf]  ;;  %v6857_v41 = vld [vmem:[#allocation7 + $0x298] sm:$0xf0]  ;;  %v6796_v46 = vor.u32 %v8925_v37, %v6793_v38 }
  0xcd   : > { %1373 = vmatpush.bf16.msrb.mxu2 %v6532_v20  ;;  %v8911_v20 = vld [vmem:[#allocation7 + $0x1a4] sm:$0xf]  ;;  %v6676_v28 = vor.u32 %v8895_v18, %v6673_v19  ;;  %v6860_v50 = vor.u32 %v8941_v40, %v6857_v41  ;;  %v6785_v51 = vld [vmem:[#allocation7 + $0x208] sm:$0xf0]  ;;  %v7095_v60 = vld [vmem:[%s10364_s11 + $0x170] sm:$0xf] }
  0xce   : > { %1387 = vmatpush.bf16.msrb.mxu3 %v6596_v25  ;;  %1346 = vmatmul.bf16.vlgmr.msrb.gmra.mxu0 %v10408_v35  ;;  %v6801_v25 = vld [vmem:[#allocation7 + $0x228] sm:$0xf0]  ;;  %v8939_v52 = vld [vmem:[#allocation7 + $0x284] sm:$0xf]  ;;  %v9018_v1 = vld [vmem:[%s10364_s11 + $0x1f4] sm:$0xf0] }
  0xcf   : > { %1394 = vmatpush.bf16.msra.mxu0 %v6716_v26  ;;  %1360 = vmatmul.bf16.vlgmr.msrb.gmra.mxu1 %v10410_v39  ;;  %v8943_v26 = vld [vmem:[#allocation7 + $0x2a4] sm:$0xf]  ;;  %v6849_v53 = vld [vmem:[#allocation7 + $0x288] sm:$0xf0]  ;;  %v6959_v4 = vld [vmem:[%s10364_s11 + $0x60] sm:$0xf] }
  0xd0   : > { %1408 = vmatpush.bf16.msra.mxu1 %v6780_v29  ;;  %1374 = vmatmul.bf16.vlgmr.msrb.gmra.mxu2 %v10396_v58  ;;  %v6692_v58 = vor.u32 %v8899_v57, %v6689_v59  ;;  %v6740_v29 = vor.u32 %v8911_v20, %v6737_v22  ;;  %v8986_v59 = vld [vmem:[%s10364_s11 + $0xf4] sm:$0xf0]  ;;  %v6852_v2 = vor.u32 %v8939_v52, %v6849_v53  ;;  %v8968_v6 = vld [vmem:[%s10364_s11 + $0x64] sm:$0xf0]  ;;  %v7023_v7 = vld [vmem:[%s10364_s11 + $0xe0] sm:$0xf] }
  0xd1   : > { %1422 = vmatpush.bf16.msra.mxu2 %v6844_v30  ;;  %1388 = vmatmul.bf16.vlgmr.msrb.gmra.mxu3 %v10399_v5  ;;  %v6820_v5 = vor.u32 %v8931_v63, %v6817_v0  ;;  %v6804_v30 = vor.u32 %v8927_v24, %v6801_v25  ;;  %v6788_v63 = vor.u32 %v8923_v49, %v6785_v51  ;;  %v7159_v0 = vld [vmem:[%s10364_s11 + $0x1f0] sm:$0xf]  ;;  %v8984_v9 = vld [vmem:[%s10364_s11 + $0xe4] sm:$0xf0]  ;;  %v7087_v10 = vld [vmem:[%s10364_s11 + $0x160] sm:$0xf] }
  0xd2   : > { %1436 = vmatpush.bf16.msra.mxu3 %v6908_v34  ;;  %v6868_v34 = vor.u32 %v8943_v26, %v6865_v27  ;;  %v9000_v12 = vld [vmem:[%s10364_s11 + $0x164] sm:$0xf0]  ;;  %v7151_v13 = vld [vmem:[%s10364_s11 + $0x1e0] sm:$0xf]  ;;  %v6951_v18 = vld [vmem:[%s10364_s11 + $0x50] sm:$0xf] }
  0xd3   : > { %1395 = vmatpush.bf16.msra.mxu0 %v6708_v42  ;;  %v6668_v42 = vor.u32 %v8893_v31, %v6665_v32  ;;  %v9016_v14 = vld [vmem:[%s10364_s11 + $0x1e4] sm:$0xf0]  ;;  %v8966_v19 = vld [vmem:[%s10364_s11 + $0x54] sm:$0xf0]  ;;  %v7015_v20 = vld [vmem:[%s10364_s11 + $0xd0] sm:$0xf] }
  0xd4   : > { %1409 = vmatpush.bf16.msra.mxu1 %v6772_v43  ;;  %v8891_v43 = vld [vmem:[#allocation7 + $0x104] sm:$0xf]  ;;  %v8982_v22 = vld [vmem:[%s10364_s11 + $0xd4] sm:$0xf0]  ;;  %v7079_v24 = vld [vmem:[%s10364_s11 + $0x150] sm:$0xf] }
  0xd5   : > { %1423 = vmatpush.bf16.msra.mxu2 %v6836_v44  ;;  %v6657_v44 = vld [vmem:[#allocation7 + $0x108] sm:$0xf0]  ;;  %v8998_v25 = vld [vmem:[%s10364_s11 + $0x154] sm:$0xf0]  ;;  %v7143_v26 = vld [vmem:[%s10364_s11 + $0x1d0] sm:$0xf] }
  0xd6   : > { %1437 = vmatpush.bf16.msra.mxu3 %v6900_v48  ;;  %v6721_v48 = vld [vmem:[#allocation7 + $0x188] sm:$0xf0]  ;;  %v6660_v57 = vor.u32 %v8891_v43, %v6657_v44  ;;  %v9014_v27 = vld [vmem:[%s10364_s11 + $0x1d4] sm:$0xf0]  ;;  %v7007_v31 = vld [vmem:[%s10364_s11 + $0xc0] sm:$0xf] }
  0xd7   : > { %1396 = vmatpush.bf16.msra.mxu0 %v6700_v54  ;;  %v6967_v54 = vld [vmem:[%s10364_s11 + $0x70] sm:$0xf]  ;;  %v6724_v62 = vor.u32 %v8907_v47, %v6721_v48  ;;  %v8980_v32 = vld [vmem:[%s10364_s11 + $0xc4] sm:$0xf0]  ;;  %v7071_v33 = vld [vmem:[%s10364_s11 + $0x140] sm:$0xf] }
  0xd8   : > { %1410 = vmatpush.bf16.msra.mxu1 %v6764_v55  ;;  %v8970_v55 = vld [vmem:[%s10364_s11 + $0x74] sm:$0xf0]  ;;  %v9012_v36 = vld [vmem:[%s10364_s11 + $0x1c4] sm:$0xf0]  ;;  %v7008_v38 = vor.u32 %v8980_v32, %v7007_v31  ;;  %v6935_v41 = vld [vmem:[%s10364_s11 + $0x30] sm:$0xf] }
  0xd9   : > { %1424 = vmatpush.bf16.msra.mxu2 %v6828_v56  ;;  %v7031_v56 = vld [vmem:[%s10364_s11 + $0xf0] sm:$0xf]  ;;  %v8994_v47 = vld [vmem:[%s10364_s11 + $0x134] sm:$0xf0]  ;;  %v6927_v53 = vld [vmem:[%s10364_s11 + $0x20] sm:$0xf] }
  0xda   : > { %1438 = vmatpush.bf16.msra.mxu3 %v6892_v61  ;;  %v9002_v61 = vld [vmem:[%s10364_s11 + $0x174] sm:$0xf0]  ;;  %v6999_v43 = vld [vmem:[%s10364_s11 + $0xb0] sm:$0xf]  ;;  %v7215_v32 = vld [vmem:[%s10364_s11 + $0x260] sm:$0xf] }
  0xdb   : > { %1397 = vmatpush.bf16.msra.mxu0 %v6692_v58  ;;  %v6968_v58 = vor.u32 %v8970_v55, %v6967_v54  ;;  %v7127_v48 = vld [vmem:[%s10364_s11 + $0x1b0] sm:$0xf]  ;;  %v9010_v49 = vld [vmem:[%s10364_s11 + $0x1b4] sm:$0xf0]  ;;  %v8960_v54 = vld [vmem:[%s10364_s11 + $0x24] sm:$0xf0] }
  0xdc   : > { %1411 = vmatpush.bf16.msra.mxu1 %v6756_v3  ;;  %v7032_v3 = vor.u32 %v8986_v59, %v7031_v56  ;;  %v6991_v55 = vld [vmem:[%s10364_s11 + $0xa0] sm:$0xf]  ;;  %v7128_v56 = vor.u32 %v9010_v49, %v7127_v48  ;;  %v9048_v49 = vld [vmem:[%s10364_s11 + $0x2e4] sm:$0xf0] }
  0xdd   : > { %1425 = vmatpush.bf16.msra.mxu2 %v6820_v5  ;;  %v7096_v5 = vor.u32 %v9002_v61, %v7095_v60  ;;  %v7055_v59 = vld [vmem:[%s10364_s11 + $0x120] sm:$0xf]  ;;  %v8992_v60 = vld [vmem:[%s10364_s11 + $0x124] sm:$0xf0] }
  0xde   : > { %1439 = vmatpush.bf16.msra.mxu3 %v6884_v8  ;;  %v7160_v8 = vor.u32 %v9018_v1, %v7159_v0  ;;  %v7119_v61 = vld [vmem:[%s10364_s11 + $0x1a0] sm:$0xf]  ;;  %v7056_v1 = vor.u32 %v8992_v60, %v7055_v59 }
  0xdf   : > { %1398 = vmatpush.bf16.msra.mxu0 %v6684_v15  ;;  %v6960_v15 = vor.u32 %v8968_v6, %v6959_v4  ;;  %v8974_v4 = vld [vmem:[%s10364_s11 + $0x94] sm:$0xf0]  ;;  %v7047_v6 = vld [vmem:[%s10364_s11 + $0x110] sm:$0xf] }
  0xe0   : > { %1412 = vmatpush.bf16.msra.mxu1 %v6748_v16  ;;  %v7024_v16 = vor.u32 %v8984_v9, %v7023_v7  ;;  %v8990_v7 = vld [vmem:[%s10364_s11 + $0x114] sm:$0xf0] }
  0xe1   : > { %1426 = vmatpush.bf16.msra.mxu2 %v6812_v17  ;;  %v7088_v17 = vor.u32 %v9000_v12, %v7087_v10  ;;  %v9006_v9 = vld [vmem:[%s10364_s11 + $0x194] sm:$0xf0]  ;;  %v6911_v10 = vld [vmem:[%s10364_s11] sm:$0xf] }
  0xe2   : > { %1440 = vmatpush.bf16.msra.mxu3 %v6876_v21  ;;  %v7152_v21 = vor.u32 %v9016_v14, %v7151_v13  ;;  %v8956_v13 = vld [vmem:[%s10364_s11 + $0x4] sm:$0xf0]  ;;  %v6975_v14 = vld [vmem:[%s10364_s11 + $0x80] sm:$0xf] }
  0xe3   : > { %1399 = vmatpush.bf16.msra.mxu0 %v6676_v28  ;;  %v7016_v28 = vor.u32 %v8982_v22, %v7015_v20  ;;  %v7103_v20 = vld [vmem:[%s10364_s11 + $0x180] sm:$0xf]  ;;  %v9004_v22 = vld [vmem:[%s10364_s11 + $0x184] sm:$0xf0] }
  0xe4   : > { %1413 = vmatpush.bf16.msra.mxu1 %v6740_v29  ;;  %v7080_v29 = vor.u32 %v8998_v25, %v7079_v24  ;;  %v7223_v24 = vld [vmem:[%s10364_s11 + $0x270] sm:$0xf]  ;;  %v9034_v25 = vld [vmem:[%s10364_s11 + $0x274] sm:$0xf0] }
  0xe5   : > { %1427 = vmatpush.bf16.msra.mxu2 %v6804_v30  ;;  %v6943_v30 = vld [vmem:[%s10364_s11 + $0x40] sm:$0xf] }
  0xe6   : > { %1441 = vmatpush.bf16.msra.mxu3 %v6868_v34  ;;  %v7135_v34 = vld [vmem:[%s10364_s11 + $0x1c0] sm:$0xf] }
  0xe7   : > { %1400 = vmatpush.bf16.msra.mxu0 %v6668_v42  ;;  %v8962_v42 = vld [vmem:[%s10364_s11 + $0x34] sm:$0xf0]  ;;  %v7136_v44 = vor.u32 %v9012_v36, %v7135_v34  ;;  %v1456_v34 = vld [vmem:[%s10383_s6 + $0x30] sm:$0xff]  ;;  %v1451_v36 = vld [vmem:[%s10383_s6 + $0x8] sm:$0xff] }
  0xe8   : > { %1414 = vmatpush.bf16.msra.mxu1 %v6732_v45  ;;  %v8978_v45 = vld [vmem:[%s10364_s11 + $0xb4] sm:$0xf0] }
  0xe9   : > { %1428 = vmatpush.bf16.msra.mxu2 %v6796_v46  ;;  %v7063_v46 = vld [vmem:[%s10364_s11 + $0x130] sm:$0xf]  ;;  %v7000_v51 = vor.u32 %v8978_v45, %v6999_v43  ;;  %v7279_v45 = vld [vmem:[%s10364_s11 + $0x2e0] sm:$0xf] }
  0xea   : > { %1442 = vmatpush.bf16.msra.mxu3 %v6860_v50  ;;  %v6936_v50 = vor.u32 %v8962_v42, %v6935_v41  ;;  %v7064_v52 = vor.u32 %v8994_v47, %v7063_v46  ;;  %v1452_v41 = vld [vmem:[%s10383_s6 + $0x10] sm:$0xff]  ;;  %v1458_v42 = vld [vmem:[%s10383_s6 + $0x40] sm:$0xff]  ;;  %v1453_v46 = vld [vmem:[%s10383_s6 + $0x18] sm:$0xff]  ;;  %v7280_v60 = vor.u32 %v9048_v49, %v7279_v45 }
  0xeb   : > { %1401 = vmatpush.bf16.msra.mxu0 %v6660_v57  ;;  %v8976_v57 = vld [vmem:[%s10364_s11 + $0xa4] sm:$0xf0]  ;;  %v7175_v45 = vld [vmem:[%s10364_s11 + $0x210] sm:$0xf]  ;;  %v9038_v49 = vld [vmem:[%s10364_s11 + $0x294] sm:$0xf0] }
  0xec   : > { %1415 = vmatpush.bf16.msra.mxu1 %v6724_v62  ;;  %v9008_v62 = vld [vmem:[%s10364_s11 + $0x1a4] sm:$0xf0]  ;;  %v6992_v0 = vor.u32 %v8976_v57, %v6991_v55 }
  0xed   : > { %1429 = vmatpush.bf16.msra.mxu2 %v6788_v63  ;;  %v6928_v63 = vor.u32 %v8960_v54, %v6927_v53  ;;  %v1459_v47 = vld [vmem:[%s10383_s6 + $0x48] sm:$0xff]  ;;  %v8983_v53 = vld [vmem:[%s10364_s11 + $0xe4] sm:$0xf] }
  0xee   : > { %1443 = vmatpush.bf16.msra.mxu3 %v6852_v2  ;;  %1402 = vmatmul.bf16.vlgmr.msra.gmra.mxu0 %v10401_v11  ;;  %v6952_v11 = vor.u32 %v8966_v19, %v6951_v18  ;;  %v6919_v2 = vld [vmem:[%s10364_s11 + $0x10] sm:$0xf]  ;;  %v7039_v18 = vld [vmem:[%s10364_s11 + $0x100] sm:$0xf]  ;;  %v8988_v19 = vld [vmem:[%s10364_s11 + $0x104] sm:$0xf0]  ;;  %v10514_v59 = vpack.c.bf16 %v1459_v47, %v1453_v46 }
  0xef   : > { %2044 = vmatpush.bf16.msrb.mxu0 %v6968_v58  ;;  %1416 = vmatmul.bf16.vlgmr.msra.gmra.mxu1 %v10405_v23  ;;  %v7144_v23 = vor.u32 %v9014_v27, %v7143_v26  ;;  %v8958_v58 = vld [vmem:[%s10364_s11 + $0x14] sm:$0xf0]  ;;  %v7287_v26 = vld [vmem:[%s10364_s11 + $0x2f0] sm:$0xf]  ;;  %v7025_v54 = vld [vmem:[%s10364_s11 + $0xe8] sm:$0xf0] }
  0xf0   : > { %2058 = vmatpush.bf16.msrb.mxu1 %v7032_v3  ;;  %1430 = vmatmul.bf16.vlgmr.msra.gmra.mxu2 %v10408_v35  ;;  %v8964_v35 = vld [vmem:[%s10364_s11 + $0x44] sm:$0xf0]  ;;  %v6983_v3 = vld [vmem:[%s10364_s11 + $0x90] sm:$0xf]  ;;  %v6920_v12 = vor.u32 %v8958_v58, %v6919_v2  ;;  %v9050_v27 = vld [vmem:[%s10364_s11 + $0x2f4] sm:$0xf0] }
  0xf1   : > { %2072 = vmatpush.bf16.msrb.mxu2 %v7096_v5  ;;  %1444 = vmatmul.bf16.vlgmr.msra.gmra.mxu3 %v10410_v39  ;;  %v8996_v39 = vld [vmem:[%s10364_s11 + $0x144] sm:$0xf0]  ;;  %v6944_v37 = vor.u32 %v8964_v35, %v6943_v30  ;;  %v7120_v5 = vor.u32 %v9008_v62, %v7119_v61  ;;  %v8985_v30 = vld [vmem:[%s10364_s11 + $0xf4] sm:$0xf]  ;;  %v7033_v35 = vld [vmem:[%s10364_s11 + $0xf8] sm:$0xf0]  ;;  %v7288_v43 = vor.u32 %v9050_v27, %v7287_v26 }
  0xf2   : > { %2086 = vmatpush.bf16.msrb.mxu3 %v7160_v8  ;;  %v7072_v40 = vor.u32 %v8996_v39, %v7071_v33  ;;  %v7111_v8 = vld [vmem:[%s10364_s11 + $0x190] sm:$0xf]  ;;  %v9032_v33 = vld [vmem:[%s10364_s11 + $0x264] sm:$0xf0]  ;;  %v1450_v39 = vld [vmem:[%s10383_s6] sm:$0xff]  ;;  %v7036_v48 = vor.u32 %v8985_v30, %v7033_v35 }
  0xf3   : > { %2045 = vmatpush.bf16.msrb.mxu0 %v6960_v15  ;;  %v8972_v15 = vld [vmem:[%s10364_s11 + $0x84] sm:$0xf0]  ;;  %v7216_v57 = vor.u32 %v9032_v33, %v7215_v32  ;;  %v7207_v62 = vld [vmem:[%s10364_s11 + $0x250] sm:$0xf]  ;;  %v9046_v2 = vld [vmem:[%s10364_s11 + $0x2d4] sm:$0xf0] }
  0xf4   : > { %2059 = vmatpush.bf16.msrb.mxu1 %v7024_v16  ;;  %v6984_v16 = vor.u32 %v8974_v4, %v6983_v3  ;;  %v6976_v31 = vor.u32 %v8972_v15, %v6975_v14  ;;  %v8965_v58 = vld [vmem:[%s10364_s11 + $0x54] sm:$0xf]  ;;  %v6953_v3 = vld [vmem:[%s10364_s11 + $0x58] sm:$0xf0]  ;;  %v9044_v14 = vld [vmem:[%s10364_s11 + $0x2c4] sm:$0xf0] }
  0xf5   : > { %2073 = vmatpush.bf16.msrb.mxu2 %v7088_v17  ;;  %v7048_v17 = vor.u32 %v8990_v7, %v7047_v6  ;;  %v7017_v4 = vld [vmem:[%s10364_s11 + $0xd8] sm:$0xf0]  ;;  %v8963_v15 = vld [vmem:[%s10364_s11 + $0x44] sm:$0xf]  ;;  %v9042_v27 = vld [vmem:[%s10364_s11 + $0x2b4] sm:$0xf0] }
  0xf6   : > { %2087 = vmatpush.bf16.msrb.mxu3 %v7152_v21  ;;  %v7112_v21 = vor.u32 %v9006_v9, %v7111_v8  ;;  %v6956_v8 = vor.u32 %v8965_v58, %v6953_v3  ;;  %v7199_v9 = vld [vmem:[%s10364_s11 + $0x240] sm:$0xf]  ;;  %v7001_v30 = vld [vmem:[%s10364_s11 + $0xb8] sm:$0xf0]  ;;  %v9024_v33 = vld [vmem:[%s10364_s11 + $0x224] sm:$0xf0] }
  0xf7   : > { %2046 = vmatpush.bf16.msrb.mxu0 %v6952_v11  ;;  %v8969_v11 = vld [vmem:[%s10364_s11 + $0x74] sm:$0xf]  ;;  %v7183_v32 = vld [vmem:[%s10364_s11 + $0x220] sm:$0xf]  ;;  %v9022_v46 = vld [vmem:[%s10364_s11 + $0x214] sm:$0xf0] }
  0xf8   : > { %2060 = vmatpush.bf16.msrb.mxu1 %v7016_v28  ;;  %v6912_v28 = vor.u32 %v8956_v13, %v6911_v10  ;;  %v9028_v10 = vld [vmem:[%s10364_s11 + $0x244] sm:$0xf0]  ;;  %v7239_v47 = vld [vmem:[%s10364_s11 + $0x290] sm:$0xf]  ;;  %v6913_v58 = vld [vmem:[%s10364_s11 + $0x8] sm:$0xf0] }
  0xf9   : > { %2074 = vmatpush.bf16.msrb.mxu2 %v7080_v29  ;;  %v6969_v29 = vld [vmem:[%s10364_s11 + $0x78] sm:$0xf0] }
  0xfa   : > { %2088 = vmatpush.bf16.msrb.mxu3 %v7144_v23  ;;  %v7040_v23 = vor.u32 %v8988_v19, %v7039_v18  ;;  %v7009_v18 = vld [vmem:[%s10364_s11 + $0xc8] sm:$0xf0]  ;;  %v7200_v19 = vor.u32 %v9028_v10, %v7199_v9  ;;  %v7161_v9 = vld [vmem:[%s10364_s11 + $0x1f8] sm:$0xf0] }
  0xfb   : > { %2047 = vmatpush.bf16.msrb.mxu0 %v6944_v37  ;;  %v7104_v37 = vor.u32 %v9004_v22, %v7103_v20  ;;  %v7191_v22 = vld [vmem:[%s10364_s11 + $0x230] sm:$0xf] }
  0xfc   : > { %2061 = vmatpush.bf16.msrb.mxu1 %v7008_v38  ;;  %v7224_v38 = vor.u32 %v9034_v25, %v7223_v24  ;;  %v9026_v24 = vld [vmem:[%s10364_s11 + $0x234] sm:$0xf0]  ;;  %v7255_v25 = vld [vmem:[%s10364_s11 + $0x2b0] sm:$0xf] }
  0xfd   : > { %2075 = vmatpush.bf16.msrb.mxu2 %v7072_v40  ;;  %v1457_v40 = vld [vmem:[%s10383_s6 + $0x38] sm:$0xff]  ;;  %v7192_v35 = vor.u32 %v9026_v24, %v7191_v22  ;;  %v1455_v22 = vld [vmem:[%s10383_s6 + $0x28] sm:$0xff] }
  0xfe   : > { %2089 = vmatpush.bf16.msrb.mxu3 %v7136_v44  ;;  %v6972_v44 = vor.u32 %v8969_v11, %v6969_v29  ;;  %v10510_v55 = vpack.c.bf16 %v1457_v40, %v1451_v36  ;;  %v8961_v11 = vld [vmem:[%s10364_s11 + $0x34] sm:$0xf]  ;;  %v9040_v36 = vld [vmem:[%s10364_s11 + $0x2a4] sm:$0xf0]  ;;  %v8975_v40 = vld [vmem:[%s10364_s11 + $0xa4] sm:$0xf] }
  0xff   : > { %2048 = vmatpush.bf16.msrb.mxu0 %v6936_v50  ;;  %v8967_v50 = vld [vmem:[%s10364_s11 + $0x64] sm:$0xf]  ;;  %v8977_v29 = vld [vmem:[%s10364_s11 + $0xb4] sm:$0xf]  ;;  %v1461_v24 = vld [vmem:[%s10383_s6 + $0x58] sm:$0xff] }
 0x100   : > { %2062 = vmatpush.bf16.msrb.mxu1 %v7000_v51  ;;  %v6961_v51 = vld [vmem:[%s10364_s11 + $0x68] sm:$0xf0] }
 0x101   : > { %2076 = vmatpush.bf16.msrb.mxu2 %v7064_v52  ;;  %v10506_v52 = vpack.c.bf16 %v1456_v34, %v1450_v39  ;;  %v6964_v61 = vor.u32 %v8967_v50, %v6961_v51  ;;  %v7247_v39 = vld [vmem:[%s10364_s11 + $0x2a0] sm:$0xf]  ;;  %v7004_v34 = vor.u32 %v8977_v29, %v7001_v30  ;;  %v8957_v50 = vld [vmem:[%s10364_s11 + $0x14] sm:$0xf]  ;;  %v6921_v51 = vld [vmem:[%s10364_s11 + $0x18] sm:$0xf0] }
 0x102   : > { %2090 = vmatpush.bf16.msrb.mxu3 %v7128_v56  ;;  %v10512_v56 = vpack.c.bf16 %v1458_v42, %v1452_v41  ;;  %v6993_v41 = vld [vmem:[%s10364_s11 + $0xa8] sm:$0xf0]  ;;  %v7184_v42 = vor.u32 %v9024_v33, %v7183_v32  ;;  %v10588_v32 = vpack.c.bf16 %v1461_v24, %v1455_v22  ;;  %v9047_v33 = vld [vmem:[%s10364_s11 + $0x2e4] sm:$0xf] }
 0x103   : > { %2049 = vmatpush.bf16.msrb.mxu0 %v6928_v63  ;;  %v9030_v63 = vld [vmem:[%s10364_s11 + $0x254] sm:$0xf0]  ;;  %v7249_v22 = vld [vmem:[%s10364_s11 + $0x2a8] sm:$0xf0] }
 0x104   : > { %2063 = vmatpush.bf16.msrb.mxu1 %v6992_v0  ;;  %v7271_v0 = vld [vmem:[%s10364_s11 + $0x2d0] sm:$0xf]  ;;  %v7208_v6 = vor.u32 %v9030_v63, %v7207_v62  ;;  %v7231_v62 = vld [vmem:[%s10364_s11 + $0x280] sm:$0xf]  ;;  %v7240_v63 = vor.u32 %v9038_v49, %v7239_v47  ;;  %v7273_v47 = vld [vmem:[%s10364_s11 + $0x2d8] sm:$0xf0] }
 0x105   : > { %2077 = vmatpush.bf16.msrb.mxu2 %v7056_v1  ;;  %v7028_v1 = vor.u32 %v8983_v53, %v7025_v54  ;;  %v7272_v7 = vor.u32 %v9046_v2, %v7271_v0  ;;  %v8973_v53 = vld [vmem:[%s10364_s11 + $0x94] sm:$0xf]  ;;  %v6985_v54 = vld [vmem:[%s10364_s11 + $0x98] sm:$0xf0]  ;;  %v6924_v0 = vor.u32 %v8957_v50, %v6921_v51  ;;  %v8955_v2 = vld [vmem:[%s10364_s11 + $0x4] sm:$0xf] }
 0x106   : > { %2091 = vmatpush.bf16.msrb.mxu3 %v7120_v5  ;;  %v8981_v5 = vld [vmem:[%s10364_s11 + $0xd4] sm:$0xf]  ;;  %v6988_v3 = vor.u32 %v8973_v53, %v6985_v54  ;;  %v8995_v51 = vld [vmem:[%s10364_s11 + $0x144] sm:$0xf]  ;;  %v7073_v53 = vld [vmem:[%s10364_s11 + $0x148] sm:$0xf0] }
 0x107   : > { %2050 = vmatpush.bf16.msrb.mxu0 %v6920_v12  ;;  %v7263_v12 = vld [vmem:[%s10364_s11 + $0x2c0] sm:$0xf]  ;;  %v7020_v13 = vor.u32 %v8981_v5, %v7017_v4  ;;  %v8971_v5 = vld [vmem:[%s10364_s11 + $0x84] sm:$0xf]  ;;  %v6977_v4 = vld [vmem:[%s10364_s11 + $0x88] sm:$0xf0] }
 0x108   : > { %2064 = vmatpush.bf16.msrb.mxu1 %v6984_v16  ;;  %v6945_v16 = vld [vmem:[%s10364_s11 + $0x48] sm:$0xf0]  ;;  %v7264_v20 = vor.u32 %v9044_v14, %v7263_v12  ;;  %v9033_v12 = vld [vmem:[%s10364_s11 + $0x274] sm:$0xf]  ;;  %v9011_v54 = vld [vmem:[%s10364_s11 + $0x1c4] sm:$0xf] }
 0x109   : > { %2078 = vmatpush.bf16.msrb.mxu2 %v7048_v17  ;;  %v8979_v17 = vld [vmem:[%s10364_s11 + $0xc4] sm:$0xf]  ;;  %v9049_v14 = vld [vmem:[%s10364_s11 + $0x2f4] sm:$0xf] }
 0x10a   : > { %2092 = vmatpush.bf16.msrb.mxu3 %v7112_v21  ;;  %v6948_v21 = vor.u32 %v8963_v15, %v6945_v16  ;;  %v7012_v26 = vor.u32 %v8979_v17, %v7009_v18  ;;  %v6916_v16 = vor.u32 %v8955_v2, %v6913_v58  ;;  %v7289_v17 = vld [vmem:[%s10364_s11 + $0x2f8] sm:$0xf0]  ;;  %v1454_v18 = vld [vmem:[%s10383_s6 + $0x20] sm:$0xff]  ;;  %v8993_v2 = vld [vmem:[%s10364_s11 + $0x134] sm:$0xf] }
 0x10b   : > { %2051 = vmatpush.bf16.msrb.mxu0 %v6912_v28  ;;  %v6937_v28 = vld [vmem:[%s10364_s11 + $0x38] sm:$0xf0]  ;;  %v7292_v29 = vor.u32 %v9049_v14, %v7289_v17  ;;  %v8991_v14 = vld [vmem:[%s10364_s11 + $0x124] sm:$0xf] }
 0x10c   : > { %2065 = vmatpush.bf16.msrb.mxu1 %v6976_v31  ;;  %v7256_v31 = vor.u32 %v9042_v27, %v7255_v25  ;;  %v8999_v27 = vld [vmem:[%s10364_s11 + $0x164] sm:$0xf]  ;;  %v7065_v58 = vld [vmem:[%s10364_s11 + $0x138] sm:$0xf0] }
 0x10d   : > { %2079 = vmatpush.bf16.msrb.mxu2 %v7040_v23  ;;  %v6940_v23 = vor.u32 %v8961_v11, %v6937_v28  ;;  %v7089_v11 = vld [vmem:[%s10364_s11 + $0x168] sm:$0xf0]  ;;  %v9015_v28 = vld [vmem:[%s10364_s11 + $0x1e4] sm:$0xf] }
 0x10e   : > { %2093 = vmatpush.bf16.msrb.mxu3 %v7104_v37  ;;  %2052 = vmatmul.bf16.vlgmr.msrb.gmra.mxu0 %v10506_v52  ;;  %v8959_v37 = vld [vmem:[%s10364_s11 + $0x24] sm:$0xf] }
 0x10f   : > { %2100 = vmatpush.bf16.msra.mxu0 %v7224_v38  ;;  %2066 = vmatmul.bf16.vlgmr.msrb.gmra.mxu1 %v10510_v55  ;;  %v6929_v38 = vld [vmem:[%s10364_s11 + $0x28] sm:$0xf0] }
 0x110   : > { %2114 = vmatpush.bf16.msra.mxu1 %v7288_v43  ;;  %2080 = vmatmul.bf16.vlgmr.msrb.gmra.mxu2 %v10512_v56  ;;  %v7248_v43 = vor.u32 %v9040_v36, %v7247_v39  ;;  %v7281_v39 = vld [vmem:[%s10364_s11 + $0x2e8] sm:$0xf0] }
 0x111   : > { %2128 = vmatpush.bf16.msra.mxu2 %v6972_v44  ;;  %2094 = vmatmul.bf16.vlgmr.msrb.gmra.mxu3 %v10514_v59  ;;  %v6932_v44 = vor.u32 %v8959_v37, %v6929_v38  ;;  %v8997_v38 = vld [vmem:[%s10364_s11 + $0x154] sm:$0xf] }
 0x112   : > { %2142 = vmatpush.bf16.msra.mxu3 %v7036_v48  ;;  %v6996_v48 = vor.u32 %v8975_v40, %v6993_v41  ;;  %v7081_v40 = vld [vmem:[%s10364_s11 + $0x158] sm:$0xf0]  ;;  %v9013_v41 = vld [vmem:[%s10364_s11 + $0x1d4] sm:$0xf] }
 0x113   : > { %2101 = vmatpush.bf16.msra.mxu0 %v7216_v57  ;;  %v7176_v57 = vor.u32 %v9022_v46, %v7175_v45  ;;  %v7209_v45 = vld [vmem:[%s10364_s11 + $0x258] sm:$0xf0]  ;;  %v9045_v46 = vld [vmem:[%s10364_s11 + $0x2d4] sm:$0xf] }
 0x114   : > { %2115 = vmatpush.bf16.msra.mxu1 %v7280_v60  ;;  %v7167_v60 = vld [vmem:[%s10364_s11 + $0x200] sm:$0xf] }
 0x115   : > { %2129 = vmatpush.bf16.msra.mxu2 %v6964_v61  ;;  %v9020_v61 = vld [vmem:[%s10364_s11 + $0x204] sm:$0xf0] }
 0x116   : > { %2143 = vmatpush.bf16.msra.mxu3 %v7028_v1  ;;  %v9036_v1 = vld [vmem:[%s10364_s11 + $0x284] sm:$0xf0]  ;;  %v7168_v10 = vor.u32 %v9020_v61, %v7167_v60  ;;  %v9027_v60 = vld [vmem:[%s10364_s11 + $0x244] sm:$0xf]  ;;  %v7201_v61 = vld [vmem:[%s10364_s11 + $0x248] sm:$0xf0] }
 0x117   : > { %2102 = vmatpush.bf16.msra.mxu0 %v7208_v6  ;;  %v9001_v6 = vld [vmem:[%s10364_s11 + $0x174] sm:$0xf]  ;;  %v7232_v15 = vor.u32 %v9036_v1, %v7231_v62  ;;  %v7265_v62 = vld [vmem:[%s10364_s11 + $0x2c8] sm:$0xf0]  ;;  %v7204_v1 = vor.u32 %v9027_v60, %v7201_v61 }
 0x118   : > { %2116 = vmatpush.bf16.msra.mxu1 %v7272_v7  ;;  %v7097_v7 = vld [vmem:[%s10364_s11 + $0x178] sm:$0xf0] }
 0x119   : > { %2130 = vmatpush.bf16.msra.mxu2 %v6956_v8  ;;  %v9017_v8 = vld [vmem:[%s10364_s11 + $0x1f4] sm:$0xf] }
 0x11a   : > { %2144 = vmatpush.bf16.msra.mxu3 %v7020_v13  ;;  %v7225_v13 = vld [vmem:[%s10364_s11 + $0x278] sm:$0xf0]  ;;  %v7164_v25 = vor.u32 %v9017_v8, %v7161_v9  ;;  %v9041_v8 = vld [vmem:[%s10364_s11 + $0x2b4] sm:$0xf] }
 0x11b   : > { %2103 = vmatpush.bf16.msra.mxu0 %v7200_v19  ;;  %v1460_v19 = vld [vmem:[%s10383_s6 + $0x50] sm:$0xff]  ;;  %v7257_v9 = vld [vmem:[%s10364_s11 + $0x2b8] sm:$0xf0] }
 0x11c   : > { %2117 = vmatpush.bf16.msra.mxu1 %v7264_v20  ;;  %v6980_v20 = vor.u32 %v8971_v5, %v6977_v4  ;;  %v10583_v30 = vpack.c.bf16 %v1460_v19, %v1454_v18  ;;  %v7129_v4 = vld [vmem:[%s10364_s11 + $0x1b8] sm:$0xf0]  ;;  %v7260_v17 = vor.u32 %v9041_v8, %v7257_v9  ;;  %v7121_v18 = vld [vmem:[%s10364_s11 + $0x1a8] sm:$0xf0]  ;;  %v9023_v19 = vld [vmem:[%s10364_s11 + $0x224] sm:$0xf] }
 0x11d   : > { %2131 = vmatpush.bf16.msra.mxu2 %v6948_v21  ;;  %v7100_v21 = vor.u32 %v9001_v6, %v7097_v7  ;;  %v9025_v6 = vld [vmem:[%s10364_s11 + $0x234] sm:$0xf]  ;;  %v7193_v7 = vld [vmem:[%s10364_s11 + $0x238] sm:$0xf0] }
 0x11e   : > { %2145 = vmatpush.bf16.msra.mxu3 %v7012_v26  ;;  %v7228_v26 = vor.u32 %v9033_v12, %v7225_v13  ;;  %v7196_v13 = vor.u32 %v9025_v6, %v7193_v7  ;;  %v2216_v6 = vld [vmem:[%s11986_s18] sm:$0xff] }
 0x11f   : > { %2104 = vmatpush.bf16.msra.mxu0 %v7192_v35  ;;  %v7153_v35 = vld [vmem:[%s10364_s11 + $0x1e8] sm:$0xf0] }
 0x120   : > { %2118 = vmatpush.bf16.msra.mxu1 %v7256_v31  ;;  %v9031_v31 = vld [vmem:[%s10364_s11 + $0x264] sm:$0xf]  ;;  %v7156_v36 = vor.u32 %v9015_v28, %v7153_v35  ;;  %v7049_v28 = vld [vmem:[%s10364_s11 + $0x118] sm:$0xf0] }
 0x121   : > { %2132 = vmatpush.bf16.msra.mxu2 %v6940_v23  ;;  %v7217_v23 = vld [vmem:[%s10364_s11 + $0x268] sm:$0xf0] }
 0x122   : > { %2146 = vmatpush.bf16.msra.mxu3 %v7004_v34  ;;  %v7092_v34 = vor.u32 %v8999_v27, %v7089_v11  ;;  %v7220_v37 = vor.u32 %v9031_v31, %v7217_v23  ;;  %v8989_v11 = vld [vmem:[%s10364_s11 + $0x114] sm:$0xf]  ;;  %v7113_v31 = vld [vmem:[%s10364_s11 + $0x198] sm:$0xf0] }
 0x123   : > { %2105 = vmatpush.bf16.msra.mxu0 %v7184_v42  ;;  %v7284_v42 = vor.u32 %v9047_v33, %v7281_v39  ;;  %v9021_v23 = vld [vmem:[%s10364_s11 + $0x214] sm:$0xf]  ;;  %v7177_v33 = vld [vmem:[%s10364_s11 + $0x218] sm:$0xf0] }
 0x124   : > { %2119 = vmatpush.bf16.msra.mxu1 %v7248_v43  ;;  %v7145_v43 = vld [vmem:[%s10364_s11 + $0x1d8] sm:$0xf0] }
 0x125   : > { %2133 = vmatpush.bf16.msra.mxu2 %v6932_v44  ;;  %v9029_v44 = vld [vmem:[%s10364_s11 + $0x254] sm:$0xf]  ;;  %v7148_v49 = vor.u32 %v9013_v41, %v7145_v43  ;;  %v8987_v41 = vld [vmem:[%s10364_s11 + $0x104] sm:$0xf] }
 0x126   : > { %2147 = vmatpush.bf16.msra.mxu3 %v6996_v48  ;;  %v7084_v48 = vor.u32 %v8997_v38, %v7081_v40  ;;  %v7212_v50 = vor.u32 %v9029_v44, %v7209_v45  ;;  %v7180_v40 = vor.u32 %v9021_v23, %v7177_v33  ;;  %v9003_v43 = vld [vmem:[%s10364_s11 + $0x184] sm:$0xf]  ;;  %v7105_v45 = vld [vmem:[%s10364_s11 + $0x188] sm:$0xf0] }
 0x127   : > { %2106 = vmatpush.bf16.msra.mxu0 %v7176_v57  ;;  %v7137_v57 = vld [vmem:[%s10364_s11 + $0x1c8] sm:$0xf0] }
 0x128   : > { %2120 = vmatpush.bf16.msra.mxu1 %v7240_v63  ;;  %v7076_v63 = vor.u32 %v8995_v51, %v7073_v53  ;;  %v7108_v51 = vor.u32 %v9003_v43, %v7105_v45 }
 0x129   : > { %2134 = vmatpush.bf16.msra.mxu2 %v6924_v0  ;;  %v7140_v0 = vor.u32 %v9011_v54, %v7137_v57 }
 0x12a   : > { %2148 = vmatpush.bf16.msra.mxu3 %v6988_v3  ;;  %v9009_v3 = vld [vmem:[%s10364_s11 + $0x1b4] sm:$0xf] }
 0x12b   : > { %2107 = vmatpush.bf16.msra.mxu0 %v7168_v10  ;;  %v7068_v10 = vor.u32 %v8993_v2, %v7065_v58  ;;  %v7132_v12 = vor.u32 %v9009_v3, %v7129_v4  ;;  %v1291_v27 = vpop.f32.mrf.mxu0 }
 0x12c   : > { %2121 = vmatpush.bf16.msra.mxu1 %v7232_v15  ;;  %v7057_v15 = vld [vmem:[%s10364_s11 + $0x128] sm:$0xf0]  ;;  %v1305_v39 = vpop.f32.mrf.mxu1 }
 0x12d   : > { %2135 = vmatpush.bf16.msra.mxu2 %v6916_v16  ;;  %v9007_v16 = vld [vmem:[%s10364_s11 + $0x1a4] sm:$0xf]  ;;  %v7060_v24 = vor.u32 %v8991_v14, %v7057_v15  ;;  %v1306_v54 = vadd.f32 %v1305_v39, %v1291_v27 }
 0x12e   : > { %2149 = vmatpush.bf16.msra.mxu3 %v6980_v20  ;;  %2108 = vmatmul.bf16.vlgmr.msra.gmra.mxu0 %v10583_v30  ;;  %v7185_v20 = vld [vmem:[%s10364_s11 + $0x228] sm:$0xf0] }
 0x12f   : > { %2156 = vmatpush.bf16.msrb.mxu0 %v7100_v21  ;;  %2122 = vmatmul.bf16.vlgmr.msra.gmra.mxu1 %v10588_v32  ;;  %v9039_v21 = vld [vmem:[%s10364_s11 + $0x2a4] sm:$0xf] }
 0x130   : > { %2170 = vmatpush.bf16.msrb.mxu1 %v7164_v25  ;;  %2136 = vmatmul.bf16.vlgmr.msra.gmra.mxu2 %v10506_v52  ;;  %v7276_v52 = vor.u32 %v9045_v46, %v7273_v47  ;;  %v7124_v25 = vor.u32 %v9007_v16, %v7121_v18  ;;  %v7252_v35 = vor.u32 %v9039_v21, %v7249_v22  ;;  %v9019_v46 = vld [vmem:[%s10364_s11 + $0x204] sm:$0xf]  ;;  %v7169_v47 = vld [vmem:[%s10364_s11 + $0x208] sm:$0xf0] }
 0x131   : > { %2184 = vmatpush.bf16.msrb.mxu2 %v7228_v26  ;;  %2150 = vmatmul.bf16.vlgmr.msra.gmra.mxu3 %v10510_v55  ;;  %v9043_v55 = vld [vmem:[%s10364_s11 + $0x2c4] sm:$0xf]  ;;  %v7188_v26 = vor.u32 %v9023_v19, %v7185_v20  ;;  %v7172_v53 = vor.u32 %v9019_v46, %v7169_v47 }
 0x132   : > { %2198 = vmatpush.bf16.msrb.mxu3 %v7292_v29  ;;  %v7268_v5 = vor.u32 %v9043_v55, %v7265_v62  ;;  %v9005_v29 = vld [vmem:[%s10364_s11 + $0x194] sm:$0xf] }
 0x133   : > { %2157 = vmatpush.bf16.msrb.mxu0 %v7092_v34  ;;  %v9037_v34 = vld [vmem:[%s10364_s11 + $0x294] sm:$0xf]  ;;  %v7116_v38 = vor.u32 %v9005_v29, %v7113_v31  ;;  %v1293_v57 = vpop.f32.mrf.mxu0  ;;  %v1319_v60 = vpop.f32.mrf.mxu2  ;;  %v2217_v31 = vld [vmem:[%s11987_s12 + $0x8] sm:$0xff] }
 0x134   : > { %2171 = vmatpush.bf16.msrb.mxu1 %v7156_v36  ;;  %v7241_v36 = vld [vmem:[%s10364_s11 + $0x298] sm:$0xf0]  ;;  %v1307_v61 = vpop.f32.mrf.mxu1  ;;  %v1320_v55 = vadd.f32 %v1319_v60, %v1306_v54  ;;  %v1333_v62 = vpop.f32.mrf.mxu3 }
 0x135   : > { %2185 = vmatpush.bf16.msrb.mxu2 %v7220_v37  ;;  %v7052_v37 = vor.u32 %v8989_v11, %v7049_v28  ;;  %v7244_v44 = vor.u32 %v9037_v34, %v7241_v36 }
 0x136   : > { %2199 = vmatpush.bf16.msrb.mxu3 %v7284_v42  ;;  %v7041_v42 = vld [vmem:[%s10364_s11 + $0x108] sm:$0xf0] }
 0x137   : > { %2158 = vmatpush.bf16.msrb.mxu0 %v7084_v48  ;;  %v9035_v48 = vld [vmem:[%s10364_s11 + $0x284] sm:$0xf] }
 0x138   : > { %2172 = vmatpush.bf16.msrb.mxu1 %v7148_v49  ;;  %v7233_v49 = vld [vmem:[%s10364_s11 + $0x288] sm:$0xf0] }
 0x139   : > { %2186 = vmatpush.bf16.msrb.mxu2 %v7212_v50  ;;  %v7044_v50 = vor.u32 %v8987_v41, %v7041_v42  ;;  %v2219_v41 = vld [vmem:[%s11987_s12 + $0x18] sm:$0xff] }
 0x13a   : > { %2200 = vmatpush.bf16.msrb.mxu3 %v7276_v52  ;;  %v7236_v52 = vor.u32 %v9035_v48, %v7233_v49 }
 0x13b   : > { %2159 = vmatpush.bf16.msrb.mxu0 %v7076_v63  ;;  %v1334_v63 = vadd.f32 %v1333_v62, %v1320_v55  ;;  %v1321_v2 = vpop.f32.mrf.mxu2 }
 0x13c   : > { %2173 = vmatpush.bf16.msrb.mxu1 %v7140_v0  ;;  %v1308_v0 = vadd.f32 %v1307_v61, %v1293_v57 }
 0x13d   : > { %2187 = vmatpush.bf16.msrb.mxu2 %v7204_v1 }
 0x13e   : > { %2201 = vmatpush.bf16.msrb.mxu3 %v7268_v5  ;;  %v1322_v5 = vadd.f32 %v1321_v2, %v1308_v0 }
 0x13f   : > { %2160 = vmatpush.bf16.msrb.mxu0 %v7068_v10 }
 0x140   : > { %2174 = vmatpush.bf16.msrb.mxu1 %v7132_v12  ;;  %v2218_v12 = vld [vmem:[%s11987_s12 + $0x10] sm:$0xff] }
 0x141   : > { %2188 = vmatpush.bf16.msrb.mxu2 %v7196_v13 }
 0x142   : > { %2202 = vmatpush.bf16.msrb.mxu3 %v7260_v17 }
 0x143   : > { %2161 = vmatpush.bf16.msrb.mxu0 %v7060_v24 }
 0x144   : > { %2175 = vmatpush.bf16.msrb.mxu1 %v7124_v25 }
 0x145   : > { %2189 = vmatpush.bf16.msrb.mxu2 %v7188_v26 }
 0x146   : > { %2203 = vmatpush.bf16.msrb.mxu3 %v7252_v35 }
 0x147   : > { %2162 = vmatpush.bf16.msrb.mxu0 %v7052_v37 }
 0x148   : > { %2176 = vmatpush.bf16.msrb.mxu1 %v7116_v38 }
 0x149   : > { %2190 = vmatpush.bf16.msrb.mxu2 %v7180_v40 }
 0x14a   : > { %2204 = vmatpush.bf16.msrb.mxu3 %v7244_v44 }
 0x14b   : > { %2163 = vmatpush.bf16.msrb.mxu0 %v7044_v50  ;;  %v1347_v1 = vpop.f32.mrf.mxu0 }
 0x14c   : > { %2177 = vmatpush.bf16.msrb.mxu1 %v7108_v51  ;;  %v1348_v58 = vadd.f32 %v1347_v1, %v1334_v63  ;;  %v1361_v3 = vpop.f32.mrf.mxu1 }
 0x14d   : > { %2191 = vmatpush.bf16.msrb.mxu2 %v7172_v53 }
 0x14e   : > { %2205 = vmatpush.bf16.msrb.mxu3 %v7236_v52  ;;  %2164 = vmatmul.bf16.vlgmr.msrb.gmra.mxu0 %v10512_v56  ;;  %v1362_v4 = vadd.f32 %v1361_v3, %v1348_v58  ;;  %v1335_v56 = vpop.f32.mrf.mxu3 }
 0x14f   : > { %2178 = vmatmul.bf16.vlgmr.msrb.gmra.mxu1 %v10514_v59  ;;  %v1336_v59 = vadd.f32 %v1335_v56, %v1322_v5 }
 0x150   : > { %2192 = vmatmul.bf16.vlgmr.msrb.gmra.mxu2 %v10583_v30  ;;  %v2212_v7 = vmul.f32 16.0, %v1362_v4 }
 0x151   : > { %2206 = vmatmul.bf16.vlgmr.msrb.gmra.mxu3 %v10588_v32 }
 0x152   : > { %v2220_v8 = vadd.f32 %v2216_v6, %v2212_v7 }
 0x153   : > { %v1349_v9 = vpop.f32.mrf.mxu0  ;;  %v1375_v15 = vpop.f32.mrf.mxu2 }
 0x154   : > { %2224 = vst [vmem:[#allocation2 + $0x10] sm:$0xff] %v2220_v8  ;;  %v1350_v30 = vadd.f32 %v1349_v9, %v1336_v59  ;;  %v1363_v32 = vpop.f32.mrf.mxu1 }
 0x156   : > { %v1364_v10 = vadd.f32 %v1363_v32, %v1350_v30  ;;  %v1389_v16 = vpop.f32.mrf.mxu3 }
 0x157   : > { %v1390_v17 = vadd.f32 %v1389_v16, %v1375_v15 }
 0x158   : > { %v2214_v13 = vmul.f32 16.0, %v1364_v10 }
 0x15a   : > { %v2222_v14 = vadd.f32 %v2218_v12, %v2214_v13 }
 0x15b   : > { %v1377_v18 = vpop.f32.mrf.mxu2 }
 0x15c   : > { %2226 = vst [vmem:[#allocation2 + $0x18] sm:$0xff] %v2222_v14 }
 0x15e   : > { %v1391_v19 = vpop.f32.mrf.mxu3 }
 0x15f   : > { %v1392_v26 = vadd.f32 %v1391_v19, %v1377_v18 }
 0x16b   : > { %v1403_v20 = vpop.f32.mrf.mxu0 }
 0x16c   : > { %v1404_v21 = vadd.f32 %v1403_v20, %v1390_v17  ;;  %v1417_v22 = vpop.f32.mrf.mxu1 }
 0x16e   : > { %v1418_v24 = vadd.f32 %v1417_v22, %v1404_v21 }
 0x173   : > { %v1431_v25 = vpop.f32.mrf.mxu2  ;;  %v1405_v11 = vpop.f32.mrf.mxu0 }
 0x174   : > { %v1432_v27 = vadd.f32 %v1431_v25, %v1418_v24  ;;  %v1445_v28 = vpop.f32.mrf.mxu3  ;;  %v1406_v29 = vadd.f32 %v1405_v11, %v1392_v26  ;;  %v1419_v23 = vpop.f32.mrf.mxu1 }
 0x176   : > { %v1446_v35 = vadd.f32 %v1445_v28, %v1432_v27  ;;  %v1420_v34 = vadd.f32 %v1419_v23, %v1406_v29 }
 0x178   : > { %v2213_v33 = vmul.f32 16.0, %v1446_v35 }
 0x17a   : > { %v2221_v39 = vadd.f32 %v2217_v31, %v2213_v33 }
 0x17b   : > { %v1433_v36 = vpop.f32.mrf.mxu2 }
 0x17c   : > { %2225 = vst [vmem:[#allocation2] sm:$0xff] %v2221_v39  ;;  %v1434_v37 = vadd.f32 %v1433_v36, %v1420_v34  ;;  %v1447_v38 = vpop.f32.mrf.mxu3 }
 0x17e   : > { %v1448_v40 = vadd.f32 %v1447_v38, %v1434_v37 }
 0x180   : > { %v2215_v42 = vmul.f32 16.0, %v1448_v40 }
 0x182   : > { %v2223_v43 = vadd.f32 %v2219_v41, %v2215_v42 }
 0x184   : > { %2227 = vst [vmem:[#allocation2 + $0x8] sm:$0xff] %v2223_v43 }
 0x18b   : > { %v2053_v44 = vpop.f32.mrf.mxu0 }
 0x18c   : > { %v2067_v45 = vpop.f32.mrf.mxu1 }
 0x18d   : > { %v2068_v46 = vadd.f32 %v2067_v45, %v2053_v44 }
 0x193   : > { %v2055_v47 = vpop.f32.mrf.mxu0  ;;  %v2081_v48 = vpop.f32.mrf.mxu2 }
 0x194   : > { %v2069_v49 = vpop.f32.mrf.mxu1  ;;  %v2082_v50 = vadd.f32 %v2081_v48, %v2068_v46  ;;  %v2095_v51 = vpop.f32.mrf.mxu3 }
 0x195   : > { %v2070_v54 = vadd.f32 %v2069_v49, %v2055_v47 }
 0x196   : > { %v2096_v53 = vadd.f32 %v2095_v51, %v2082_v50 }
 0x19b   : > { %v2083_v57 = vpop.f32.mrf.mxu2 }
 0x19c   : > { %v2084_v55 = vadd.f32 %v2083_v57, %v2070_v54  ;;  %v2097_v63 = vpop.f32.mrf.mxu3 }
 0x19e   : > { %v2098_v2 = vadd.f32 %v2097_v63, %v2084_v55 }
 0x1ab   : > { %v2109_v52 = vpop.f32.mrf.mxu0 }
 0x1ac   : > { %v2110_v60 = vadd.f32 %v2109_v52, %v2096_v53  ;;  %v2123_v61 = vpop.f32.mrf.mxu1 }
 0x1ae   : > { %v2124_v62 = vadd.f32 %v2123_v61, %v2110_v60 }
 0x1b0   : > { %v2228_v0 = vmul.f32 16.0, %v2124_v62 }
 0x1b2   : > { %v2236_v1 = vadd.f32 %v2228_v0, %v2216_v6 }
 0x1b3   : > { %v2111_v58 = vpop.f32.mrf.mxu0  ;;  %v2137_v8 = vpop.f32.mrf.mxu2 }
 0x1b4   : > { %2240 = vst [vmem:[#allocation3] sm:$0xff] %v2236_v1  ;;  %v2112_v3 = vadd.f32 %v2111_v58, %v2098_v2  ;;  %v2125_v5 = vpop.f32.mrf.mxu1  ;;  %v2151_v59 = vpop.f32.mrf.mxu3 }
 0x1b5   : > { %v2152_v30 = vadd.f32 %v2151_v59, %v2137_v8 }
 0x1b6   : > { %v2126_v4 = vadd.f32 %v2125_v5, %v2112_v3 }
 0x1b8   : > { %v2230_v56 = vmul.f32 16.0, %v2126_v4 }
 0x1ba   : > { %v2238_v7 = vadd.f32 %v2230_v56, %v2218_v12 }
 0x1bb   : > { %v2139_v9 = vpop.f32.mrf.mxu2 }
 0x1bc   : > { %2242 = vst [vmem:[#allocation3 + $0x8] sm:$0xff] %v2238_v7  ;;  %v2153_v32 = vpop.f32.mrf.mxu3 }
 0x1bd   : > { %v2154_v6 = vadd.f32 %v2153_v32, %v2139_v9 }
 0x1cb   : > { %v2165_v10 = vpop.f32.mrf.mxu0 }
 0x1cc   : > { %v2166_v13 = vadd.f32 %v2165_v10, %v2152_v30  ;;  %v2179_v14 = vpop.f32.mrf.mxu1 }
 0x1ce   : > { %v2180_v15 = vadd.f32 %v2179_v14, %v2166_v13 }
 0x1d3   : > { %v2193_v16 = vpop.f32.mrf.mxu2  ;;  %v2167_v19 = vpop.f32.mrf.mxu0 }
 0x1d4   : > { %v2194_v17 = vadd.f32 %v2193_v16, %v2180_v15  ;;  %v2207_v18 = vpop.f32.mrf.mxu3  ;;  %v2168_v21 = vadd.f32 %v2167_v19, %v2154_v6  ;;  %v2181_v24 = vpop.f32.mrf.mxu1 }
 0x1d6   : > { %v2208_v20 = vadd.f32 %v2207_v18, %v2194_v17  ;;  %v2182_v25 = vadd.f32 %v2181_v24, %v2168_v21 }
 0x1d8   : > { %v2229_v22 = vmul.f32 16.0, %v2208_v20 }
 0x1da   : > { %v2237_v12 = vadd.f32 %v2229_v22, %v2217_v31 }
 0x1db   : > { %v2195_v26 = vpop.f32.mrf.mxu2 }
 0x1dc   : > { %2241 = vst [vmem:[#allocation3 + $0x18] sm:$0xff] %v2237_v12  ;;  %v2196_v27 = vadd.f32 %v2195_v26, %v2182_v25  ;;  %v2209_v11 = vpop.f32.mrf.mxu3 }
 0x1de   : > { %v2210_v28 = vadd.f32 %v2209_v11, %v2196_v27 }
 0x1e0   : > { %v2231_v29 = vmul.f32 16.0, %v2210_v28 }
 0x1e2   : > { %v2239_v35 = vadd.f32 %v2231_v29, %v2219_v41 }
 0x1e4   : > { %2243 = vst [vmem:[#allocation3 + $0x10] sm:$0xff] %v2239_v35 }
 0x1e5 PF: > { %v2252_v23 = vld [vmem:[#allocation3] sm:$0xff]  ;;  %v2253_v33 = vld [vmem:[#allocation3 + $0x18] sm:$0xff]  ;;  %v2248_v39 = vld [vmem:[#allocation2 + $0x10] sm:$0xff]  ;;  %v10074_v45 = vmov 256.0   ;;  %vm3213_vm13 = vcmask 523264   ;;  %s11990_s20 = sld [smem:[#allocation41_spill]] }
 0x1e6   : > { %v2335_v34 = vadd.f32 %v2253_v33, %v2252_v23  ;;  %v2249_v36 = vld [vmem:[#allocation2] sm:$0xff]  ;;  %v2254_v38 = vld [vmem:[#allocation3 + $0x8] sm:$0xff]  ;;  %v2250_v40 = vld [vmem:[#allocation2 + $0x18] sm:$0xff]  ;;  %9627 = vrcp.f32 %v10074_v45  ;;  %vm3266_vm14 = vcmask 64512   ;;  %s11991_s3 = sld [smem:[#allocation26_spill]] }
 0x1e7   : > { %v2256_v37 = vadd.f32 %v2249_v36, %v2248_v39  ;;  %v2251_v42 = vld [vmem:[#allocation2 + $0x8] sm:$0xff]  ;;  %v7463_v16 = vld [vmem:[%s10371_s0 + $0x150] sm:$0xf]  ;;  %v9093_v20 = vld [vmem:[%s10371_s0 + $0x154] sm:$0xf] }
 0x1e8   : > { %2336 = vadd.xlane.f32.xlu1 %v2335_v34  ;;  %v2259_v44 = vadd.f32 %v2251_v42, %v2250_v40  ;;  %v9096_v6 = vld [vmem:[%s10371_s0 + $0x164] sm:$0xf0]  ;;  %v7655_v17 = vld [vmem:[%s10371_s0 + $0x2d0] sm:$0xf]  ;;  %v7465_v21 = vld [vmem:[%s10371_s0 + $0x168] sm:$0xf0] }
 0x1e9   : > { %2257 = vadd.xlane.f32.xlu0 %v2256_v37  ;;  %v7464_v18 = vor.u32 %v9096_v6, %v7463_v16  ;;  %v9144_v19 = vld [vmem:[%s10371_s0 + $0x2e4] sm:$0xf0]  ;;  %v7468_v24 = vor.u32 %v9093_v20, %v7465_v21  ;;  %v9141_v12 = vld [vmem:[%s10371_s0 + $0x2d4] sm:$0xf]  ;;  %v7657_v25 = vld [vmem:[%s10371_s0 + $0x2e8] sm:$0xf0] }
 0x1ea   : > { %v7656_v22 = vor.u32 %v9144_v19, %v7655_v17  ;;  %v7660_v26 = vor.u32 %v9141_v12, %v7657_v25  ;;  %v7439_v27 = vld [vmem:[%s10371_s0 + $0x120] sm:$0xf]  ;;  %v9090_v11 = vld [vmem:[%s10371_s0 + $0x134] sm:$0xf0]  ;;  %v7633_v37 = vld [vmem:[%s10371_s0 + $0x2b8] sm:$0xf0] }
 0x1eb   : > { %v2255_v31 = vld [vmem:[#allocation3 + $0x10] sm:$0xff]  ;;  %2973 = vmatpush.bf16.msra.mxu0 %v7464_v18  ;;  %3007 = vmatpush.bf16.msra.mxu2 %v7468_v24  ;;  %v7631_v28 = vld [vmem:[%s10371_s0 + $0x2a0] sm:$0xf]  ;;  %v7440_v29 = vor.u32 %v9090_v11, %v7439_v27  ;;  %v9138_v35 = vld [vmem:[%s10371_s0 + $0x2b4] sm:$0xf0] }
 0x1ec   : > { %v2338_v43 = vadd.f32 %v2255_v31, %v2254_v38  ;;  %v9628_v41 = vpop.eup %9627  ;;  %2990 = vmatpush.bf16.msra.mxu1 %v7656_v22  ;;  %3024 = vmatpush.bf16.msra.mxu3 %v7660_v26  ;;  %v9081_v45 = vld [vmem:[%s10371_s0 + $0xf4] sm:$0xf]  ;;  %v7561_v18 = vld [vmem:[%s10371_s0 + $0x228] sm:$0xf0]  ;;  %v7343_v20 = vld [vmem:[%s10371_s0 + $0x60] sm:$0xf] }
 0x1ed   : > { %v2263_v46 = vmul.f32 256.0, %v9628_v41  ;;  %vm2267_vm0 = vweird.f32 %v9628_v41  ;;  %v9117_v17 = vld [vmem:[%s10371_s0 + $0x214] sm:$0xf]  ;;  %v9066_v21 = vld [vmem:[%s10371_s0 + $0x74] sm:$0xf0]  ;;  %p8853_p6 = scmp.ne.s32.totalorder %s11991_s3, 4 }
 0x1ee   : > { %v7564_v19 = vor.u32 %v9117_v17, %v7561_v18  ;;  %v7344_v22 = vor.u32 %v9066_v21, %v7343_v20  ;;  %v7535_v24 = vld [vmem:[%s10371_s0 + $0x1e0] sm:$0xf]  ;;  %v9114_v12 = vld [vmem:[%s10371_s0 + $0x1f4] sm:$0xf0]  ;;  %v9063_v25 = vld [vmem:[%s10371_s0 + $0x64] sm:$0xf] }
 0x1ef   : > { %v2264_v47 = vsub.f32 1.0, %v2263_v46  ;;  %2974 = vmatpush.bf16.msra.mxu0 %v7440_v29  ;;  %v7536_v26 = vor.u32 %v9114_v12, %v7535_v24  ;;  %v7345_v27 = vld [vmem:[%s10371_s0 + $0x78] sm:$0xf0]  ;;  %v9111_v11 = vld [vmem:[%s10371_s0 + $0x1e4] sm:$0xf] }
 0x1f0   : > { %2339 = vadd.xlane.f32.xlu1 %v2338_v43  ;;  %v7348_v29 = vor.u32 %v9063_v25, %v7345_v27  ;;  %v7665_v20 = vld [vmem:[%s10371_s0 + $0x2f0] sm:$0xf0]  ;;  %v7447_v21 = vld [vmem:[%s10371_s0 + $0x128] sm:$0xf]  ;;  %v9091_v12 = vld [vmem:[%s10371_s0 + $0x13c] sm:$0xf0] }
 0x1f1   : > { %2260 = vadd.xlane.f32.xlu0 %v2259_v44  ;;  %v2265_v48 = vmul.f32 %v9628_v41, %v2264_v47  ;;  %v9132_v44 = vld [vmem:[%s10371_s0 + $0x284] sm:$0xf0] }
 0x1f2   : > { %v7639_v25 = vld [vmem:[%s10371_s0 + $0x2a8] sm:$0xf] }
 0x1f3   : > { %v2266_v49 = vadd.f32 %v9628_v41, %v2265_v48  ;;  %v9129_v48 = vld [vmem:[%s10371_s0 + $0x274] sm:$0xf] }
 0x1f5   : > { %v10660_v50 = vsel %vm2267_vm0, %v9628_v41, %v2266_v49  ;;  %v7417_v41 = vld [vmem:[%s10371_s0 + $0x108] sm:$0xf0] }
 0x1f6   : > { %v7420_v47 = vor.u32 %v9081_v45, %v7417_v41  ;;  %v7609_v49 = vld [vmem:[%s10371_s0 + $0x288] sm:$0xf0] }
 0x25b   : > { %v2337_v51 = vpop.xlane.xlu1 %2336 }
 0x25c   : > { %v2341_v53 = vmul.f32 %v2337_v51, %v10660_v50  ;;  %v2258_v54 = vpop.xlane.xlu0 %2257  ;;  %v7612_v51 = vor.u32 %v9129_v48, %v7609_v49  ;;  %v7295_v48 = vld [vmem:[%s10371_s0] sm:$0xf]  ;;  %v9054_v49 = vld [vmem:[%s10371_s0 + $0x14] sm:$0xf0] }
 0x25d   : > { %v2269_v52 = vmul.f32 %v10660_v50, %v2258_v54  ;;  %v9078_v54 = vld [vmem:[%s10371_s0 + $0xd4] sm:$0xf0] }
 0x25e   : > { %v10664_v57 = vsub.f32 %v2252_v23, %v2341_v53  ;;  %v10666_v60 = vsub.f32 %v2253_v33, %v2341_v53  ;;  %v9087_v23 = vld [vmem:[%s10371_s0 + $0x124] sm:$0xf]  ;;  %v7441_v33 = vld [vmem:[%s10371_s0 + $0x138] sm:$0xf0]  ;;  %v7391_v53 = vld [vmem:[%s10371_s0 + $0xc0] sm:$0xf] }
 0x25f   : > { %v10668_v61 = vsub.f32 %v2248_v39, %v2269_v52  ;;  %v10670_v55 = vsub.f32 %v2249_v36, %v2269_v52  ;;  %v7632_v39 = vor.u32 %v9138_v35, %v7631_v28  ;;  %v7444_v34 = vor.u32 %v9087_v23, %v7441_v33  ;;  %v9135_v36 = vld [vmem:[%s10371_s0 + $0x2a4] sm:$0xf]  ;;  %v7583_v52 = vld [vmem:[%s10371_s0 + $0x240] sm:$0xf]  ;;  %v7537_v28 = vld [vmem:[%s10371_s0 + $0x1f8] sm:$0xf0] }
 0x260   : > { %v2347_v62 = vmul.f32 %v10664_v57, %v10664_v57  ;;  %v2348_v63 = vmul.f32 %v10666_v60, %v10666_v60  ;;  %v7540_v35 = vor.u32 %v9111_v11, %v7537_v28  ;;  %v7319_v23 = vld [vmem:[%s10371_s0 + $0x30] sm:$0xf]  ;;  %v9060_v33 = vld [vmem:[%s10371_s0 + $0x44] sm:$0xf0]  ;;  %v7448_v28 = vor.u32 %v9091_v12, %v7447_v21 }
 0x261   : > { %v2275_v0 = vmul.f32 %v10668_v61, %v10668_v61  ;;  %v2276_v1 = vmul.f32 %v10670_v55, %v10670_v55  ;;  %2991 = vmatpush.bf16.msra.mxu1 %v7632_v39  ;;  %3008 = vmatpush.bf16.msra.mxu2 %v7444_v34  ;;  %v7511_v39 = vld [vmem:[%s10371_s0 + $0x1b0] sm:$0xf]  ;;  %v7320_v34 = vor.u32 %v9060_v33, %v7319_v23  ;;  %v7449_v23 = vld [vmem:[%s10371_s0 + $0x140] sm:$0xf0] }
 0x262   : > { %v2351_v2 = vadd.f32 %v2348_v63, %v2347_v62  ;;  %v7392_v62 = vor.u32 %v9078_v54, %v7391_v53  ;;  %v9126_v63 = vld [vmem:[%s10371_s0 + $0x254] sm:$0xf0]  ;;  %v7296_v54 = vor.u32 %v9054_v49, %v7295_v48  ;;  %v9082_v49 = vld [vmem:[%s10371_s0 + $0xfc] sm:$0xf] }
 0x263   : > { %v2340_v58 = vpop.xlane.xlu1 %2339  ;;  %v2279_v3 = vadd.f32 %v2276_v1, %v2275_v0  ;;  %v9075_v0 = vld [vmem:[%s10371_s0 + $0xc4] sm:$0xf]  ;;  %v7393_v1 = vld [vmem:[%s10371_s0 + $0xd8] sm:$0xf0] }
 0x264   : > { %v2342_v5 = vmul.f32 %v2340_v58, %v10660_v50  ;;  %v2261_v4 = vpop.xlane.xlu0 %2260  ;;  %2352 = vadd.xlane.f32.xlu0 %v2351_v2  ;;  %v7584_v2 = vor.u32 %v9126_v63, %v7583_v52  ;;  %v7396_v58 = vor.u32 %v9075_v0, %v7393_v1  ;;  %v9102_v52 = vld [vmem:[%s10371_s0 + $0x194] sm:$0xf0]  ;;  %v7297_v1 = vld [vmem:[%s10371_s0 + $0x18] sm:$0xf0] }
 0x265   : > { %v2270_v56 = vmul.f32 %v10660_v50, %v2261_v4  ;;  %2280 = vadd.xlane.f32.xlu2 %v2279_v3  ;;  %3009 = vmatpush.bf16.msra.mxu2 %v7420_v47  ;;  %v9123_v3 = vld [vmem:[%s10371_s0 + $0x244] sm:$0xf] }
 0x266   : > { %v10682_v7 = vsub.f32 %v2254_v38, %v2342_v5  ;;  %v10684_v8 = vsub.f32 %v2255_v31, %v2342_v5  ;;  %v7636_v38 = vor.u32 %v9135_v36, %v7633_v37  ;;  %v7415_v31 = vld [vmem:[%s10371_s0 + $0xf0] sm:$0xf]  ;;  %v7585_v5 = vld [vmem:[%s10371_s0 + $0x258] sm:$0xf0]  ;;  %v9108_v36 = vld [vmem:[%s10371_s0 + $0x1c4] sm:$0xf0] }
 0x267   : > { %v10686_v59 = vsub.f32 %v2250_v40, %v2270_v56  ;;  %v10688_v9 = vsub.f32 %v2251_v42, %v2270_v56  ;;  %v9084_v40 = vld [vmem:[%s10371_s0 + $0x104] sm:$0xf0]  ;;  %v7607_v42 = vld [vmem:[%s10371_s0 + $0x270] sm:$0xf]  ;;  %v7588_v4 = vor.u32 %v9123_v3, %v7585_v5  ;;  %v9057_v37 = vld [vmem:[%s10371_s0 + $0x34] sm:$0xf] }
 0x268   : > { %v2349_v30 = vmul.f32 %v10682_v7, %v10682_v7  ;;  %v2350_v32 = vmul.f32 %v10684_v8, %v10684_v8  ;;  %3025 = vmatpush.bf16.msra.mxu3 %v7636_v38  ;;  %v7416_v43 = vor.u32 %v9084_v40, %v7415_v31  ;;  %v7608_v46 = vor.u32 %v9132_v44, %v7607_v42  ;;  %v7367_v56 = vld [vmem:[%s10371_s0 + $0x90] sm:$0xf]  ;;  %v7321_v38 = vld [vmem:[%s10371_s0 + $0x48] sm:$0xf0]  ;;  %v7489_v3 = vld [vmem:[%s10371_s0 + $0x198] sm:$0xf0] }
 0x269   : > { %v2277_v10 = vmul.f32 %v10686_v59, %v10686_v59  ;;  %v2278_v13 = vmul.f32 %v10688_v9, %v10688_v9  ;;  %3010 = vmatpush.bf16.msra.mxu2 %v7396_v58  ;;  %v7512_v40 = vor.u32 %v9108_v36, %v7511_v39  ;;  %v7324_v42 = vor.u32 %v9057_v37, %v7321_v38  ;;  %v7513_v44 = vld [vmem:[%s10371_s0 + $0x1c8] sm:$0xf0]  ;;  %v7641_v37 = vld [vmem:[%s10371_s0 + $0x2c0] sm:$0xf0] }
 0x26a   : > { %v2354_v14 = vadd.f32 %v2350_v32, %v2349_v30  ;;  %2975 = vmatpush.bf16.msra.mxu0 %v7416_v43  ;;  %2992 = vmatpush.bf16.msra.mxu1 %v7608_v46  ;;  %v9072_v30 = vld [vmem:[%s10371_s0 + $0xa4] sm:$0xf0]  ;;  %v9105_v43 = vld [vmem:[%s10371_s0 + $0x1b4] sm:$0xf]  ;;  %v9136_v36 = vld [vmem:[%s10371_s0 + $0x2ac] sm:$0xf] }
 0x26b   : > { %v2282_v15 = vadd.f32 %v2278_v13, %v2277_v10  ;;  %v7368_v32 = vor.u32 %v9072_v30, %v7367_v56  ;;  %v7559_v10 = vld [vmem:[%s10371_s0 + $0x210] sm:$0xf]  ;;  %v9120_v13 = vld [vmem:[%s10371_s0 + $0x224] sm:$0xf0]  ;;  %v7516_v46 = vor.u32 %v9105_v43, %v7513_v44  ;;  %v7663_v30 = vld [vmem:[%s10371_s0 + $0x2d8] sm:$0xf]  ;;  %v7644_v44 = vor.u32 %v9136_v36, %v7641_v37 }
 0x26c   : > { %2355 = vadd.xlane.f32.xlu1 %v2354_v14  ;;  %3026 = vmatpush.bf16.msra.mxu3 %v7612_v51  ;;  %v9069_v14 = vld [vmem:[%s10371_s0 + $0x94] sm:$0xf]  ;;  %v7560_v16 = vor.u32 %v9120_v13, %v7559_v10  ;;  %v7487_v51 = vld [vmem:[%s10371_s0 + $0x180] sm:$0xf]  ;;  %v9097_v56 = vld [vmem:[%s10371_s0 + $0x16c] sm:$0xf0] }
 0x26d   : > { %2283 = vadd.xlane.f32.xlu2 %v2282_v15  ;;  %v7369_v15 = vld [vmem:[%s10371_s0 + $0xa8] sm:$0xf0]  ;;  %v7488_v0 = vor.u32 %v9102_v52, %v7487_v51  ;;  %v9145_v13 = vld [vmem:[%s10371_s0 + $0x2ec] sm:$0xf0]  ;;  %v7425_v51 = vld [vmem:[%s10371_s0 + $0x110] sm:$0xf0] }
 0x26e   : > { %2976 = vmatpush.bf16.msra.mxu0 %v7392_v62  ;;  %2993 = vmatpush.bf16.msra.mxu1 %v7584_v2  ;;  %v7372_v6 = vor.u32 %v9069_v14, %v7369_v15  ;;  %v9051_v62 = vld [vmem:[%s10371_s0 + $0x4] sm:$0xf]  ;;  %v9094_v14 = vld [vmem:[%s10371_s0 + $0x15c] sm:$0xf]  ;;  %v7473_v15 = vld [vmem:[%s10371_s0 + $0x170] sm:$0xf0]  ;;  %v7664_v17 = vor.u32 %v9145_v13, %v7663_v30  ;;  %v7428_v52 = vor.u32 %v9082_v49, %v7425_v51 }
 0x26f   : > { %v9099_v2 = vld [vmem:[%s10371_s0 + $0x184] sm:$0xf]  ;;  %v7300_v58 = vor.u32 %v9051_v62, %v7297_v1  ;;  %v7476_v18 = vor.u32 %v9094_v14, %v7473_v15  ;;  %v7617_v62 = vld [vmem:[%s10371_s0 + $0x290] sm:$0xf0]  ;;  %v10816_v1 = vld [vmem:[%s10391_s23 + $0x8] sm:$0xff] }
 0x270   : > { %3027 = vmatpush.bf16.msra.mxu3 %v7588_v4  ;;  %3011 = vmatpush.bf16.msra.mxu2 %v7372_v6  ;;  %v7492_v5 = vor.u32 %v9099_v2, %v7489_v3  ;;  %v7471_v4 = vld [vmem:[%s10371_s0 + $0x158] sm:$0xf]  ;;  %v9079_v3 = vld [vmem:[%s10371_s0 + $0xdc] sm:$0xf0]  ;;  %v9076_v13 = vld [vmem:[%s10371_s0 + $0xcc] sm:$0xf] }
 0x271   : > { %v7472_v10 = vor.u32 %v9097_v56, %v7471_v4  ;;  %v7375_v36 = vld [vmem:[%s10371_s0 + $0x98] sm:$0xf]  ;;  %v9073_v37 = vld [vmem:[%s10371_s0 + $0xac] sm:$0xf0] }
 0x272   : > { %2977 = vmatpush.bf16.msra.mxu0 %v7368_v32  ;;  %2994 = vmatpush.bf16.msra.mxu1 %v7560_v16 }
 0x274   : > { %3028 = vmatpush.bf16.msra.mxu3 %v7564_v19  ;;  %3012 = vmatpush.bf16.msra.mxu2 %v7348_v29  ;;  %v9142_v19 = vld [vmem:[%s10371_s0 + $0x2dc] sm:$0xf] }
 0x275   : > { %v7668_v24 = vor.u32 %v9142_v19, %v7665_v20  ;;  %v2325_v19 = vperm.slane %v10816_v1, 2  ;;  %v2326_v20 = vperm.slane %v10816_v1, 6 }
 0x276   : > { %2978 = vmatpush.bf16.msra.mxu0 %v7344_v22  ;;  %2995 = vmatpush.bf16.msra.mxu1 %v7536_v26  ;;  %v9139_v26 = vld [vmem:[%s10371_s0 + $0x2bc] sm:$0xf0] }
 0x277   : > { %v7640_v29 = vor.u32 %v9139_v26, %v7639_v25 }
 0x278   : > { %3029 = vmatpush.bf16.msra.mxu3 %v7540_v35  ;;  %3013 = vmatpush.bf16.msra.mxu2 %v7324_v42  ;;  %v9088_v35 = vld [vmem:[%s10371_s0 + $0x12c] sm:$0xf]  ;;  %v10802_v42 = vld [vmem:[%s10391_s23] sm:$0xff] }
 0x279   : > { %v2314_v4 = vperm.slane %v10802_v42, 2  ;;  %v2315_v56 = vperm.slane %v10802_v42, 6 }
 0x27a   : > { %2979 = vmatpush.bf16.msra.mxu0 %v7320_v34  ;;  %2996 = vmatpush.bf16.msra.mxu1 %v7512_v40  ;;  %v7452_v34 = vor.u32 %v9088_v35, %v7449_v23  ;;  %v9085_v40 = vld [vmem:[%s10371_s0 + $0x10c] sm:$0xf0] }
 0x27c   : > { %3030 = vmatpush.bf16.msra.mxu3 %v7516_v46  ;;  %3014 = vmatpush.bf16.msra.mxu2 %v7300_v58 }
 0x27e   : > { %2980 = vmatpush.bf16.msra.mxu0 %v7296_v54  ;;  %2997 = vmatpush.bf16.msra.mxu1 %v7488_v0  ;;  %v9130_v54 = vld [vmem:[%s10371_s0 + $0x27c] sm:$0xf]  ;;  %v7399_v0 = vld [vmem:[%s10371_s0 + $0xc8] sm:$0xf] }
 0x27f   : > { %v7620_v58 = vor.u32 %v9130_v54, %v7617_v62  ;;  %v7351_v62 = vld [vmem:[%s10371_s0 + $0x68] sm:$0xf] }
 0x280   : > { %3031 = vmatpush.bf16.msra.mxu3 %v7492_v5  ;;  %3075 = vmatpush.bf16.msrb.mxu2 %v7476_v18  ;;  %v7591_v5 = vld [vmem:[%s10371_s0 + $0x248] sm:$0xf] }
 0x282   : > { %3041 = vmatpush.bf16.msrb.mxu0 %v7472_v10  ;;  %3058 = vmatpush.bf16.msrb.mxu1 %v7664_v17  ;;  %v9127_v10 = vld [vmem:[%s10371_s0 + $0x25c] sm:$0xf0]  ;;  %v9124_v17 = vld [vmem:[%s10371_s0 + $0x24c] sm:$0xf] }
 0x284   : > { %3092 = vmatpush.bf16.msrb.mxu3 %v7668_v24  ;;  %3076 = vmatpush.bf16.msrb.mxu2 %v7452_v34  ;;  %v7593_v24 = vld [vmem:[%s10371_s0 + $0x260] sm:$0xf0] }
 0x285   : > { %v7596_v26 = vor.u32 %v9124_v17, %v7593_v24 }
 0x286   : > { %3042 = vmatpush.bf16.msrb.mxu0 %v7448_v28  ;;  %3059 = vmatpush.bf16.msrb.mxu1 %v7640_v29  ;;  %v10843_v28 = vperm.slane %v2314_v4, 2  ;;  %v10845_v29 = vperm.slane %v2315_v56, 2  ;;  %v9115_v4 = vld [vmem:[%s10371_s0 + $0x1fc] sm:$0xf0]  ;;  %v9064_v56 = vld [vmem:[%s10371_s0 + $0x6c] sm:$0xf] }
 0x288   : > { %3093 = vmatpush.bf16.msrb.mxu3 %v7644_v44  ;;  %3077 = vmatpush.bf16.msrb.mxu2 %v7428_v52  ;;  %v9070_v44 = vld [vmem:[%s10371_s0 + $0x9c] sm:$0xf]  ;;  %v7569_v52 = vld [vmem:[%s10371_s0 + $0x230] sm:$0xf0] }
 0x28c   : > { %3094 = vmatpush.bf16.msrb.mxu3 %v7620_v58 }
 0x290   : > { %3095 = vmatpush.bf16.msrb.mxu3 %v7596_v26  ;;  %v9058_v26 = vld [vmem:[%s10371_s0 + $0x3c] sm:$0xf] }
 0x2d7   : > { %v2353_v31 = vpop.xlane.xlu0 %2352 }
 0x2d8   : > { %v2281_v45 = vpop.xlane.xlu2 %2280  ;;  %v2357_v41 = vmul.f32 %v2353_v31, %v10660_v50  ;;  %v7423_v31 = vld [vmem:[%s10371_s0 + $0xf8] sm:$0xf] }
 0x2d9   : > { %v2285_v47 = vmul.f32 %v2281_v45, %v10660_v50  ;;  %v7615_v45 = vld [vmem:[%s10371_s0 + $0x278] sm:$0xf] }
 0x2da   : > { %v10759_v53 = vadd.f32 1e-05, %v2357_v41  ;;  %v9133_v41 = vld [vmem:[%s10371_s0 + $0x28c] sm:$0xf0] }
 0x2db   : > { %v10763_v63 = vadd.f32 1e-05, %v2285_v47  ;;  %v7424_v47 = vor.u32 %v9085_v40, %v7423_v31  ;;  %v7616_v48 = vor.u32 %v9133_v41, %v7615_v45  ;;  %v10855_v31 = vperm.slane %v2325_v19, 2  ;;  %v9061_v19 = vld [vmem:[%s10371_s0 + $0x4c] sm:$0xf0] }
 0x2dc   : > { %9629 = vrsqrt.f32 %v10759_v53  ;;  %v10862_v45 = vperm.slane %v2326_v20, 2  ;;  %v7519_v20 = vld [vmem:[%s10371_s0 + $0x1b8] sm:$0xf]  ;;  %vm2367_vm7 = vweird.f32 %v10759_v53 }
 0x2dd   : > { %9631 = vrsqrt.f32 %v10763_v63  ;;  %3043 = vmatpush.bf16.msrb.mxu0 %v7424_v47  ;;  %3060 = vmatpush.bf16.msrb.mxu1 %v7616_v48  ;;  %vm2295_vm2 = vweird.f32 %v10763_v63  ;;  %v7377_v47 = vld [vmem:[%s10371_s0 + $0xb0] sm:$0xf0]  ;;  %v9118_v48 = vld [vmem:[%s10371_s0 + $0x21c] sm:$0xf] }
 0x2de   : > { %v7380_v54 = vor.u32 %v9070_v44, %v7377_v47 }
 0x2df   : > { %v2356_v32 = vpop.xlane.xlu1 %2355 }
 0x2e0   : > { %v2358_v16 = vmul.f32 %v2356_v32, %v10660_v50  ;;  %v2284_v6 = vpop.xlane.xlu2 %2283  ;;  %v7400_v32 = vor.u32 %v9079_v3, %v7399_v0  ;;  %v9067_v3 = vld [vmem:[%s10371_s0 + $0x7c] sm:$0xf0] }
 0x2e1   : > { %v2286_v22 = vmul.f32 %v2284_v6, %v10660_v50  ;;  %v7401_v6 = vld [vmem:[%s10371_s0 + $0xe0] sm:$0xf0] }
 0x2e2   : > { %v10784_v27 = vpop.eup %9629  ;;  %v10786_v11 = vadd.f32 1e-05, %v2358_v16  ;;  %v7592_v16 = vor.u32 %v9127_v10, %v7591_v5  ;;  %3044 = vmatpush.bf16.msrb.mxu0 %v7400_v32  ;;  %v7543_v5 = vld [vmem:[%s10371_s0 + $0x1e8] sm:$0xf] }
 0x2e3   : > { %v10790_v33 = vpop.eup %9631  ;;  %v10792_v39 = vadd.f32 1e-05, %v2286_v22  ;;  %v2362_v43 = vmul.f32 %v10784_v27, %v10759_v53  ;;  %v7404_v22 = vor.u32 %v9076_v13, %v7401_v6  ;;  %v7544_v10 = vor.u32 %v9115_v4, %v7543_v5  ;;  %v7327_v6 = vld [vmem:[%s10371_s0 + $0x38] sm:$0xf]  ;;  %v7671_v4 = vld [vmem:[%s10371_s0 + $0x2e0] sm:$0xf] }
 0x2e4   : > { %v2290_v38 = vmul.f32 %v10790_v33, %v10763_v63  ;;  %9633 = vrsqrt.f32 %v10786_v11  ;;  %vm2296_vm1 = vweird.f32 %v10790_v33  ;;  %3061 = vmatpush.bf16.msrb.mxu1 %v7592_v16  ;;  %v7545_v16 = vld [vmem:[%s10371_s0 + $0x200] sm:$0xf0]  ;;  %vm2377_vm8 = vweird.f32 %v10786_v11  ;;  %v9098_v53 = vld [vmem:[%s10371_s0 + $0x174] sm:$0xf0] }
 0x2e5   : > { %9635 = vrsqrt.f32 %v10792_v39  ;;  %v2363_v30 = vmul.f32 %v10784_v27, %v2362_v43  ;;  %vm2297_vm3 = vmor %vm2295_vm2, %vm2296_vm1  ;;  %3078 = vmatpush.bf16.msrb.mxu2 %v7404_v22  ;;  %v7376_v43 = vor.u32 %v9073_v37, %v7375_v36  ;;  %vm2305_vm5 = vweird.f32 %v10792_v39 }
 0x2e6   : > { %v2291_v46 = vmul.f32 %v10790_v33, %v2290_v38  ;;  %v7567_v38 = vld [vmem:[%s10371_s0 + $0x218] sm:$0xf]  ;;  %vm2368_vm10 = vweird.f32 %v10784_v27 }
 0x2e7   : > { %v10847_v35 = vmul.f32 0.5, %v2363_v30  ;;  %3045 = vmatpush.bf16.msrb.mxu0 %v7376_v43  ;;  %v7353_v30 = vld [vmem:[%s10371_s0 + $0x80] sm:$0xf0]  ;;  %v9055_v43 = vld [vmem:[%s10371_s0 + $0x1c] sm:$0xf0]  ;;  %vm2369_vm12 = vmor %vm2367_vm7, %vm2368_vm10 }
 0x2e8   : > { %v2292_v2 = vmul.f32 0.5, %v2291_v46  ;;  %v7356_v13 = vor.u32 %v9064_v56, %v7353_v30 }
 0x2e9   : > { %v2365_v51 = vsub.f32 1.5, %v10847_v35  ;;  %3079 = vmatpush.bf16.msrb.mxu2 %v7380_v54  ;;  %v7329_v35 = vld [vmem:[%s10371_s0 + $0x50] sm:$0xf0]  ;;  %v7305_v54 = vld [vmem:[%s10371_s0 + $0x20] sm:$0xf0] }
 0x2ea   : > { %v10825_v14 = vpop.eup %9633  ;;  %v2293_v15 = vsub.f32 1.5, %v2292_v2  ;;  %v7332_v37 = vor.u32 %v9058_v26, %v7329_v35  ;;  %v9089_v26 = vld [vmem:[%s10371_s0 + $0x134] sm:$0xf] }
 0x2eb   : > { %v10830_v18 = vpop.eup %9635  ;;  %v2372_v21 = vmul.f32 %v10825_v14, %v10786_v11  ;;  %vm2378_vm9 = vweird.f32 %v10825_v14  ;;  %v2366_v47 = vmul.f32 %v10784_v27, %v2365_v51  ;;  %v9137_v35 = vld [vmem:[%s10371_s0 + $0x2b4] sm:$0xf] }
 0x2ec   : > { %v2294_v12 = vmul.f32 %v10790_v33, %v2293_v15  ;;  %v2300_v25 = vmul.f32 %v10830_v18, %v10792_v39  ;;  %vm2306_vm4 = vweird.f32 %v10830_v18  ;;  %v7572_v39 = vor.u32 %v9118_v48, %v7569_v52  ;;  %v9112_v15 = vld [vmem:[%s10371_s0 + $0x1ec] sm:$0xf]  ;;  %vm2379_vm11 = vmor %vm2377_vm8, %vm2378_vm9 }
 0x2ed   : > { %v2373_v23 = vmul.f32 %v10825_v14, %v2372_v21  ;;  %vm10875_vm6 = vmor %vm2305_vm5, %vm2306_vm4  ;;  %v7548_v17 = vor.u32 %v9112_v15, %v7545_v16  ;;  %v9109_v21 = vld [vmem:[%s10371_s0 + $0x1cc] sm:$0xf0]  ;;  %3080 = vmatpush.bf16.msrb.mxu2 %v7356_v13  ;;  %v9100_v52 = vld [vmem:[%s10371_s0 + $0x18c] sm:$0xf]  ;;  %v2370_v56 = vsel %vm2369_vm12, %v10784_v27, %v2366_v47 }
 0x2ee   : > { %v2298_v63 = vsel %vm2297_vm3, %v10790_v33, %v2294_v12  ;;  %v2301_v34 = vmul.f32 %v10830_v18, %v2300_v25  ;;  %v9121_v33 = vld [vmem:[%s10371_s0 + $0x22c] sm:$0xf0]  ;;  %3096 = vmatpush.bf16.msrb.mxu3 %v7572_v39  ;;  %v7328_v25 = vor.u32 %v9061_v19, %v7327_v6  ;;  %v7520_v36 = vor.u32 %v9109_v21, %v7519_v20  ;;  %v9143_v16 = vld [vmem:[%s10371_s0 + $0x2e4] sm:$0xf]  ;;  %v7673_v27 = vld [vmem:[%s10371_s0 + $0x2f8] sm:$0xf0] }
 0x2ef   : > { %v10857_v40 = vmul.f32 0.5, %v2373_v23  ;;  %v7568_v46 = vor.u32 %v9121_v33, %v7567_v38  ;;  %v2309_v49 = vmul.f32 %v2298_v63, %v10668_v61  ;;  %v2310_v0 = vmul.f32 %v2298_v63, %v10670_v55  ;;  %v9106_v23 = vld [vmem:[%s10371_s0 + $0x1bc] sm:$0xf]  ;;  %v7521_v38 = vld [vmem:[%s10371_s0 + $0x1d0] sm:$0xf0] }
 0x2f0   : > { %v2302_v41 = vmul.f32 0.5, %v2301_v34  ;;  %v7352_v55 = vor.u32 %v9067_v3, %v7351_v62  ;;  %v7497_v62 = vld [vmem:[%s10371_s0 + $0x1a0] sm:$0xf0]  ;;  %v7455_v6 = vld [vmem:[%s10371_s0 + $0x130] sm:$0xf]  ;;  %v7676_v20 = vor.u32 %v9143_v16, %v7673_v27 }
 0x2f1   : > { %v2375_v2 = vsub.f32 1.5, %v10857_v40  ;;  %3062 = vmatpush.bf16.msrb.mxu1 %v7568_v46  ;;  %v2320_v22 = vmul.f32 %v10843_v28, %v2309_v49  ;;  %v2321_v24 = vmul.f32 %v10845_v29, %v2310_v0  ;;  %v7303_v40 = vld [vmem:[%s10371_s0 + $0x8] sm:$0xf]  ;;  %v9052_v46 = vld [vmem:[%s10371_s0 + $0xc] sm:$0xf]  ;;  %3081 = vmatpush.bf16.msrb.mxu2 %v7332_v37  ;;  %v7500_v3 = vor.u32 %v9100_v52, %v7497_v62 }
 0x2f2   : > { %v2303_v58 = vsub.f32 1.5, %v2302_v41  ;;  %3046 = vmatpush.bf16.msrb.mxu0 %v7352_v55  ;;  %3097 = vmatpush.bf16.msrb.mxu3 %v7548_v17  ;;  %v7304_v41 = vor.u32 %v9055_v43, %v7303_v40  ;;  %v7308_v11 = vor.u32 %v9052_v46, %v7305_v54  ;;  %v7479_v55 = vld [vmem:[%s10371_s0 + $0x160] sm:$0xf]  ;;  %v9092_v21 = vld [vmem:[%s10371_s0 + $0x144] sm:$0xf0] }
 0x2f3   : > { %v2376_v48 = vmul.f32 %v10825_v14, %v2375_v2  ;;  %v2331_v0 = vadd.f32 %v10855_v31, %v2320_v22  ;;  %v7480_v30 = vor.u32 %v9098_v53, %v7479_v55  ;;  %v7647_v22 = vld [vmem:[%s10371_s0 + $0x2b0] sm:$0xf]  ;;  %v9134_v40 = vld [vmem:[%s10371_s0 + $0x294] sm:$0xf0]  ;;  %v9083_v43 = vld [vmem:[%s10371_s0 + $0x104] sm:$0xf] }
 0x2f4   : > { %v2304_v32 = vmul.f32 %v10830_v18, %v2303_v58  ;;  %v2332_v58 = vadd.f32 %v10862_v45, %v2321_v24  ;;  %v9140_v24 = vld [vmem:[%s10371_s0 + $0x2c4] sm:$0xf0]  ;;  %v7407_v47 = vld [vmem:[%s10371_s0 + $0xd0] sm:$0xf]  ;;  %v7385_v16 = vld [vmem:[%s10371_s0 + $0xb8] sm:$0xf0] }
 0x2f5   : > { %3063 = vmatpush.bf16.msrb.mxu1 %v7544_v10  ;;  %v2380_v5 = vsel %vm2379_vm11, %v10825_v14, %v2376_v48  ;;  %v9095_v10 = vld [vmem:[%s10371_s0 + $0x164] sm:$0xf]  ;;  %v7481_v14 = vld [vmem:[%s10371_s0 + $0x178] sm:$0xf0]  ;;  %3082 = vmatpush.bf16.msrb.mxu2 %v7308_v11  ;;  %v9080_v52 = vld [vmem:[%s10371_s0 + $0xe4] sm:$0xf0] }
 0x2f6   : > { %v2308_v12 = vsel %vm10875_vm6, %v10830_v18, %v2304_v32  ;;  %v7495_v18 = vld [vmem:[%s10371_s0 + $0x188] sm:$0xf]  ;;  %3047 = vmatpush.bf16.msrb.mxu0 %v7328_v25  ;;  %v9146_v32 = vld [vmem:[%s10371_s0 + $0x2f4] sm:$0xf0]  ;;  %v7484_v15 = vor.u32 %v9095_v10, %v7481_v14  ;;  %v2383_v17 = vmul.f32 %v2380_v5, %v10682_v7  ;;  %v2384_v19 = vmul.f32 %v2380_v5, %v10684_v8  ;;  %v7457_v8 = vld [vmem:[%s10371_s0 + $0x148] sm:$0xf0] }
 0x2f7   : > { %v2311_v63 = vmul.f32 %v2308_v12, %v10686_v59  ;;  %v2312_v34 = vmul.f32 %v2308_v12, %v10688_v9  ;;  %v7524_v59 = vor.u32 %v9106_v23, %v7521_v38  ;;  %v9103_v9 = vld [vmem:[%s10371_s0 + $0x19c] sm:$0xf0]  ;;  %v7672_v13 = vor.u32 %v9146_v32, %v7671_v4  ;;  %v7599_v62 = vld [vmem:[%s10371_s0 + $0x250] sm:$0xf]  ;;  %v7409_v11 = vld [vmem:[%s10371_s0 + $0xe8] sm:$0xf0] }
 0x2f8   : > { %v7496_v49 = vor.u32 %v9103_v9, %v7495_v18  ;;  %v2381_v12 = vmul.f32 %v2370_v56, %v10664_v57  ;;  %v7456_v25 = vor.u32 %v9092_v21, %v7455_v6  ;;  %v7648_v7 = vor.u32 %v9140_v24, %v7647_v22  ;;  %v7431_v57 = vld [vmem:[%s10371_s0 + $0x100] sm:$0xf]  ;;  %v7433_v9 = vld [vmem:[%s10371_s0 + $0x118] sm:$0xf0]  ;;  %v7601_v5 = vld [vmem:[%s10371_s0 + $0x268] sm:$0xf0] }
 0x2f9   : > { %v2322_v33 = vmul.f32 %v10843_v28, %v2311_v63  ;;  %v2323_v44 = vmul.f32 %v10845_v29, %v2312_v34  ;;  %3064 = vmatpush.bf16.msrb.mxu1 %v7520_v36  ;;  %3098 = vmatpush.bf16.msrb.mxu3 %v7524_v59  ;;  %v2382_v23 = vmul.f32 %v2370_v56, %v10666_v60  ;;  %v7649_v34 = vld [vmem:[%s10371_s0 + $0x2c8] sm:$0xf0]  ;;  %v9086_v36 = vld [vmem:[%s10371_s0 + $0x114] sm:$0xf0]  ;;  %v7623_v38 = vld [vmem:[%s10371_s0 + $0x280] sm:$0xf] }
 0x2fa   : > { %3048 = vmatpush.bf16.msrb.mxu0 %v7304_v41  ;;  %v7460_v63 = vor.u32 %v9089_v26, %v7457_v8  ;;  %v7652_v37 = vor.u32 %v9137_v35, %v7649_v34  ;;  %v2387_v59 = vmul.f32 %v2383_v17, %v10843_v28  ;;  %v2388_v18 = vmul.f32 %v2384_v19, %v10845_v29  ;;  %v9131_v60 = vld [vmem:[%s10371_s0 + $0x284] sm:$0xf]  ;;  %v7383_v10 = vld [vmem:[%s10371_s0 + $0xa0] sm:$0xf]  ;;  %v7577_v17 = vld [vmem:[%s10371_s0 + $0x238] sm:$0xf0] }
 0x2fb   : > { %v2333_v51 = vadd.f32 %v10855_v31, %v2322_v33  ;;  %v2334_v2 = vadd.f32 %v10862_v45, %v2323_v44  ;;  %v7625_v33 = vld [vmem:[%s10371_s0 + $0x298] sm:$0xf0]  ;;  %v2385_v44 = vmul.f32 %v2381_v12, %v10843_v28  ;;  %v7432_v41 = vor.u32 %v9086_v36, %v7431_v57  ;;  %v7575_v14 = vld [vmem:[%s10371_s0 + $0x220] sm:$0xf]  ;;  %v9119_v6 = vld [vmem:[%s10371_s0 + $0x224] sm:$0xf] }
 0x2fc   : > { %v7624_v46 = vor.u32 %v9134_v40, %v7623_v38  ;;  %v2386_v48 = vmul.f32 %v2382_v23, %v10845_v29  ;;  %v7628_v54 = vor.u32 %v9131_v60, %v7625_v33  ;;  %v2391_v28 = vadd.f32 %v2387_v59, %v10855_v31  ;;  %v7359_v19 = vld [vmem:[%s10371_s0 + $0x70] sm:$0xf]  ;;  %v9068_v22 = vld [vmem:[%s10371_s0 + $0x84] sm:$0xf0]  ;;  %v9065_v26 = vld [vmem:[%s10371_s0 + $0x74] sm:$0xf] }
 0x2fd   : > { %v10930_v61 = vpack.c.bf16 %v2333_v51, %v2331_v0  ;;  %v10932_v39 = vpack.c.bf16 %v2334_v2, %v2332_v58  ;;  %3065 = vmatpush.bf16.msrb.mxu1 %v7496_v49  ;;  %3099 = vmatpush.bf16.msrb.mxu3 %v7500_v3  ;;  %v7436_v49 = vor.u32 %v9083_v43, %v7433_v9  ;;  %v9128_v0 = vld [vmem:[%s10371_s0 + $0x264] sm:$0xf0]  ;;  %v9077_v51 = vld [vmem:[%s10371_s0 + $0xd4] sm:$0xf]  ;;  %v7551_v24 = vld [vmem:[%s10371_s0 + $0x1f0] sm:$0xf] }
 0x2fe   : > { %v2392_v58 = vadd.f32 %v2388_v18, %v10862_v45  ;;  %v7408_v2 = vor.u32 %v9080_v52, %v7407_v47  ;;  %v7600_v29 = vor.u32 %v9128_v0, %v7599_v62  ;;  %v9125_v3 = vld [vmem:[%s10371_s0 + $0x254] sm:$0xf]  ;;  %v2389_v55 = vadd.f32 %v2385_v44, %v10855_v31  ;;  %v9074_v31 = vld [vmem:[%s10371_s0 + $0xb4] sm:$0xf0]  ;;  %v9116_v12 = vld [vmem:[%s10371_s0 + $0x204] sm:$0xf0] }
 0x2ff   : > { %2981 = vmatmul.bf16.vlgmr.msra.gmra.mxu0 %v10930_v61  ;;  %2998 = vmatmul.bf16.vlgmr.msra.gmra.mxu1 %v10932_v39  ;;  %v2390_v53 = vadd.f32 %v2386_v48, %v10862_v45  ;;  %v7604_v32 = vor.u32 %v9125_v3, %v7601_v5  ;;  %v7384_v45 = vor.u32 %v9074_v31, %v7383_v10  ;;  %v7361_v8 = vld [vmem:[%s10371_s0 + $0x88] sm:$0xf0]  ;;  %v9113_v35 = vld [vmem:[%s10371_s0 + $0x1f4] sm:$0xf]  ;;  %v9062_v34 = vld [vmem:[%s10371_s0 + $0x54] sm:$0xf0] }
 0x300   : > { %3015 = vmatmul.bf16.vlgmr.msra.gmra.mxu2 %v10930_v61  ;;  %3032 = vmatmul.bf16.vlgmr.msra.gmra.mxu3 %v10932_v39  ;;  %v10984_v4 = vpack.c.bf16 %v2391_v28, %v2389_v55  ;;  %v7580_v21 = vor.u32 %v9119_v6, %v7577_v17  ;;  %v7553_v23 = vld [vmem:[%s10371_s0 + $0x208] sm:$0xf0]  ;;  %v7527_v57 = vld [vmem:[%s10371_s0 + $0x1c0] sm:$0xf]  ;;  %v9110_v36 = vld [vmem:[%s10371_s0 + $0x1d4] sm:$0xf0] }
 0x301   : > { %3109 = vmatpush.bf16.msra.mxu0 %v7480_v30  ;;  %3126 = vmatpush.bf16.msra.mxu1 %v7672_v13  ;;  %v10986_v56 = vpack.c.bf16 %v2392_v58, %v2390_v53  ;;  %v7412_v30 = vor.u32 %v9077_v51, %v7409_v11  ;;  %v9122_v13 = vld [vmem:[%s10371_s0 + $0x234] sm:$0xf0]  ;;  %v7556_v38 = vor.u32 %v9113_v35, %v7553_v23  ;;  %v9059_v40 = vld [vmem:[%s10371_s0 + $0x44] sm:$0xf]  ;;  %v7337_v43 = vld [vmem:[%s10371_s0 + $0x58] sm:$0xf0] }
 0x302   : > { %3143 = vmatpush.bf16.msra.mxu2 %v7484_v15  ;;  %3160 = vmatpush.bf16.msra.mxu3 %v7676_v20  ;;  %v9071_v15 = vld [vmem:[%s10371_s0 + $0xa4] sm:$0xf]  ;;  %v7576_v27 = vor.u32 %v9122_v13, %v7575_v14  ;;  %v7528_v18 = vor.u32 %v9110_v36, %v7527_v57  ;;  %v7529_v60 = vld [vmem:[%s10371_s0 + $0x1d8] sm:$0xf0]  ;;  %v7311_v33 = vld [vmem:[%s10371_s0 + $0x10] sm:$0xf]  ;;  %v7340_v47 = vor.u32 %v9059_v40, %v7337_v43 }
 0x303   : > { %v7388_v20 = vor.u32 %v9071_v15, %v7385_v16  ;;  %v9107_v9 = vld [vmem:[%s10371_s0 + $0x1c4] sm:$0xf]  ;;  %v9056_v44 = vld [vmem:[%s10371_s0 + $0x24] sm:$0xf0]  ;;  %v7313_v62 = vld [vmem:[%s10371_s0 + $0x28] sm:$0xf0] }
 0x304   : > { %v7532_v48 = vor.u32 %v9107_v9, %v7529_v60  ;;  %v9101_v0 = vld [vmem:[%s10371_s0 + $0x194] sm:$0xf]  ;;  %v7505_v28 = vld [vmem:[%s10371_s0 + $0x1a8] sm:$0xf0]  ;;  %v3178_v55 = vperm.slane %v10802_v42, 5  ;;  %v3192_v60 = vperm.slane %v10816_v1, 5 }
 0x305   : > { %3110 = vmatpush.bf16.msra.mxu0 %v7456_v25  ;;  %3127 = vmatpush.bf16.msra.mxu1 %v7648_v7  ;;  %v7360_v25 = vor.u32 %v9068_v22, %v7359_v19  ;;  %v7552_v7 = vor.u32 %v9116_v12, %v7551_v24  ;;  %v7508_v51 = vor.u32 %v9101_v0, %v7505_v28 }
 0x306   : > { %3144 = vmatpush.bf16.msra.mxu2 %v7460_v63  ;;  %3161 = vmatpush.bf16.msra.mxu3 %v7652_v37  ;;  %v7335_v63 = vld [vmem:[%s10371_s0 + $0x40] sm:$0xf]  ;;  %v7364_v37 = vor.u32 %v9065_v26, %v7361_v8  ;;  %v3191_v26 = vperm.slane %v10816_v1, 1 }
 0x307   : > { %v7336_v59 = vor.u32 %v9062_v34, %v7335_v63 }
 0x308   : > { %v3195_v23 = vperm.slane %v3191_v26, 1 }
 0x309   : > { %3111 = vmatpush.bf16.msra.mxu0 %v7432_v41  ;;  %3128 = vmatpush.bf16.msra.mxu1 %v7624_v46  ;;  %v7503_v41 = vld [vmem:[%s10371_s0 + $0x190] sm:$0xf]  ;;  %v9104_v46 = vld [vmem:[%s10371_s0 + $0x1a4] sm:$0xf0] }
 0x30a   : > { %3145 = vmatpush.bf16.msra.mxu2 %v7436_v49  ;;  %3162 = vmatpush.bf16.msra.mxu3 %v7628_v54  ;;  %v9053_v49 = vld [vmem:[%s10371_s0 + $0x14] sm:$0xf]  ;;  %v7312_v54 = vor.u32 %v9056_v44, %v7311_v33  ;;  %v7504_v52 = vor.u32 %v9104_v46, %v7503_v41  ;;  %s10075_s0 = smov 64   ;;  %v3196_v46 = vperm.slane %v3192_v60, 1 }
 0x30b   : > { %v7316_v58 = vor.u32 %v9053_v49, %v7313_v62 }
 0x30d   : > { %3112 = vmatpush.bf16.msra.mxu0 %v7408_v2  ;;  %3129 = vmatpush.bf16.msra.mxu1 %v7600_v29  ;;  %v3177_v2 = vperm.slane %v10802_v42, 1 }
 0x30e   : > { %3146 = vmatpush.bf16.msra.mxu2 %v7412_v30  ;;  %3163 = vmatpush.bf16.msra.mxu3 %v7604_v32  ;;  %v11042_v30 = vperm.slane %v3178_v55, 1 }
 0x30f   : > { %2986 = vmatmul.bf16.gmra.mxu0 %v10984_v4  ;;  %3003 = vmatmul.bf16.gmra.mxu1 %v10986_v56  ;;  %v3181_v29 = vperm.slane %v3177_v2, 1 }
 0x310   : > { %3020 = vmatmul.bf16.gmra.mxu2 %v10984_v4  ;;  %3037 = vmatmul.bf16.gmra.mxu3 %v10986_v56 }
 0x311   : > { %3113 = vmatpush.bf16.msra.mxu0 %v7384_v45  ;;  %3130 = vmatpush.bf16.msra.mxu1 %v7576_v27 }
 0x312   : > { %3147 = vmatpush.bf16.msra.mxu2 %v7388_v20  ;;  %3164 = vmatpush.bf16.msra.mxu3 %v7580_v21 }
 0x315   : > { %3114 = vmatpush.bf16.msra.mxu0 %v7360_v25  ;;  %3131 = vmatpush.bf16.msra.mxu1 %v7552_v7 }
 0x316   : > { %3148 = vmatpush.bf16.msra.mxu2 %v7364_v37  ;;  %3165 = vmatpush.bf16.msra.mxu3 %v7556_v38 }
 0x319   : > { %3115 = vmatpush.bf16.msra.mxu0 %v7336_v59  ;;  %3132 = vmatpush.bf16.msra.mxu1 %v7528_v18 }
 0x31a   : > { %3149 = vmatpush.bf16.msra.mxu2 %v7340_v47  ;;  %3166 = vmatpush.bf16.msra.mxu3 %v7532_v48 }
 0x31d   : > { %3116 = vmatpush.bf16.msra.mxu0 %v7312_v54  ;;  %3133 = vmatpush.bf16.msra.mxu1 %v7504_v52 }
 0x31e   : > { %3150 = vmatpush.bf16.msra.mxu2 %v7316_v58  ;;  %3167 = vmatpush.bf16.msra.mxu3 %v7508_v51 }
 0x31f   : > { %3049 = vmatmul.bf16.vlgmr.msrb.gmra.mxu0 %v10930_v61  ;;  %3066 = vmatmul.bf16.vlgmr.msrb.gmra.mxu1 %v10932_v39 }
 0x320   : > { %3083 = vmatmul.bf16.vlgmr.msrb.gmra.mxu2 %v10930_v61  ;;  %3100 = vmatmul.bf16.vlgmr.msrb.gmra.mxu3 %v10932_v39 }
 0x32f   : > { %3052 = vmatmul.bf16.gmra.mxu0 %v10984_v4  ;;  %3069 = vmatmul.bf16.gmra.mxu1 %v10986_v56 }
 0x330   : > { %3086 = vmatmul.bf16.gmra.mxu2 %v10984_v4  ;;  %3103 = vmatmul.bf16.gmra.mxu3 %v10986_v56 }
 0x33f   : > { %3117 = vmatmul.bf16.vlgmr.msra.gmra.mxu0 %v10930_v61  ;;  %3134 = vmatmul.bf16.vlgmr.msra.gmra.mxu1 %v10932_v39 }
 0x340   : > { %3151 = vmatmul.bf16.vlgmr.msra.gmra.mxu2 %v10930_v61  ;;  %3168 = vmatmul.bf16.vlgmr.msra.gmra.mxu3 %v10932_v39 }
 0x34f   : > { %3120 = vmatmul.bf16.gmra.mxu0 %v10984_v4  ;;  %3137 = vmatmul.bf16.gmra.mxu1 %v10986_v56 }
 0x350   : > { %3154 = vmatmul.bf16.gmra.mxu2 %v10984_v4  ;;  %3171 = vmatmul.bf16.gmra.mxu3 %v10986_v56 }
 0x37c   : > { %v2982_v11 = vpop.f32.mrf.mxu0  ;;  %v2999_v3 = vpop.f32.mrf.mxu1 }
 0x37d   : > { %v3000_v5 = vadd.f32 %v2999_v3, %v2982_v11  ;;  %v11063_v3 = vld [vmem:[%s10391_s23 + $0x10] sm:$0xff] }
 0x37e   : > { %v3202_v55 = vperm.slane %v11063_v3, 1 }
 0x37f   : > { %v3183_v53 = vadd.f32 %v3181_v29, %v3000_v5 }
 0x381   : > { %v3187_v61 = vmul.f32 0.125, %v3183_v53 }
 0x383   : > { %v3016_v39 = vpop.f32.mrf.mxu2  ;;  %v3033_v32 = vpop.f32.mrf.mxu3  ;;  %3335 = vrot.lane.b32.xlu1 %v3187_v61, %s10075_s0 }
 0x384   : > { %v3034_v4 = vadd.f32 %v3033_v32, %v3016_v39  ;;  %v2984_v10 = vpop.f32.mrf.mxu0  ;;  %v3001_v56 = vpop.f32.mrf.mxu1  ;;  %v3206_v39 = vperm.slane %v3202_v55, 1 }
 0x385   : > { %v3002_v36 = vadd.f32 %v3001_v56, %v2984_v10 }
 0x386   : > { %v3184_v31 = vadd.f32 %v11042_v30, %v3034_v4 }
 0x387   : > { %v3185_v38 = vadd.f32 %v3181_v29, %v3002_v36 }
 0x388   : > { %v11046_v14 = vmul.f32 0.125, %v3184_v31 }
 0x389   : > { %v3189_v44 = vmul.f32 0.125, %v3185_v38 }
 0x38b   : > { %v3018_v45 = vpop.f32.mrf.mxu2  ;;  %v3035_v13 = vpop.f32.mrf.mxu3  ;;  %3587 = vrot.lane.b32.xlu1 %v11046_v14, %s10075_s0 }
 0x38c   : > { %v2987_v42 = vpop.f32.mrf.mxu0  ;;  %v3004_v15 = vpop.f32.mrf.mxu1  ;;  %v3036_v62 = vadd.f32 %v3035_v13, %v3018_v45 }
 0x38e   : > { %v3186_v58 = vadd.f32 %v11042_v30, %v3036_v62 }
 0x390   : > { %v3190_v5 = vmul.f32 0.125, %v3186_v58 }
 0x393   : > { %v3021_v16 = vpop.f32.mrf.mxu2  ;;  %v3038_v27 = vpop.f32.mrf.mxu3 }
 0x394   : > { %v2988_v6 = vpop.f32.mrf.mxu0  ;;  %v3005_v17 = vpop.f32.mrf.mxu1 }
 0x39b   : > { %v3022_v19 = vpop.f32.mrf.mxu2  ;;  %v3039_v20 = vpop.f32.mrf.mxu3 }
 0x39c   : > { %v3050_v21 = vpop.f32.mrf.mxu0  ;;  %v3067_v22 = vpop.f32.mrf.mxu1  ;;  %v3212_v19 = vld [vmem:[%s11990_s20] sm:$0xff] }
 0x3a3   : > { %v3084_v24 = vpop.f32.mrf.mxu2  ;;  %v3101_v12 = vpop.f32.mrf.mxu3 }
 0x3a4   : > { %v3051_v25 = vpop.f32.mrf.mxu0  ;;  %v3068_v7 = vpop.f32.mrf.mxu1 }
 0x3ab   : > { %v3085_v8 = vpop.f32.mrf.mxu2  ;;  %v3102_v35 = vpop.f32.mrf.mxu3 }
 0x3ac   : > { %v3053_v63 = vpop.f32.mrf.mxu0  ;;  %v3070_v34 = vpop.f32.mrf.mxu1 }
 0x3ad   : > { %v3071_v57 = vadd.f32 %v3070_v34, %v3053_v63 }
 0x3af   : > { %v3197_v37 = vadd.f32 %v3195_v23, %v3071_v57 }
 0x3b1   : > { %3337 = vrot.lane.b32.xlu2 %v3197_v37, %s10075_s0  ;;  %7677 = vmatpush.xpose.msk.msrb.mxu0 %vm3213_vm13, %v3197_v37 }
 0x3b3   : > { %v3087_v40 = vpop.f32.mrf.mxu2  ;;  %v3104_v43 = vpop.f32.mrf.mxu3 }
 0x3b4   : > { %v3055_v59 = vpop.f32.mrf.mxu0  ;;  %v3072_v18 = vpop.f32.mrf.mxu1  ;;  %7678 = vmatmul.msk.f32.vlgmr.msrb.gmra.mxu0 %vm3213_vm13, %v3187_v61  ;;  %v3105_v41 = vadd.f32 %v3104_v43, %v3087_v40 }
 0x3b5   : > { %v3073_v9 = vadd.f32 %v3072_v18, %v3055_v59 }
 0x3b6   : > { %v3198_v0 = vadd.f32 %v3196_v46, %v3105_v41 }
 0x3b7   : > { %v3199_v33 = vadd.f32 %v3195_v23, %v3073_v9 }
 0x3b9   : > { %3363 = vrot.lane.b32.xlu2 %v3189_v44, %s10075_s0  ;;  %3365 = vrot.lane.b32.xlu0 %v3199_v33, %s10075_s0 }
 0x3ba   : > { %7679 = vmatpush.xpose.msk.msrb.mxu1 %vm3213_vm13, %v3199_v33 }
 0x3bb   : > { %v3089_v47 = vpop.f32.mrf.mxu2  ;;  %v3106_v48 = vpop.f32.mrf.mxu3 }
 0x3bc   : > { %v3107_v49 = vadd.f32 %v3106_v48, %v3089_v47  ;;  %v3118_v54 = vpop.f32.mrf.mxu0  ;;  %v3135_v52 = vpop.f32.mrf.mxu1 }
 0x3bd   : > { %7680 = vmatmul.msk.f32.vlgmr.msrb.gmra.mxu1 %vm3213_vm13, %v3189_v44 }
 0x3be   : > { %v3200_v28 = vadd.f32 %v3196_v46, %v3107_v49 }
 0x3c1   : > { %3617 = vrot.lane.b32.xlu2 %v3200_v28, %s10075_s0  ;;  %3589 = vrot.lane.b32.xlu0 %v3198_v0, %s10075_s0 }
 0x3c3   : > { %v3152_v51 = vpop.f32.mrf.mxu2  ;;  %v3169_v2 = vpop.f32.mrf.mxu3 }
 0x3c4   : > { %v3119_v29 = vpop.f32.mrf.mxu0  ;;  %v3136_v11 = vpop.f32.mrf.mxu1 }
 0x3c9   : > { %3615 = vrot.lane.b32.xlu0 %v3190_v5, %s10075_s0 }
 0x3cb   : > { %v3153_v53 = vpop.f32.mrf.mxu2  ;;  %v3170_v61 = vpop.f32.mrf.mxu3 }
 0x3cc   : > { %v3121_v32 = vpop.f32.mrf.mxu0  ;;  %v3138_v4 = vpop.f32.mrf.mxu1 }
 0x3cd   : > { %v3139_v10 = vadd.f32 %v3138_v4, %v3121_v32 }
 0x3cf   : > { %v11067_v56 = vadd.f32 %v3206_v39, %v3139_v10 }
 0x3d1   : > { %3307 = vmatpush.msrb.mxu2 %v11067_v56 }
 0x3d4   : > { %v3123_v30 = vpop.f32.mrf.mxu0  ;;  %v3140_v31 = vpop.f32.mrf.mxu1 }
 0x3d5   : > { %v3141_v45 = vadd.f32 %v3140_v31, %v3123_v30 }
 0x3d7   : > { %v11070_v13 = vadd.f32 %v3206_v39, %v3141_v45 }
 0x3d9   : > { %3330 = vmatpush.msrb.mxu3 %v11070_v13  ;;  %v9607_v42 = vpack.i.bf16 %v11070_v13, %v11067_v56 }
 0x3f5   : > { %v3336_v16 = vpop.permute.xlu1 %3335 }
 0x3fd   : > { %v3588_v24 = vpop.permute.xlu1 %3587 }
 0x40b   : > { %v3338_v15 = vpop.permute.xlu2 %3337 }
 0x40c   : > { %7683 = vmatpush.xpose.msk.msra.mxu0 %vm3213_vm13, %v3338_v15 }
 0x40f   : > { %7684 = vmatmul.msk.f32.vlgmr.msra.gmra.mxu0 %vm3213_vm13, %v3336_v16 }
 0x410   : > { %7689 = vmatpush.xpose.msk.msrb.mxu0 %vm3213_vm13, %v3198_v0 }
 0x413   : > { %v3364_v27 = vpop.permute.xlu2 %3363 }
 0x417   : > { %7690 = vmatmul.msk.f32.vlgmr.msrb.gmra.mxu0 %vm3213_vm13, %v11046_v14 }
 0x41b   : > { %v3618_v17 = vpop.permute.xlu2 %3617 }
 0x42b   : > { %v3366_v6 = vpop.permute.xlu0 %3365 }
 0x42c   : > { %7685 = vmatpush.xpose.msk.msra.mxu1 %vm3213_vm13, %v3366_v6 }
 0x42f   : > { %7686 = vmatmul.msk.f32.vlgmr.msra.gmra.mxu1 %vm3213_vm13, %v3364_v27 }
 0x430   : > { %7691 = vmatpush.xpose.msk.msrb.mxu1 %vm3213_vm13, %v3200_v28 }
 0x431   : > { %v3237_v20 = vpop.f32.mrf.mxu0 }
 0x432   : > { %v3238_v21 = vadd.f32 %v3237_v20, %v3212_v19 }
 0x433   : > { %v3590_v22 = vpop.permute.xlu0 %3589 }
 0x434   : > { %7697 = vmatpush.xpose.msk.msra.mxu1 %vm3213_vm13, %v3618_v17  ;;  %7695 = vmatpush.xpose.msk.msra.mxu0 %vm3213_vm13, %v3590_v22  ;;  %v3267_v14 = vsel %vm3266_vm14, %v3238_v21, -inf }
 0x435   : > { %3268 = vmax.xlane.f32.xlu2 %v3267_v14 }
 0x437   : > { %7692 = vmatmul.msk.f32.vlgmr.msrb.gmra.mxu1 %vm3213_vm13, %v3190_v5  ;;  %7696 = vmatmul.msk.f32.vlgmr.msra.gmra.mxu0 %vm3213_vm13, %v3588_v24 }
 0x43a   : > { %v3263_v12 = vpop.f32.mrf.mxu1 }
 0x43b   : > { %v3264_v25 = vadd.f32 %v3263_v12, %v3212_v19  ;;  %v3616_v26 = vpop.permute.xlu0 %3615 }
 0x43d   : > { %v3270_v7 = vsel %vm3266_vm14, %v3264_v25, -inf }
 0x43e   : > { %3271 = vmax.xlane.f32.xlu1 %v3270_v7 }
 0x43f   : > { %7698 = vmatmul.msk.f32.vlgmr.msra.gmra.mxu1 %vm3213_vm13, %v3616_v26 }
 0x48c   : > { %v3360_v8 = vpop.f32.mrf.mxu0 }
 0x48d   : > { %v3361_v35 = vadd.f32 %v3360_v8, %v3212_v19 }
 0x48f   : > { %v3391_v23 = vsel %vm3266_vm14, %v3361_v35, -inf }
 0x490   : > { %3392 = vmax.xlane.f32.xlu0 %v3391_v23  ;;  %v3172_v23 = vpop.f32.mrf.mxu3 }
 0x494   : > { %v3490_v63 = vpop.f32.mrf.mxu0 }
 0x495   : > { %v3491_v34 = vadd.f32 %v3490_v63, %v3212_v19 }
 0x497   : > { %v3519_v57 = vsel %vm3266_vm14, %v3491_v34, -inf }
 0x498   : > { %3520 = vmax.xlane.f32.xlu1 %v3519_v57 }
 0x4a8   : > { %v3269_v36 = vpop.xlane.xlu2 %3268 }
 0x4a9   : > { %v3273_v40 = vsub.f32 %v3238_v21, %v3269_v36 }
 0x4ab   : > { %v3275_v18 = vmul.f32 1.442695, %v3273_v40  ;;  %v3174_v40 = vpop.f32.mrf.mxu3 }
 0x4ac   : > { %v3388_v37 = vpop.f32.mrf.mxu1 }
 0x4ad   : > { %v3389_v38 = vadd.f32 %v3388_v37, %v3212_v19  ;;  %9637 = vpow2.f32 %v3275_v18 }
 0x4af   : > { %v3394_v43 = vsel %vm3266_vm14, %v3389_v38, -inf }
 0x4b0   : > { %3395 = vmax.xlane.f32.xlu2 %v3394_v43  ;;  %v3203_v43 = vperm.slane %v11063_v3, 5 }
 0x4b1   : > { %v3272_v59 = vpop.xlane.xlu1 %3271 }
 0x4b2   : > { %v3274_v9 = vsub.f32 %v3264_v25, %v3272_v59 }
 0x4b3   : > { %v9638_v49 = vpop.eup %9637 }
 0x4b4   : > { %v3277_v60 = vmul.f32 1.442695, %v3274_v9  ;;  %v3516_v33 = vpop.f32.mrf.mxu1  ;;  %v3612_v44 = vpop.f32.mrf.mxu0  ;;  %v3279_v0 = vsel %vm3266_vm14, %v9638_v49, 0.0  ;;  %v3207_v9 = vperm.slane %v3203_v43, 1  ;;  %v7737_v43 = vld [vmem:[%s10385_s21 + $0x48] sm:$0xf0] }
 0x4b5   : > { %v3517_v41 = vadd.f32 %v3516_v33, %v3212_v19  ;;  %v3613_v46 = vadd.f32 %v3612_v44, %v3212_v19 }
 0x4b6   : > { %9639 = vpow2.f32 %v3277_v60 }
 0x4b7   : > { %v3522_v47 = vsel %vm3266_vm14, %v3517_v41, -inf  ;;  %v3643_v48 = vsel %vm3266_vm14, %v3613_v46, -inf }
 0x4b8   : > { %3523 = vmax.xlane.f32.xlu0 %v3522_v47  ;;  %3644 = vmax.xlane.f32.xlu2 %v3643_v48 }
 0x4bc   : > { %v3640_v54 = vpop.f32.mrf.mxu1  ;;  %v9640_v52 = vpop.eup %9639 }
 0x4bd   : > { %v3641_v62 = vadd.f32 %v3640_v54, %v3212_v19  ;;  %v3282_v58 = vsel %vm3266_vm14, %v9640_v52, 0.0 }
 0x4bf   : > { %v3646_v28 = vsel %vm3266_vm14, %v3641_v62, -inf }
 0x4c0   : > { %3280 = vadd.xlane.f32.xlu0 %v3279_v0  ;;  %3647 = vmax.xlane.f32.xlu1 %v3646_v28 }
 0x4c1   : > { %3283 = vadd.xlane.f32.xlu2 %v3282_v58 }
 0x503   : > { %v3393_v51 = vpop.xlane.xlu0 %3392 }
 0x504   : > { %v3397_v2 = vsub.f32 %v3361_v35, %v3393_v51  ;;  %v3155_v35 = vpop.f32.mrf.mxu2 }
 0x505   : > { %v3173_v18 = vadd.f32 %v3172_v23, %v3155_v35  ;;  %v9177_v23 = vld [vmem:[%s10385_s21 + $0xf4] sm:$0xf] }
 0x506   : > { %v3399_v29 = vmul.f32 1.442695, %v3397_v2 }
 0x507   : > { %v3209_v33 = vadd.f32 %v3207_v9, %v3173_v18 }
 0x508   : > { %9641 = vpow2.f32 %v3399_v29 }
 0x50b   : > { %v3521_v11 = vpop.xlane.xlu1 %3520 }
 0x50c   : > { %v3525_v5 = vsub.f32 %v3491_v34, %v3521_v11 }
 0x50e   : > { %v11101_v55 = vpop.eup %9641  ;;  %v3527_v53 = vmul.f32 1.442695, %v3525_v5 }
 0x50f   : > { %v3403_v61 = vsel %vm3266_vm14, %v11101_v55, 0.0 }
 0x510   : > { %9643 = vpow2.f32 %v3527_v53  ;;  %3404 = vadd.xlane.f32.xlu1 %v3403_v61 }
 0x516   : > { %v11105_v39 = vpop.eup %9643 }
 0x517   : > { %v3531_v32 = vsel %vm3266_vm14, %v11105_v39, 0.0 }
 0x518   : > { %3532 = vadd.xlane.f32.xlu2 %v3531_v32 }
 0x523   : > { %v3396_v4 = vpop.xlane.xlu2 %3395 }
 0x524   : > { %v3398_v10 = vsub.f32 %v3389_v38, %v3396_v4  ;;  %v3157_v38 = vpop.f32.mrf.mxu2 }
 0x525   : > { %v3175_v59 = vadd.f32 %v3174_v40, %v3157_v38  ;;  %v7815_v38 = vld [vmem:[%s10385_s21 + $0xe0] sm:$0xf]  ;;  %v9155_v40 = vld [vmem:[%s10385_s21 + $0x44] sm:$0xf] }
 0x526   : > { %v3401_v30 = vmul.f32 1.442695, %v3398_v10  ;;  %v9162_v10 = vld [vmem:[%s10385_s21 + $0x74] sm:$0xf0] }
 0x527   : > { %v3211_v60 = vadd.f32 %v3207_v9, %v3175_v59  ;;  %v9176_v59 = vld [vmem:[%s10385_s21 + $0xe4] sm:$0xf0]  ;;  %v9175_v9 = vld [vmem:[%s10385_s21 + $0xe4] sm:$0xf] }
 0x528   : > { %9645 = vpow2.f32 %v3401_v30  ;;  %v9161_v30 = vld [vmem:[%s10385_s21 + $0x74] sm:$0xf]  ;;  %v7816_v18 = vor.u32 %v9176_v59, %v7815_v38  ;;  %v7783_v38 = vld [vmem:[%s10385_s21 + $0xa0] sm:$0xf]  ;;  %v9167_v59 = vld [vmem:[%s10385_s21 + $0xa4] sm:$0xf] }
 0x529   : > { %v9612_v44 = vpack.i.bf16 %v3211_v60, %v3209_v33 }
 0x52b   : > { %v3524_v31 = vpop.xlane.xlu0 %3523  ;;  %v3645_v45 = vpop.xlane.xlu2 %3644 }
 0x52c   : > { %v3526_v15 = vsub.f32 %v3517_v41, %v3524_v31  ;;  %v3649_v16 = vsub.f32 %v3613_v46, %v3645_v45  ;;  %v7761_v45 = vld [vmem:[%s10385_s21 + $0x78] sm:$0xf0] }
 0x52e   : > { %v9646_v27 = vpop.eup %9645  ;;  %v3529_v6 = vmul.f32 1.442695, %v3526_v15  ;;  %v3651_v17 = vmul.f32 1.442695, %v3649_v16  ;;  %v7751_v15 = vld [vmem:[%s10385_s21 + $0x60] sm:$0xf] }
 0x52f   : > { %v3406_v19 = vsel %vm3266_vm14, %v9646_v27, 0.0  ;;  %v9160_v16 = vld [vmem:[%s10385_s21 + $0x64] sm:$0xf0] }
 0x530   : > { %9647 = vpow2.f32 %v3529_v6  ;;  %3407 = vadd.xlane.f32.xlu0 %v3406_v19  ;;  %v9159_v6 = vld [vmem:[%s10385_s21 + $0x64] sm:$0xf]  ;;  %v7752_v19 = vor.u32 %v9160_v16, %v7751_v15 }
 0x531   : > { %9649 = vpow2.f32 %v3651_v17  ;;  %v7753_v17 = vld [vmem:[%s10385_s21 + $0x68] sm:$0xf0] }
 0x533   : > { %v3281_v20 = vpop.xlane.xlu0 %3280  ;;  %v3648_v21 = vpop.xlane.xlu1 %3647 }
 0x534   : > { %9651 = vrcp.f32 %v3281_v20  ;;  %v3284_v22 = vpop.xlane.xlu2 %3283  ;;  %v3650_v14 = vsub.f32 %v3641_v62, %v3648_v21  ;;  %v7756_v20 = vor.u32 %v9159_v6, %v7753_v17  ;;  %v7743_v21 = vld [vmem:[%s10385_s21 + $0x50] sm:$0xf]  ;;  %v7703_v17 = vld [vmem:[%s10385_s21] sm:$0xf] }
 0x535   : > { %9653 = vrcp.f32 %v3284_v22  ;;  %v9158_v22 = vld [vmem:[%s10385_s21 + $0x54] sm:$0xf0] }
 0x536   : > { %v11110_v24 = vpop.eup %9647  ;;  %v3653_v12 = vmul.f32 1.442695, %v3650_v14 }
 0x537   : > { %v11112_v25 = vpop.eup %9649  ;;  %v3534_v7 = vsel %vm3266_vm14, %v11110_v24, 0.0 }
 0x538   : > { %9655 = vpow2.f32 %v3653_v12  ;;  %3535 = vadd.xlane.f32.xlu1 %v3534_v7  ;;  %v3655_v26 = vsel %vm3266_vm14, %v11112_v25, 0.0  ;;  %v9157_v12 = vld [vmem:[%s10385_s21 + $0x54] sm:$0xf]  ;;  %v7823_v7 = vld [vmem:[%s10385_s21 + $0xf0] sm:$0xf] }
 0x539   : > { %3656 = vadd.xlane.f32.xlu2 %v3655_v26  ;;  %v9178_v26 = vld [vmem:[%s10385_s21 + $0xf4] sm:$0xf0] }
 0x53a   : > { %v9652_v8 = vpop.eup %9651  ;;  %v7824_v35 = vor.u32 %v9178_v26, %v7823_v7 }
 0x53b   : > { %v9654_v63 = vpop.eup %9653  ;;  %v3287_v34 = vmul.f32 %v9652_v8, %v9638_v49  ;;  %v7744_v8 = vor.u32 %v9158_v22, %v7743_v21  ;;  %v9172_v22 = vld [vmem:[%s10385_s21 + $0xc4] sm:$0xf0] }
 0x53c   : > { %v3288_v57 = vmul.f32 %v9654_v63, %v9640_v52  ;;  %v7825_v63 = vld [vmem:[%s10385_s21 + $0xf8] sm:$0xf0]  ;;  %3954 = vmatpush.bf16.msrb.mxu1 %v7824_v35  ;;  %v7801_v35 = vld [vmem:[%s10385_s21 + $0xc8] sm:$0xf0] }
 0x53d   : > { %7681 = vmatmul.msk.f32.vlgmr.msrb.gmra.mxu2 %vm3266_vm14, %v3287_v34 }
 0x53e   : > { %v9656_v36 = vpop.eup %9655  ;;  %7682 = vmatmul.msk.f32.vlgmr.msrb.gmra.mxu3 %vm3266_vm14, %v3288_v57  ;;  %v7735_v57 = vld [vmem:[%s10385_s21 + $0x40] sm:$0xf] }
 0x53f   : > { %v3658_v37 = vsel %vm3266_vm14, %v9656_v36, 0.0 }
 0x540   : > { %3659 = vadd.xlane.f32.xlu1 %v3658_v37  ;;  %v7828_v37 = vor.u32 %v9177_v23, %v7825_v63  ;;  %3955 = vmatpush.bf16.msrb.mxu1 %v7816_v18  ;;  %v7791_v63 = vld [vmem:[%s10385_s21 + $0xb0] sm:$0xf]  ;;  %v7785_v18 = vld [vmem:[%s10385_s21 + $0xa8] sm:$0xf0] }
 0x544   : > { %9608 = vrot.lane.b32.xlu0 %v9607_v42, %s10075_s0 }
 0x551   : > { %9613 = vrot.lane.b32.xlu2 %v9612_v44, %s10075_s0 }
 0x583   : > { %v3405_v46 = vpop.xlane.xlu1 %3404 }
 0x584   : > { %9657 = vrcp.f32 %v3405_v46  ;;  %v9174_v46 = vld [vmem:[%s10385_s21 + $0xd4] sm:$0xf0] }
 0x58a   : > { %v9658_v54 = vpop.eup %9657 }
 0x58b   : > { %v3533_v41 = vpop.xlane.xlu2 %3532  ;;  %v3411_v0 = vmul.f32 %v9658_v54, %v11101_v55  ;;  %v9173_v54 = vld [vmem:[%s10385_s21 + $0xd4] sm:$0xf] }
 0x5a3   : > { %v3408_v47 = vpop.xlane.xlu0 %3407 }
 0x5a4   : > { %9659 = vrcp.f32 %v3408_v47  ;;  %v7740_v47 = vor.u32 %v9155_v40, %v7737_v43  ;;  %v9168_v40 = vld [vmem:[%s10385_s21 + $0xa4] sm:$0xf0] }
 0x5a5   : > { %9661 = vrcp.f32 %v3533_v41  ;;  %v7807_v41 = vld [vmem:[%s10385_s21 + $0xd0] sm:$0xf] }
 0x5aa   : > { %v9660_v56 = vpop.eup %9659 }
 0x5ab   : > { %v3536_v49 = vpop.xlane.xlu1 %3535  ;;  %v3412_v28 = vmul.f32 %v9660_v56, %v9646_v27  ;;  %v9662_v2 = vpop.eup %9661  ;;  %v7764_v27 = vor.u32 %v9161_v30, %v7761_v45  ;;  %v9149_v30 = vld [vmem:[%s10385_s21 + $0x14] sm:$0xf] }
 0x5ac   : > { %v3657_v48 = vpop.xlane.xlu2 %3656  ;;  %9663 = vrcp.f32 %v3536_v49  ;;  %v3539_v5 = vmul.f32 %v9662_v2, %v11105_v39  ;;  %v7759_v39 = vld [vmem:[%s10385_s21 + $0x70] sm:$0xf]  ;;  %v9154_v49 = vld [vmem:[%s10385_s21 + $0x34] sm:$0xf0] }
 0x5ad   : > { %9665 = vrcp.f32 %v3657_v48  ;;  %v7760_v31 = vor.u32 %v9162_v10, %v7759_v39  ;;  %v7727_v48 = vld [vmem:[%s10385_s21 + $0x30] sm:$0xf] }
 0x5af   : > { %3940 = vmatpush.bf16.msrb.mxu0 %v7760_v31  ;;  %v7713_v31 = vld [vmem:[%s10385_s21 + $0x18] sm:$0xf0] }
 0x5b0   : > { %v7716_v15 = vor.u32 %v9149_v30, %v7713_v31 }
 0x5b2   : > { %v9664_v11 = vpop.eup %9663 }
 0x5b3   : > { %v3660_v29 = vpop.xlane.xlu1 %3659  ;;  %v3540_v55 = vmul.f32 %v9664_v11, %v11110_v24  ;;  %v9666_v53 = vpop.eup %9665  ;;  %3941 = vmatpush.bf16.msrb.mxu0 %v7752_v19  ;;  %v9152_v11 = vld [vmem:[%s10385_s21 + $0x24] sm:$0xf0] }
 0x5b4   : > { %v9614_v42 = vpop.permute.xlu2 %9613  ;;  %9667 = vrcp.f32 %v3660_v29  ;;  %v3663_v32 = vmul.f32 %v9666_v53, %v11112_v25  ;;  %v7745_v25 = vld [vmem:[%s10385_s21 + $0x58] sm:$0xf0]  ;;  %v7719_v29 = vld [vmem:[%s10385_s21 + $0x20] sm:$0xf]  ;;  %v9148_v19 = vld [vmem:[%s10385_s21 + $0x4] sm:$0xf0] }
 0x5b5   : > { %v9616_v58 = vunpack.i.h.bf16 %v9614_v42  ;;  %v9615_v51 = vunpack.i.l.bf16 %v9614_v42  ;;  %v7748_v34 = vor.u32 %v9157_v12, %v7745_v25  ;;  %v9153_v42 = vld [vmem:[%s10385_s21 + $0x34] sm:$0xf]  ;;  %v7720_v53 = vor.u32 %v9152_v11, %v7719_v29  ;;  %v9147_v12 = vld [vmem:[%s10385_s21 + $0x4] sm:$0xf]  ;;  %v7705_v25 = vld [vmem:[%s10385_s21 + $0x8] sm:$0xf0] }
 0x5b6   : > { %v9609_v13 = vpop.permute.xlu0 %9608  ;;  %v7704_v21 = vor.u32 %v9148_v19, %v7703_v17  ;;  %v7708_v26 = vor.u32 %v9147_v12, %v7705_v25  ;;  %v9673_v19 = vld [vmem:[#allocation2 + $0x10] sm:$0xff] }
 0x5b7   : > { %v9611_v52 = vunpack.i.h.bf16 %v9609_v13  ;;  %v9610_v62 = vunpack.i.l.bf16 %v9609_v13  ;;  %3942 = vmatpush.bf16.msrb.mxu0 %v7744_v8  ;;  %v9171_v8 = vld [vmem:[%s10385_s21 + $0xc4] sm:$0xf] }
 0x5b8   : > { %v7804_v23 = vor.u32 %v9171_v8, %v7801_v35 }
 0x5b9   : > { %3435 = vmatpush.msra.mxu2 %v9610_v62  ;;  %3462 = vmatpush.msra.mxu3 %v9611_v52  ;;  %v7729_v52 = vld [vmem:[%s10385_s21 + $0x38] sm:$0xf0]  ;;  %v7808_v62 = vor.u32 %v9174_v46, %v7807_v41  ;;  %v9165_v41 = vld [vmem:[%s10385_s21 + $0x94] sm:$0xf] }
 0x5ba   : > { %7687 = vmatmul.msk.f32.vlgmr.msra.gmra.mxu2 %vm3266_vm14, %v3411_v0  ;;  %7688 = vmatmul.msk.f32.vlgmr.msra.gmra.mxu3 %vm3266_vm14, %v3412_v28  ;;  %v9668_v61 = vpop.eup %9667  ;;  %v7809_v0 = vld [vmem:[%s10385_s21 + $0xd8] sm:$0xf0]  ;;  %v7732_v2 = vor.u32 %v9153_v42, %v7729_v52  ;;  %v7769_v42 = vld [vmem:[%s10385_s21 + $0x88] sm:$0xf0] }
 0x5bb   : > { %3559 = vmatpush.msrb.mxu2 %v3209_v33  ;;  %3582 = vmatpush.msrb.mxu3 %v3211_v60  ;;  %v3664_v4 = vmul.f32 %v9668_v61, %v9656_v36  ;;  %v9156_v36 = vld [vmem:[%s10385_s21 + $0x44] sm:$0xf0]  ;;  %v7817_v60 = vld [vmem:[%s10385_s21 + $0xe8] sm:$0xf0]  ;;  %v7777_v46 = vld [vmem:[%s10385_s21 + $0x98] sm:$0xf0] }
 0x5bc   : > { %v7736_v33 = vor.u32 %v9156_v36, %v7735_v57  ;;  %v7820_v44 = vor.u32 %v9175_v9, %v7817_v60  ;;  %3956 = vmatpush.bf16.msrb.mxu1 %v7808_v62  ;;  %v9169_v57 = vld [vmem:[%s10385_s21 + $0xb4] sm:$0xf]  ;;  %v7784_v9 = vor.u32 %v9168_v40, %v7783_v38  ;;  %v7788_v60 = vor.u32 %v9167_v59, %v7785_v18  ;;  %v8055_v40 = vld [vmem:[%s10387_s15 + $0x1c0] sm:$0xf] }
 0x5bd   : > { %3687 = vmatpush.msra.mxu2 %v9615_v51  ;;  %3714 = vmatpush.msra.mxu3 %v9616_v58  ;;  %v7812_v58 = vor.u32 %v9173_v54, %v7809_v0  ;;  %v7728_v51 = vor.u32 %v9154_v49, %v7727_v48  ;;  %v7780_v48 = vor.u32 %v9165_v41, %v7777_v46  ;;  %v7767_v49 = vld [vmem:[%s10385_s21 + $0x80] sm:$0xf]  ;;  %v9164_v54 = vld [vmem:[%s10385_s21 + $0x84] sm:$0xf0]  ;;  %v9299_v46 = vld [vmem:[%s10387_s15 + $0x3c4] sm:$0xf] }
 0x5be   : > { %3943 = vmatpush.bf16.msrb.mxu0 %v7736_v33  ;;  %v7775_v33 = vld [vmem:[%s10385_s21 + $0x90] sm:$0xf]  ;;  %v8311_v59 = vld [vmem:[%s10387_s15 + $0x3c0] sm:$0xf] }
 0x5c0   : > { %v11147_v14 = vpop.f32.mrf.mxu2 }
 0x5c1   : > { %v11149_v24 = vpop.f32.mrf.mxu3 }
 0x5c2   : > { %7693 = vmatmul.msk.f32.vlgmr.msrb.gmra.mxu2 %vm3266_vm14, %v3539_v5  ;;  %7694 = vmatmul.msk.f32.vlgmr.msrb.gmra.mxu3 %vm3266_vm14, %v3540_v55  ;;  %v9151_v5 = vld [vmem:[%s10385_s21 + $0x24] sm:$0xf]  ;;  %v7721_v55 = vld [vmem:[%s10385_s21 + $0x28] sm:$0xf0] }
 0x5c3   : > { %3968 = vmatpush.bf16.msrb.mxu2 %v7764_v27  ;;  %3982 = vmatpush.bf16.msrb.mxu3 %v7828_v37  ;;  %v7724_v61 = vor.u32 %v9151_v5, %v7721_v55  ;;  %v7793_v37 = vld [vmem:[%s10385_s21 + $0xb8] sm:$0xf0] }
 0x5c4   : > { %3944 = vmatpush.bf16.msrb.mxu0 %v7728_v51  ;;  %v7796_v43 = vor.u32 %v9169_v57, %v7793_v37 }
 0x5c7   : > { %3969 = vmatpush.bf16.msrb.mxu2 %v7756_v20  ;;  %3983 = vmatpush.bf16.msrb.mxu3 %v7820_v44  ;;  %v7799_v20 = vld [vmem:[%s10385_s21 + $0xc0] sm:$0xf]  ;;  %v9166_v44 = vld [vmem:[%s10385_s21 + $0x94] sm:$0xf0] }
 0x5c8   : > { %3945 = vmatpush.bf16.msrb.mxu0 %v7720_v53  ;;  %v7800_v7 = vor.u32 %v9172_v22, %v7799_v20 }
 0x5ca   : > { %7699 = vmatmul.msk.f32.vlgmr.msra.gmra.mxu2 %vm3266_vm14, %v3663_v32  ;;  %7700 = vmatmul.msk.f32.vlgmr.msra.gmra.mxu3 %vm3266_vm14, %v3664_v4  ;;  %v7711_v32 = vld [vmem:[%s10385_s21 + $0x10] sm:$0xf]  ;;  %v9150_v4 = vld [vmem:[%s10385_s21 + $0x14] sm:$0xf0] }
 0x5cb   : > { %3970 = vmatpush.bf16.msrb.mxu2 %v7748_v34  ;;  %3984 = vmatpush.bf16.msrb.mxu3 %v7812_v58  ;;  %v7712_v45 = vor.u32 %v9150_v4, %v7711_v32  ;;  %v9170_v34 = vld [vmem:[%s10385_s21 + $0xb4] sm:$0xf0] }
 0x5cc   : > { %3957 = vmatpush.bf16.msrb.mxu1 %v7800_v7  ;;  %v7792_v36 = vor.u32 %v9170_v34, %v7791_v63  ;;  %v11220_v32 = vld [vmem:[%s10391_s23 + $0x18] sm:$0xff] }
 0x5cd   : > { %3946 = vmatpush.bf16.msrb.mxu0 %v7712_v45  ;;  %v9675_v34 = vld [vmem:[#allocation2 + $0x18] sm:$0xff] }
 0x5cf   : > { %3971 = vmatpush.bf16.msrb.mxu2 %v7740_v47  ;;  %3985 = vmatpush.bf16.msrb.mxu3 %v7804_v23  ;;  %v7776_v47 = vor.u32 %v9166_v44, %v7775_v33  ;;  %v8057_v33 = vld [vmem:[%s10387_s15 + $0x1e0] sm:$0xf0] }
 0x5d0   : > { %3958 = vmatpush.bf16.msrb.mxu1 %v7792_v36  ;;  %v9676_v36 = vld [vmem:[#allocation2 + $0x8] sm:$0xff] }
 0x5d1   : > { %3947 = vmatpush.bf16.msrb.mxu0 %v7704_v21  ;;  %v9674_v21 = vld [vmem:[#allocation2] sm:$0xff] }
 0x5d3   : > { %3972 = vmatpush.bf16.msrb.mxu2 %v7732_v2  ;;  %3986 = vmatpush.bf16.msrb.mxu3 %v7796_v43  ;;  %v9239_v43 = vld [vmem:[%s10387_s15 + $0x1dc] sm:$0xf0] }
 0x5d4   : > { %3959 = vmatpush.bf16.msrb.mxu1 %v7784_v9  ;;  %v8056_v18 = vor.u32 %v9239_v43, %v8055_v40  ;;  %v9303_v9 = vld [vmem:[%s10387_s15 + $0x3dc] sm:$0xf0] }
 0x5d5   : > { %v8312_v44 = vor.u32 %v9303_v9, %v8311_v59 }
 0x5d6   : > { %4864 = vmatpush.bf16.msra.mxu0 %v8056_v18 }
 0x5d7   : > { %3973 = vmatpush.bf16.msrb.mxu2 %v7724_v61  ;;  %3987 = vmatpush.bf16.msrb.mxu3 %v7788_v60  ;;  %v9235_v60 = vld [vmem:[%s10387_s15 + $0x1c4] sm:$0xf] }
 0x5d8   : > { %3960 = vmatpush.bf16.msrb.mxu1 %v7776_v47  ;;  %v8060_v41 = vor.u32 %v9235_v60, %v8057_v33  ;;  %v8313_v47 = vld [vmem:[%s10387_s15 + $0x3e0] sm:$0xf0] }
 0x5db   : > { %3974 = vmatpush.bf16.msrb.mxu2 %v7716_v15  ;;  %3988 = vmatpush.bf16.msrb.mxu3 %v7780_v48  ;;  %v8023_v48 = vld [vmem:[%s10387_s15 + $0x180] sm:$0xf] }
 0x5df   : > { %3975 = vmatpush.bf16.msrb.mxu2 %v7708_v26 }
 0x5e3   : > { %4892 = vmatpush.bf16.msra.mxu2 %v8060_v41 }
 0x63d   : > { %v3437_v56 = vpop.f32.mrf.mxu2  ;;  %v3464_v13 = vpop.f32.mrf.mxu3 }
 0x63e   : > { %v9617_v28 = vpack.i.bf16 %v3464_v13, %v3437_v56  ;;  %v9163_v56 = vld [vmem:[%s10385_s21 + $0x84] sm:$0xf]  ;;  %v7768_v13 = vor.u32 %v9164_v54, %v7767_v49  ;;  %v8316_v49 = vor.u32 %v9299_v46, %v8313_v47  ;;  %v9231_v54 = vld [vmem:[%s10387_s15 + $0x19c] sm:$0xf0] }
 0x63f   : > { %v7772_v52 = vor.u32 %v9163_v56, %v7769_v42  ;;  %v8279_v56 = vld [vmem:[%s10387_s15 + $0x380] sm:$0xf]  ;;  %v8024_v42 = vor.u32 %v9231_v54, %v8023_v48 }
 0x640   : > { %9618 = vrot.lane.b32.xlu1 %v9617_v28, %s10075_s0  ;;  %3961 = vmatpush.bf16.msrb.mxu1 %v7768_v13  ;;  %v9295_v13 = vld [vmem:[%s10387_s15 + $0x39c] sm:$0xf0] }
 0x641   : > { %3989 = vmatpush.bf16.msrb.mxu3 %v7772_v52  ;;  %v8280_v52 = vor.u32 %v9295_v13, %v8279_v56  ;;  %4865 = vmatpush.bf16.msra.mxu0 %v8024_v42 }
 0x644   : > { %4878 = vmatpush.bf16.msra.mxu1 %v8312_v44 }
 0x645   : > { %v11180_v39 = vpop.f32.mrf.mxu2  ;;  %v11182_v10 = vpop.f32.mrf.mxu3  ;;  %4906 = vmatpush.bf16.msra.mxu3 %v8316_v49 }
 0x648   : > { %4879 = vmatpush.bf16.msra.mxu1 %v8280_v52 }
 0x64d   : > { %v3689_v16 = vpop.f32.mrf.mxu2  ;;  %v3716_v27 = vpop.f32.mrf.mxu3 }
 0x64e   : > { %v9622_v6 = vpack.i.bf16 %v3716_v27, %v3689_v16 }
 0x650   : > { %9623 = vrot.lane.b32.xlu0 %v9622_v6, %s10075_s0 }
 0x6b2   : > { %v9619_v62 = vpop.permute.xlu1 %9618 }
 0x6b3   : > { %v9621_v0 = vunpack.i.h.bf16 %v9619_v62  ;;  %v9620_v28 = vunpack.i.l.bf16 %v9619_v62  ;;  %v9227_v62 = vld [vmem:[%s10387_s15 + $0x184] sm:$0xf] }
 0x6b5   : > { %v3736_v58 = vsel %vm3213_vm13, %v11149_v24, %v9621_v0  ;;  %v3735_v51 = vsel %vm3213_vm13, %v11147_v14, %v9620_v28  ;;  %v3774_v24 = vperm.slane %v11220_v32, 1  ;;  %v3775_v14 = vperm.slane %v11220_v32, 5  ;;  %v8025_v0 = vld [vmem:[%s10387_s15 + $0x1a0] sm:$0xf0] }
 0x6b6   : > { %v3739_v2 = vpack.c.bf16 %v3736_v58, %v3735_v51  ;;  %v9291_v28 = vld [vmem:[%s10387_s15 + $0x384] sm:$0xf]  ;;  %v8028_v58 = vor.u32 %v9227_v62, %v8025_v0  ;;  %v7895_v62 = vld [vmem:[%s10387_s15 + $0x80] sm:$0xf] }
 0x6b7   : > { %v3778_v30 = vperm.slane %v3774_v24, 1  ;;  %v3779_v15 = vperm.slane %v3775_v14, 1  ;;  %v8281_v51 = vld [vmem:[%s10387_s15 + $0x3a0] sm:$0xf0]  ;;  %v9199_v0 = vld [vmem:[%s10387_s15 + $0x9c] sm:$0xf0] }
 0x6b8   : > { %3948 = vmatmul.bf16.vlgmr.msrb.gmra.mxu0 %v3739_v2  ;;  %3976 = vmatmul.bf16.vlgmr.msrb.gmra.mxu2 %v3739_v2  ;;  %v7991_v2 = vld [vmem:[%s10387_s15 + $0x140] sm:$0xf]  ;;  %v7993_v24 = vld [vmem:[%s10387_s15 + $0x160] sm:$0xf0] }
 0x6b9   : > { %v9283_v14 = vld [vmem:[%s10387_s15 + $0x344] sm:$0xf]  ;;  %4893 = vmatpush.bf16.msra.mxu2 %v8028_v58  ;;  %v7896_v58 = vor.u32 %v9199_v0, %v7895_v62  ;;  %v9296_v62 = vld [vmem:[%s10387_s15 + $0x3a4] sm:$0xf0]  ;;  %v9228_v0 = vld [vmem:[%s10387_s15 + $0x18c] sm:$0xf] }
 0x6c2   : > { %v9624_v29 = vpop.permute.xlu0 %9623 }
 0x6c3   : > { %v9626_v11 = vunpack.i.h.bf16 %v9624_v29  ;;  %v9625_v5 = vunpack.i.l.bf16 %v9624_v29  ;;  %v9223_v29 = vld [vmem:[%s10387_s15 + $0x15c] sm:$0xf0] }
 0x6c5   : > { %v3738_v55 = vsel %vm3213_vm13, %v11182_v10, %v9626_v11  ;;  %v3737_v53 = vsel %vm3213_vm13, %v11180_v39, %v9625_v5  ;;  %v8284_v11 = vor.u32 %v9291_v28, %v8281_v51  ;;  %v8247_v5 = vld [vmem:[%s10387_s15 + $0x340] sm:$0xf] }
 0x6c6   : > { %v3740_v61 = vpack.c.bf16 %v3738_v55, %v3737_v53  ;;  %v9287_v55 = vld [vmem:[%s10387_s15 + $0x35c] sm:$0xf0]  ;;  %v9219_v53 = vld [vmem:[%s10387_s15 + $0x144] sm:$0xf] }
 0x6c7   : > { %4907 = vmatpush.bf16.msra.mxu3 %v8284_v11  ;;  %v8151_v28 = vld [vmem:[%s10387_s15 + $0x280] sm:$0xf] }
 0x6c8   : > { %3962 = vmatmul.bf16.vlgmr.msrb.gmra.mxu1 %v3740_v61  ;;  %3990 = vmatmul.bf16.vlgmr.msrb.gmra.mxu3 %v3740_v61  ;;  %v7992_v61 = vor.u32 %v9223_v29, %v7991_v2  ;;  %v9263_v51 = vld [vmem:[%s10387_s15 + $0x29c] sm:$0xf0]  ;;  %v9195_v2 = vld [vmem:[%s10387_s15 + $0x84] sm:$0xf] }
 0x6c9   : > { %v7897_v29 = vld [vmem:[%s10387_s15 + $0xa0] sm:$0xf0]  ;;  %v8152_v11 = vor.u32 %v9263_v51, %v8151_v28  ;;  %v9292_v51 = vld [vmem:[%s10387_s15 + $0x38c] sm:$0xf] }
 0x6ca   : > { %4866 = vmatpush.bf16.msra.mxu0 %v7992_v61 }
 0x735   : > { %v3949_v4 = vpop.f32.mrf.mxu0 }
 0x736   : > { %v3950_v16 = vadd.f32 %v3949_v4, %v3778_v30  ;;  %v8249_v4 = vld [vmem:[%s10387_s15 + $0x360] sm:$0xf0] }
 0x73b   : > { %v3977_v31 = vpop.f32.mrf.mxu2 }
 0x73c   : > { %v3978_v27 = vadd.f32 %v3977_v31, %v3779_v15  ;;  %v7996_v31 = vor.u32 %v9219_v53, %v7993_v24  ;;  %v8153_v53 = vld [vmem:[%s10387_s15 + $0x2a0] sm:$0xf0]  ;;  %v7863_v24 = vld [vmem:[%s10387_s15 + $0x40] sm:$0xf] }
 0x73d   : > { %v3951_v39 = vpop.f32.mrf.mxu0 }
 0x73e   : > { %v3952_v7 = vadd.f32 %v3951_v39, %v3778_v30  ;;  %v8248_v30 = vor.u32 %v9287_v55, %v8247_v5  ;;  %v9275_v39 = vld [vmem:[%s10387_s15 + $0x304] sm:$0xf]  ;;  %4894 = vmatpush.bf16.msra.mxu2 %v7996_v31  ;;  %v7900_v5 = vor.u32 %v9195_v2, %v7897_v29  ;;  %v9255_v31 = vld [vmem:[%s10387_s15 + $0x25c] sm:$0xf0]  ;;  %v8289_v2 = vld [vmem:[%s10387_s15 + $0x3a8] sm:$0xf0] }
 0x73f   : > { %v9259_v55 = vld [vmem:[%s10387_s15 + $0x284] sm:$0xf] }
 0x740   : > { %4880 = vmatpush.bf16.msra.mxu1 %v8248_v30  ;;  %v8156_v61 = vor.u32 %v9259_v55, %v8153_v53  ;;  %v9224_v55 = vld [vmem:[%s10387_s15 + $0x164] sm:$0xf0] }
 0x741   : > { %v8255_v53 = vld [vmem:[%s10387_s15 + $0x348] sm:$0xf] }
 0x743   : > { %v3979_v12 = vpop.f32.mrf.mxu2 }
 0x744   : > { %v3980_v8 = vadd.f32 %v3979_v12, %v3779_v15  ;;  %v9215_v15 = vld [vmem:[%s10387_s15 + $0x11c] sm:$0xf0] }
 0x745   : > { %v3963_v45 = vpop.f32.mrf.mxu1 }
 0x746   : > { %v3964_v10 = vadd.f32 %v3963_v45, %v3950_v16  ;;  %v7959_v45 = vld [vmem:[%s10387_s15 + $0x100] sm:$0xf] }
 0x747   : > { %v8215_v16 = vld [vmem:[%s10387_s15 + $0x300] sm:$0xf] }
 0x748   : > { %v11224_v20 = vadd.f32 %v9673_v19, %v3964_v10  ;;  %v9279_v10 = vld [vmem:[%s10387_s15 + $0x31c] sm:$0xf0]  ;;  %v8217_v19 = vld [vmem:[%s10387_s15 + $0x320] sm:$0xf0] }
 0x749   : > { %v8216_v12 = vor.u32 %v9279_v10, %v8215_v16  ;;  %v9251_v10 = vld [vmem:[%s10387_s15 + $0x244] sm:$0xf] }
 0x74b   : > { %v3991_v6 = vpop.f32.mrf.mxu3  ;;  %4881 = vmatpush.bf16.msra.mxu1 %v8216_v12 }
 0x74c   : > { %v3992_v17 = vadd.f32 %v3991_v6, %v3978_v27  ;;  %v8252_v27 = vor.u32 %v9283_v14, %v8249_v4  ;;  %v9211_v6 = vld [vmem:[%s10387_s15 + $0x104] sm:$0xf]  ;;  %v9191_v14 = vld [vmem:[%s10387_s15 + $0x5c] sm:$0xf0] }
 0x74d   : > { %v3965_v25 = vpop.f32.mrf.mxu1  ;;  %v8119_v4 = vld [vmem:[%s10387_s15 + $0x240] sm:$0xf]  ;;  %v7864_v30 = vor.u32 %v9191_v14, %v7863_v24  ;;  %v9288_v24 = vld [vmem:[%s10387_s15 + $0x364] sm:$0xf0]  ;;  %v9220_v14 = vld [vmem:[%s10387_s15 + $0x14c] sm:$0xf] }
 0x74e   : > { %v11226_v22 = vadd.f32 %v9674_v21, %v3992_v17  ;;  %v3966_v35 = vadd.f32 %v3965_v25, %v3952_v7  ;;  %v7961_v17 = vld [vmem:[%s10387_s15 + $0x120] sm:$0xf0]  ;;  %v7960_v21 = vor.u32 %v9215_v15, %v7959_v45  ;;  %v7927_v7 = vld [vmem:[%s10387_s15 + $0xc0] sm:$0xf]  ;;  %4908 = vmatpush.bf16.msra.mxu3 %v8252_v27  ;;  %v8120_v16 = vor.u32 %v9255_v31, %v8119_v4  ;;  %v8001_v4 = vld [vmem:[%s10387_s15 + $0x168] sm:$0xf0] }
 0x74f   : > { %v7964_v25 = vor.u32 %v9211_v6, %v7961_v17  ;;  %v9187_v45 = vld [vmem:[%s10387_s15 + $0x44] sm:$0xf]  ;;  %v8004_v31 = vor.u32 %v9220_v14, %v8001_v4 }
 0x750   : > { %v4000_v26 = vadd.f32 %v11226_v22, %v11224_v20  ;;  %v11230_v57 = vadd.f32 %v9675_v34, %v3966_v35  ;;  %v8220_v35 = vor.u32 %v9275_v39, %v8217_v19  ;;  %v7929_v34 = vld [vmem:[%s10387_s15 + $0xe0] sm:$0xf0]  ;;  %4867 = vmatpush.bf16.msra.mxu0 %v7960_v21  ;;  %v7831_v39 = vld [vmem:[%s10387_s15] sm:$0xf] }
 0x751   : > { %4895 = vmatpush.bf16.msra.mxu2 %v7964_v25  ;;  %v7865_v15 = vld [vmem:[%s10387_s15 + $0x60] sm:$0xf0]  ;;  %v9183_v19 = vld [vmem:[%s10387_s15 + $0x1c] sm:$0xf0] }
 0x752   : > { %4001 = vadd.xlane.f32.xlu0 %v4000_v26  ;;  %v9207_v26 = vld [vmem:[%s10387_s15 + $0xdc] sm:$0xf0]  ;;  %4909 = vmatpush.bf16.msra.mxu3 %v8220_v35  ;;  %v7868_v27 = vor.u32 %v9187_v45, %v7865_v15  ;;  %v8121_v6 = vld [vmem:[%s10387_s15 + $0x260] sm:$0xf0]  ;;  %v7832_v12 = vor.u32 %v9183_v19, %v7831_v39  ;;  %v9284_v45 = vld [vmem:[%s10387_s15 + $0x34c] sm:$0xf] }
 0x753   : > { %v3993_v23 = vpop.f32.mrf.mxu3  ;;  %v7928_v43 = vor.u32 %v9207_v26, %v7927_v7  ;;  %v8124_v17 = vor.u32 %v9251_v10, %v8121_v6  ;;  %v8087_v21 = vld [vmem:[%s10387_s15 + $0x200] sm:$0xf]  ;;  %v9179_v7 = vld [vmem:[%s10387_s15 + $0x4] sm:$0xf]  ;;  %v8257_v15 = vld [vmem:[%s10387_s15 + $0x368] sm:$0xf0] }
 0x754   : > { %v3994_v63 = vadd.f32 %v3993_v23, %v3980_v8  ;;  %v8183_v8 = vld [vmem:[%s10387_s15 + $0x2c0] sm:$0xf]  ;;  %v7833_v26 = vld [vmem:[%s10387_s15 + $0x20] sm:$0xf0]  ;;  %v9216_v10 = vld [vmem:[%s10387_s15 + $0x124] sm:$0xf0] }
 0x755   : > { %v9271_v23 = vld [vmem:[%s10387_s15 + $0x2dc] sm:$0xf0]  ;;  %4868 = vmatpush.bf16.msra.mxu0 %v7928_v43  ;;  %v7836_v35 = vor.u32 %v9179_v7, %v7833_v26  ;;  %v9304_v43 = vld [vmem:[%s10387_s15 + $0x3e4] sm:$0xf0]  ;;  %v9212_v19 = vld [vmem:[%s10387_s15 + $0x10c] sm:$0xf] }
 0x756   : > { %v11232_v37 = vadd.f32 %v9676_v36, %v3994_v63  ;;  %v9203_v63 = vld [vmem:[%s10387_s15 + $0xc4] sm:$0xf]  ;;  %v8184_v18 = vor.u32 %v9271_v23, %v8183_v8  ;;  %v9247_v25 = vld [vmem:[%s10387_s15 + $0x21c] sm:$0xf0]  ;;  %v8223_v6 = vld [vmem:[%s10387_s15 + $0x308] sm:$0xf] }
 0x757   : > { %v9267_v36 = vld [vmem:[%s10387_s15 + $0x2c4] sm:$0xf]  ;;  %v7932_v9 = vor.u32 %v9203_v63, %v7929_v34  ;;  %v8088_v8 = vor.u32 %v9247_v25, %v8087_v21  ;;  %v8063_v34 = vld [vmem:[%s10387_s15 + $0x1c8] sm:$0xf]  ;;  %v7969_v21 = vld [vmem:[%s10387_s15 + $0x128] sm:$0xf0] }
 0x758   : > { %v4003_v38 = vadd.f32 %v11232_v37, %v11230_v57  ;;  %4882 = vmatpush.bf16.msra.mxu1 %v8184_v18  ;;  %v9243_v23 = vld [vmem:[%s10387_s15 + $0x204] sm:$0xf]  ;;  %v9280_v39 = vld [vmem:[%s10387_s15 + $0x324] sm:$0xf0]  ;;  %v7972_v25 = vor.u32 %v9212_v19, %v7969_v21  ;;  %v9276_v7 = vld [vmem:[%s10387_s15 + $0x30c] sm:$0xf] }
 0x759   : > { %4896 = vmatpush.bf16.msra.mxu2 %v7932_v9  ;;  %4869 = vmatpush.bf16.msra.mxu0 %v7896_v58  ;;  %v8089_v63 = vld [vmem:[%s10387_s15 + $0x220] sm:$0xf0]  ;;  %v9236_v9 = vld [vmem:[%s10387_s15 + $0x1cc] sm:$0xf] }
 0x75a   : > { %4004 = vadd.xlane.f32.xlu2 %v4003_v38  ;;  %v8185_v38 = vld [vmem:[%s10387_s15 + $0x2e0] sm:$0xf0]  ;;  %v8033_v58 = vld [vmem:[%s10387_s15 + $0x1a8] sm:$0xf0] }
 0x75b   : > { %v8188_v60 = vor.u32 %v9267_v36, %v8185_v38  ;;  %v8092_v36 = vor.u32 %v9243_v23, %v8089_v63  ;;  %v9240_v38 = vld [vmem:[%s10387_s15 + $0x1e4] sm:$0xf0]  ;;  %v8036_v29 = vor.u32 %v9228_v0, %v8033_v58  ;;  %v8225_v26 = vld [vmem:[%s10387_s15 + $0x328] sm:$0xf0] }
 0x75c   : > { %4883 = vmatpush.bf16.msra.mxu1 %v8152_v11  ;;  %v8292_v11 = vor.u32 %v9292_v51, %v8289_v2  ;;  %v9208_v23 = vld [vmem:[%s10387_s15 + $0xe4] sm:$0xf0]  ;;  %v9260_v0 = vld [vmem:[%s10387_s15 + $0x28c] sm:$0xf] }
 0x75d   : > { %4910 = vmatpush.bf16.msra.mxu3 %v8188_v60  ;;  %4897 = vmatpush.bf16.msra.mxu2 %v7900_v5  ;;  %v8065_v60 = vld [vmem:[%s10387_s15 + $0x1e8] sm:$0xf0]  ;;  %v7999_v5 = vld [vmem:[%s10387_s15 + $0x148] sm:$0xf] }
 0x75e   : > { %4870 = vmatpush.bf16.msra.mxu0 %v7864_v30  ;;  %v8256_v30 = vor.u32 %v9288_v24, %v8255_v53  ;;  %v8191_v63 = vld [vmem:[%s10387_s15 + $0x2c8] sm:$0xf]  ;;  %v7873_v24 = vld [vmem:[%s10387_s15 + $0x68] sm:$0xf0] }
 0x75f   : > { %v7871_v2 = vld [vmem:[%s10387_s15 + $0x48] sm:$0xf]  ;;  %v7841_v19 = vld [vmem:[%s10387_s15 + $0x28] sm:$0xf0] }
 0x760   : > { %4884 = vmatpush.bf16.msra.mxu1 %v8120_v16  ;;  %v8260_v16 = vor.u32 %v9284_v45, %v8257_v15  ;;  %v9256_v53 = vld [vmem:[%s10387_s15 + $0x264] sm:$0xf0] }
 0x761   : > { %4911 = vmatpush.bf16.msra.mxu3 %v8156_v61  ;;  %4898 = vmatpush.bf16.msra.mxu2 %v7868_v27  ;;  %v8000_v61 = vor.u32 %v9224_v55, %v7999_v5  ;;  %v7967_v27 = vld [vmem:[%s10387_s15 + $0x108] sm:$0xf] }
 0x762   : > { %4871 = vmatpush.bf16.msra.mxu0 %v7832_v12  ;;  %v8224_v12 = vor.u32 %v9280_v39, %v8223_v6  ;;  %v9180_v39 = vld [vmem:[%s10387_s15 + $0xc] sm:$0xf] }
 0x764   : > { %4885 = vmatpush.bf16.msra.mxu1 %v8088_v8  ;;  %v8228_v8 = vor.u32 %v9276_v7, %v8225_v26  ;;  %v8097_v7 = vld [vmem:[%s10387_s15 + $0x228] sm:$0xf0] }
 0x765   : > { %4912 = vmatpush.bf16.msra.mxu3 %v8124_v17  ;;  %4899 = vmatpush.bf16.msra.mxu2 %v7836_v35  ;;  %v7968_v17 = vor.u32 %v9216_v10, %v7967_v27  ;;  %v7935_v35 = vld [vmem:[%s10387_s15 + $0xc8] sm:$0xf] }
 0x766   : > { %v9184_v27 = vld [vmem:[%s10387_s15 + $0x24] sm:$0xf0] }
 0x767   : > { %v8095_v10 = vld [vmem:[%s10387_s15 + $0x208] sm:$0xf] }
 0x769   : > { %4913 = vmatpush.bf16.msra.mxu3 %v8092_v36  ;;  %v9272_v36 = vld [vmem:[%s10387_s15 + $0x2e4] sm:$0xf0] }
 0x7c5   : > { %v4002_v40 = vpop.xlane.xlu0 %4001 }
 0x7c6   : > { %v4006_v59 = vmul.f32 %v4002_v40, %v10660_v50  ;;  %v8319_v40 = vld [vmem:[%s10387_s15 + $0x3c8] sm:$0xf] }
 0x7c7   : > { %v8320_v18 = vor.u32 %v9304_v43, %v8319_v40  ;;  %v7937_v40 = vld [vmem:[%s10387_s15 + $0xe8] sm:$0xf0]  ;;  %v8192_v43 = vor.u32 %v9272_v36, %v8191_v63 }
 0x7c8   : > { %v11278_v33 = vsub.f32 %v11224_v20, %v4006_v59  ;;  %v11281_v44 = vsub.f32 %v11226_v22, %v4006_v59  ;;  %v8064_v59 = vor.u32 %v9240_v38, %v8063_v34  ;;  %v7936_v34 = vor.u32 %v9208_v23, %v7935_v35  ;;  %v9204_v38 = vld [vmem:[%s10387_s15 + $0xcc] sm:$0xf] }
 0x7c9   : > { %4934 = vmatpush.bf16.msrb.mxu1 %v8320_v18  ;;  %v9268_v18 = vld [vmem:[%s10387_s15 + $0x2cc] sm:$0xf] }
 0x7ca   : > { %v4012_v41 = vmul.f32 %v11278_v33, %v11278_v33  ;;  %v4013_v46 = vmul.f32 %v11281_v44, %v11281_v44  ;;  %4920 = vmatpush.bf16.msrb.mxu0 %v8064_v59  ;;  %v7940_v59 = vor.u32 %v9204_v38, %v7937_v40 }
 0x7cc   : > { %v4016_v47 = vadd.f32 %v4013_v46, %v4012_v41  ;;  %v9300_v41 = vld [vmem:[%s10387_s15 + $0x3cc] sm:$0xf]  ;;  %v8068_v46 = vor.u32 %v9236_v9, %v8065_v60 }
 0x7cd   : > { %v4005_v48 = vpop.xlane.xlu2 %4004  ;;  %v8193_v9 = vld [vmem:[%s10387_s15 + $0x2e8] sm:$0xf0] }
 0x7ce   : > { %v4007_v49 = vmul.f32 %v4005_v48, %v10660_v50  ;;  %4017 = vadd.xlane.f32.xlu1 %v4016_v47  ;;  %v8321_v47 = vld [vmem:[%s10387_s15 + $0x3e8] sm:$0xf0]  ;;  %v8031_v48 = vld [vmem:[%s10387_s15 + $0x188] sm:$0xf]  ;;  %4948 = vmatpush.bf16.msrb.mxu2 %v8068_v46  ;;  %v8196_v60 = vor.u32 %v9268_v18, %v8193_v9 }
 0x7cf   : > { %v9200_v46 = vld [vmem:[%s10387_s15 + $0xa4] sm:$0xf0] }
 0x7d0   : > { %v11289_v54 = vsub.f32 %v11230_v57, %v4007_v49  ;;  %v11292_v56 = vsub.f32 %v11232_v37, %v4007_v49  ;;  %v9232_v49 = vld [vmem:[%s10387_s15 + $0x1a4] sm:$0xf0] }
 0x7d2   : > { %v4014_v13 = vmul.f32 %v11289_v54, %v11289_v54  ;;  %v4015_v42 = vmul.f32 %v11292_v56, %v11292_v56  ;;  %4949 = vmatpush.bf16.msrb.mxu2 %v8036_v29  ;;  %v9192_v29 = vld [vmem:[%s10387_s15 + $0x64] sm:$0xf0] }
 0x7d3   : > { %v7872_v55 = vor.u32 %v9192_v29, %v7871_v2 }
 0x7d4   : > { %v4019_v52 = vadd.f32 %v4015_v42, %v4014_v13  ;;  %v8324_v13 = vor.u32 %v9300_v41, %v8321_v47  ;;  %v8032_v42 = vor.u32 %v9232_v49, %v8031_v48  ;;  %v7903_v41 = vld [vmem:[%s10387_s15 + $0x88] sm:$0xf] }
 0x7d5   : > { %v8159_v47 = vld [vmem:[%s10387_s15 + $0x288] sm:$0xf]  ;;  %v7904_v48 = vor.u32 %v9200_v46, %v7903_v41 }
 0x7d6   : > { %4020 = vadd.xlane.f32.xlu0 %v4019_v52  ;;  %v8287_v52 = vld [vmem:[%s10387_s15 + $0x388] sm:$0xf]  ;;  %4962 = vmatpush.bf16.msrb.mxu3 %v8324_v13  ;;  %v9196_v13 = vld [vmem:[%s10387_s15 + $0x8c] sm:$0xf] }
 0x7d7   : > { %v8288_v28 = vor.u32 %v9296_v62, %v8287_v52  ;;  %4921 = vmatpush.bf16.msrb.mxu0 %v8032_v42  ;;  %4950 = vmatpush.bf16.msrb.mxu2 %v8004_v31  ;;  %v9264_v49 = vld [vmem:[%s10387_s15 + $0x2a4] sm:$0xf0]  ;;  %v7905_v42 = vld [vmem:[%s10387_s15 + $0xa8] sm:$0xf0] }
 0x7d8   : > { %v8160_v52 = vor.u32 %v9264_v49, %v8159_v47  ;;  %v7908_v62 = vor.u32 %v9196_v13, %v7905_v42  ;;  %v8129_v31 = vld [vmem:[%s10387_s15 + $0x268] sm:$0xf0]  ;;  %v4060_v49 = vperm.slane %v11220_v32, 2  ;;  %v4061_v13 = vperm.slane %v11220_v32, 6 }
 0x7d9   : > { %4935 = vmatpush.bf16.msrb.mxu1 %v8288_v28  ;;  %v8161_v28 = vld [vmem:[%s10387_s15 + $0x2a8] sm:$0xf0] }
 0x7da   : > { %4963 = vmatpush.bf16.msrb.mxu3 %v8292_v11  ;;  %v8164_v58 = vor.u32 %v9260_v0, %v8161_v28  ;;  %v8127_v11 = vld [vmem:[%s10387_s15 + $0x248] sm:$0xf]  ;;  %v4065_v2 = vperm.slane %v4061_v13, 2  ;;  %v9217_v13 = vld [vmem:[%s10387_s15 + $0x12c] sm:$0xf0] }
 0x7db   : > { %4922 = vmatpush.bf16.msrb.mxu0 %v8000_v61  ;;  %4951 = vmatpush.bf16.msrb.mxu2 %v7972_v25  ;;  %v9188_v61 = vld [vmem:[%s10387_s15 + $0x4c] sm:$0xf]  ;;  %v8128_v14 = vor.u32 %v9256_v53, %v8127_v11 }
 0x7dc   : > { %v7876_v4 = vor.u32 %v9188_v61, %v7873_v24  ;;  %v9244_v25 = vld [vmem:[%s10387_s15 + $0x20c] sm:$0xf]  ;;  %v9241_v61 = vld [vmem:[%s10387_s15 + $0x1ec] sm:$0xf0] }
 0x7dd   : > { %4936 = vmatpush.bf16.msrb.mxu1 %v8256_v30  ;;  %v9252_v30 = vld [vmem:[%s10387_s15 + $0x24c] sm:$0xf]  ;;  %v8100_v26 = vor.u32 %v9244_v25, %v8097_v7  ;;  %v8327_v24 = vld [vmem:[%s10387_s15 + $0x3d0] sm:$0xf] }
 0x7de   : > { %4964 = vmatpush.bf16.msrb.mxu3 %v8260_v16  ;;  %v8132_v15 = vor.u32 %v9252_v30, %v8129_v31  ;;  %v7839_v16 = vld [vmem:[%s10387_s15 + $0x8] sm:$0xf]  ;;  %v8295_v25 = vld [vmem:[%s10387_s15 + $0x390] sm:$0xf] }
 0x7df   : > { %4923 = vmatpush.bf16.msrb.mxu0 %v7968_v17  ;;  %4952 = vmatpush.bf16.msrb.mxu2 %v7940_v59  ;;  %v7840_v6 = vor.u32 %v9184_v27, %v7839_v16  ;;  %v9248_v17 = vld [vmem:[%s10387_s15 + $0x224] sm:$0xf0]  ;;  %v8073_v16 = vld [vmem:[%s10387_s15 + $0x1f0] sm:$0xf0]  ;;  %v9297_v7 = vld [vmem:[%s10387_s15 + $0x3ac] sm:$0xf0] }
 0x7e0   : > { %v8096_v21 = vor.u32 %v9248_v17, %v8095_v10 }
 0x7e1   : > { %4937 = vmatpush.bf16.msrb.mxu1 %v8224_v12  ;;  %v7844_v12 = vor.u32 %v9180_v39, %v7841_v19  ;;  %v8039_v39 = vld [vmem:[%s10387_s15 + $0x190] sm:$0xf] }
 0x7e2   : > { %4965 = vmatpush.bf16.msrb.mxu3 %v8228_v8  ;;  %v9233_v19 = vld [vmem:[%s10387_s15 + $0x1ac] sm:$0xf0] }
 0x7e3   : > { %4924 = vmatpush.bf16.msrb.mxu0 %v7936_v34  ;;  %4953 = vmatpush.bf16.msrb.mxu2 %v7908_v62 }
 0x7e5   : > { %4938 = vmatpush.bf16.msrb.mxu1 %v8192_v43 }
 0x7e6   : > { %4966 = vmatpush.bf16.msrb.mxu3 %v8196_v60  ;;  %v9677_v60 = vld [vmem:[%s10391_s23 + $0x10] sm:$0xff] }
 0x7e7   : > { %4925 = vmatpush.bf16.msrb.mxu0 %v7904_v48  ;;  %4954 = vmatpush.bf16.msrb.mxu2 %v7876_v4  ;;  %v4050_v41 = vperm.slane %v9677_v60, 2  ;;  %v4051_v46 = vperm.slane %v9677_v60, 6  ;;  %v9237_v4 = vld [vmem:[%s10387_s15 + $0x1d4] sm:$0xf] }
 0x7e8   : > { %v8009_v60 = vld [vmem:[%s10387_s15 + $0x170] sm:$0xf0] }
 0x7e9   : > { %4939 = vmatpush.bf16.msrb.mxu1 %v8160_v52  ;;  %v4054_v52 = vperm.slane %v4050_v41, 2  ;;  %v4055_v62 = vperm.slane %v4051_v46, 2  ;;  %v9285_v41 = vld [vmem:[%s10387_s15 + $0x354] sm:$0xf] }
 0x7ea   : > { %4967 = vmatpush.bf16.msrb.mxu3 %v8164_v58  ;;  %v8265_v46 = vld [vmem:[%s10387_s15 + $0x370] sm:$0xf0] }
 0x7eb   : > { %4926 = vmatpush.bf16.msrb.mxu0 %v7872_v55  ;;  %4955 = vmatpush.bf16.msrb.mxu2 %v7844_v12 }
 0x7ed   : > { %4940 = vmatpush.bf16.msrb.mxu1 %v8128_v14  ;;  %v9305_v14 = vld [vmem:[%s10387_s15 + $0x3ec] sm:$0xf0] }
 0x7ee   : > { %4968 = vmatpush.bf16.msrb.mxu3 %v8132_v15  ;;  %v8328_v17 = vor.u32 %v9305_v14, %v8327_v24  ;;  %v7945_v24 = vld [vmem:[%s10387_s15 + $0xf0] sm:$0xf0] }
 0x7ef   : > { %4927 = vmatpush.bf16.msrb.mxu0 %v7840_v6  ;;  %v9269_v14 = vld [vmem:[%s10387_s15 + $0x2d4] sm:$0xf] }
 0x7f1   : > { %4941 = vmatpush.bf16.msrb.mxu1 %v8096_v21  ;;  %v8076_v21 = vor.u32 %v9237_v4, %v8073_v16  ;;  %v8201_v4 = vld [vmem:[%s10387_s15 + $0x2f0] sm:$0xf0] }
 0x7f2   : > { %4969 = vmatpush.bf16.msrb.mxu3 %v8100_v26  ;;  %v9229_v26 = vld [vmem:[%s10387_s15 + $0x194] sm:$0xf] }
 0x841   : > { %v4018_v51 = vpop.xlane.xlu1 %4017 }
 0x842   : > { %v4022_v5 = vmul.f32 %v4018_v51, %v10660_v50  ;;  %v4064_v51 = vperm.slane %v4060_v49, 2  ;;  %v7975_v49 = vld [vmem:[%s10387_s15 + $0x110] sm:$0xf] }
 0x844   : > { %v4024_v45 = vadd.f32 1e-05, %v4022_v5 }
 0x846   : > { %9669 = vrsqrt.f32 %v4024_v45  ;;  %vm4032_vm0 = vweird.f32 %v4024_v45 }
 0x849   : > { %v4021_v8 = vpop.xlane.xlu0 %4020 }
 0x84a   : > { %v4023_v35 = vmul.f32 %v4021_v8, %v10660_v50  ;;  %v8041_v8 = vld [vmem:[%s10387_s15 + $0x1b0] sm:$0xf0] }
 0x84c   : > { %v9670_v23 = vpop.eup %9669  ;;  %v4025_v63 = vadd.f32 1e-05, %v4023_v35  ;;  %v9293_v35 = vld [vmem:[%s10387_s15 + $0x394] sm:$0xf] }
 0x84d   : > { %v4027_v34 = vmul.f32 %v9670_v23, %v4024_v45  ;;  %vm4033_vm15 = vweird.f32 %v9670_v23 }
 0x84e   : > { %9671 = vrsqrt.f32 %v4025_v63  ;;  %vm4034_vm1 = vmor %vm4032_vm0, %vm4033_vm15  ;;  %vm4042_vm3 = vweird.f32 %v4025_v63 }
 0x84f   : > { %v4028_v36 = vmul.f32 %v9670_v23, %v4027_v34  ;;  %v8296_v34 = vor.u32 %v9297_v7, %v8295_v25  ;;  %v7879_v7 = vld [vmem:[%s10387_s15 + $0x50] sm:$0xf] }
 0x851   : > { %v4029_v38 = vmul.f32 0.5, %v4028_v36  ;;  %v8007_v36 = vld [vmem:[%s10387_s15 + $0x150] sm:$0xf] }
 0x853   : > { %v4030_v40 = vsub.f32 1.5, %v4029_v38  ;;  %v9225_v38 = vld [vmem:[%s10387_s15 + $0x16c] sm:$0xf0] }
 0x854   : > { %v9672_v43 = vpop.eup %9671 }
 0x855   : > { %v4031_v59 = vmul.f32 %v9670_v23, %v4030_v40  ;;  %v4037_v18 = vmul.f32 %v9672_v43, %v4025_v63  ;;  %vm4043_vm2 = vweird.f32 %v9672_v43  ;;  %v8040_v63 = vor.u32 %v9233_v19, %v8039_v39  ;;  %v7913_v39 = vld [vmem:[%s10387_s15 + $0xb0] sm:$0xf0] }
 0x856   : > { %vm4044_vm4 = vmor %vm4042_vm3, %vm4043_vm2  ;;  %v8044_v40 = vor.u32 %v9229_v26, %v8041_v8  ;;  %v9261_v19 = vld [vmem:[%s10387_s15 + $0x294] sm:$0xf]  ;;  %v9193_v26 = vld [vmem:[%s10387_s15 + $0x6c] sm:$0xf0] }
 0x857   : > { %v4038_v9 = vmul.f32 %v9672_v43, %v4037_v18  ;;  %v4035_v47 = vsel %vm4034_vm1, %v9670_v23, %v4031_v59  ;;  %v8297_v23 = vld [vmem:[%s10387_s15 + $0x3b0] sm:$0xf0]  ;;  %v8263_v59 = vld [vmem:[%s10387_s15 + $0x350] sm:$0xf] }
 0x858   : > { %v4046_v0 = vmul.f32 %v4035_v47, %v11278_v33  ;;  %v4047_v28 = vmul.f32 %v4035_v47, %v11281_v44  ;;  %v8071_v44 = vld [vmem:[%s10387_s15 + $0x1d0] sm:$0xf]  ;;  %v8008_v47 = vor.u32 %v9225_v38, %v8007_v36  ;;  %v7881_v36 = vld [vmem:[%s10387_s15 + $0x70] sm:$0xf0] }
 0x859   : > { %v4039_v48 = vmul.f32 0.5, %v4038_v9  ;;  %v8072_v6 = vor.u32 %v9241_v61, %v8071_v44  ;;  %v9289_v18 = vld [vmem:[%s10387_s15 + $0x36c] sm:$0xf0]  ;;  %v9221_v9 = vld [vmem:[%s10387_s15 + $0x154] sm:$0xf] }
 0x85a   : > { %v4056_v32 = vmul.f32 %v4054_v52, %v4046_v0  ;;  %v4057_v11 = vmul.f32 %v4055_v62, %v4047_v28  ;;  %v9281_v0 = vld [vmem:[%s10387_s15 + $0x32c] sm:$0xf0]  ;;  %v9213_v28 = vld [vmem:[%s10387_s15 + $0x114] sm:$0xf] }
 0x85b   : > { %v4040_v42 = vsub.f32 1.5, %v4039_v48  ;;  %v8264_v48 = vor.u32 %v9289_v18, %v8263_v59  ;;  %v9273_v44 = vld [vmem:[%s10387_s15 + $0x2ec] sm:$0xf0]  ;;  %v9205_v61 = vld [vmem:[%s10387_s15 + $0xd4] sm:$0xf]  ;;  %v7880_v59 = vor.u32 %v9193_v26, %v7879_v7 }
 0x85c   : > { %v4066_v30 = vadd.f32 %v4064_v51, %v4056_v32  ;;  %v4067_v31 = vadd.f32 %v4065_v2, %v4057_v11  ;;  %v7943_v11 = vld [vmem:[%s10387_s15 + $0xd0] sm:$0xf]  ;;  %v7948_v16 = vor.u32 %v9205_v61, %v7945_v24  ;;  %v9253_v38 = vld [vmem:[%s10387_s15 + $0x254] sm:$0xf]  ;;  %v9234_v61 = vld [vmem:[%s10387_s15 + $0x1b4] sm:$0xf0] }
 0x85d   : > { %v4041_v58 = vmul.f32 %v9672_v43, %v4040_v42  ;;  %v8012_v42 = vor.u32 %v9221_v9, %v8009_v60  ;;  %v9185_v9 = vld [vmem:[%s10387_s15 + $0x2c] sm:$0xf0]  ;;  %v8017_v7 = vld [vmem:[%s10387_s15 + $0x178] sm:$0xf0] }
 0x85e   : > { %v8103_v60 = vld [vmem:[%s10387_s15 + $0x210] sm:$0xf]  ;;  %v9286_v26 = vld [vmem:[%s10387_s15 + $0x35c] sm:$0xf] }
 0x85f   : > { %v4045_v29 = vsel %vm4044_vm4, %v9672_v43, %v4041_v58  ;;  %v8300_v43 = vor.u32 %v9293_v35, %v8297_v23  ;;  %v7977_v58 = vld [vmem:[%s10387_s15 + $0x130] sm:$0xf0]  ;;  %v8135_v23 = vld [vmem:[%s10387_s15 + $0x250] sm:$0xf] }
 0x860   : > { %v4048_v5 = vmul.f32 %v4045_v29, %v11289_v54  ;;  %v4049_v33 = vmul.f32 %v4045_v29, %v11292_v56  ;;  %v9301_v54 = vld [vmem:[%s10387_s15 + $0x3d4] sm:$0xf]  ;;  %v7976_v29 = vor.u32 %v9217_v13, %v7975_v49 }
 0x861   : > { %v8329_v56 = vld [vmem:[%s10387_s15 + $0x3f0] sm:$0xf0] }
 0x862   : > { %v4058_v55 = vmul.f32 %v4054_v52, %v4048_v5  ;;  %v4059_v53 = vmul.f32 %v4055_v62, %v4049_v33  ;;  %v8332_v12 = vor.u32 %v9301_v54, %v8329_v56  ;;  %v8268_v52 = vor.u32 %v9285_v41, %v8265_v46  ;;  %v8231_v62 = vld [vmem:[%s10387_s15 + $0x310] sm:$0xf]  ;;  %v7849_v49 = vld [vmem:[%s10387_s15 + $0x30] sm:$0xf0] }
 0x863   : > { %v8232_v32 = vor.u32 %v9281_v0, %v8231_v62  ;;  %v9209_v5 = vld [vmem:[%s10387_s15 + $0xec] sm:$0xf0]  ;;  %v7980_v33 = vor.u32 %v9213_v28, %v7977_v58  ;;  %v8204_v54 = vor.u32 %v9269_v14, %v8201_v4  ;;  %v9245_v13 = vld [vmem:[%s10387_s15 + $0x214] sm:$0xf]  ;;  %v9242_v62 = vld [vmem:[%s10387_s15 + $0x1f4] sm:$0xf0] }
 0x864   : > { %v4068_v45 = vadd.f32 %v4064_v51, %v4058_v55  ;;  %v4069_v15 = vadd.f32 %v4065_v2, %v4059_v53  ;;  %v9277_v51 = vld [vmem:[%s10387_s15 + $0x314] sm:$0xf]  ;;  %v8199_v53 = vld [vmem:[%s10387_s15 + $0x2d0] sm:$0xf]  ;;  %v8335_v0 = vld [vmem:[%s10387_s15 + $0x3d8] sm:$0xf] }
 0x865   : > { %v8233_v2 = vld [vmem:[%s10387_s15 + $0x330] sm:$0xf0]  ;;  %v8167_v56 = vld [vmem:[%s10387_s15 + $0x290] sm:$0xf]  ;;  %v9306_v28 = vld [vmem:[%s10387_s15 + $0x3f4] sm:$0xf0] }
 0x866   : > { %v11403_v27 = vpack.c.bf16 %v4068_v45, %v4066_v30  ;;  %v11405_v10 = vpack.c.bf16 %v4069_v15, %v4067_v31  ;;  %v8236_v55 = vor.u32 %v9277_v51, %v8233_v2  ;;  %v7944_v30 = vor.u32 %v9209_v5, %v7943_v11  ;;  %v7911_v45 = vld [vmem:[%s10387_s15 + $0x90] sm:$0xf]  ;;  %v9238_v58 = vld [vmem:[%s10387_s15 + $0x1dc] sm:$0xf]  ;;  %v8303_v4 = vld [vmem:[%s10387_s15 + $0x398] sm:$0xf] }
 0x867   : > { %v8200_v31 = vor.u32 %v9273_v44, %v8199_v53  ;;  %v9201_v15 = vld [vmem:[%s10387_s15 + $0xac] sm:$0xf0]  ;;  %v8337_v11 = vld [vmem:[%s10387_s15 + $0x3f8] sm:$0xf0]  ;;  %v8336_v53 = vor.u32 %v9306_v28, %v8335_v0  ;;  %v8047_v44 = vld [vmem:[%s10387_s15 + $0x198] sm:$0xf] }
 0x868   : > { %4872 = vmatmul.bf16.vlgmr.msra.gmra.mxu0 %v11403_v27  ;;  %4886 = vmatmul.bf16.vlgmr.msra.gmra.mxu1 %v11405_v10  ;;  %v9249_v41 = vld [vmem:[%s10387_s15 + $0x22c] sm:$0xf0]  ;;  %v7953_v0 = vld [vmem:[%s10387_s15 + $0xf8] sm:$0xf0] }
 0x869   : > { %4900 = vmatmul.bf16.vlgmr.msra.gmra.mxu2 %v11403_v27  ;;  %4914 = vmatmul.bf16.vlgmr.msra.gmra.mxu3 %v11405_v10  ;;  %v8104_v2 = vor.u32 %v9249_v41, %v8103_v60  ;;  %v8241_v60 = vld [vmem:[%s10387_s15 + $0x338] sm:$0xf0] }
 0x86a   : > { %4976 = vmatpush.bf16.msra.mxu0 %v8072_v6  ;;  %4990 = vmatpush.bf16.msra.mxu1 %v8328_v17  ;;  %v9265_v6 = vld [vmem:[%s10387_s15 + $0x2ac] sm:$0xf0]  ;;  %v9197_v17 = vld [vmem:[%s10387_s15 + $0x94] sm:$0xf]  ;;  %v9270_v28 = vld [vmem:[%s10387_s15 + $0x2dc] sm:$0xf] }
 0x86b   : > { %5004 = vmatpush.bf16.msra.mxu2 %v8076_v21  ;;  %5018 = vmatpush.bf16.msra.mxu3 %v8332_v12  ;;  %v8169_v21 = vld [vmem:[%s10387_s15 + $0x2b0] sm:$0xf0]  ;;  %v7912_v12 = vor.u32 %v9201_v15, %v7911_v45  ;;  %v8168_v25 = vor.u32 %v9265_v6, %v8167_v56  ;;  %v7916_v8 = vor.u32 %v9197_v17, %v7913_v39  ;;  %v8049_v45 = vld [vmem:[%s10387_s15 + $0x1b8] sm:$0xf0]  ;;  %v8015_v6 = vld [vmem:[%s10387_s15 + $0x158] sm:$0xf] }
 0x86c   : > { %v8172_v35 = vor.u32 %v9261_v19, %v8169_v21  ;;  %v9294_v15 = vld [vmem:[%s10387_s15 + $0x39c] sm:$0xf]  ;;  %v9226_v17 = vld [vmem:[%s10387_s15 + $0x174] sm:$0xf0] }
 0x86d   : > { %v8271_v21 = vld [vmem:[%s10387_s15 + $0x358] sm:$0xf] }
 0x86e   : > { %4977 = vmatpush.bf16.msra.mxu0 %v8040_v63  ;;  %4991 = vmatpush.bf16.msra.mxu1 %v8296_v34  ;;  %v9257_v63 = vld [vmem:[%s10387_s15 + $0x26c] sm:$0xf0]  ;;  %v9189_v34 = vld [vmem:[%s10387_s15 + $0x54] sm:$0xf] }
 0x86f   : > { %5005 = vmatpush.bf16.msra.mxu2 %v8044_v40  ;;  %5019 = vmatpush.bf16.msra.mxu3 %v8300_v43  ;;  %v8137_v40 = vld [vmem:[%s10387_s15 + $0x270] sm:$0xf0]  ;;  %v7847_v43 = vld [vmem:[%s10387_s15 + $0x10] sm:$0xf]  ;;  %v8136_v18 = vor.u32 %v9257_v63, %v8135_v23  ;;  %v7884_v46 = vor.u32 %v9189_v34, %v7881_v36  ;;  %v7983_v63 = vld [vmem:[%s10387_s15 + $0x118] sm:$0xf] }
 0x870   : > { %v7848_v51 = vor.u32 %v9185_v9, %v7847_v43  ;;  %v9218_v34 = vld [vmem:[%s10387_s15 + $0x134] sm:$0xf0]  ;;  %v9278_v9 = vld [vmem:[%s10387_s15 + $0x31c] sm:$0xf] }
 0x871   : > { %v9282_v43 = vld [vmem:[%s10387_s15 + $0x334] sm:$0xf0]  ;;  %v7984_v41 = vor.u32 %v9218_v34, %v7983_v63  ;;  %v7857_v63 = vld [vmem:[%s10387_s15 + $0x38] sm:$0xf0] }
 0x872   : > { %4978 = vmatpush.bf16.msra.mxu0 %v8008_v47  ;;  %4992 = vmatpush.bf16.msra.mxu1 %v8264_v48  ;;  %v8140_v47 = vor.u32 %v9253_v38, %v8137_v40  ;;  %v9181_v48 = vld [vmem:[%s10387_s15 + $0x14] sm:$0xf]  ;;  %v8239_v40 = vld [vmem:[%s10387_s15 + $0x318] sm:$0xf]  ;;  %v9246_v34 = vld [vmem:[%s10387_s15 + $0x21c] sm:$0xf] }
 0x873   : > { %5006 = vmatpush.bf16.msra.mxu2 %v8012_v42  ;;  %5020 = vmatpush.bf16.msra.mxu3 %v8268_v52  ;;  %v8105_v42 = vld [vmem:[%s10387_s15 + $0x230] sm:$0xf0]  ;;  %v8079_v52 = vld [vmem:[%s10387_s15 + $0x1d8] sm:$0xf]  ;;  %v7852_v5 = vor.u32 %v9181_v48, %v7849_v49 }
 0x874   : > { %v9210_v48 = vld [vmem:[%s10387_s15 + $0xf4] sm:$0xf0] }
 0x876   : > { %4979 = vmatpush.bf16.msra.mxu0 %v7976_v29  ;;  %4993 = vmatpush.bf16.msra.mxu1 %v8232_v32  ;;  %v8081_v29 = vld [vmem:[%s10387_s15 + $0x1f8] sm:$0xf0] }
 0x877   : > { %5007 = vmatpush.bf16.msra.mxu2 %v7980_v33  ;;  %5021 = vmatpush.bf16.msra.mxu3 %v8236_v55  ;;  %v9302_v32 = vld [vmem:[%s10387_s15 + $0x3dc] sm:$0xf]  ;;  %v8108_v33 = vor.u32 %v9245_v13, %v8105_v42  ;;  %v8080_v55 = vor.u32 %v9242_v62, %v8079_v52  ;;  %v8084_v24 = vor.u32 %v9238_v58, %v8081_v29  ;;  %v8207_v42 = vld [vmem:[%s10387_s15 + $0x2d8] sm:$0xf] }
 0x878   : > { %4928 = vmatmul.bf16.vlgmr.msrb.gmra.mxu0 %v11403_v27  ;;  %4942 = vmatmul.bf16.vlgmr.msrb.gmra.mxu1 %v11405_v10  ;;  %v8340_v14 = vor.u32 %v9302_v32, %v8337_v11  ;;  %v8244_v13 = vor.u32 %v9278_v9, %v8241_v60  ;;  %v9274_v52 = vld [vmem:[%s10387_s15 + $0x2f4] sm:$0xf0]  ;;  %v9206_v62 = vld [vmem:[%s10387_s15 + $0xdc] sm:$0xf] }
 0x879   : > { %4956 = vmatmul.bf16.vlgmr.msrb.gmra.mxu2 %v11403_v27  ;;  %4970 = vmatmul.bf16.vlgmr.msrb.gmra.mxu3 %v11405_v10  ;;  %v8209_v58 = vld [vmem:[%s10387_s15 + $0x2f8] sm:$0xf0]  ;;  %v7919_v29 = vld [vmem:[%s10387_s15 + $0x98] sm:$0xf]  ;;  %v7956_v11 = vor.u32 %v9206_v62, %v7953_v0  ;;  %v9336_v62 = vld [vmem:[%s10389_s14 + $0xe4] sm:$0xf0] }
 0x87a   : > { %4980 = vmatpush.bf16.msra.mxu0 %v7944_v30  ;;  %4994 = vmatpush.bf16.msra.mxu1 %v8200_v31  ;;  %v9298_v30 = vld [vmem:[%s10387_s15 + $0x3b4] sm:$0xf0]  ;;  %v9230_v31 = vld [vmem:[%s10387_s15 + $0x19c] sm:$0xf]  ;;  %v8383_v0 = vld [vmem:[%s10389_s14 + $0x50] sm:$0xf] }
 0x87b   : > { %5008 = vmatpush.bf16.msra.mxu2 %v7948_v16  ;;  %5022 = vmatpush.bf16.msra.mxu3 %v8204_v54  ;;  %v8305_v16 = vld [vmem:[%s10387_s15 + $0x3b8] sm:$0xf0]  ;;  %v8048_v54 = vor.u32 %v9234_v61, %v8047_v44  ;;  %v8304_v56 = vor.u32 %v9298_v30, %v8303_v4  ;;  %v8052_v39 = vor.u32 %v9230_v31, %v8049_v45  ;;  %v9202_v32 = vld [vmem:[%s10387_s15 + $0xb4] sm:$0xf0] }
 0x87c   : > { %v8308_v19 = vor.u32 %v9294_v15, %v8305_v16  ;;  %v7921_v44 = vld [vmem:[%s10387_s15 + $0xb8] sm:$0xf0]  ;;  %v7887_v30 = vld [vmem:[%s10387_s15 + $0x58] sm:$0xf] }
 0x87d   : > { %v9262_v61 = vld [vmem:[%s10387_s15 + $0x29c] sm:$0xf]  ;;  %v9194_v31 = vld [vmem:[%s10387_s15 + $0x74] sm:$0xf0] }
 0x87e   : > { %4981 = vmatpush.bf16.msra.mxu0 %v7912_v12  ;;  %4995 = vmatpush.bf16.msra.mxu1 %v8168_v25  ;;  %v9290_v12 = vld [vmem:[%s10387_s15 + $0x374] sm:$0xf0]  ;;  %v9222_v25 = vld [vmem:[%s10387_s15 + $0x15c] sm:$0xf] }
 0x87f   : > { %5009 = vmatpush.bf16.msra.mxu2 %v7916_v8  ;;  %5023 = vmatpush.bf16.msra.mxu3 %v8172_v35  ;;  %v8273_v8 = vld [vmem:[%s10387_s15 + $0x378] sm:$0xf0]  ;;  %v8016_v35 = vor.u32 %v9226_v17, %v8015_v6  ;;  %v8272_v23 = vor.u32 %v9290_v12, %v8271_v21  ;;  %v8020_v36 = vor.u32 %v9222_v25, %v8017_v7  ;;  %v8143_v16 = vld [vmem:[%s10387_s15 + $0x258] sm:$0xf] }
 0x880   : > { %v8276_v38 = vor.u32 %v9286_v26, %v8273_v8  ;;  %v7889_v6 = vld [vmem:[%s10387_s15 + $0x78] sm:$0xf0]  ;;  %v7855_v12 = vld [vmem:[%s10387_s15 + $0x18] sm:$0xf] }
 0x881   : > { %v9254_v17 = vld [vmem:[%s10387_s15 + $0x25c] sm:$0xf]  ;;  %v9186_v25 = vld [vmem:[%s10387_s15 + $0x34] sm:$0xf0] }
 0x882   : > { %4982 = vmatpush.bf16.msra.mxu0 %v7880_v59  ;;  %4996 = vmatpush.bf16.msra.mxu1 %v8136_v18  ;;  %v9214_v59 = vld [vmem:[%s10387_s15 + $0x11c] sm:$0xf]  ;;  %v8111_v7 = vld [vmem:[%s10387_s15 + $0x218] sm:$0xf] }
 0x883   : > { %5010 = vmatpush.bf16.msra.mxu2 %v7884_v46  ;;  %5024 = vmatpush.bf16.msra.mxu3 %v8140_v47  ;;  %v7985_v18 = vld [vmem:[%s10387_s15 + $0x138] sm:$0xf0]  ;;  %v8240_v46 = vor.u32 %v9282_v43, %v8239_v40  ;;  %v7951_v47 = vld [vmem:[%s10387_s15 + $0xd8] sm:$0xf]  ;;  %v8463_v43 = vld [vmem:[%s10389_s14 + $0xf0] sm:$0xf] }
 0x884   : > { %v7988_v49 = vor.u32 %v9214_v59, %v7985_v18  ;;  %v9322_v40 = vld [vmem:[%s10389_s14 + $0x74] sm:$0xf0]  ;;  %v7856_v18 = vor.u32 %v9186_v25, %v7855_v12  ;;  %v9312_v12 = vld [vmem:[%s10389_s14 + $0x24] sm:$0xf0]  ;;  %v8423_v25 = vld [vmem:[%s10389_s14 + $0xa0] sm:$0xf] }
 0x885   : > { %v9338_v59 = vld [vmem:[%s10389_s14 + $0xf4] sm:$0xf0] }
 0x886   : > { %4983 = vmatpush.bf16.msra.mxu0 %v7848_v51  ;;  %4997 = vmatpush.bf16.msra.mxu1 %v8104_v2  ;;  %v7952_v51 = vor.u32 %v9210_v48, %v7951_v47  ;;  %v8208_v2 = vor.u32 %v9274_v52, %v8207_v42  ;;  %v8391_v47 = vld [vmem:[%s10389_s14 + $0x60] sm:$0xf]  ;;  %v8464_v48 = vor.u32 %v9338_v59, %v8463_v43  ;;  %v9320_v42 = vld [vmem:[%s10389_s14 + $0x64] sm:$0xf0]  ;;  %v8655_v59 = vld [vmem:[%s10389_s14 + $0x270] sm:$0xf] }
 0x887   : > { %5011 = vmatpush.bf16.msra.mxu2 %v7852_v5  ;;  %5025 = vmatpush.bf16.msra.mxu3 %v8108_v33  ;;  %v8212_v5 = vor.u32 %v9270_v28, %v8209_v58  ;;  %v8175_v33 = vld [vmem:[%s10387_s15 + $0x298] sm:$0xf]  ;;  %v8455_v52 = vld [vmem:[%s10389_s14 + $0xe0] sm:$0xf]  ;;  %v8392_v58 = vor.u32 %v9320_v42, %v8391_v47 }
 0x888   : > { %v8647_v42 = vld [vmem:[%s10389_s14 + $0x260] sm:$0xf] }
 0x889   : > { %4984 = vmatmul.bf16.vlgmr.msra.gmra.mxu0 %v11403_v27  ;;  %4998 = vmatmul.bf16.vlgmr.msra.gmra.mxu1 %v11405_v10 }
 0x88a   : > { %5032 = vmatpush.bf16.msrb.mxu0 %v8080_v55  ;;  %5046 = vmatpush.bf16.msrb.mxu1 %v8336_v53  ;;  %v9266_v55 = vld [vmem:[%s10387_s15 + $0x2b4] sm:$0xf0]  ;;  %v9198_v53 = vld [vmem:[%s10387_s15 + $0x9c] sm:$0xf] }
 0x88b   : > { %5060 = vmatpush.bf16.msrb.mxu2 %v8084_v24  ;;  %5074 = vmatpush.bf16.msrb.mxu3 %v8340_v14  ;;  %v8177_v24 = vld [vmem:[%s10387_s15 + $0x2b8] sm:$0xf0]  ;;  %v7920_v14 = vor.u32 %v9202_v32, %v7919_v29  ;;  %v8176_v4 = vor.u32 %v9266_v55, %v8175_v33  ;;  %v7924_v45 = vor.u32 %v9198_v53, %v7921_v44  ;;  %v8519_v29 = vld [vmem:[%s10389_s14 + $0x160] sm:$0xf]  ;;  %v9352_v32 = vld [vmem:[%s10389_s14 + $0x164] sm:$0xf0] }
 0x88c   : > { %5012 = vmatmul.bf16.vlgmr.msra.gmra.mxu2 %v11403_v27  ;;  %5026 = vmatmul.bf16.vlgmr.msra.gmra.mxu3 %v11405_v10  ;;  %v8180_v15 = vor.u32 %v9262_v61, %v8177_v24  ;;  %v8591_v33 = vld [vmem:[%s10389_s14 + $0x1f0] sm:$0xf]  ;;  %v9370_v55 = vld [vmem:[%s10389_s14 + $0x1f4] sm:$0xf0]  ;;  %v8520_v53 = vor.u32 %v9352_v32, %v8519_v29  ;;  %v8375_v24 = vld [vmem:[%s10389_s14 + $0x40] sm:$0xf] }
 0x88d   : > { %v8592_v44 = vor.u32 %v9370_v55, %v8591_v33  ;;  %v8711_v32 = vld [vmem:[%s10389_s14 + $0x2e0] sm:$0xf]  ;;  %v9348_v55 = vld [vmem:[%s10389_s14 + $0x144] sm:$0xf0] }
 0x88e   : > { %5033 = vmatpush.bf16.msrb.mxu0 %v8048_v54  ;;  %5047 = vmatpush.bf16.msrb.mxu1 %v8304_v56  ;;  %v9258_v54 = vld [vmem:[%s10387_s15 + $0x274] sm:$0xf0]  ;;  %v9190_v56 = vld [vmem:[%s10387_s15 + $0x5c] sm:$0xf]  ;;  %v8503_v33 = vld [vmem:[%s10389_s14 + $0x140] sm:$0xf] }
 0x88f   : > { %5061 = vmatpush.bf16.msrb.mxu2 %v8052_v39  ;;  %5075 = vmatpush.bf16.msrb.mxu3 %v8308_v19  ;;  %v8145_v39 = vld [vmem:[%s10387_s15 + $0x278] sm:$0xf0]  ;;  %v7888_v19 = vor.u32 %v9194_v31, %v7887_v30  ;;  %v8144_v21 = vor.u32 %v9258_v54, %v8143_v16  ;;  %v7892_v26 = vor.u32 %v9190_v56, %v7889_v6  ;;  %v9350_v30 = vld [vmem:[%s10389_s14 + $0x154] sm:$0xf0]  ;;  %v9316_v31 = vld [vmem:[%s10389_s14 + $0x44] sm:$0xf0] }
 0x890   : > { %v8148_v8 = vor.u32 %v9254_v17, %v8145_v39  ;;  %v8367_v16 = vld [vmem:[%s10389_s14 + $0x30] sm:$0xf]  ;;  %v9314_v56 = vld [vmem:[%s10389_s14 + $0x34] sm:$0xf0] }
 0x891   : > { %v8431_v6 = vld [vmem:[%s10389_s14 + $0xb0] sm:$0xf]  ;;  %v9330_v17 = vld [vmem:[%s10389_s14 + $0xb4] sm:$0xf0]  ;;  %v8368_v39 = vor.u32 %v9314_v56, %v8367_v16 }
 0x892   : > { %5034 = vmatpush.bf16.msrb.mxu0 %v8016_v35  ;;  %5048 = vmatpush.bf16.msrb.mxu1 %v8272_v23  ;;  %v9250_v35 = vld [vmem:[%s10387_s15 + $0x234] sm:$0xf0]  ;;  %v9182_v23 = vld [vmem:[%s10387_s15 + $0x1c] sm:$0xf] }
 0x893   : > { %5062 = vmatpush.bf16.msrb.mxu2 %v8020_v36  ;;  %5076 = vmatpush.bf16.msrb.mxu3 %v8276_v38  ;;  %v8113_v36 = vld [vmem:[%s10387_s15 + $0x238] sm:$0xf0]  ;;  %v8399_v38 = vld [vmem:[%s10389_s14 + $0x70] sm:$0xf]  ;;  %v8112_v9 = vor.u32 %v9250_v35, %v8111_v7  ;;  %v7860_v60 = vor.u32 %v9182_v23, %v7857_v63  ;;  %v9328_v7 = vld [vmem:[%s10389_s14 + $0xa4] sm:$0xf0] }
 0x894   : > { %v8424_v35 = vor.u32 %v9328_v7, %v8423_v25  ;;  %v9310_v23 = vld [vmem:[%s10389_s14 + $0x14] sm:$0xf0]  ;;  %v8415_v63 = vld [vmem:[%s10389_s14 + $0x90] sm:$0xf]  ;;  %v8487_v7 = vld [vmem:[%s10389_s14 + $0x120] sm:$0xf] }
 0x895   : > { %v9378_v56 = vld [vmem:[%s10389_s14 + $0x234] sm:$0xf0] }
 0x896   : > { %5035 = vmatpush.bf16.msrb.mxu0 %v7984_v41  ;;  %5049 = vmatpush.bf16.msrb.mxu1 %v8240_v46  ;;  %v8116_v41 = vor.u32 %v9246_v34, %v8113_v36  ;;  %v8400_v46 = vor.u32 %v9322_v40, %v8399_v38  ;;  %v9326_v34 = vld [vmem:[%s10389_s14 + $0x94] sm:$0xf0]  ;;  %v8343_v38 = vld [vmem:[%s10389_s14] sm:$0xf]  ;;  %v9308_v40 = vld [vmem:[%s10389_s14 + $0x4] sm:$0xf0] }
 0x897   : > { %5063 = vmatpush.bf16.msrb.mxu2 %v7988_v49  ;;  %5077 = vmatpush.bf16.msrb.mxu3 %v8244_v13  ;;  %v8527_v49 = vld [vmem:[%s10389_s14 + $0x170] sm:$0xf]  ;;  %v9354_v13 = vld [vmem:[%s10389_s14 + $0x174] sm:$0xf0]  ;;  %v8416_v43 = vor.u32 %v9326_v34, %v8415_v63  ;;  %v8344_v47 = vor.u32 %v9308_v40, %v8343_v38 }
 0x898   : > { %v8528_v28 = vor.u32 %v9354_v13, %v8527_v49  ;;  %v8559_v34 = vld [vmem:[%s10389_s14 + $0x1b0] sm:$0xf] }
 0x899   : > { %v8687_v40 = vld [vmem:[%s10389_s14 + $0x2b0] sm:$0xf] }
 0x89a   : > { %5036 = vmatpush.bf16.msrb.mxu0 %v7952_v51  ;;  %5050 = vmatpush.bf16.msrb.mxu1 %v8208_v2  ;;  %v9318_v51 = vld [vmem:[%s10389_s14 + $0x54] sm:$0xf0]  ;;  %v8456_v2 = vor.u32 %v9336_v62, %v8455_v52  ;;  %v9384_v52 = vld [vmem:[%s10389_s14 + $0x264] sm:$0xf0] }
 0x89b   : > { %5064 = vmatpush.bf16.msrb.mxu2 %v7956_v11  ;;  %5078 = vmatpush.bf16.msrb.mxu3 %v8212_v5  ;;  %v8447_v11 = vld [vmem:[%s10389_s14 + $0xd0] sm:$0xf]  ;;  %v9334_v5 = vld [vmem:[%s10389_s14 + $0xd4] sm:$0xf0]  ;;  %v8384_v61 = vor.u32 %v9318_v51, %v8383_v0  ;;  %v8648_v62 = vor.u32 %v9384_v52, %v8647_v42  ;;  %v8583_v51 = vld [vmem:[%s10389_s14 + $0x1e0] sm:$0xf] }
 0x89c   : > { %v8639_v0 = vld [vmem:[%s10389_s14 + $0x250] sm:$0xf]  ;;  %v8679_v42 = vld [vmem:[%s10389_s14 + $0x2a0] sm:$0xf]  ;;  %v9392_v52 = vld [vmem:[%s10389_s14 + $0x2a4] sm:$0xf0] }
 0x89e   : > { %5037 = vmatpush.bf16.msrb.mxu0 %v7920_v14  ;;  %5051 = vmatpush.bf16.msrb.mxu1 %v8176_v4  ;;  %v8448_v14 = vor.u32 %v9334_v5, %v8447_v11  ;;  %v8511_v4 = vld [vmem:[%s10389_s14 + $0x150] sm:$0xf]  ;;  %v9400_v11 = vld [vmem:[%s10389_s14 + $0x2e4] sm:$0xf0] }
 0x89f   : > { %5065 = vmatpush.bf16.msrb.mxu2 %v7924_v45  ;;  %5079 = vmatpush.bf16.msrb.mxu3 %v8180_v15  ;;  %v8439_v45 = vld [vmem:[%s10389_s14 + $0xc0] sm:$0xf]  ;;  %v8376_v15 = vor.u32 %v9316_v31, %v8375_v24  ;;  %v8712_v5 = vor.u32 %v9400_v11, %v8711_v32  ;;  %v8575_v24 = vld [vmem:[%s10389_s14 + $0x1d0] sm:$0xf]  ;;  %v9418_v11 = vld [vmem:[%s10389_s14 + $0x374] sm:$0xf0] }
 0x8a0   : > { %v8703_v31 = vld [vmem:[%s10389_s14 + $0x2d0] sm:$0xf] }
 0x8a2   : > { %5038 = vmatpush.bf16.msrb.mxu0 %v7888_v19  ;;  %5052 = vmatpush.bf16.msrb.mxu1 %v8144_v21  ;;  %v8359_v19 = vld [vmem:[%s10389_s14 + $0x20] sm:$0xf]  ;;  %v8432_v21 = vor.u32 %v9330_v17, %v8431_v6 }
 0x8a3   : > { %5066 = vmatpush.bf16.msrb.mxu2 %v7892_v26  ;;  %5080 = vmatpush.bf16.msrb.mxu3 %v8148_v8  ;;  %v8360_v26 = vor.u32 %v9312_v12, %v8359_v19  ;;  %v8351_v8 = vld [vmem:[%s10389_s14 + $0x10] sm:$0xf]  ;;  %v8567_v17 = vld [vmem:[%s10389_s14 + $0x1c0] sm:$0xf]  ;;  %v9396_v12 = vld [vmem:[%s10389_s14 + $0x2c4] sm:$0xf0] }
 0x8a4   : > { %v8352_v36 = vor.u32 %v9310_v23, %v8351_v8  ;;  %v9376_v23 = vld [vmem:[%s10389_s14 + $0x224] sm:$0xf0] }
 0x8a6   : > { %5039 = vmatpush.bf16.msrb.mxu0 %v7856_v18  ;;  %5053 = vmatpush.bf16.msrb.mxu1 %v8112_v9  ;;  %v8407_v18 = vld [vmem:[%s10389_s14 + $0x80] sm:$0xf]  ;;  %v9324_v9 = vld [vmem:[%s10389_s14 + $0x84] sm:$0xf0] }
 0x8a7   : > { %5067 = vmatpush.bf16.msrb.mxu2 %v7860_v60  ;;  %5081 = vmatpush.bf16.msrb.mxu3 %v8116_v41  ;;  %v9386_v60 = vld [vmem:[%s10389_s14 + $0x274] sm:$0xf0]  ;;  %v8719_v41 = vld [vmem:[%s10389_s14 + $0x2f0] sm:$0xf] }
 0x8a8   : > { %v8656_v49 = vor.u32 %v9386_v60, %v8655_v59 }
 0x8a9   : > { %5040 = vmatmul.bf16.vlgmr.msrb.gmra.mxu0 %v11403_v27  ;;  %5054 = vmatmul.bf16.vlgmr.msrb.gmra.mxu1 %v11405_v10 }
 0x8aa   : > { %5886 = vmatpush.bf16.msra.mxu0 %v8400_v46  ;;  %5900 = vmatpush.bf16.msra.mxu1 %v8464_v48  ;;  %v9402_v46 = vld [vmem:[%s10389_s14 + $0x2f4] sm:$0xf0]  ;;  %v8408_v48 = vor.u32 %v9324_v9, %v8407_v18  ;;  %v8479_v18 = vld [vmem:[%s10389_s14 + $0x110] sm:$0xf] }
 0x8ab   : > { %5068 = vmatmul.bf16.vlgmr.msrb.gmra.mxu2 %v11403_v27  ;;  %5082 = vmatmul.bf16.vlgmr.msrb.gmra.mxu3 %v11405_v10  ;;  %v9332_v27 = vld [vmem:[%s10389_s14 + $0xc4] sm:$0xf0]  ;;  %v8512_v10 = vor.u32 %v9350_v30, %v8511_v4  ;;  %v8720_v13 = vor.u32 %v9402_v46, %v8719_v41  ;;  %v9366_v4 = vld [vmem:[%s10389_s14 + $0x1d4] sm:$0xf0]  ;;  %v8607_v41 = vld [vmem:[%s10389_s14 + $0x210] sm:$0xf] }
 0x8ac   : > { %5914 = vmatpush.bf16.msra.mxu2 %v8528_v28  ;;  %5928 = vmatpush.bf16.msra.mxu3 %v8592_v44  ;;  %v8440_v54 = vor.u32 %v9332_v27, %v8439_v45  ;;  %v9382_v28 = vld [vmem:[%s10389_s14 + $0x254] sm:$0xf0]  ;;  %v8631_v44 = vld [vmem:[%s10389_s14 + $0x240] sm:$0xf]  ;;  %v8576_v30 = vor.u32 %v9366_v4, %v8575_v24  ;;  %v9416_v4 = vld [vmem:[%s10389_s14 + $0x364] sm:$0xf0] }
 0x8ad   : > { %v9398_v45 = vld [vmem:[%s10389_s14 + $0x2d4] sm:$0xf0] }
 0x8ae   : > { %5887 = vmatpush.bf16.msra.mxu0 %v8392_v58  ;;  %5901 = vmatpush.bf16.msra.mxu1 %v8456_v2  ;;  %v8640_v58 = vor.u32 %v9382_v28, %v8639_v0  ;;  %v9368_v2 = vld [vmem:[%s10389_s14 + $0x1e4] sm:$0xf0]  ;;  %v8704_v27 = vor.u32 %v9398_v45, %v8703_v31  ;;  %v9342_v9 = vld [vmem:[%s10389_s14 + $0x114] sm:$0xf0]  ;;  %v8471_v0 = vld [vmem:[%s10389_s14 + $0x100] sm:$0xf] }
 0x8af   : > { %v8584_v29 = vor.u32 %v9368_v2, %v8583_v51  ;;  %v8480_v60 = vor.u32 %v9342_v9, %v8479_v18  ;;  %v9374_v46 = vld [vmem:[%s10389_s14 + $0x214] sm:$0xf0]  ;;  %v9340_v28 = vld [vmem:[%s10389_s14 + $0x104] sm:$0xf0]  ;;  %v8599_v51 = vld [vmem:[%s10389_s14 + $0x200] sm:$0xf] }
 0x8b0   : > { %5915 = vmatpush.bf16.msra.mxu2 %v8520_v53  ;;  %v8504_v53 = vor.u32 %v9348_v55, %v8503_v33  ;;  %v9372_v2 = vld [vmem:[%s10389_s14 + $0x204] sm:$0xf0]  ;;  %v9358_v33 = vld [vmem:[%s10389_s14 + $0x194] sm:$0xf0]  ;;  %v8535_v31 = vld [vmem:[%s10389_s14 + $0x180] sm:$0xf] }
 0x8b1   : > { %5929 = vmatpush.bf16.msra.mxu3 %v8584_v29  ;;  %v8783_v29 = vld [vmem:[%s10389_s14 + $0x370] sm:$0xf]  ;;  %v8600_v32 = vor.u32 %v9372_v2, %v8599_v51  ;;  %v9356_v45 = vld [vmem:[%s10389_s14 + $0x184] sm:$0xf0]  ;;  %v9321_v2 = vld [vmem:[%s10389_s14 + $0x74] sm:$0xf] }
 0x8b2   : > { %5888 = vmatpush.bf16.msra.mxu0 %v8384_v61  ;;  %5902 = vmatpush.bf16.msra.mxu1 %v8448_v14  ;;  %v9380_v61 = vld [vmem:[%s10389_s14 + $0x244] sm:$0xf0]  ;;  %v8784_v55 = vor.u32 %v9418_v11, %v8783_v29  ;;  %v8751_v9 = vld [vmem:[%s10389_s14 + $0x330] sm:$0xf]  ;;  %v8401_v11 = vld [vmem:[%s10389_s14 + $0x78] sm:$0xf0] }
 0x8b3   : > { %v8632_v14 = vor.u32 %v9380_v61, %v8631_v44  ;;  %v8671_v44 = vld [vmem:[%s10389_s14 + $0x290] sm:$0xf]  ;;  %v9390_v61 = vld [vmem:[%s10389_s14 + $0x294] sm:$0xf0]  ;;  %v9408_v51 = vld [vmem:[%s10389_s14 + $0x324] sm:$0xf0] }
 0x8b4   : > { %5916 = vmatpush.bf16.msra.mxu2 %v8512_v10  ;;  %v8495_v10 = vld [vmem:[%s10389_s14 + $0x130] sm:$0xf]  ;;  %v8672_v24 = vor.u32 %v9390_v61, %v8671_v44 }
 0x8b5   : > { %5930 = vmatpush.bf16.msra.mxu3 %v8576_v30 }
 0x8b6   : > { %5889 = vmatpush.bf16.msra.mxu0 %v8376_v15  ;;  %5903 = vmatpush.bf16.msra.mxu1 %v8440_v54  ;;  %v9346_v15 = vld [vmem:[%s10389_s14 + $0x134] sm:$0xf0]  ;;  %v8623_v54 = vld [vmem:[%s10389_s14 + $0x230] sm:$0xf] }
 0x8b7   : > { %v8496_v16 = vor.u32 %v9346_v15, %v8495_v10  ;;  %v8624_v6 = vor.u32 %v9378_v56, %v8623_v54  ;;  %v8663_v10 = vld [vmem:[%s10389_s14 + $0x280] sm:$0xf]  ;;  %v9388_v15 = vld [vmem:[%s10389_s14 + $0x284] sm:$0xf0]  ;;  %v8847_v54 = vld [vmem:[%s10389_s14 + $0x3f0] sm:$0xf] }
 0x8b8   : > { %5917 = vmatpush.bf16.msra.mxu2 %v8504_v53  ;;  %v9434_v56 = vld [vmem:[%s10389_s14 + $0x3f4] sm:$0xf0] }
 0x8ba   : > { %5890 = vmatpush.bf16.msra.mxu0 %v8368_v39  ;;  %5904 = vmatpush.bf16.msra.mxu1 %v8432_v21  ;;  %v9364_v39 = vld [vmem:[%s10389_s14 + $0x1c4] sm:$0xf0]  ;;  %v8695_v21 = vld [vmem:[%s10389_s14 + $0x2c0] sm:$0xf] }
 0x8bb   : > { %v8568_v19 = vor.u32 %v9364_v39, %v8567_v17  ;;  %v8696_v25 = vor.u32 %v9396_v12, %v8695_v21  ;;  %v8848_v39 = vor.u32 %v9434_v56, %v8847_v54  ;;  %v9414_v21 = vld [vmem:[%s10389_s14 + $0x354] sm:$0xf0]  ;;  %v8393_v54 = vld [vmem:[%s10389_s14 + $0x68] sm:$0xf0]  ;;  %v8807_v56 = vld [vmem:[%s10389_s14 + $0x3a0] sm:$0xf] }
 0x8bc   : > { %5918 = vmatpush.bf16.msra.mxu2 %v8496_v16  ;;  %v8664_v16 = vor.u32 %v9388_v15, %v8663_v10 }
 0x8bd   : > { %5931 = vmatpush.bf16.msra.mxu3 %v8568_v19  ;;  %v8767_v19 = vld [vmem:[%s10389_s14 + $0x350] sm:$0xf] }
 0x8be   : > { %5891 = vmatpush.bf16.msra.mxu0 %v8360_v26  ;;  %5905 = vmatpush.bf16.msra.mxu1 %v8424_v35  ;;  %v9344_v26 = vld [vmem:[%s10389_s14 + $0x124] sm:$0xf0]  ;;  %v8615_v35 = vld [vmem:[%s10389_s14 + $0x220] sm:$0xf]  ;;  %v8768_v12 = vor.u32 %v9414_v21, %v8767_v19 }
 0x8bf   : > { %v8488_v8 = vor.u32 %v9344_v26, %v8487_v7  ;;  %v8616_v63 = vor.u32 %v9376_v23, %v8615_v35  ;;  %v9432_v7 = vld [vmem:[%s10389_s14 + $0x3e4] sm:$0xf0] }
 0x8c1   : > { %5919 = vmatpush.bf16.msra.mxu2 %v8488_v8 }
 0x8c2   : > { %5892 = vmatpush.bf16.msra.mxu0 %v8352_v36  ;;  %5906 = vmatpush.bf16.msra.mxu1 %v8416_v43  ;;  %v9362_v36 = vld [vmem:[%s10389_s14 + $0x1b4] sm:$0xf0] }
 0x8c3   : > { %v8560_v38 = vor.u32 %v9362_v36, %v8559_v34  ;;  %v9394_v43 = vld [vmem:[%s10389_s14 + $0x2b4] sm:$0xf0]  ;;  %v9412_v34 = vld [vmem:[%s10389_s14 + $0x344] sm:$0xf0] }
 0x8c4   : > { %v8688_v59 = vor.u32 %v9394_v43, %v8687_v40  ;;  %v9430_v40 = vld [vmem:[%s10389_s14 + $0x3d4] sm:$0xf0] }
 0x8c5   : > { %5932 = vmatpush.bf16.msra.mxu3 %v8560_v38  ;;  %5920 = vmatpush.bf16.msra.mxu2 %v8480_v60  ;;  %v8831_v38 = vld [vmem:[%s10389_s14 + $0x3d0] sm:$0xf]  ;;  %v9410_v60 = vld [vmem:[%s10389_s14 + $0x334] sm:$0xf0] }
 0x8c6   : > { %5893 = vmatpush.bf16.msra.mxu0 %v8344_v47  ;;  %5907 = vmatpush.bf16.msra.mxu1 %v8408_v48  ;;  %v8608_v47 = vor.u32 %v9374_v46, %v8607_v41  ;;  %v8551_v48 = vld [vmem:[%s10389_s14 + $0x1a0] sm:$0xf]  ;;  %v8752_v41 = vor.u32 %v9410_v60, %v8751_v9 }
 0x8ca   : > { %5942 = vmatpush.bf16.msrb.mxu0 %v8656_v49  ;;  %5956 = vmatpush.bf16.msrb.mxu1 %v8720_v13  ;;  %v9360_v49 = vld [vmem:[%s10389_s14 + $0x1a4] sm:$0xf0] }
 0x8cb   : > { %v8552_v13 = vor.u32 %v9360_v49, %v8551_v48  ;;  %v8823_v48 = vld [vmem:[%s10389_s14 + $0x3c0] sm:$0xf]  ;;  %v9428_v49 = vld [vmem:[%s10389_s14 + $0x3c4] sm:$0xf0] }
 0x8cd   : > { %5933 = vmatpush.bf16.msra.mxu3 %v8552_v13 }
 0x8ce   : > { %5943 = vmatpush.bf16.msrb.mxu0 %v8648_v62  ;;  %5957 = vmatpush.bf16.msrb.mxu1 %v8712_v5  ;;  %v8680_v62 = vor.u32 %v9392_v52, %v8679_v42  ;;  %v8543_v5 = vld [vmem:[%s10389_s14 + $0x190] sm:$0xf] }
 0x8cf   : > { %v8544_v53 = vor.u32 %v9358_v33, %v8543_v5  ;;  %v8815_v5 = vld [vmem:[%s10389_s14 + $0x3b0] sm:$0xf]  ;;  %v9426_v33 = vld [vmem:[%s10389_s14 + $0x3b4] sm:$0xf0] }
 0x8d0   : > { %v8816_v61 = vor.u32 %v9426_v33, %v8815_v5 }
 0x8d1   : > { %5934 = vmatpush.bf16.msra.mxu3 %v8544_v53  ;;  %v9679_v53 = vld [vmem:[%s10391_s23 + $0x8] sm:$0xff] }
 0x8d2   : > { %5944 = vmatpush.bf16.msrb.mxu0 %v8640_v58  ;;  %5958 = vmatpush.bf16.msrb.mxu1 %v8704_v27  ;;  %v8472_v58 = vor.u32 %v9340_v28, %v8471_v0  ;;  %v8536_v27 = vor.u32 %v9356_v45, %v8535_v31  ;;  %v4202_v44 = vperm.slane %v9679_v53, 0  ;;  %v8404_v31 = vor.u32 %v9321_v2, %v8401_v11  ;;  %v9319_v45 = vld [vmem:[%s10389_s14 + $0x64] sm:$0xf] }
 0x8d3   : > { %v4203_v60 = vperm.slane %v9679_v53, 4 }
 0x8d4   : > { %5921 = vmatpush.bf16.msra.mxu2 %v8472_v58  ;;  %v8743_v58 = vld [vmem:[%s10389_s14 + $0x320] sm:$0xf] }
 0x8d5   : > { %5935 = vmatpush.bf16.msra.mxu3 %v8536_v27  ;;  %v8744_v29 = vor.u32 %v9408_v51, %v8743_v58  ;;  %v8791_v58 = vld [vmem:[%s10389_s14 + $0x380] sm:$0xf]  ;;  %v9420_v51 = vld [vmem:[%s10389_s14 + $0x384] sm:$0xf0]  ;;  %v4219_v2 = vperm.slane %v4203_v60, 0 }
 0x8d6   : > { %5945 = vmatpush.bf16.msrb.mxu0 %v8632_v14  ;;  %5959 = vmatpush.bf16.msrb.mxu1 %v8696_v25  ;;  %v8775_v14 = vld [vmem:[%s10389_s14 + $0x360] sm:$0xf]  ;;  %v8792_v11 = vor.u32 %v9420_v51, %v8791_v58  ;;  %v9327_v51 = vld [vmem:[%s10389_s14 + $0xa4] sm:$0xf] }
 0x8d7   : > { %v8776_v30 = vor.u32 %v9416_v4, %v8775_v14  ;;  %v8839_v25 = vld [vmem:[%s10389_s14 + $0x3e0] sm:$0xf]  ;;  %v8735_v4 = vld [vmem:[%s10389_s14 + $0x310] sm:$0xf] }
 0x8d8   : > { %5970 = vmatpush.bf16.msrb.mxu2 %v8784_v55  ;;  %v8840_v35 = vor.u32 %v9432_v7, %v8839_v25  ;;  %v4218_v7 = vperm.slane %v4202_v44, 0  ;;  %v9333_v44 = vld [vmem:[%s10389_s14 + $0xd4] sm:$0xf] }
 0x8d9   : > { %5984 = vmatpush.bf16.msrb.mxu3 %v8848_v39 }
 0x8da   : > { %5946 = vmatpush.bf16.msrb.mxu0 %v8624_v6  ;;  %5960 = vmatpush.bf16.msrb.mxu1 %v8688_v59  ;;  %v11646_v6 = vld [vmem:[%s10391_s23] sm:$0xff]  ;;  %v8832_v59 = vor.u32 %v9430_v40, %v8831_v38  ;;  %v8385_v40 = vld [vmem:[%s10389_s14 + $0x58] sm:$0xf0] }
 0x8db   : > { %v4200_v17 = vperm.slane %v11646_v6, 0  ;;  %v4201_v43 = vperm.slane %v11646_v6, 4 }
 0x8dc   : > { %5971 = vmatpush.bf16.msrb.mxu2 %v8776_v30  ;;  %v9406_v30 = vld [vmem:[%s10389_s14 + $0x314] sm:$0xf0] }
 0x8dd   : > { %v4216_v23 = vperm.slane %v4200_v17, 0  ;;  %5985 = vmatpush.bf16.msrb.mxu3 %v8840_v35  ;;  %v4217_v13 = vperm.slane %v4201_v43, 0  ;;  %v8736_v27 = vor.u32 %v9406_v30, %v8735_v4  ;;  %v9424_v17 = vld [vmem:[%s10389_s14 + $0x3a4] sm:$0xf0]  ;;  %v8799_v43 = vld [vmem:[%s10389_s14 + $0x390] sm:$0xf] }
 0x8de   : > { %5947 = vmatpush.bf16.msrb.mxu0 %v8616_v63  ;;  %5961 = vmatpush.bf16.msrb.mxu1 %v8680_v62  ;;  %v8759_v63 = vld [vmem:[%s10389_s14 + $0x340] sm:$0xf]  ;;  %v8824_v62 = vor.u32 %v9428_v49, %v8823_v48  ;;  %v8808_v25 = vor.u32 %v9424_v17, %v8807_v56  ;;  %v8369_v4 = vld [vmem:[%s10389_s14 + $0x38] sm:$0xf0]  ;;  %v9353_v30 = vld [vmem:[%s10389_s14 + $0x174] sm:$0xf] }
 0x8df   : > { %v8760_v36 = vor.u32 %v9412_v34, %v8759_v63  ;;  %v9337_v63 = vld [vmem:[%s10389_s14 + $0xf4] sm:$0xf]  ;;  %v8465_v34 = vld [vmem:[%s10389_s14 + $0xf8] sm:$0xf0] }
 0x8e0   : > { %5972 = vmatpush.bf16.msrb.mxu2 %v8768_v12 }
 0x8e1   : > { %5986 = vmatpush.bf16.msrb.mxu3 %v8832_v59  ;;  %v9422_v59 = vld [vmem:[%s10389_s14 + $0x394] sm:$0xf0] }
 0x8e2   : > { %5948 = vmatpush.bf16.msrb.mxu0 %v8608_v47  ;;  %5962 = vmatpush.bf16.msrb.mxu1 %v8672_v24 }
 0x8e4   : > { %5973 = vmatpush.bf16.msrb.mxu2 %v8760_v36  ;;  %v9317_v36 = vld [vmem:[%s10389_s14 + $0x54] sm:$0xf] }
 0x8e5   : > { %v4873_v26 = vpop.f32.mrf.mxu0  ;;  %v4887_v8 = vpop.f32.mrf.mxu1  ;;  %5987 = vmatpush.bf16.msrb.mxu3 %v8824_v62  ;;  %v8388_v49 = vor.u32 %v9317_v36, %v8385_v40  ;;  %v9329_v40 = vld [vmem:[%s10389_s14 + $0xb4] sm:$0xf] }
 0x8e6   : > { %5949 = vmatpush.bf16.msrb.mxu0 %v8600_v32  ;;  %5963 = vmatpush.bf16.msrb.mxu1 %v8664_v16  ;;  %v4874_v18 = vadd.f32 %v4873_v26, %v4216_v23  ;;  %v8727_v26 = vld [vmem:[%s10389_s14 + $0x300] sm:$0xf] }
 0x8e8   : > { %v4888_v0 = vadd.f32 %v4887_v8, %v4874_v18  ;;  %5974 = vmatpush.bf16.msrb.mxu2 %v8752_v41  ;;  %v9404_v8 = vld [vmem:[%s10389_s14 + $0x304] sm:$0xf0]  ;;  %v8800_v41 = vor.u32 %v9422_v59, %v8799_v43  ;;  %v8433_v43 = vld [vmem:[%s10389_s14 + $0xb8] sm:$0xf0] }
 0x8e9   : > { %5988 = vmatpush.bf16.msrb.mxu3 %v8816_v61  ;;  %v8728_v38 = vor.u32 %v9404_v8, %v8727_v26  ;;  %v8449_v61 = vld [vmem:[%s10389_s14 + $0xd8] sm:$0xf0]  ;;  %v8361_v8 = vld [vmem:[%s10389_s14 + $0x28] sm:$0xf0]  ;;  %v8436_v58 = vor.u32 %v9329_v40, %v8433_v43 }
 0x8ea   : > { %v5088_v24 = vmax.f32 %v4888_v0, 0.0  ;;  %v8452_v56 = vor.u32 %v9333_v44, %v8449_v61  ;;  %v8345_v61 = vld [vmem:[%s10389_s14 + $0x8] sm:$0xf0] }
 0x8ec   : > { %v4901_v46 = vpop.f32.mrf.mxu2  ;;  %v4915_v47 = vpop.f32.mrf.mxu3  ;;  %5975 = vmatpush.bf16.msrb.mxu2 %v8744_v29 }
 0x8ed   : > { %v4875_v42 = vpop.f32.mrf.mxu0  ;;  %v4889_v52 = vpop.f32.mrf.mxu1  ;;  %v4902_v55 = vadd.f32 %v4901_v46, %v4217_v13  ;;  %5989 = vmatpush.bf16.msrb.mxu3 %v8808_v25 }
 0x8ee   : > { %v4876_v28 = vadd.f32 %v4875_v42, %v4216_v23  ;;  %v8396_v23 = vor.u32 %v9319_v45, %v8393_v54  ;;  %v8457_v42 = vld [vmem:[%s10389_s14 + $0xe8] sm:$0xf0] }
 0x8ef   : > { %v4916_v39 = vadd.f32 %v4915_v47, %v4902_v55  ;;  %v8468_v47 = vor.u32 %v9337_v63, %v8465_v34 }
 0x8f0   : > { %v4890_v32 = vadd.f32 %v4889_v52, %v4876_v28  ;;  %5976 = vmatpush.bf16.msrb.mxu2 %v8736_v27  ;;  %v9315_v52 = vld [vmem:[%s10389_s14 + $0x44] sm:$0xf]  ;;  %v8377_v28 = vld [vmem:[%s10389_s14 + $0x48] sm:$0xf0] }
 0x8f1   : > { %v5089_v18 = vmax.f32 %v4916_v39, 0.0  ;;  %5990 = vmatpush.bf16.msrb.mxu3 %v8800_v41  ;;  %v8380_v53 = vor.u32 %v9315_v52, %v8377_v28  ;;  %v9331_v39 = vld [vmem:[%s10389_s14 + $0xc4] sm:$0xf]  ;;  %v9309_v41 = vld [vmem:[%s10389_s14 + $0x14] sm:$0xf] }
 0x8f2   : > { %v5096_v14 = vmax.f32 %v4890_v32, 0.0  ;;  %v8513_v52 = vld [vmem:[%s10389_s14 + $0x158] sm:$0xf0] }
 0x8f4   : > { %v11672_v10 = vpack.c.bf16 %v5096_v14, %v5088_v24  ;;  %v4903_v15 = vpop.f32.mrf.mxu2  ;;  %v4917_v16 = vpop.f32.mrf.mxu3  ;;  %5977 = vmatpush.bf16.msrb.mxu2 %v8728_v38  ;;  %v9313_v24 = vld [vmem:[%s10389_s14 + $0x34] sm:$0xf] }
 0x8f5   : > { %v4904_v19 = vadd.f32 %v4903_v15, %v4217_v13  ;;  %v4929_v21 = vpop.f32.mrf.mxu0  ;;  %v4943_v12 = vpop.f32.mrf.mxu1  ;;  %v9335_v13 = vld [vmem:[%s10389_s14 + $0xe4] sm:$0xf]  ;;  %5991 = vmatpush.bf16.msrb.mxu3 %v8792_v11  ;;  %v8372_v17 = vor.u32 %v9313_v24, %v8369_v4 }
 0x8f6   : > { %5894 = vmatmul.bf16.vlgmr.msra.gmra.mxu0 %v11672_v10  ;;  %v4930_v46 = vadd.f32 %v4929_v21, %v4218_v7  ;;  %v8460_v55 = vor.u32 %v9335_v13, %v8457_v42  ;;  %v9311_v21 = vld [vmem:[%s10389_s14 + $0x24] sm:$0xf]  ;;  %v8353_v13 = vld [vmem:[%s10389_s14 + $0x18] sm:$0xf0]  ;;  %v9349_v42 = vld [vmem:[%s10389_s14 + $0x154] sm:$0xf] }
 0x8f7   : > { %v4918_v35 = vadd.f32 %v4917_v16, %v4904_v19  ;;  %5998 = vmatpush.bf16.msra.mxu0 %v8404_v31  ;;  %v8529_v31 = vld [vmem:[%s10389_s14 + $0x178] sm:$0xf0]  ;;  %v9680_v16 = vld [vmem:[%s10391_s23 + $0x10] sm:$0xff]  ;;  %v8441_v19 = vld [vmem:[%s10389_s14 + $0xc8] sm:$0xf0]  ;;  %v8364_v60 = vor.u32 %v9311_v21, %v8361_v8  ;;  %v8356_v11 = vor.u32 %v9309_v41, %v8353_v13 }
 0x8f8   : > { %v4944_v5 = vadd.f32 %v4943_v12, %v4930_v46  ;;  %v4204_v54 = vperm.slane %v9680_v16, 0  ;;  %v8532_v12 = vor.u32 %v9353_v30, %v8529_v31  ;;  %v8444_v38 = vor.u32 %v9331_v39, %v8441_v19  ;;  %v9347_v24 = vld [vmem:[%s10389_s14 + $0x144] sm:$0xf]  ;;  %v9365_v39 = vld [vmem:[%s10389_s14 + $0x1d4] sm:$0xf] }
 0x8f9   : > { %v5097_v9 = vmax.f32 %v4918_v35, 0.0  ;;  %v9351_v35 = vld [vmem:[%s10389_s14 + $0x164] sm:$0xf]  ;;  %v4205_v28 = vperm.slane %v9680_v16, 4  ;;  %v8577_v19 = vld [vmem:[%s10389_s14 + $0x1d8] sm:$0xf0] }
 0x8fa   : > { %v5090_v27 = vmax.f32 %v4944_v5, 0.0  ;;  %v4220_v36 = vperm.slane %v4204_v54, 0  ;;  %v9307_v5 = vld [vmem:[%s10389_s14 + $0x4] sm:$0xf]  ;;  %v8580_v40 = vor.u32 %v9365_v39, %v8577_v19 }
 0x8fb   : > { %v11686_v48 = vpack.c.bf16 %v5097_v9, %v5089_v18  ;;  %5999 = vmatpush.bf16.msra.mxu0 %v8396_v23  ;;  %v8521_v23 = vld [vmem:[%s10389_s14 + $0x168] sm:$0xf0]  ;;  %v4221_v4 = vperm.slane %v4205_v28, 0  ;;  %v8348_v54 = vor.u32 %v9307_v5, %v8345_v61  ;;  %v9401_v61 = vld [vmem:[%s10389_s14 + $0x2f4] sm:$0xf] }
 0x8fc   : > { %v4957_v62 = vpop.f32.mrf.mxu2  ;;  %v4971_v0 = vpop.f32.mrf.mxu3  ;;  %v8524_v46 = vor.u32 %v9351_v35, %v8521_v23  ;;  %v9385_v23 = vld [vmem:[%s10389_s14 + $0x274] sm:$0xf] }
 0x8fd   : > { %5908 = vmatmul.bf16.vlgmr.msra.gmra.mxu1 %v11686_v48  ;;  %v4931_v29 = vpop.f32.mrf.mxu0  ;;  %v4945_v32 = vpop.f32.mrf.mxu1  ;;  %v4958_v45 = vadd.f32 %v4957_v62, %v4219_v2 }
 0x8fe   : > { %v4932_v33 = vadd.f32 %v4931_v29, %v4218_v7  ;;  %6012 = vmatpush.bf16.msra.mxu1 %v8468_v47  ;;  %v9369_v47 = vld [vmem:[%s10389_s14 + $0x1f4] sm:$0xf] }
 0x8ff   : > { %6000 = vmatpush.bf16.msra.mxu0 %v8388_v49  ;;  %v4972_v63 = vadd.f32 %v4971_v0, %v4958_v45  ;;  %v8593_v49 = vld [vmem:[%s10389_s14 + $0x1f8] sm:$0xf0] }
 0x900   : > { %v4946_v14 = vadd.f32 %v4945_v32, %v4932_v33  ;;  %v8596_v29 = vor.u32 %v9369_v47, %v8593_v49  ;;  %v8516_v33 = vor.u32 %v9349_v42, %v8513_v52  ;;  %v8489_v47 = vld [vmem:[%s10389_s14 + $0x128] sm:$0xf0]  ;;  %v9383_v52 = vld [vmem:[%s10389_s14 + $0x264] sm:$0xf] }
 0x901   : > { %v5091_v62 = vmax.f32 %v4972_v63, 0.0  ;;  %v8657_v63 = vld [vmem:[%s10389_s14 + $0x278] sm:$0xf0] }
 0x902   : > { %v5098_v15 = vmax.f32 %v4946_v14, 0.0  ;;  %6013 = vmatpush.bf16.msra.mxu1 %v8460_v55  ;;  %v9367_v55 = vld [vmem:[%s10389_s14 + $0x1e4] sm:$0xf]  ;;  %v8505_v14 = vld [vmem:[%s10389_s14 + $0x148] sm:$0xf0]  ;;  %v8660_v49 = vor.u32 %v9385_v23, %v8657_v63 }
 0x903   : > { %6001 = vmatpush.bf16.msra.mxu0 %v8380_v53  ;;  %v8585_v53 = vld [vmem:[%s10389_s14 + $0x1e8] sm:$0xf0]  ;;  %v9357_v23 = vld [vmem:[%s10389_s14 + $0x194] sm:$0xf]  ;;  %v8545_v63 = vld [vmem:[%s10389_s14 + $0x198] sm:$0xf0] }
 0x904   : > { %v11705_v25 = vpack.c.bf16 %v5098_v15, %v5090_v27  ;;  %v4959_v7 = vpop.f32.mrf.mxu2  ;;  %v4973_v26 = vpop.f32.mrf.mxu3  ;;  %v9325_v27 = vld [vmem:[%s10389_s14 + $0x94] sm:$0xf]  ;;  %v8588_v15 = vor.u32 %v9367_v55, %v8585_v53  ;;  %v8481_v55 = vld [vmem:[%s10389_s14 + $0x118] sm:$0xf0] }
 0x905   : > { %v4960_v34 = vadd.f32 %v4959_v7, %v4219_v2  ;;  %v8425_v2 = vld [vmem:[%s10389_s14 + $0xa8] sm:$0xf0]  ;;  %v9345_v7 = vld [vmem:[%s10389_s14 + $0x134] sm:$0xf] }
 0x906   : > { %5922 = vmatmul.bf16.vlgmr.msra.gmra.mxu2 %v11705_v25  ;;  %6014 = vmatpush.bf16.msra.mxu1 %v8452_v56  ;;  %v4985_v18 = vpop.f32.mrf.mxu0  ;;  %v4999_v9 = vpop.f32.mrf.mxu1  ;;  %v8428_v45 = vor.u32 %v9327_v51, %v8425_v2  ;;  %v8417_v56 = vld [vmem:[%s10389_s14 + $0x98] sm:$0xf0] }
 0x907   : > { %v4974_v59 = vadd.f32 %v4973_v26, %v4960_v34  ;;  %6002 = vmatpush.bf16.msra.mxu0 %v8372_v17  ;;  %6026 = vmatpush.bf16.msra.mxu2 %v8532_v12  ;;  %v4986_v44 = vadd.f32 %v4985_v18, %v4220_v36  ;;  %v8508_v17 = vor.u32 %v9347_v24, %v8505_v14  ;;  %v8497_v26 = vld [vmem:[%s10389_s14 + $0x138] sm:$0xf0]  ;;  %v9363_v18 = vld [vmem:[%s10389_s14 + $0x1c4] sm:$0xf]  ;;  %v9381_v14 = vld [vmem:[%s10389_s14 + $0x254] sm:$0xf] }
 0x908   : > { %v8420_v34 = vor.u32 %v9325_v27, %v8417_v56  ;;  %v8721_v24 = vld [vmem:[%s10389_s14 + $0x2f8] sm:$0xf0]  ;;  %v9339_v56 = vld [vmem:[%s10389_s14 + $0x104] sm:$0xf] }
 0x909   : > { %v5099_v0 = vmax.f32 %v4974_v59, 0.0  ;;  %v5000_v21 = vadd.f32 %v4999_v9, %v4986_v44  ;;  %v8500_v59 = vor.u32 %v9345_v7, %v8497_v26  ;;  %v8569_v9 = vld [vmem:[%s10389_s14 + $0x1c8] sm:$0xf0]  ;;  %v9379_v7 = vld [vmem:[%s10389_s14 + $0x244] sm:$0xf] }
 0x90a   : > { %6015 = vmatpush.bf16.msra.mxu1 %v8444_v38  ;;  %v9323_v38 = vld [vmem:[%s10389_s14 + $0x84] sm:$0xf]  ;;  %v8572_v28 = vor.u32 %v9363_v18, %v8569_v9  ;;  %v8633_v26 = vld [vmem:[%s10389_s14 + $0x248] sm:$0xf0]  ;;  %v9377_v18 = vld [vmem:[%s10389_s14 + $0x234] sm:$0xf] }
 0x90b   : > { %v11721_v32 = vpack.c.bf16 %v5099_v0, %v5091_v62  ;;  %6003 = vmatpush.bf16.msra.mxu0 %v8364_v60  ;;  %6027 = vmatpush.bf16.msra.mxu2 %v8524_v46  ;;  %v5092_v60 = vmax.f32 %v5000_v21, 0.0  ;;  %v9343_v46 = vld [vmem:[%s10389_s14 + $0x124] sm:$0xf]  ;;  %v8649_v62 = vld [vmem:[%s10389_s14 + $0x268] sm:$0xf0] }
 0x90c   : > { %v8492_v2 = vor.u32 %v9343_v46, %v8489_v47  ;;  %v8652_v44 = vor.u32 %v9383_v52, %v8649_v62  ;;  %v9399_v21 = vld [vmem:[%s10389_s14 + $0x2e4] sm:$0xf]  ;;  %v8625_v9 = vld [vmem:[%s10389_s14 + $0x238] sm:$0xf0]  ;;  %v8537_v46 = vld [vmem:[%s10389_s14 + $0x188] sm:$0xf0] }
 0x90d   : > { %5936 = vmatmul.bf16.vlgmr.msra.gmra.mxu3 %v11721_v32  ;;  %v8628_v62 = vor.u32 %v9377_v18, %v8625_v9 }
 0x90e   : > { %6016 = vmatpush.bf16.msra.mxu1 %v8436_v58  ;;  %6040 = vmatpush.bf16.msra.mxu3 %v8596_v29  ;;  %v4987_v16 = vpop.f32.mrf.mxu0  ;;  %v5001_v8 = vpop.f32.mrf.mxu1  ;;  %v9361_v29 = vld [vmem:[%s10389_s14 + $0x1b4] sm:$0xf] }
 0x90f   : > { %v5013_v30 = vpop.f32.mrf.mxu2  ;;  %v5027_v31 = vpop.f32.mrf.mxu3  ;;  %6004 = vmatpush.bf16.msra.mxu0 %v8356_v11  ;;  %6028 = vmatpush.bf16.msra.mxu2 %v8516_v33  ;;  %v4988_v12 = vadd.f32 %v4987_v16, %v4220_v36  ;;  %v8409_v36 = vld [vmem:[%s10389_s14 + $0x88] sm:$0xf0]  ;;  %v8561_v11 = vld [vmem:[%s10389_s14 + $0x1b8] sm:$0xf0]  ;;  %v9341_v33 = vld [vmem:[%s10389_s14 + $0x114] sm:$0xf] }
 0x910   : > { %v5014_v43 = vadd.f32 %v5013_v30, %v4221_v4  ;;  %v8412_v0 = vor.u32 %v9323_v38, %v8409_v36  ;;  %v8564_v30 = vor.u32 %v9361_v29, %v8561_v11  ;;  %v8484_v27 = vor.u32 %v9341_v33, %v8481_v55  ;;  %v8553_v16 = vld [vmem:[%s10389_s14 + $0x1a8] sm:$0xf0]  ;;  %v9681_v38 = vld [vmem:[%s10391_s23 + $0x18] sm:$0xff]  ;;  %v9397_v36 = vld [vmem:[%s10389_s14 + $0x2d4] sm:$0xf] }
 0x911   : > { %v5002_v35 = vadd.f32 %v5001_v8, %v4988_v12  ;;  %v8713_v12 = vld [vmem:[%s10389_s14 + $0x2e8] sm:$0xf0]  ;;  %v4207_v29 = vperm.slane %v9681_v38, 4  ;;  %v9393_v55 = vld [vmem:[%s10389_s14 + $0x2b4] sm:$0xf] }
 0x912   : > { %6017 = vmatpush.bf16.msra.mxu1 %v8428_v45  ;;  %6041 = vmatpush.bf16.msra.mxu3 %v8588_v15  ;;  %v5028_v58 = vadd.f32 %v5027_v31, %v5014_v43  ;;  %v9359_v15 = vld [vmem:[%s10389_s14 + $0x1a4] sm:$0xf]  ;;  %v8636_v43 = vor.u32 %v9379_v7, %v8633_v26 }
 0x913   : > { %6005 = vmatpush.bf16.msra.mxu0 %v8348_v54  ;;  %6029 = vmatpush.bf16.msra.mxu2 %v8508_v17  ;;  %v5100_v41 = vmax.f32 %v5002_v35, 0.0  ;;  %v8724_v54 = vor.u32 %v9401_v61, %v8721_v24  ;;  %v8473_v17 = vld [vmem:[%s10389_s14 + $0x108] sm:$0xf0]  ;;  %v8556_v8 = vor.u32 %v9359_v15, %v8553_v16  ;;  %v8609_v61 = vld [vmem:[%s10389_s14 + $0x218] sm:$0xf0] }
 0x914   : > { %v5093_v31 = vmax.f32 %v5028_v58, 0.0  ;;  %v8476_v35 = vor.u32 %v9339_v56, %v8473_v17  ;;  %v9375_v58 = vld [vmem:[%s10389_s14 + $0x224] sm:$0xf]  ;;  %v8681_v16 = vld [vmem:[%s10389_s14 + $0x2a8] sm:$0xf0] }
 0x915   : > { %v11744_v13 = vpack.c.bf16 %v5100_v41, %v5092_v60  ;;  %v8548_v60 = vor.u32 %v9357_v23, %v8545_v63  ;;  %v9355_v41 = vld [vmem:[%s10389_s14 + $0x184] sm:$0xf]  ;;  %v8601_v17 = vld [vmem:[%s10389_s14 + $0x208] sm:$0xf0]  ;;  %v9389_v63 = vld [vmem:[%s10389_s14 + $0x294] sm:$0xf] }
 0x916   : > { %6018 = vmatpush.bf16.msra.mxu1 %v8420_v34  ;;  %6042 = vmatpush.bf16.msra.mxu3 %v8580_v40  ;;  %v8716_v34 = vor.u32 %v9399_v21, %v8713_v12  ;;  %v4206_v40 = vperm.slane %v9681_v38, 0  ;;  %v9391_v15 = vld [vmem:[%s10389_s14 + $0x2a4] sm:$0xf]  ;;  %v9417_v21 = vld [vmem:[%s10389_s14 + $0x374] sm:$0xf] }
 0x917   : > { %v5015_v42 = vpop.f32.mrf.mxu2  ;;  %6030 = vmatpush.bf16.msra.mxu2 %v8500_v59  ;;  %v5029_v5 = vpop.f32.mrf.mxu3  ;;  %5950 = vmatmul.bf16.vlgmr.msrb.gmra.mxu0 %v11744_v13  ;;  %v8705_v59 = vld [vmem:[%s10389_s14 + $0x2d8] sm:$0xf0]  ;;  %v9371_v56 = vld [vmem:[%s10389_s14 + $0x204] sm:$0xf]  ;;  %v8684_v26 = vor.u32 %v9391_v15, %v8681_v16  ;;  %v8745_v15 = vld [vmem:[%s10389_s14 + $0x328] sm:$0xf0] }
 0x918   : > { %v5016_v51 = vadd.f32 %v5015_v42, %v4221_v4  ;;  %6054 = vmatpush.bf16.msrb.mxu0 %v8660_v49  ;;  %v8641_v4 = vld [vmem:[%s10389_s14 + $0x258] sm:$0xf0]  ;;  %v8708_v42 = vor.u32 %v9397_v36, %v8705_v59  ;;  %v4222_v52 = vperm.slane %v4206_v40, 0  ;;  %v8604_v23 = vor.u32 %v9371_v56, %v8601_v17  ;;  %v8777_v36 = vld [vmem:[%s10389_s14 + $0x368] sm:$0xf0] }
 0x919   : > { %v8644_v19 = vor.u32 %v9381_v14, %v8641_v4  ;;  %v4223_v4 = vperm.slane %v4207_v29, 0  ;;  %v8785_v12 = vld [vmem:[%s10389_s14 + $0x378] sm:$0xf0]  ;;  %v9405_v17 = vld [vmem:[%s10389_s14 + $0x314] sm:$0xf] }
 0x91a   : > { %v5030_v53 = vadd.f32 %v5029_v5, %v5016_v51  ;;  %6019 = vmatpush.bf16.msra.mxu1 %v8412_v0  ;;  %6043 = vmatpush.bf16.msra.mxu3 %v8572_v28  ;;  %v9395_v0 = vld [vmem:[%s10389_s14 + $0x2c4] sm:$0xf]  ;;  %v8697_v28 = vld [vmem:[%s10389_s14 + $0x2c8] sm:$0xf0]  ;;  %v8788_v38 = vor.u32 %v9417_v21, %v8785_v12  ;;  %v8817_v56 = vld [vmem:[%s10389_s14 + $0x3b8] sm:$0xf0] }
 0x91b   : > { %6031 = vmatpush.bf16.msra.mxu2 %v8492_v2  ;;  %v8617_v51 = vld [vmem:[%s10389_s14 + $0x228] sm:$0xf0]  ;;  %v8540_v2 = vor.u32 %v9355_v41, %v8537_v46  ;;  %v8700_v11 = vor.u32 %v9395_v0, %v8697_v28  ;;  %v9387_v41 = vld [vmem:[%s10389_s14 + $0x284] sm:$0xf]  ;;  %v8769_v0 = vld [vmem:[%s10389_s14 + $0x358] sm:$0xf0] }
 0x91c   : > { %v5101_v45 = vmax.f32 %v5030_v53, 0.0  ;;  %6055 = vmatpush.bf16.msrb.mxu0 %v8652_v44  ;;  %v8620_v33 = vor.u32 %v9375_v58, %v8617_v51  ;;  %v8689_v53 = vld [vmem:[%s10389_s14 + $0x2b8] sm:$0xf0]  ;;  %v9373_v44 = vld [vmem:[%s10389_s14 + $0x214] sm:$0xf] }
 0x91d   : > { %v8665_v46 = vld [vmem:[%s10389_s14 + $0x288] sm:$0xf0] }
 0x91e   : > { %v11761_v39 = vpack.c.bf16 %v5101_v45, %v5093_v31  ;;  %6044 = vmatpush.bf16.msra.mxu3 %v8564_v30  ;;  %v8692_v30 = vor.u32 %v9393_v55, %v8689_v53  ;;  %v8668_v51 = vor.u32 %v9387_v41, %v8665_v46  ;;  %v9411_v55 = vld [vmem:[%s10389_s14 + $0x344] sm:$0xf]  ;;  %v8761_v53 = vld [vmem:[%s10389_s14 + $0x348] sm:$0xf0]  ;;  %v5240_v41 = vperm.slane %v11646_v6, 3 }
 0x91f   : > { %6032 = vmatpush.bf16.msra.mxu2 %v8484_v27  ;;  %v8612_v27 = vor.u32 %v9373_v44, %v8609_v61  ;;  %v8764_v44 = vor.u32 %v9411_v55, %v8761_v53  ;;  %v9429_v61 = vld [vmem:[%s10389_s14 + $0x3d4] sm:$0xf] }
 0x920   : > { %5964 = vmatmul.bf16.vlgmr.msrb.gmra.mxu1 %v11761_v39  ;;  %6056 = vmatpush.bf16.msrb.mxu0 %v8644_v19 }
 0x921   : > { %6068 = vmatpush.bf16.msrb.mxu1 %v8724_v54 }
 0x922   : > { %6045 = vmatpush.bf16.msra.mxu3 %v8556_v8 }
 0x923   : > { %6033 = vmatpush.bf16.msra.mxu2 %v8476_v35 }
 0x924   : > { %6057 = vmatpush.bf16.msrb.mxu0 %v8636_v43 }
 0x925   : > { %6069 = vmatpush.bf16.msrb.mxu1 %v8716_v34  ;;  %v8673_v34 = vld [vmem:[%s10389_s14 + $0x298] sm:$0xf0] }
 0x926   : > { %v5041_v47 = vpop.f32.mrf.mxu0  ;;  %v5055_v49 = vpop.f32.mrf.mxu1  ;;  %6046 = vmatpush.bf16.msra.mxu3 %v8548_v60  ;;  %v8676_v9 = vor.u32 %v9389_v63, %v8673_v34  ;;  %v9421_v63 = vld [vmem:[%s10389_s14 + $0x394] sm:$0xf]  ;;  %v8801_v34 = vld [vmem:[%s10389_s14 + $0x398] sm:$0xf0] }
 0x927   : > { %6006 = vmatmul.bf16.vlgmr.msra.gmra.mxu0 %v11672_v10  ;;  %v5042_v5 = vadd.f32 %v5041_v47, %v4222_v52 }
 0x928   : > { %6058 = vmatpush.bf16.msrb.mxu0 %v8628_v62  ;;  %v9413_v62 = vld [vmem:[%s10389_s14 + $0x354] sm:$0xf] }
 0x929   : > { %6070 = vmatpush.bf16.msrb.mxu1 %v8708_v42  ;;  %v5056_v31 = vadd.f32 %v5055_v49, %v5042_v5  ;;  %v9433_v42 = vld [vmem:[%s10389_s14 + $0x3f4] sm:$0xf]  ;;  %v9431_v5 = vld [vmem:[%s10389_s14 + $0x3e4] sm:$0xf] }
 0x92a   : > { %6047 = vmatpush.bf16.msra.mxu3 %v8540_v2 }
 0x92b   : > { %v5094_v8 = vmax.f32 %v5056_v31, 0.0  ;;  %v9427_v31 = vld [vmem:[%s10389_s14 + $0x3c4] sm:$0xf] }
 0x92c   : > { %6059 = vmatpush.bf16.msrb.mxu0 %v8620_v33  ;;  %v8841_v33 = vld [vmem:[%s10389_s14 + $0x3e8] sm:$0xf0] }
 0x92d   : > { %6071 = vmatpush.bf16.msrb.mxu1 %v8700_v11  ;;  %v8772_v11 = vor.u32 %v9413_v62, %v8769_v0 }
 0x92e   : > { %v5069_v24 = vpop.f32.mrf.mxu2  ;;  %v5083_v14 = vpop.f32.mrf.mxu3 }
 0x92f   : > { %v5043_v10 = vpop.f32.mrf.mxu0  ;;  %v5057_v54 = vpop.f32.mrf.mxu1  ;;  %v5070_v7 = vadd.f32 %v5069_v24, %v4223_v4  ;;  %v8833_v24 = vld [vmem:[%s10389_s14 + $0x3d8] sm:$0xf0] }
 0x930   : > { %v5044_v45 = vadd.f32 %v5043_v10, %v4222_v52  ;;  %6020 = vmatmul.bf16.vlgmr.msra.gmra.mxu1 %v11686_v48  ;;  %6060 = vmatpush.bf16.msrb.mxu0 %v8612_v27  ;;  %v9415_v48 = vld [vmem:[%s10389_s14 + $0x364] sm:$0xf]  ;;  %v8849_v52 = vld [vmem:[%s10389_s14 + $0x3f8] sm:$0xf0]  ;;  %v8836_v10 = vor.u32 %v9429_v61, %v8833_v24 }
 0x931   : > { %6072 = vmatpush.bf16.msrb.mxu1 %v8692_v30  ;;  %v5084_v59 = vadd.f32 %v5083_v14, %v5070_v7  ;;  %v8780_v49 = vor.u32 %v9415_v48, %v8777_v36  ;;  %v8852_v2 = vor.u32 %v9433_v42, %v8849_v52  ;;  %v9409_v14 = vld [vmem:[%s10389_s14 + $0x334] sm:$0xf]  ;;  %v9407_v27 = vld [vmem:[%s10389_s14 + $0x324] sm:$0xf]  ;;  %v8793_v48 = vld [vmem:[%s10389_s14 + $0x388] sm:$0xf0] }
 0x932   : > { %v5058_v19 = vadd.f32 %v5057_v54, %v5044_v45  ;;  %v8825_v45 = vld [vmem:[%s10389_s14 + $0x3c8] sm:$0xf0]  ;;  %v8748_v16 = vor.u32 %v9407_v27, %v8745_v15  ;;  %v9425_v54 = vld [vmem:[%s10389_s14 + $0x3b4] sm:$0xf]  ;;  %v9423_v7 = vld [vmem:[%s10389_s14 + $0x3a4] sm:$0xf] }
 0x933   : > { %v5095_v28 = vmax.f32 %v5084_v59, 0.0  ;;  %v8820_v21 = vor.u32 %v9425_v54, %v8817_v56  ;;  %v5241_v27 = vperm.slane %v11646_v6, 7 }
 0x934   : > { %v5102_v35 = vmax.f32 %v5058_v19, 0.0  ;;  %6061 = vmatpush.bf16.msrb.mxu0 %v8604_v23  ;;  %v8737_v19 = vld [vmem:[%s10389_s14 + $0x318] sm:$0xf0] }
 0x935   : > { %6073 = vmatpush.bf16.msrb.mxu1 %v8684_v26  ;;  %v8740_v12 = vor.u32 %v9405_v17, %v8737_v19  ;;  %v8809_v26 = vld [vmem:[%s10389_s14 + $0x3a8] sm:$0xf0]  ;;  %v5245_v56 = vperm.slane %v5241_v27, 3 }
 0x936   : > { %v11795_v40 = vpack.c.bf16 %v5102_v35, %v5094_v8  ;;  %v5071_v43 = vpop.f32.mrf.mxu2  ;;  %v5085_v60 = vpop.f32.mrf.mxu3  ;;  %v9403_v8 = vld [vmem:[%s10389_s14 + $0x304] sm:$0xf]  ;;  %v8729_v35 = vld [vmem:[%s10389_s14 + $0x308] sm:$0xf0] }
 0x937   : > { %v5072_v18 = vadd.f32 %v5071_v43, %v4223_v4  ;;  %6062 = vmatmul.bf16.vlgmr.msrb.gmra.mxu0 %v11744_v13  ;;  %v8844_v13 = vor.u32 %v9431_v5, %v8841_v33  ;;  %v8753_v4 = vld [vmem:[%s10389_s14 + $0x338] sm:$0xf0]  ;;  %v8732_v23 = vor.u32 %v9403_v8, %v8729_v35  ;;  %v9419_v43 = vld [vmem:[%s10389_s14 + $0x384] sm:$0xf] }
 0x938   : > { %5978 = vmatmul.bf16.vlgmr.msrb.gmra.mxu2 %v11795_v40  ;;  %v8756_v30 = vor.u32 %v9409_v14, %v8753_v4  ;;  %v8796_v36 = vor.u32 %v9419_v43, %v8793_v48 }
 0x939   : > { %v5086_v47 = vadd.f32 %v5085_v60, %v5072_v18  ;;  %6082 = vmatpush.bf16.msrb.mxu2 %v8788_v38  ;;  %6074 = vmatpush.bf16.msrb.mxu1 %v8676_v9  ;;  %v8804_v38 = vor.u32 %v9421_v63, %v8801_v34 }
 0x93b   : > { %v5103_v58 = vmax.f32 %v5086_v47, 0.0 }
 0x93d   : > { %v5111_v29 = vpack.c.bf16 %v5103_v58, %v5095_v28  ;;  %6083 = vmatpush.bf16.msrb.mxu2 %v8780_v49  ;;  %6075 = vmatpush.bf16.msrb.mxu1 %v8668_v51  ;;  %v5244_v49 = vperm.slane %v5240_v41, 3 }
 0x93f   : > { %5992 = vmatmul.bf16.vlgmr.msrb.gmra.mxu3 %v5111_v29 }
 0x940   : > { %6096 = vmatpush.bf16.msrb.mxu3 %v8852_v2  ;;  %6076 = vmatmul.bf16.vlgmr.msrb.gmra.mxu1 %v11761_v39  ;;  %v8828_v39 = vor.u32 %v9427_v31, %v8825_v45 }
 0x941   : > { %6084 = vmatpush.bf16.msrb.mxu2 %v8772_v11 }
 0x944   : > { %6097 = vmatpush.bf16.msrb.mxu3 %v8844_v13 }
 0x945   : > { %6085 = vmatpush.bf16.msrb.mxu2 %v8764_v44 }
 0x948   : > { %6098 = vmatpush.bf16.msrb.mxu3 %v8836_v10  ;;  %6034 = vmatmul.bf16.vlgmr.msra.gmra.mxu2 %v11705_v25  ;;  %v8812_v25 = vor.u32 %v9423_v7, %v8809_v26 }
 0x949   : > { %6086 = vmatpush.bf16.msrb.mxu2 %v8756_v30 }
 0x94c   : > { %6099 = vmatpush.bf16.msrb.mxu3 %v8828_v39 }
 0x94d   : > { %6087 = vmatpush.bf16.msrb.mxu2 %v8748_v16 }
 0x94f   : > { %6048 = vmatmul.bf16.vlgmr.msra.gmra.mxu3 %v11721_v32 }
 0x950   : > { %6100 = vmatpush.bf16.msrb.mxu3 %v8820_v21 }
 0x951   : > { %6088 = vmatpush.bf16.msrb.mxu2 %v8740_v12 }
 0x954   : > { %6101 = vmatpush.bf16.msrb.mxu3 %v8812_v25 }
 0x955   : > { %6089 = vmatpush.bf16.msrb.mxu2 %v8732_v23 }
 0x958   : > { %6102 = vmatpush.bf16.msrb.mxu3 %v8804_v38  ;;  %6090 = vmatmul.bf16.vlgmr.msrb.gmra.mxu2 %v11795_v40 }
 0x95c   : > { %6103 = vmatpush.bf16.msrb.mxu3 %v8796_v36 }
 0x95f   : > { %6104 = vmatmul.bf16.vlgmr.msrb.gmra.mxu3 %v5111_v29 }
 0x973   : > { %v5895_v59 = vpop.f32.mrf.mxu0 }
 0x974   : > { %v5896_v62 = vadd.f32 %v5895_v59, %v5244_v49 }
 0x97a   : > { %v5909_v18 = vpop.f32.mrf.mxu1 }
 0x97b   : > { %v5897_v32 = vpop.f32.mrf.mxu0  ;;  %v5910_v0 = vadd.f32 %v5909_v18, %v5896_v62 }
 0x97c   : > { %v5898_v29 = vadd.f32 %v5897_v32, %v5244_v49 }
 0x982   : > { %v5911_v60 = vpop.f32.mrf.mxu1 }
 0x983   : > { %v5912_v33 = vadd.f32 %v5911_v60, %v5898_v29 }
 0x989   : > { %v5923_v9 = vpop.f32.mrf.mxu2 }
 0x98a   : > { %v5924_v28 = vadd.f32 %v5923_v9, %v5910_v0 }
 0x990   : > { %v5937_v46 = vpop.f32.mrf.mxu3 }
 0x991   : > { %v5925_v42 = vpop.f32.mrf.mxu2  ;;  %v5938_v51 = vadd.f32 %v5937_v46, %v5924_v28 }
 0x992   : > { %v5926_v53 = vadd.f32 %v5925_v42, %v5912_v33 }
 0x994   : > { %v5951_v47 = vpop.f32.mrf.mxu0 }
 0x995   : > { %v5952_v11 = vadd.f32 %v5951_v47, %v5938_v51 }
 0x998   : > { %v5939_v58 = vpop.f32.mrf.mxu3 }
 0x999   : > { %v5940_v61 = vadd.f32 %v5939_v58, %v5926_v53 }
 0x99c   : > { %v5953_v40 = vpop.f32.mrf.mxu0 }
 0x99d   : > { %v5965_v52 = vpop.f32.mrf.mxu1  ;;  %v5954_v10 = vadd.f32 %v5953_v40, %v5940_v61 }
 0x99e   : > { %v5966_v55 = vadd.f32 %v5965_v52, %v5952_v11 }
 0x9a4   : > { %v6007_v4 = vpop.f32.mrf.mxu0 }
 0x9a5   : > { %v5967_v5 = vpop.f32.mrf.mxu1  ;;  %v6008_v21 = vadd.f32 %v6007_v4, %v5245_v56 }
 0x9a6   : > { %v5968_v31 = vadd.f32 %v5967_v5, %v5954_v10 }
 0x9ac   : > { %v6009_v19 = vpop.f32.mrf.mxu0 }
 0x9ad   : > { %v6021_v45 = vpop.f32.mrf.mxu1  ;;  %v6010_v23 = vadd.f32 %v6009_v19, %v5245_v56 }
 0x9ae   : > { %v6022_v26 = vadd.f32 %v6021_v45, %v6008_v21 }
 0x9b4   : > { %v6063_v25 = vpop.f32.mrf.mxu0 }
 0x9b5   : > { %v6023_v12 = vpop.f32.mrf.mxu1 }
 0x9b6   : > { %v6024_v6 = vadd.f32 %v6023_v12, %v6010_v23 }
 0x9bb   : > { %v5979_v2 = vpop.f32.mrf.mxu2 }
 0x9bc   : > { %v5980_v13 = vadd.f32 %v5979_v2, %v5966_v55  ;;  %v6065_v18 = vpop.f32.mrf.mxu0 }
 0x9bd   : > { %v6077_v38 = vpop.f32.mrf.mxu1 }
 0x9c2   : > { %v5993_v44 = vpop.f32.mrf.mxu3 }
 0x9c3   : > { %v5994_v24 = vadd.f32 %v5993_v44, %v5980_v13  ;;  %v5981_v14 = vpop.f32.mrf.mxu2 }
 0x9c4   : > { %v5982_v15 = vadd.f32 %v5981_v14, %v5968_v31 }
 0x9c5   : > { %v6110_v30 = vadd.f32 %v5994_v24, %v11224_v20  ;;  %v6079_v46 = vpop.f32.mrf.mxu1 }
 0x9c7   : > { %6114 = vst [vmem:[#allocation2 + $0x10] sm:$0xff] %v6110_v30 }
 0x9ca   : > { %v5995_v39 = vpop.f32.mrf.mxu3 }
 0x9cb   : > { %v5996_v16 = vadd.f32 %v5995_v39, %v5982_v15  ;;  %v6035_v54 = vpop.f32.mrf.mxu2 }
 0x9cc   : > { %v6036_v20 = vadd.f32 %v6035_v54, %v6022_v26 }
 0x9cd   : > { %v6112_v17 = vadd.f32 %v5996_v16, %v11230_v57 }
 0x9cf   : > { %6116 = vst [vmem:[#allocation2 + $0x18] sm:$0xff] %v6112_v17 }
 0x9d2   : > { %v6049_v7 = vpop.f32.mrf.mxu3 }
 0x9d3   : > { %v6037_v8 = vpop.f32.mrf.mxu2  ;;  %v6050_v35 = vadd.f32 %v6049_v7, %v6036_v20 }
 0x9d4   : > { %v6038_v48 = vadd.f32 %v6037_v8, %v6024_v6 }
 0x9d5   : > { %v6064_v34 = vadd.f32 %v6063_v25, %v6050_v35 }
 0x9d7   : > { %v6078_v59 = vadd.f32 %v6077_v38, %v6064_v34 }
 0x9da   : > { %v6051_v63 = vpop.f32.mrf.mxu3 }
 0x9db   : > { %v6091_v43 = vpop.f32.mrf.mxu2  ;;  %v6052_v36 = vadd.f32 %v6051_v63, %v6038_v48 }
 0x9dc   : > { %v6092_v57 = vadd.f32 %v6091_v43, %v6078_v59 }
 0x9dd   : > { %v6066_v9 = vadd.f32 %v6065_v18, %v6052_v36 }
 0x9df   : > { %v6080_v49 = vadd.f32 %v6079_v46, %v6066_v9 }
 0x9e2   : > { %v6105_v32 = vpop.f32.mrf.mxu3 }
 0x9e3   : > { %v6106_v60 = vadd.f32 %v6105_v32, %v6092_v57  ;;  %v6093_v47 = vpop.f32.mrf.mxu2 }
 0x9e4   : > { %v6094_v42 = vadd.f32 %v6093_v47, %v6080_v49 }
 0x9e5   : > { %v6111_v41 = vadd.f32 %v6106_v60, %v11226_v22 }
 0x9e7   : > { %6115 = vst [vmem:[#allocation2] sm:$0xff] %v6111_v41 }
 0x9ea   : > { %v6107_v52 = vpop.f32.mrf.mxu3 }
 0x9eb   : > { %v6108_v62 = vadd.f32 %v6107_v52, %v6094_v42  ;;  %6121 = sbr.rel (%p8853_p6) target bundleno = 2844 (0xb1c), region = 104 }
 0x9ed   : > { %v6113_v0 = vadd.f32 %v6108_v62, %v11232_v37 }
 0x9ef   : > { %6117 = vst [vmem:[#allocation2 + $0x8] sm:$0xff] %v6113_v0 }
 0x9f0   : > { %v6125_v28 = vadd.f32 %v6113_v0, %v6112_v17  ;;  %v6122_v58 = vadd.f32 %v6111_v41, %v6110_v30  ;;  %v10076_v15 = vmov 8.0   ;;  %v6172_v54 = vperm.slane %v10816_v1, 3 }
 0x9f1   : > { %v6173_v56 = vperm.slane %v10816_v1, 7  ;;  %v6182_v12 = vperm.slane %v11063_v3, 3  ;;  %vm6233_vm12 = vcmask 1041408   ;;  %vm6241_vm13 = vcmask 1041409  }
 0x9f2   : > { %6126 = vadd.xlane.f32.xlu0 %v6125_v28  ;;  %v6176_v8 = vperm.slane %v6172_v54, 3  ;;  %vm6243_vm14 = vcmask 1043459   ;;  %vm6245_vm15 = vcmask 1045509   ;;  %vm6247_vm0 = vcmask 1047559  }
 0x9f3   : > { %v6177_v20 = vperm.slane %v6173_v56, 3  ;;  %v6186_v63 = vperm.slane %v6182_v12, 3 }
 0x9fa   : > { %6123 = vadd.xlane.f32.xlu0 %v6122_v58 }
 0xa65   : > { %v6127_v40 = vpop.xlane.xlu0 %6126 }
 0xa66   : > { %v6129_v22 = vmul.f32 %v6127_v40, %v10660_v50 }
 0xa68   : > { %v6132_v51 = vsub.f32 %v6112_v17, %v6129_v22  ;;  %v6133_v2 = vsub.f32 %v6113_v0, %v6129_v22 }
 0xa6a   : > { %v6136_v29 = vmul.f32 %v6132_v51, %v6132_v51  ;;  %v6137_v11 = vmul.f32 %v6133_v2, %v6133_v2 }
 0xa6c   : > { %v6141_v5 = vadd.f32 %v6137_v11, %v6136_v29 }
 0xa6d   : > { %v6124_v33 = vpop.xlane.xlu0 %6123 }
 0xa6e   : > { %v6128_v55 = vmul.f32 %v6124_v33, %v10660_v50  ;;  %6142 = vadd.xlane.f32.xlu1 %v6141_v5 }
 0xa70   : > { %v6130_v37 = vsub.f32 %v6110_v30, %v6128_v55  ;;  %v6131_v53 = vsub.f32 %v6111_v41, %v6128_v55 }
 0xa72   : > { %v6134_v13 = vmul.f32 %v6130_v37, %v6130_v37  ;;  %v6135_v44 = vmul.f32 %v6131_v53, %v6131_v53 }
 0xa74   : > { %v6138_v61 = vadd.f32 %v6135_v44, %v6134_v13 }
 0xa76   : > { %6139 = vadd.xlane.f32.xlu1 %v6138_v61 }
 0xae1   : > { %v6143_v24 = vpop.xlane.xlu1 %6142 }
 0xae2   : > { %v6145_v14 = vmul.f32 %v6143_v24, %v10660_v50 }
 0xae4   : > { %v6147_v4 = vadd.f32 1e-05, %v6145_v14 }
 0xae6   : > { %9682 = vrsqrt.f32 %v6147_v4  ;;  %vm6164_vm6 = vweird.f32 %v6147_v4 }
 0xae7   : > { %9684 = vrcp.f32 %v10076_v15 }
 0xae9   : > { %v6140_v10 = vpop.xlane.xlu1 %6139 }
 0xaea   : > { %v6144_v31 = vmul.f32 %v6140_v10, %v10660_v50  ;;  %v6183_v50 = vperm.slane %v11063_v3, 7 }
 0xaec   : > { %v9683_v45 = vpop.eup %9682  ;;  %v6146_v27 = vadd.f32 1e-05, %v6144_v31  ;;  %v6187_v6 = vperm.slane %v6183_v50, 3 }
 0xaed   : > { %v6159_v39 = vmul.f32 %v9683_v45, %v6147_v4  ;;  %v9685_v17 = vpop.eup %9684  ;;  %vm6165_vm5 = vweird.f32 %v9683_v45 }
 0xaee   : > { %9686 = vrsqrt.f32 %v6146_v27  ;;  %vm6166_vm7 = vmor %vm6164_vm6, %vm6165_vm5  ;;  %v6217_v35 = vmul.f32 8.0, %v9685_v17  ;;  %vm6154_vm9 = vweird.f32 %v6146_v27  ;;  %vm6221_vm11 = vweird.f32 %v9685_v17 }
 0xaef   : > { %v6160_v30 = vmul.f32 %v9683_v45, %v6159_v39 }
 0xaf0   : > { %v6218_v36 = vsub.f32 1.0, %v6217_v35 }
 0xaf1   : > { %v6161_v16 = vmul.f32 0.5, %v6160_v30 }
 0xaf2   : > { %v6219_v60 = vmul.f32 %v9685_v17, %v6218_v36 }
 0xaf3   : > { %v6162_v19 = vsub.f32 1.5, %v6161_v16 }
 0xaf4   : > { %v9687_v21 = vpop.eup %9686  ;;  %v6220_v58 = vadd.f32 %v9685_v17, %v6219_v60 }
 0xaf5   : > { %v6163_v7 = vmul.f32 %v9683_v45, %v6162_v19  ;;  %v6149_v26 = vmul.f32 %v9687_v21, %v6146_v27  ;;  %vm6155_vm8 = vweird.f32 %v9687_v21 }
 0xaf6   : > { %vm6156_vm10 = vmor %vm6154_vm9, %vm6155_vm8  ;;  %v6222_v33 = vsel %vm6221_vm11, %v9685_v17, %v6220_v58 }
 0xaf7   : > { %v6167_v25 = vsel %vm6166_vm7, %v9683_v45, %v6163_v7  ;;  %v6150_v23 = vmul.f32 %v9687_v21, %v6149_v26 }
 0xaf8   : > { %v6170_v1 = vmul.f32 %v6167_v25, %v6132_v51  ;;  %v6171_v34 = vmul.f32 %v6167_v25, %v6133_v2 }
 0xaf9   : > { %v6151_v38 = vmul.f32 0.5, %v6150_v23 }
 0xafa   : > { %v6180_v43 = vmul.f32 %v6176_v8, %v6170_v1  ;;  %v6181_v48 = vmul.f32 %v6177_v20, %v6171_v34 }
 0xafb   : > { %v6152_v59 = vsub.f32 1.5, %v6151_v38 }
 0xafc   : > { %v6190_v3 = vadd.f32 %v6186_v63, %v6180_v43  ;;  %v6191_v57 = vadd.f32 %v6187_v6, %v6181_v48 }
 0xafd   : > { %v6153_v18 = vmul.f32 %v9687_v21, %v6152_v59 }
 0xafe   : > { %v6204_v32 = vrot.slane %v6190_v3, 4  ;;  %v6210_v9 = vrot.slane %v6191_v57, 4 }
 0xaff   : > { %v6157_v41 = vsel %vm6156_vm10, %v9687_v21, %v6153_v18 }
 0xb00   : > { %v6205_v46 = vadd.f32 %v6204_v32, %v6190_v3  ;;  %v6211_v47 = vadd.f32 %v6210_v9, %v6191_v57  ;;  %v6168_v49 = vmul.f32 %v6157_v41, %v6130_v37  ;;  %v6169_v42 = vmul.f32 %v6157_v41, %v6131_v53 }
 0xb02   : > { %v6206_v52 = vrot.slane %v6205_v46, 2  ;;  %v6212_v62 = vrot.slane %v6211_v47, 2  ;;  %v6178_v0 = vmul.f32 %v6176_v8, %v6168_v49  ;;  %v6179_v28 = vmul.f32 %v6177_v20, %v6169_v42 }
 0xb04   : > { %v6207_v40 = vadd.f32 %v6206_v52, %v6205_v46  ;;  %v6213_v22 = vadd.f32 %v6212_v62, %v6211_v47  ;;  %v6188_v51 = vadd.f32 %v6186_v63, %v6178_v0  ;;  %v6189_v2 = vadd.f32 %v6187_v6, %v6179_v28 }
 0xb06   : > { %v6214_v29 = vrot.slane %v6213_v22, 1  ;;  %v6192_v11 = vrot.slane %v6188_v51, 4  ;;  %v6198_v5 = vrot.slane %v6189_v2, 4  ;;  %v6208_v55 = vrot.slane %v6207_v40, 1 }
 0xb08   : > { %v6215_v13 = vadd.f32 %v6214_v29, %v6213_v22  ;;  %v6193_v44 = vadd.f32 %v6192_v11, %v6188_v51  ;;  %v6199_v61 = vadd.f32 %v6198_v5, %v6189_v2  ;;  %v6209_v14 = vadd.f32 %v6208_v55, %v6207_v40 }
 0xb0a   : > { %v6226_v37 = vmul.f32 %v6222_v33, %v6215_v13  ;;  %v6194_v53 = vrot.slane %v6193_v44, 2  ;;  %v6200_v24 = vrot.slane %v6199_v61, 2  ;;  %v6225_v15 = vmul.f32 %v6222_v33, %v6209_v14 }
 0xb0c   : > { %v6195_v4 = vadd.f32 %v6194_v53, %v6193_v44  ;;  %v6201_v10 = vadd.f32 %v6200_v24, %v6199_v61  ;;  %v6232_v31 = vrot.slane %v6226_v37, 6 }
 0xb0e   : > { %v6196_v45 = vrot.slane %v6195_v4, 1  ;;  %v6202_v27 = vrot.slane %v6201_v10, 1  ;;  %v6235_v16 = vsel %vm6233_vm12, %v6225_v15, %v6232_v31 }
 0xb0f   : > { %v6240_v19 = vrot.slane %v6235_v16, 7 }
 0xb10   : > { %v6197_v39 = vadd.f32 %v6196_v45, %v6195_v4  ;;  %v6203_v30 = vadd.f32 %v6202_v27, %v6201_v10 }
 0xb12   : > { %v6224_v54 = vmul.f32 %v6222_v33, %v6203_v30  ;;  %v6223_v56 = vmul.f32 %v6222_v33, %v6197_v39 }
 0xb14   : > { %v6231_v17 = vrot.slane %v6224_v54, 6 }
 0xb16   : > { %v6234_v21 = vsel %vm6233_vm12, %v6223_v56, %v6231_v17 }
 0xb17   : > { %v6242_v12 = vsel %vm6241_vm13, %v6240_v19, %v6234_v21 }
 0xb18   : > { %v6244_v50 = vsel %vm6243_vm14, %v6240_v19, %v6242_v12 }
 0xb19   : > { %v6246_v7 = vsel %vm6245_vm15, %v6240_v19, %v6244_v50 }
 0xb1a   : > { %v6248_v26 = vsel %vm6247_vm0, %v6240_v19, %v6246_v7 }
 0xb1b   : > { %6250 = vst [vmem:[%s10393_s16] sm:$0xf] %v6248_v26 }
 0xb1c PF: > { %s11992_s30 = sld [smem:[#allocation27_spill]]  ;;  %s6265_s27 = sshll.u32 %s10393_s16, 4  ;;  %s6266_s27 = int_to_ptr.vmem [resolvable:$true] %s6265_s27 }
 0xb1d   : > { %s11994_s23 = sld [smem:[#allocation43_spill]]  ;;  %s6252_s29 = scalar_lea.sflag [#allocation6], %s10361_s4 }
 0xb22   : > { %s9435_s21 = sshll.u32 %s11992_s30, 2 }
 0xb23   : > { %s11995_s11 = smov %s11994_s23  ;;  %s6263_s17 = scalar_lea.hbm %s11994_s23, %s9435_s21 }
 0xb24   : > { %s6267_s18 = sshll.u32 %s6263_s17, 4  ;;  %s9948_s22 = scalar_lea.hbm %s11995_s11, 8  ;;  %s6268_s18 = int_to_ptr.hbm [resolvable:$true] %s6267_s18 }
 0xb25   : > { %s9942_s24 = sshra.s32 %s6268_s18, 4  ;;  %s9943_s24 = int_to_ptr.hbm [resolvable:$true] %s9942_s24 }
 0xb26   : > { %s9944_s28 = scalar_lea.hbm %s9943_s24, 4  ;;  %p9949_p0 = scmp.lt.s32.totalorder %s9943_s24, %s11995_s11 }
 0xb27   : > { %p9945_p13 = scmp.ne.s32.totalorder %s9943_s24, %s9944_s28  ;;  %p9950_p5 = scmp.lt.s32.totalorder %s9948_s22, %s9944_s28 }
 0xb29   : > { %p9946_p3 = pnand %p9945_p13, %p10247_p7  ;;  %p9951_p12 = por %p9950_p5, %p9949_p0 }
 0xb2b   : > { %p9947_p1 = pneg %p9946_p3 }
 0xb2d   : > { %p9952_p2 = pnand %p9951_p12, %p9947_p1 }
 0xb2f   : > { %9955 = shalt.err (!%p9952_p2)
}
 0xb30   : > { %9468 = dma.vmem_to_hbm [thread:$0]  (%p10247_p7), %s6266_s27, 64, %s6268_s18, %s6252_s29  }
 0xb31 PF: > { %s11996_s4 = sld [smem:[#allocation28_spill]] }
 0xb32   : > { %s11997_s16 = sld [smem:[#allocation23_spill]] }
 0xb37   : > { %p9505_p9 = scmp.ge.s32.totalorder %s11996_s4, 2 }
 0xb38   : > { %s6279_s20 = sand.u32 1, %s11997_s16  }
 0xb39   : > { %p9497_p11 = pnand %p9505_p9, %p10212_p8  ;;  %s6280_s3 = scalar_lea.sflag [#allocation6], %s6279_s20 }
 0xb3b   : > { %p9498_p10 = pneg %p9497_p11 }
 0xb3d   : > { %10017 = dma.done.wait (%p9498_p10), %s6280_s3, 64  }
 0xb3e   : > { %10019 = vsyncadd (%p9498_p10), %s6280_s3, 4294967232  ;;  %s26_s27 = sadd.s32 1, %s11996_s4   ;;  %s11999_s17 = sld [smem:[#allocation21_spill]] }
 0xb3f   : > { %p23_p4 = scmp.ge.s32.totalorder %s26_s27, 12   ;;  %s12000_s18 = sld [smem:[#allocation22_spill]] }
 0xb40   : > { %s12001_s19 = sld [smem:[#allocation36_spill]]  ;;  %s12007_s23 = smov %s10054_s25 }
 0xb41   : > { %s12002_s20 = sld [smem:[#allocation24_spill]]  ;;  %s12008_s24 = smov %s10058_s26 }
 0xb42   : > { %s12003_s21 = sld [smem:[#allocation25_spill]] }
 0xb43   : > { %s12004_s22 = sld [smem:[#allocation35_spill]] }
 0xb44   : > { %s12005_s30 = sld [smem:[#allocation32_spill]] }
 0xb45   : > { %s12006_s6 = sld [smem:[#allocation34_spill]] }
 0xb47   :  { %25 = sbr.rel (!%p23_p4) target bundleno = 17 (0x11), region = 182 }
 0xb4a   : > { %s12009_s25 = smov %s12005_s30 }
 0xb4b   : > { %s12010_s26 = smov %s12006_s6 }
 0xb4c   :  { %6286 = vsyncpa [#allocation5], 1 }
 0xb4d   :  { %6288 = vsyncpa [#allocation5 + $0x1], 1 }
 0xb4e   :  { %6289 = vsyncpa [#allocation8], 1 }
 0xb4f   :  { %6290 = vsyncpa [#allocation6], 1 }
 0xb50   :  { %6292 = vsyncpa [#allocation6 + $0x1], 1 }

</bundles_post_ra>
